<compile_context>
chip_gen: v7x
topology: tpu7x:2x2x1
jax: 0.10.0
libtpu: 0.0.40
codegen_flags: <defaults>
</compile_context>

<pallas_src>
import jax
import jax.numpy as jnp
from jax import lax
from jax.experimental import pallas as pl
from jax.experimental.pallas import tpu as pltpu

FC_PAD = 128          # FC hidden/output widths padded to one 128-lane vreg row
CONV_FEAT = 96        # conv-stage feature row width: 16 oc * 6 cols (lane-concat)


# ----------------------------------------------------------------------------
# In-kernel constant builders (hoisted: built once per grid step, reused by all
# images / channels of that step)
# ----------------------------------------------------------------------------
def _even_rows(out_dim, in_dim):
    # S[p, r] = 1.0 where r == 2*p  -> picks every other row via a matmul.
    p = lax.broadcasted_iota(jnp.int32, (out_dim, in_dim), 0)
    r = lax.broadcasted_iota(jnp.int32, (out_dim, in_dim), 1)
    return (r == 2 * p).astype(jnp.float32)


def _even_cols(in_dim, out_dim):
    # S[c, q] = 1.0 where c == 2*q  -> picks every other column via a matmul.
    c = lax.broadcasted_iota(jnp.int32, (in_dim, out_dim), 0)
    q = lax.broadcasted_iota(jnp.int32, (in_dim, out_dim), 1)
    return (c == 2 * q).astype(jnp.float32)


def _channel_sum_matrix():
    # (88, 13): S[c*15 + x, x] = 1 for x < 13, c < 6  -> sums the 6 lane-blocks.
    r = lax.broadcasted_iota(jnp.int32, (88, 13), 0)
    q = lax.broadcasted_iota(jnp.int32, (88, 13), 1)
    hit = r == q
    for c in range(1, 6):
        hit = hit | (r == q + 15 * c)
    return hit.astype(jnp.float32)


# ----------------------------------------------------------------------------
# Kernel 1: fused conv1 + ReLU + pool + conv2 + ReLU + pool, Bn images per step
# ----------------------------------------------------------------------------
def _conv_stage_kernel(x_ref, w1_ref, b1_ref, w2v_ref, b2_ref, o_ref, p_ref):
    bn = x_ref.shape[0]

    # Constants built once per grid step (not per pool call).
    sel_r15 = _even_rows(15, 29)
    sel_c15 = _even_cols(29, 15)
    sel_r6 = _even_rows(6, 12)
    sel_c6 = _even_cols(12, 6)
    ch_sum = _channel_sum_matrix()                    # (88, 13)

    for b in range(bn):
        img = x_ref[b, 0]                             # (32, 32)
        # 9 shifted views shared by all 6 conv1 output channels.
        xs = [img[i:i + 30, j:j + 30] for i in range(3) for j in range(3)]

        # ---- conv1 (1->6, 3x3) + ReLU + 2x2 maxpool --------------------------
        for c in range(6):
            acc = xs[0] * w1_ref[c * 9]
            for k in range(1, 9):
                acc = acc + xs[k] * w1_ref[c * 9 + k]
            acc = jnp.maximum(acc + b1_ref[c], 0.0)                      # (30, 30)
            cm = jnp.maximum(acc[:, :29], acc[:, 1:30])                  # (30, 29)
            rm = jnp.maximum(cm[:29, :], cm[1:30, :])                    # (29, 29)
            pooled = jnp.dot(jnp.dot(sel_r15, rm,
                                     preferred_element_type=jnp.float32),
                             sel_c15, preferred_element_type=jnp.float32)  # (15,15)
            # Lane-concatenate the 6 pooled maps: P[y, c*15 + x] = pooled[y, x]
            p_ref[:, c * 15:(c + 1) * 15] = pooled

        # ---- conv2 (6->16, 3x3) + ReLU + 2x2 maxpool -------------------------
        # 9 lane-dense shifted views over ALL 6 input channels at once.
        views = [p_ref[i:i + 13, j:j + 88] for i in range(3) for j in range(3)]
        for oc in range(16):
            a = views[0] * w2v_ref[oc * 9:oc * 9 + 1, :]
            for k in range(1, 9):
                a = a + views[k] * w2v_ref[oc * 9 + k:oc * 9 + k + 1, :]
            # Sum the 6 channel lane-blocks with one MXU matmul -> (13, 13).
            o13 = jnp.dot(a, ch_sum, preferred_element_type=jnp.float32) + b2_ref[oc]
            o13 = jnp.maximum(o13, 0.0)
            cm = jnp.maximum(o13[:, :12], o13[:, 1:13])                  # (13, 12)
            rm = jnp.maximum(cm[:12, :], cm[1:13, :])                    # (12, 12)
            p6 = jnp.dot(jnp.dot(sel_r6, rm,
                                 preferred_element_type=jnp.float32),
                         sel_c6, preferred_element_type=jnp.float32)     # (6, 6)
            # Lane-dense feature layout: out[b, y, oc*6 + x]
            o_ref[b, :, oc * 6:(oc + 1) * 6] = p6


def conv_stage(x, w1_flat, b1, w2_vec, b2, *, bn=None):
    """x: (N, 1, 32, 32) f32 -> (N, 6, 96) f32 features, layout [n, y, oc*6+x]."""
    N = x.shape[0]
    if bn is None:
        bn = max(1, min(8, pl.cdiv(N, 2)))   # >=2 grid steps for small N (megacore)
    grid = (pl.cdiv(N, bn),)
    flops = N * (2 * 6 * 9 * 30 * 30            # conv1 FMAs
                 + 2 * 16 * 9 * 13 * 88          # conv2 FMAs
                 + 2 * 16 * 13 * 88 * 13         # channel-sum matmuls
                 + 2 * 6 * (15 * 29 * 29 + 15 * 29 * 15)
                 + 2 * 16 * (6 * 12 * 12 + 6 * 12 * 6))
    bytes_accessed = 4 * (x.size + N * 6 * CONV_FEAT
                          + w1_flat.size + b1.size + w2_vec.size + b2.size)
    return pl.pallas_call(
        _conv_stage_kernel,
        out_shape=jax.ShapeDtypeStruct((N, 6, CONV_FEAT), jnp.float32),
        grid=grid,
        in_specs=[
            pl.BlockSpec((bn, 1, 32, 32), lambda g: (g, 0, 0, 0)),
            pl.BlockSpec(memory_space=pltpu.MemorySpace.SMEM),   # conv1 weights (54,)
            pl.BlockSpec(memory_space=pltpu.MemorySpace.SMEM),   # conv1 bias    (6,)
            pl.BlockSpec((144, 88), lambda g: (0, 0)),           # conv2 weight lanes
            pl.BlockSpec(memory_space=pltpu.MemorySpace.SMEM),   # conv2 bias    (16,)
        ],
        out_specs=pl.BlockSpec((bn, 6, CONV_FEAT), lambda g: (g, 0, 0)),
        scratch_shapes=[pltpu.VMEM((15, 90), jnp.float32)],      # 6 pooled conv1 maps
        compiler_params=pltpu.CompilerParams(
            dimension_semantics=("parallel",),
            vmem_limit_bytes=32 * 1024 * 1024),
        cost_estimate=pl.CostEstimate(flops=flops, transcendentals=0,
                                      bytes_accessed=bytes_accessed),
    )(x.astype(jnp.float32), w1_flat, b1, w2_vec, b2)


# ----------------------------------------------------------------------------
# Kernel 2: fused fc1 + ReLU + fc2 + ReLU + fc3 (outputs padded to 128 lanes)
# ----------------------------------------------------------------------------
def _fc_stack_kernel(x_ref, w1_ref, b1_ref, w2_ref, b2_ref, w3_ref, b3_ref, o_ref):
    h = x_ref[...]                                               # (TB, 576)
    h = jnp.maximum(
        jnp.dot(h, w1_ref[...], preferred_element_type=jnp.float32) + b1_ref[...], 0.0)
    h = jnp.maximum(
        jnp.dot(h, w2_ref[...], preferred_element_type=jnp.float32) + b2_ref[...], 0.0)
    o_ref[...] = (
        jnp.dot(h, w3_ref[...], preferred_element_type=jnp.float32) + b3_ref[...])


def fc_stack(x, w1, b1, w2, b2, w3, b3, *, tile_m=1024):
    M, K = x.shape
    P = w1.shape[1]                     # 128 (padded)
    TB = min(tile_m, M)
    grid_m = pl.cdiv(M, TB)
    flops = 2 * M * (K * P + P * P + P * P)
    bytes_accessed = 4 * (M * K + M * P + w1.size + w2.size + w3.size + 3 * P)
    b1r, b2r, b3r = b1.reshape(1, -1), b2.reshape(1, -1), b3.reshape(1, -1)
    return pl.pallas_call(
        _fc_stack_kernel,
        out_shape=jax.ShapeDtypeStruct((M, P), jnp.float32),
        grid=(grid_m,),
        in_specs=[
            pl.BlockSpec((TB, K), lambda m: (m, 0)),
            pl.BlockSpec((K, P), lambda m: (0, 0)),
            pl.BlockSpec((1, P), lambda m: (0, 0)),
            pl.BlockSpec((P, P), lambda m: (0, 0)),
            pl.BlockSpec((1, P), lambda m: (0, 0)),
            pl.BlockSpec((P, P), lambda m: (0, 0)),
            pl.BlockSpec((1, P), lambda m: (0, 0)),
        ],
        out_specs=pl.BlockSpec((TB, P), lambda m: (m, 0)),
        compiler_params=pltpu.CompilerParams(
            dimension_semantics=("parallel",),
            vmem_limit_bytes=32 * 1024 * 1024),
        cost_estimate=pl.CostEstimate(flops=flops, transcendentals=0,
                                      bytes_accessed=bytes_accessed),
    )(x, w1, b1r, w2, b2r, w3, b3r)


# ----------------------------------------------------------------------------
# Parameter construction (deterministic, PyTorch-default-style uniform init)
# ----------------------------------------------------------------------------
def _uniform(key, shape, fan_in):
    bound = 1.0 / jnp.sqrt(float(fan_in))
    return jax.random.uniform(key, shape, jnp.float32, -bound, bound)


def _pad2d(w, rows, cols):
    return jnp.zeros((rows, cols), jnp.float32).at[: w.shape[0], : w.shape[1]].set(w)


def _pad1d(b, n):
    return jnp.zeros((n,), jnp.float32).at[: b.shape[0]].set(b)


def _conv2_weight_lanes(w2):
    """w2: (16, 6, 3, 3) torch layout -> (144, 88) lane vectors.

    Row oc*9 + i*3 + j holds w2[oc, c, i, j] broadcast across channel c's
    15-wide lane block (lane index c*15 + x), matching the conv2 slab layout.
    """
    w2r = jnp.transpose(w2, (0, 2, 3, 1)).reshape(16 * 9, 6)      # [oc*9+i*3+j, c]
    return jnp.repeat(w2r, 15, axis=1)[:, :88]                    # (144, 88)


def _permute_fc1_rows(w):
    """fc1 weight (576, out) with torch row order oc*36+y*6+x -> kernel order
    y*96 + oc*6 + x (the conv-stage lane-dense feature layout)."""
    out = w.shape[1]
    w4 = w.reshape(16, 6, 6, out)                 # [oc, y, x, out]
    return jnp.transpose(w4, (1, 0, 2, 3)).reshape(576, out)


def init_params(key):
    ks = jax.random.split(key, 10)
    conv1_w = _uniform(ks[0], (6, 1, 3, 3), 1 * 3 * 3)
    conv1_b = _uniform(ks[1], (6,), 1 * 3 * 3)
    conv2_w = _uniform(ks[2], (16, 6, 3, 3), 6 * 3 * 3)
    conv2_b = _uniform(ks[3], (16,), 6 * 3 * 3)
    fc1_w = _uniform(ks[4], (16 * 6 * 6, 120), 16 * 6 * 6)   # (in=torch order, out)
    fc1_b = _uniform(ks[5], (120,), 16 * 6 * 6)
    fc2_w = _uniform(ks[6], (120, 84), 120)
    fc2_b = _uniform(ks[7], (84,), 120)
    fc3_w = _uniform(ks[8], (84, 10), 84)
    fc3_b = _uniform(ks[9], (10,), 84)
    return {
        "conv1_w": conv1_w.reshape(-1),                 # (54,)  SMEM scalars
        "conv1_b": conv1_b,                             # (6,)
        "conv2_w_vec": _conv2_weight_lanes(conv2_w),    # (144, 88) VMEM lane vectors
        "conv2_b": conv2_b,                             # (16,)
        # FC weights (in, out); fc1 rows permuted to kernel feature order; padded.
        "fc1_w": _pad2d(_permute_fc1_rows(fc1_w), 576, FC_PAD),
        "fc1_b": _pad1d(fc1_b, FC_PAD),
        "fc2_w": _pad2d(fc2_w, FC_PAD, FC_PAD), "fc2_b": _pad1d(fc2_b, FC_PAD),
        "fc3_w": _pad2d(fc3_w, FC_PAD, FC_PAD), "fc3_b": _pad1d(fc3_b, FC_PAD),
    }


# ----------------------------------------------------------------------------
# Forward pass (mirrors Net.forward)
# ----------------------------------------------------------------------------
@jax.jit
def net_forward(params, x):
    # x: (N, 1, 32, 32) NCHW float32
    N = x.shape[0]
    feats = conv_stage(x, params["conv1_w"], params["conv1_b"],
                       params["conv2_w_vec"], params["conv2_b"])    # (N, 6, 96)
    flat = feats.reshape(N, 6 * CONV_FEAT)    # contiguous, free reshape to (N, 576)
    logits = fc_stack(flat, params["fc1_w"], params["fc1_b"],
                      params["fc2_w"], params["fc2_b"],
                      params["fc3_w"], params["fc3_b"])             # (N, 128) padded
    return logits[:, :10]                     # drop padded lanes at the very end


if __name__ == "__main__":
    key = jax.random.PRNGKey(0)
    k_params, k_x = jax.random.split(key)
    params = init_params(k_params)
    # Spatial size 32x32 is implied by fc1 expecting 16*6*6 flat features.
    x = jax.random.normal(k_x, (2, 1, 32, 32), jnp.float32)
    out = net_forward(params, x)
    out = jax.block_until_ready(out)
    assert out.shape == (2, 10), out.shape
    assert out.dtype == jnp.float32
    print("KERNEL_OK")
</pallas_src>

<mosaic_0001>
module attributes {stable_mosaic.version = 11 : i64} {
  func.func @_fc_stack_kernel(%arg0: i32, %arg1: memref<2x576xf32, #tpu.memory_space<vmem>>, %arg2: memref<576x128xf32, #tpu.memory_space<vmem>>, %arg3: memref<1x128xf32, #tpu.memory_space<vmem>>, %arg4: memref<128x128xf32, #tpu.memory_space<vmem>>, %arg5: memref<1x128xf32, #tpu.memory_space<vmem>>, %arg6: memref<128x128xf32, #tpu.memory_space<vmem>>, %arg7: memref<1x128xf32, #tpu.memory_space<vmem>>, %arg8: memref<2x128xf32, #tpu.memory_space<vmem>>) attributes {dimension_semantics = [#tpu.dimension_semantics<parallel>], iteration_bounds = array<i64: 1>, scalar_prefetch = 0 : i64, scratch_operands = 0 : i64, tpu.core_type = #tpu.core_type<tc>, window_params = [{transform_indices = @transform_0, window_bounds = array<i64: 2, 576>}, {pipeline_mode = #tpu.pipeline_mode<synchronous>, transform_indices = @transform_1, window_bounds = array<i64: 576, 128>}, {pipeline_mode = #tpu.pipeline_mode<synchronous>, transform_indices = @transform_2, window_bounds = array<i64: 1, 128>}, {pipeline_mode = #tpu.pipeline_mode<synchronous>, transform_indices = @transform_3, window_bounds = array<i64: 128, 128>}, {pipeline_mode = #tpu.pipeline_mode<synchronous>, transform_indices = @transform_4, window_bounds = array<i64: 1, 128>}, {pipeline_mode = #tpu.pipeline_mode<synchronous>, transform_indices = @transform_5, window_bounds = array<i64: 128, 128>}, {pipeline_mode = #tpu.pipeline_mode<synchronous>, transform_indices = @transform_6, window_bounds = array<i64: 1, 128>}, {transform_indices = @transform_7, window_bounds = array<i64: 2, 128>}]} {
    %c0 = arith.constant 0 : index
    %c0_0 = arith.constant 0 : index
    %0 = vector.load %arg1[%c0, %c0_0] : memref<2x576xf32, #tpu.memory_space<vmem>>, vector<2x576xf32>
    %c0_1 = arith.constant 0 : index
    %c0_2 = arith.constant 0 : index
    %1 = vector.load %arg2[%c0_1, %c0_2] : memref<576x128xf32, #tpu.memory_space<vmem>>, vector<576x128xf32>
    %cst = arith.constant dense<0.000000e+00> : vector<2x128xf32>
    %2 = tpu.matmul %0, %1, %cst {dimension_numbers = #tpu.dot_dimension_numbers<[1], [0], [0], [1], [0, 0, 1, 1], [], []>} : vector<2x576xf32>, vector<576x128xf32>, vector<2x128xf32> -> vector<2x128xf32>
    %c0_3 = arith.constant 0 : index
    %c0_4 = arith.constant 0 : index
    %3 = vector.load %arg3[%c0_3, %c0_4] : memref<1x128xf32, #tpu.memory_space<vmem>>, vector<1x128xf32>
    %4 = vector.broadcast %3 : vector<1x128xf32> to vector<2x128xf32>
    %5 = arith.addf %2, %4 : vector<2x128xf32>
    %cst_5 = arith.constant 0.000000e+00 : f32
    %6 = vector.broadcast %cst_5 : f32 to vector<2x128xf32>
    %7 = arith.maximumf %5, %6 : vector<2x128xf32>
    %c0_6 = arith.constant 0 : index
    %c0_7 = arith.constant 0 : index
    %8 = vector.load %arg4[%c0_6, %c0_7] : memref<128x128xf32, #tpu.memory_space<vmem>>, vector<128x128xf32>
    %cst_8 = arith.constant dense<0.000000e+00> : vector<2x128xf32>
    %9 = tpu.matmul %7, %8, %cst_8 {dimension_numbers = #tpu.dot_dimension_numbers<[1], [0], [0], [1], [0, 0, 1, 1], [], []>} : vector<2x128xf32>, vector<128x128xf32>, vector<2x128xf32> -> vector<2x128xf32>
    %c0_9 = arith.constant 0 : index
    %c0_10 = arith.constant 0 : index
    %10 = vector.load %arg5[%c0_9, %c0_10] : memref<1x128xf32, #tpu.memory_space<vmem>>, vector<1x128xf32>
    %11 = vector.broadcast %10 : vector<1x128xf32> to vector<2x128xf32>
    %12 = arith.addf %9, %11 : vector<2x128xf32>
    %cst_11 = arith.constant 0.000000e+00 : f32
    %13 = vector.broadcast %cst_11 : f32 to vector<2x128xf32>
    %14 = arith.maximumf %12, %13 : vector<2x128xf32>
    %c0_12 = arith.constant 0 : index
    %c0_13 = arith.constant 0 : index
    %15 = vector.load %arg6[%c0_12, %c0_13] : memref<128x128xf32, #tpu.memory_space<vmem>>, vector<128x128xf32>
    %cst_14 = arith.constant dense<0.000000e+00> : vector<2x128xf32>
    %16 = tpu.matmul %14, %15, %cst_14 {dimension_numbers = #tpu.dot_dimension_numbers<[1], [0], [0], [1], [0, 0, 1, 1], [], []>} : vector<2x128xf32>, vector<128x128xf32>, vector<2x128xf32> -> vector<2x128xf32>
    %c0_15 = arith.constant 0 : index
    %c0_16 = arith.constant 0 : index
    %17 = vector.load %arg7[%c0_15, %c0_16] : memref<1x128xf32, #tpu.memory_space<vmem>>, vector<1x128xf32>
    %18 = vector.broadcast %17 : vector<1x128xf32> to vector<2x128xf32>
    %19 = arith.addf %16, %18 : vector<2x128xf32>
    %c0_17 = arith.constant 0 : index
    %c0_18 = arith.constant 0 : index
    %20 = vector.load %arg8[%c0_17, %c0_18] : memref<2x128xf32, #tpu.memory_space<vmem>>, vector<2x128xf32>
    tpu.vector_store %arg8[%c0_17, %c0_18], %19 {strides = array<i32>} : memref<2x128xf32, #tpu.memory_space<vmem>>, vector<2x128xf32>,
    return
  }
  func.func @transform_0(%arg0: i32) -> (i32, i32) {
    %c0_i32 = arith.constant 0 : i32
    %c0_i32_0 = arith.constant 0 : i32
    return %arg0, %c0_i32 : i32, i32
  }
  func.func @transform_1(%arg0: i32) -> (i32, i32) {
    %c0_i32 = arith.constant 0 : i32
    %c0_i32_0 = arith.constant 0 : i32
    %c0_i32_1 = arith.constant 0 : i32
    return %c0_i32, %c0_i32_0 : i32, i32
  }
  func.func @transform_2(%arg0: i32) -> (i32, i32) {
    %c0_i32 = arith.constant 0 : i32
    %c0_i32_0 = arith.constant 0 : i32
    %c0_i32_1 = arith.constant 0 : i32
    return %c0_i32, %c0_i32_0 : i32, i32
  }
  func.func @transform_3(%arg0: i32) -> (i32, i32) {
    %c0_i32 = arith.constant 0 : i32
    %c0_i32_0 = arith.constant 0 : i32
    %c0_i32_1 = arith.constant 0 : i32
    return %c0_i32, %c0_i32_0 : i32, i32
  }
  func.func @transform_4(%arg0: i32) -> (i32, i32) {
    %c0_i32 = arith.constant 0 : i32
    %c0_i32_0 = arith.constant 0 : i32
    %c0_i32_1 = arith.constant 0 : i32
    return %c0_i32, %c0_i32_0 : i32, i32
  }
  func.func @transform_5(%arg0: i32) -> (i32, i32) {
    %c0_i32 = arith.constant 0 : i32
    %c0_i32_0 = arith.constant 0 : i32
    %c0_i32_1 = arith.constant 0 : i32
    return %c0_i32, %c0_i32_0 : i32, i32
  }
  func.func @transform_6(%arg0: i32) -> (i32, i32) {
    %c0_i32 = arith.constant 0 : i32
    %c0_i32_0 = arith.constant 0 : i32
    %c0_i32_1 = arith.constant 0 : i32
    return %c0_i32, %c0_i32_0 : i32, i32
  }
  func.func @transform_7(%arg0: i32) -> (i32, i32) {
    %c0_i32 = arith.constant 0 : i32
    %c0_i32_0 = arith.constant 0 : i32
    return %arg0, %c0_i32 : i32, i32
  }
}

module attributes {stable_mosaic.version = 11 : i64} {
  func.func @_conv_stage_kernel(%arg0: i32, %arg1: memref<1x1x32x32xf32, #tpu.memory_space<vmem>>, %arg2: memref<54xf32, #tpu.memory_space<smem>>, %arg3: memref<6xf32, #tpu.memory_space<smem>>, %arg4: memref<144x88xf32, #tpu.memory_space<vmem>>, %arg5: memref<16xf32, #tpu.memory_space<smem>>, %arg6: memref<1x6x96xf32, #tpu.memory_space<vmem>>, %arg7: memref<15x90xf32, #tpu.memory_space<vmem>>) attributes {dimension_semantics = [#tpu.dimension_semantics<parallel>], iteration_bounds = array<i64: 2>, scalar_prefetch = 0 : i64, scratch_operands = 1 : i64, tpu.core_type = #tpu.core_type<tc>, window_params = [{transform_indices = @transform_0, window_bounds = array<i64: 1, 1, 32, 32>}, {transform_indices = @transform_1, window_bounds = array<i64: 54>}, {transform_indices = @transform_2, window_bounds = array<i64: 6>}, {pipeline_mode = #tpu.pipeline_mode<synchronous>, transform_indices = @transform_3, window_bounds = array<i64: 144, 88>}, {transform_indices = @transform_4, window_bounds = array<i64: 16>}, {transform_indices = @transform_5, window_bounds = array<i64: 1, 6, 96>}]} {
    %0 = tpu.iota {dimensions = array<i32: 0>} : vector<15x29xi32>
    %1 = tpu.iota {dimensions = array<i32: 1>} : vector<15x29xi32>
    %c2_i32 = arith.constant 2 : i32
    %2 = vector.broadcast %c2_i32 : i32 to vector<15x29xi32>
    %3 = arith.muli %2, %0 : vector<15x29xi32>
    %4 = arith.cmpi eq, %1, %3 : vector<15x29xi32>
    %5 = arith.extui %4 : vector<15x29xi1> to vector<15x29xi32>
    %6 = arith.sitofp %5 : vector<15x29xi32> to vector<15x29xf32>
    %7 = tpu.iota {dimensions = array<i32: 0>} : vector<29x15xi32>
    %8 = tpu.iota {dimensions = array<i32: 1>} : vector<29x15xi32>
    %c2_i32_0 = arith.constant 2 : i32
    %9 = vector.broadcast %c2_i32_0 : i32 to vector<29x15xi32>
    %10 = arith.muli %9, %8 : vector<29x15xi32>
    %11 = arith.cmpi eq, %7, %10 : vector<29x15xi32>
    %12 = arith.extui %11 : vector<29x15xi1> to vector<29x15xi32>
    %13 = arith.sitofp %12 : vector<29x15xi32> to vector<29x15xf32>
    %14 = tpu.iota {dimensions = array<i32: 0>} : vector<6x12xi32>
    %15 = tpu.iota {dimensions = array<i32: 1>} : vector<6x12xi32>
    %c2_i32_1 = arith.constant 2 : i32
    %16 = vector.broadcast %c2_i32_1 : i32 to vector<6x12xi32>
    %17 = arith.muli %16, %14 : vector<6x12xi32>
    %18 = arith.cmpi eq, %15, %17 : vector<6x12xi32>
    %19 = arith.extui %18 : vector<6x12xi1> to vector<6x12xi32>
    %20 = arith.sitofp %19 : vector<6x12xi32> to vector<6x12xf32>
    %21 = tpu.iota {dimensions = array<i32: 0>} : vector<12x6xi32>
    %22 = tpu.iota {dimensions = array<i32: 1>} : vector<12x6xi32>
    %c2_i32_2 = arith.constant 2 : i32
    %23 = vector.broadcast %c2_i32_2 : i32 to vector<12x6xi32>
    %24 = arith.muli %23, %22 : vector<12x6xi32>
    %25 = arith.cmpi eq, %21, %24 : vector<12x6xi32>
    %26 = arith.extui %25 : vector<12x6xi1> to vector<12x6xi32>
    %27 = arith.sitofp %26 : vector<12x6xi32> to vector<12x6xf32>
    %28 = tpu.iota {dimensions = array<i32: 0>} : vector<88x13xi32>
    %29 = tpu.iota {dimensions = array<i32: 1>} : vector<88x13xi32>
    %30 = arith.cmpi eq, %28, %29 : vector<88x13xi32>
    %c15_i32 = arith.constant 15 : i32
    %31 = vector.broadcast %c15_i32 : i32 to vector<88x13xi32>
    %32 = arith.addi %29, %31 : vector<88x13xi32>
    %33 = arith.cmpi eq, %28, %32 : vector<88x13xi32>
    %34 = arith.ori %30, %33 : vector<88x13xi1>
    %c30_i32 = arith.constant 30 : i32
    %35 = vector.broadcast %c30_i32 : i32 to vector<88x13xi32>
    %36 = arith.addi %29, %35 : vector<88x13xi32>
    %37 = arith.cmpi eq, %28, %36 : vector<88x13xi32>
    %38 = arith.ori %34, %37 : vector<88x13xi1>
    %c45_i32 = arith.constant 45 : i32
    %39 = vector.broadcast %c45_i32 : i32 to vector<88x13xi32>
    %40 = arith.addi %29, %39 : vector<88x13xi32>
    %41 = arith.cmpi eq, %28, %40 : vector<88x13xi32>
    %42 = arith.ori %38, %41 : vector<88x13xi1>
    %c60_i32 = arith.constant 60 : i32
    %43 = vector.broadcast %c60_i32 : i32 to vector<88x13xi32>
    %44 = arith.addi %29, %43 : vector<88x13xi32>
    %45 = arith.cmpi eq, %28, %44 : vector<88x13xi32>
    %46 = arith.ori %42, %45 : vector<88x13xi1>
    %c75_i32 = arith.constant 75 : i32
    %47 = vector.broadcast %c75_i32 : i32 to vector<88x13xi32>
    %48 = arith.addi %29, %47 : vector<88x13xi32>
    %49 = arith.cmpi eq, %28, %48 : vector<88x13xi32>
    %50 = arith.ori %46, %49 : vector<88x13xi1>
    %51 = arith.extui %50 : vector<88x13xi1> to vector<88x13xi32>
    %52 = arith.sitofp %51 : vector<88x13xi32> to vector<88x13xf32>
    %c0 = arith.constant 0 : index
    %c0_3 = arith.constant 0 : index
    %c0_4 = arith.constant 0 : index
    %c0_5 = arith.constant 0 : index
    %53 = vector.load %arg1[%c0, %c0_3, %c0_4, %c0_5] : memref<1x1x32x32xf32, #tpu.memory_space<vmem>>, vector<1x1x32x32xf32>
    %54 = vector.shape_cast %53 : vector<1x1x32x32xf32> to vector<32x32xf32>
    %55 = vector.extract_strided_slice %54 {offsets = [0, 0], sizes = [30, 30], strides = [1, 1]} : vector<32x32xf32> to vector<30x30xf32>
    %56 = vector.extract_strided_slice %54 {offsets = [0, 1], sizes = [30, 30], strides = [1, 1]} : vector<32x32xf32> to vector<30x30xf32>
    %57 = vector.extract_strided_slice %54 {offsets = [0, 2], sizes = [30, 30], strides = [1, 1]} : vector<32x32xf32> to vector<30x30xf32>
    %58 = vector.extract_strided_slice %54 {offsets = [1, 0], sizes = [30, 30], strides = [1, 1]} : vector<32x32xf32> to vector<30x30xf32>
    %59 = vector.extract_strided_slice %54 {offsets = [1, 1], sizes = [30, 30], strides = [1, 1]} : vector<32x32xf32> to vector<30x30xf32>
    %60 = vector.extract_strided_slice %54 {offsets = [1, 2], sizes = [30, 30], strides = [1, 1]} : vector<32x32xf32> to vector<30x30xf32>
    %61 = vector.extract_strided_slice %54 {offsets = [2, 0], sizes = [30, 30], strides = [1, 1]} : vector<32x32xf32> to vector<30x30xf32>
    %62 = vector.extract_strided_slice %54 {offsets = [2, 1], sizes = [30, 30], strides = [1, 1]} : vector<32x32xf32> to vector<30x30xf32>
    %63 = vector.extract_strided_slice %54 {offsets = [2, 2], sizes = [30, 30], strides = [1, 1]} : vector<32x32xf32> to vector<30x30xf32>
    %c0_6 = arith.constant 0 : index
    %64 = memref.load %arg2[%c0_6] : memref<54xf32, #tpu.memory_space<smem>>
    %65 = vector.broadcast %64 : f32 to vector<30x30xf32>
    %66 = arith.mulf %55, %65 : vector<30x30xf32>
    %c1 = arith.constant 1 : index
    %67 = memref.load %arg2[%c1] : memref<54xf32, #tpu.memory_space<smem>>
    %68 = vector.broadcast %67 : f32 to vector<30x30xf32>
    %69 = arith.mulf %56, %68 : vector<30x30xf32>
    %70 = arith.addf %66, %69 : vector<30x30xf32>
    %c2 = arith.constant 2 : index
    %71 = memref.load %arg2[%c2] : memref<54xf32, #tpu.memory_space<smem>>
    %72 = vector.broadcast %71 : f32 to vector<30x30xf32>
    %73 = arith.mulf %57, %72 : vector<30x30xf32>
    %74 = arith.addf %70, %73 : vector<30x30xf32>
    %c3 = arith.constant 3 : index
    %75 = memref.load %arg2[%c3] : memref<54xf32, #tpu.memory_space<smem>>
    %76 = vector.broadcast %75 : f32 to vector<30x30xf32>
    %77 = arith.mulf %58, %76 : vector<30x30xf32>
    %78 = arith.addf %74, %77 : vector<30x30xf32>
    %c4 = arith.constant 4 : index
    %79 = memref.load %arg2[%c4] : memref<54xf32, #tpu.memory_space<smem>>
    %80 = vector.broadcast %79 : f32 to vector<30x30xf32>
    %81 = arith.mulf %59, %80 : vector<30x30xf32>
    %82 = arith.addf %78, %81 : vector<30x30xf32>
    %c5 = arith.constant 5 : index
    %83 = memref.load %arg2[%c5] : memref<54xf32, #tpu.memory_space<smem>>
    %84 = vector.broadcast %83 : f32 to vector<30x30xf32>
    %85 = arith.mulf %60, %84 : vector<30x30xf32>
    %86 = arith.addf %82, %85 : vector<30x30xf32>
    %c6 = arith.constant 6 : index
    %87 = memref.load %arg2[%c6] : memref<54xf32, #tpu.memory_space<smem>>
    %88 = vector.broadcast %87 : f32 to vector<30x30xf32>
    %89 = arith.mulf %61, %88 : vector<30x30xf32>
    %90 = arith.addf %86, %89 : vector<30x30xf32>
    %c7 = arith.constant 7 : index
    %91 = memref.load %arg2[%c7] : memref<54xf32, #tpu.memory_space<smem>>
    %92 = vector.broadcast %91 : f32 to vector<30x30xf32>
    %93 = arith.mulf %62, %92 : vector<30x30xf32>
    %94 = arith.addf %90, %93 : vector<30x30xf32>
    %c8 = arith.constant 8 : index
    %95 = memref.load %arg2[%c8] : memref<54xf32, #tpu.memory_space<smem>>
    %96 = vector.broadcast %95 : f32 to vector<30x30xf32>
    %97 = arith.mulf %63, %96 : vector<30x30xf32>
    %98 = arith.addf %94, %97 : vector<30x30xf32>
    %c0_7 = arith.constant 0 : index
    %99 = memref.load %arg3[%c0_7] : memref<6xf32, #tpu.memory_space<smem>>
    %100 = vector.broadcast %99 : f32 to vector<30x30xf32>
    %101 = arith.addf %98, %100 : vector<30x30xf32>
    %cst = arith.constant 0.000000e+00 : f32
    %102 = vector.broadcast %cst : f32 to vector<30x30xf32>
    %103 = arith.maximumf %101, %102 : vector<30x30xf32>
    %104 = vector.extract_strided_slice %103 {offsets = [0, 0], sizes = [30, 29], strides = [1, 1]} : vector<30x30xf32> to vector<30x29xf32>
    %105 = vector.extract_strided_slice %103 {offsets = [0, 1], sizes = [30, 29], strides = [1, 1]} : vector<30x30xf32> to vector<30x29xf32>
    %106 = arith.maximumf %104, %105 : vector<30x29xf32>
    %107 = vector.extract_strided_slice %106 {offsets = [0, 0], sizes = [29, 29], strides = [1, 1]} : vector<30x29xf32> to vector<29x29xf32>
    %108 = vector.extract_strided_slice %106 {offsets = [1, 0], sizes = [29, 29], strides = [1, 1]} : vector<30x29xf32> to vector<29x29xf32>
    %109 = arith.maximumf %107, %108 : vector<29x29xf32>
    %cst_8 = arith.constant dense<0.000000e+00> : vector<15x29xf32>
    %110 = tpu.matmul %6, %109, %cst_8 {dimension_numbers = #tpu.dot_dimension_numbers<[1], [0], [0], [1], [0, 0, 1, 1], [], []>} : vector<15x29xf32>, vector<29x29xf32>, vector<15x29xf32> -> vector<15x29xf32>
    %cst_9 = arith.constant dense<0.000000e+00> : vector<15x15xf32>
    %111 = tpu.matmul %110, %13, %cst_9 {dimension_numbers = #tpu.dot_dimension_numbers<[1], [0], [0], [1], [0, 0, 1, 1], [], []>} : vector<15x29xf32>, vector<29x15xf32>, vector<15x15xf32> -> vector<15x15xf32>
    %c0_10 = arith.constant 0 : index
    %c0_11 = arith.constant 0 : index
    %112 = vector.load %arg7[%c0_10, %c0_11] : memref<15x90xf32, #tpu.memory_space<vmem>>, vector<15x15xf32>
    tpu.vector_store %arg7[%c0_10, %c0_11], %111 {strides = array<i32>} : memref<15x90xf32, #tpu.memory_space<vmem>>, vector<15x15xf32>,
    %c9 = arith.constant 9 : index
    %113 = memref.load %arg2[%c9] : memref<54xf32, #tpu.memory_space<smem>>
    %114 = vector.broadcast %113 : f32 to vector<30x30xf32>
    %115 = arith.mulf %55, %114 : vector<30x30xf32>
    %c10 = arith.constant 10 : index
    %116 = memref.load %arg2[%c10] : memref<54xf32, #tpu.memory_space<smem>>
    %117 = vector.broadcast %116 : f32 to vector<30x30xf32>
    %118 = arith.mulf %56, %117 : vector<30x30xf32>
    %119 = arith.addf %115, %118 : vector<30x30xf32>
    %c11 = arith.constant 11 : index
    %120 = memref.load %arg2[%c11] : memref<54xf32, #tpu.memory_space<smem>>
    %121 = vector.broadcast %120 : f32 to vector<30x30xf32>
    %122 = arith.mulf %57, %121 : vector<30x30xf32>
    %123 = arith.addf %119, %122 : vector<30x30xf32>
    %c12 = arith.constant 12 : index
    %124 = memref.load %arg2[%c12] : memref<54xf32, #tpu.memory_space<smem>>
    %125 = vector.broadcast %124 : f32 to vector<30x30xf32>
    %126 = arith.mulf %58, %125 : vector<30x30xf32>
    %127 = arith.addf %123, %126 : vector<30x30xf32>
    %c13 = arith.constant 13 : index
    %128 = memref.load %arg2[%c13] : memref<54xf32, #tpu.memory_space<smem>>
    %129 = vector.broadcast %128 : f32 to vector<30x30xf32>
    %130 = arith.mulf %59, %129 : vector<30x30xf32>
    %131 = arith.addf %127, %130 : vector<30x30xf32>
    %c14 = arith.constant 14 : index
    %132 = memref.load %arg2[%c14] : memref<54xf32, #tpu.memory_space<smem>>
    %133 = vector.broadcast %132 : f32 to vector<30x30xf32>
    %134 = arith.mulf %60, %133 : vector<30x30xf32>
    %135 = arith.addf %131, %134 : vector<30x30xf32>
    %c15 = arith.constant 15 : index
    %136 = memref.load %arg2[%c15] : memref<54xf32, #tpu.memory_space<smem>>
    %137 = vector.broadcast %136 : f32 to vector<30x30xf32>
    %138 = arith.mulf %61, %137 : vector<30x30xf32>
    %139 = arith.addf %135, %138 : vector<30x30xf32>
    %c16 = arith.constant 16 : index
    %140 = memref.load %arg2[%c16] : memref<54xf32, #tpu.memory_space<smem>>
    %141 = vector.broadcast %140 : f32 to vector<30x30xf32>
    %142 = arith.mulf %62, %141 : vector<30x30xf32>
    %143 = arith.addf %139, %142 : vector<30x30xf32>
    %c17 = arith.constant 17 : index
    %144 = memref.load %arg2[%c17] : memref<54xf32, #tpu.memory_space<smem>>
    %145 = vector.broadcast %144 : f32 to vector<30x30xf32>
    %146 = arith.mulf %63, %145 : vector<30x30xf32>
    %147 = arith.addf %143, %146 : vector<30x30xf32>
    %c1_12 = arith.constant 1 : index
    %148 = memref.load %arg3[%c1_12] : memref<6xf32, #tpu.memory_space<smem>>
    %149 = vector.broadcast %148 : f32 to vector<30x30xf32>
    %150 = arith.addf %147, %149 : vector<30x30xf32>
    %cst_13 = arith.constant 0.000000e+00 : f32
    %151 = vector.broadcast %cst_13 : f32 to vector<30x30xf32>
    %152 = arith.maximumf %150, %151 : vector<30x30xf32>
    %153 = vector.extract_strided_slice %152 {offsets = [0, 0], sizes = [30, 29], strides = [1, 1]} : vector<30x30xf32> to vector<30x29xf32>
    %154 = vector.extract_strided_slice %152 {offsets = [0, 1], sizes = [30, 29], strides = [1, 1]} : vector<30x30xf32> to vector<30x29xf32>
    %155 = arith.maximumf %153, %154 : vector<30x29xf32>
    %156 = vector.extract_strided_slice %155 {offsets = [0, 0], sizes = [29, 29], strides = [1, 1]} : vector<30x29xf32> to vector<29x29xf32>
    %157 = vector.extract_strided_slice %155 {offsets = [1, 0], sizes = [29, 29], strides = [1, 1]} : vector<30x29xf32> to vector<29x29xf32>
    %158 = arith.maximumf %156, %157 : vector<29x29xf32>
    %cst_14 = arith.constant dense<0.000000e+00> : vector<15x29xf32>
    %159 = tpu.matmul %6, %158, %cst_14 {dimension_numbers = #tpu.dot_dimension_numbers<[1], [0], [0], [1], [0, 0, 1, 1], [], []>} : vector<15x29xf32>, vector<29x29xf32>, vector<15x29xf32> -> vector<15x29xf32>
    %cst_15 = arith.constant dense<0.000000e+00> : vector<15x15xf32>
    %160 = tpu.matmul %159, %13, %cst_15 {dimension_numbers = #tpu.dot_dimension_numbers<[1], [0], [0], [1], [0, 0, 1, 1], [], []>} : vector<15x29xf32>, vector<29x15xf32>, vector<15x15xf32> -> vector<15x15xf32>
    %c0_16 = arith.constant 0 : index
    %c15_17 = arith.constant 15 : index
    %161 = vector.load %arg7[%c0_16, %c15_17] : memref<15x90xf32, #tpu.memory_space<vmem>>, vector<15x15xf32>
    tpu.vector_store %arg7[%c0_16, %c15_17], %160 {strides = array<i32>} : memref<15x90xf32, #tpu.memory_space<vmem>>, vector<15x15xf32>,
    %c18 = arith.constant 18 : index
    %162 = memref.load %arg2[%c18] : memref<54xf32, #tpu.memory_space<smem>>
    %163 = vector.broadcast %162 : f32 to vector<30x30xf32>
    %164 = arith.mulf %55, %163 : vector<30x30xf32>
    %c19 = arith.constant 19 : index
    %165 = memref.load %arg2[%c19] : memref<54xf32, #tpu.memory_space<smem>>
    %166 = vector.broadcast %165 : f32 to vector<30x30xf32>
    %167 = arith.mulf %56, %166 : vector<30x30xf32>
    %168 = arith.addf %164, %167 : vector<30x30xf32>
    %c20 = arith.constant 20 : index
    %169 = memref.load %arg2[%c20] : memref<54xf32, #tpu.memory_space<smem>>
    %170 = vector.broadcast %169 : f32 to vector<30x30xf32>
    %171 = arith.mulf %57, %170 : vector<30x30xf32>
    %172 = arith.addf %168, %171 : vector<30x30xf32>
    %c21 = arith.constant 21 : index
    %173 = memref.load %arg2[%c21] : memref<54xf32, #tpu.memory_space<smem>>
    %174 = vector.broadcast %173 : f32 to vector<30x30xf32>
    %175 = arith.mulf %58, %174 : vector<30x30xf32>
    %176 = arith.addf %172, %175 : vector<30x30xf32>
    %c22 = arith.constant 22 : index
    %177 = memref.load %arg2[%c22] : memref<54xf32, #tpu.memory_space<smem>>
    %178 = vector.broadcast %177 : f32 to vector<30x30xf32>
    %179 = arith.mulf %59, %178 : vector<30x30xf32>
    %180 = arith.addf %176, %179 : vector<30x30xf32>
    %c23 = arith.constant 23 : index
    %181 = memref.load %arg2[%c23] : memref<54xf32, #tpu.memory_space<smem>>
    %182 = vector.broadcast %181 : f32 to vector<30x30xf32>
    %183 = arith.mulf %60, %182 : vector<30x30xf32>
    %184 = arith.addf %180, %183 : vector<30x30xf32>
    %c24 = arith.constant 24 : index
    %185 = memref.load %arg2[%c24] : memref<54xf32, #tpu.memory_space<smem>>
    %186 = vector.broadcast %185 : f32 to vector<30x30xf32>
    %187 = arith.mulf %61, %186 : vector<30x30xf32>
    %188 = arith.addf %184, %187 : vector<30x30xf32>
    %c25 = arith.constant 25 : index
    %189 = memref.load %arg2[%c25] : memref<54xf32, #tpu.memory_space<smem>>
    %190 = vector.broadcast %189 : f32 to vector<30x30xf32>
    %191 = arith.mulf %62, %190 : vector<30x30xf32>
    %192 = arith.addf %188, %191 : vector<30x30xf32>
    %c26 = arith.constant 26 : index
    %193 = memref.load %arg2[%c26] : memref<54xf32, #tpu.memory_space<smem>>
    %194 = vector.broadcast %193 : f32 to vector<30x30xf32>
    %195 = arith.mulf %63, %194 : vector<30x30xf32>
    %196 = arith.addf %192, %195 : vector<30x30xf32>
    %c2_18 = arith.constant 2 : index
    %197 = memref.load %arg3[%c2_18] : memref<6xf32, #tpu.memory_space<smem>>
    %198 = vector.broadcast %197 : f32 to vector<30x30xf32>
    %199 = arith.addf %196, %198 : vector<30x30xf32>
    %cst_19 = arith.constant 0.000000e+00 : f32
    %200 = vector.broadcast %cst_19 : f32 to vector<30x30xf32>
    %201 = arith.maximumf %199, %200 : vector<30x30xf32>
    %202 = vector.extract_strided_slice %201 {offsets = [0, 0], sizes = [30, 29], strides = [1, 1]} : vector<30x30xf32> to vector<30x29xf32>
    %203 = vector.extract_strided_slice %201 {offsets = [0, 1], sizes = [30, 29], strides = [1, 1]} : vector<30x30xf32> to vector<30x29xf32>
    %204 = arith.maximumf %202, %203 : vector<30x29xf32>
    %205 = vector.extract_strided_slice %204 {offsets = [0, 0], sizes = [29, 29], strides = [1, 1]} : vector<30x29xf32> to vector<29x29xf32>
    %206 = vector.extract_strided_slice %204 {offsets = [1, 0], sizes = [29, 29], strides = [1, 1]} : vector<30x29xf32> to vector<29x29xf32>
    %207 = arith.maximumf %205, %206 : vector<29x29xf32>
    %cst_20 = arith.constant dense<0.000000e+00> : vector<15x29xf32>
    %208 = tpu.matmul %6, %207, %cst_20 {dimension_numbers = #tpu.dot_dimension_numbers<[1], [0], [0], [1], [0, 0, 1, 1], [], []>} : vector<15x29xf32>, vector<29x29xf32>, vector<15x29xf32> -> vector<15x29xf32>
    %cst_21 = arith.constant dense<0.000000e+00> : vector<15x15xf32>
    %209 = tpu.matmul %208, %13, %cst_21 {dimension_numbers = #tpu.dot_dimension_numbers<[1], [0], [0], [1], [0, 0, 1, 1], [], []>} : vector<15x29xf32>, vector<29x15xf32>, vector<15x15xf32> -> vector<15x15xf32>
    %c0_22 = arith.constant 0 : index
    %c30 = arith.constant 30 : index
    %210 = vector.load %arg7[%c0_22, %c30] : memref<15x90xf32, #tpu.memory_space<vmem>>, vector<15x15xf32>
    tpu.vector_store %arg7[%c0_22, %c30], %209 {strides = array<i32>} : memref<15x90xf32, #tpu.memory_space<vmem>>, vector<15x15xf32>,
    %c27 = arith.constant 27 : index
    %211 = memref.load %arg2[%c27] : memref<54xf32, #tpu.memory_space<smem>>
    %212 = vector.broadcast %211 : f32 to vector<30x30xf32>
    %213 = arith.mulf %55, %212 : vector<30x30xf32>
    %c28 = arith.constant 28 : index
    %214 = memref.load %arg2[%c28] : memref<54xf32, #tpu.memory_space<smem>>
    %215 = vector.broadcast %214 : f32 to vector<30x30xf32>
    %216 = arith.mulf %56, %215 : vector<30x30xf32>
    %217 = arith.addf %213, %216 : vector<30x30xf32>
    %c29 = arith.constant 29 : index
    %218 = memref.load %arg2[%c29] : memref<54xf32, #tpu.memory_space<smem>>
    %219 = vector.broadcast %218 : f32 to vector<30x30xf32>
    %220 = arith.mulf %57, %219 : vector<30x30xf32>
    %221 = arith.addf %217, %220 : vector<30x30xf32>
    %c30_23 = arith.constant 30 : index
    %222 = memref.load %arg2[%c30_23] : memref<54xf32, #tpu.memory_space<smem>>
    %223 = vector.broadcast %222 : f32 to vector<30x30xf32>
    %224 = arith.mulf %58, %223 : vector<30x30xf32>
    %225 = arith.addf %221, %224 : vector<30x30xf32>
    %c31 = arith.constant 31 : index
    %226 = memref.load %arg2[%c31] : memref<54xf32, #tpu.memory_space<smem>>
    %227 = vector.broadcast %226 : f32 to vector<30x30xf32>
    %228 = arith.mulf %59, %227 : vector<30x30xf32>
    %229 = arith.addf %225, %228 : vector<30x30xf32>
    %c32 = arith.constant 32 : index
    %230 = memref.load %arg2[%c32] : memref<54xf32, #tpu.memory_space<smem>>
    %231 = vector.broadcast %230 : f32 to vector<30x30xf32>
    %232 = arith.mulf %60, %231 : vector<30x30xf32>
    %233 = arith.addf %229, %232 : vector<30x30xf32>
    %c33 = arith.constant 33 : index
    %234 = memref.load %arg2[%c33] : memref<54xf32, #tpu.memory_space<smem>>
    %235 = vector.broadcast %234 : f32 to vector<30x30xf32>
    %236 = arith.mulf %61, %235 : vector<30x30xf32>
    %237 = arith.addf %233, %236 : vector<30x30xf32>
    %c34 = arith.constant 34 : index
    %238 = memref.load %arg2[%c34] : memref<54xf32, #tpu.memory_space<smem>>
    %239 = vector.broadcast %238 : f32 to vector<30x30xf32>
    %240 = arith.mulf %62, %239 : vector<30x30xf32>
    %241 = arith.addf %237, %240 : vector<30x30xf32>
    %c35 = arith.constant 35 : index
    %242 = memref.load %arg2[%c35] : memref<54xf32, #tpu.memory_space<smem>>
    %243 = vector.broadcast %242 : f32 to vector<30x30xf32>
    %244 = arith.mulf %63, %243 : vector<30x30xf32>
    %245 = arith.addf %241, %244 : vector<30x30xf32>
    %c3_24 = arith.constant 3 : index
    %246 = memref.load %arg3[%c3_24] : memref<6xf32, #tpu.memory_space<smem>>
    %247 = vector.broadcast %246 : f32 to vector<30x30xf32>
    %248 = arith.addf %245, %247 : vector<30x30xf32>
    %cst_25 = arith.constant 0.000000e+00 : f32
    %249 = vector.broadcast %cst_25 : f32 to vector<30x30xf32>
    %250 = arith.maximumf %248, %249 : vector<30x30xf32>
    %251 = vector.extract_strided_slice %250 {offsets = [0, 0], sizes = [30, 29], strides = [1, 1]} : vector<30x30xf32> to vector<30x29xf32>
    %252 = vector.extract_strided_slice %250 {offsets = [0, 1], sizes = [30, 29], strides = [1, 1]} : vector<30x30xf32> to vector<30x29xf32>
    %253 = arith.maximumf %251, %252 : vector<30x29xf32>
    %254 = vector.extract_strided_slice %253 {offsets = [0, 0], sizes = [29, 29], strides = [1, 1]} : vector<30x29xf32> to vector<29x29xf32>
    %255 = vector.extract_strided_slice %253 {offsets = [1, 0], sizes = [29, 29], strides = [1, 1]} : vector<30x29xf32> to vector<29x29xf32>
    %256 = arith.maximumf %254, %255 : vector<29x29xf32>
    %cst_26 = arith.constant dense<0.000000e+00> : vector<15x29xf32>
    %257 = tpu.matmul %6, %256, %cst_26 {dimension_numbers = #tpu.dot_dimension_numbers<[1], [0], [0], [1], [0, 0, 1, 1], [], []>} : vector<15x29xf32>, vector<29x29xf32>, vector<15x29xf32> -> vector<15x29xf32>
    %cst_27 = arith.constant dense<0.000000e+00> : vector<15x15xf32>
    %258 = tpu.matmul %257, %13, %cst_27 {dimension_numbers = #tpu.dot_dimension_numbers<[1], [0], [0], [1], [0, 0, 1, 1], [], []>} : vector<15x29xf32>, vector<29x15xf32>, vector<15x15xf32> -> vector<15x15xf32>
    %c0_28 = arith.constant 0 : index
    %c45 = arith.constant 45 : index
    %259 = vector.load %arg7[%c0_28, %c45] : memref<15x90xf32, #tpu.memory_space<vmem>>, vector<15x15xf32>
    tpu.vector_store %arg7[%c0_28, %c45], %258 {strides = array<i32>} : memref<15x90xf32, #tpu.memory_space<vmem>>, vector<15x15xf32>,
    %c36 = arith.constant 36 : index
    %260 = memref.load %arg2[%c36] : memref<54xf32, #tpu.memory_space<smem>>
    %261 = vector.broadcast %260 : f32 to vector<30x30xf32>
    %262 = arith.mulf %55, %261 : vector<30x30xf32>
    %c37 = arith.constant 37 : index
    %263 = memref.load %arg2[%c37] : memref<54xf32, #tpu.memory_space<smem>>
    %264 = vector.broadcast %263 : f32 to vector<30x30xf32>
    %265 = arith.mulf %56, %264 : vector<30x30xf32>
    %266 = arith.addf %262, %265 : vector<30x30xf32>
    %c38 = arith.constant 38 : index
    %267 = memref.load %arg2[%c38] : memref<54xf32, #tpu.memory_space<smem>>
    %268 = vector.broadcast %267 : f32 to vector<30x30xf32>
    %269 = arith.mulf %57, %268 : vector<30x30xf32>
    %270 = arith.addf %266, %269 : vector<30x30xf32>
    %c39 = arith.constant 39 : index
    %271 = memref.load %arg2[%c39] : memref<54xf32, #tpu.memory_space<smem>>
    %272 = vector.broadcast %271 : f32 to vector<30x30xf32>
    %273 = arith.mulf %58, %272 : vector<30x30xf32>
    %274 = arith.addf %270, %273 : vector<30x30xf32>
    %c40 = arith.constant 40 : index
    %275 = memref.load %arg2[%c40] : memref<54xf32, #tpu.memory_space<smem>>
    %276 = vector.broadcast %275 : f32 to vector<30x30xf32>
    %277 = arith.mulf %59, %276 : vector<30x30xf32>
    %278 = arith.addf %274, %277 : vector<30x30xf32>
    %c41 = arith.constant 41 : index
    %279 = memref.load %arg2[%c41] : memref<54xf32, #tpu.memory_space<smem>>
    %280 = vector.broadcast %279 : f32 to vector<30x30xf32>
    %281 = arith.mulf %60, %280 : vector<30x30xf32>
    %282 = arith.addf %278, %281 : vector<30x30xf32>
    %c42 = arith.constant 42 : index
    %283 = memref.load %arg2[%c42] : memref<54xf32, #tpu.memory_space<smem>>
    %284 = vector.broadcast %283 : f32 to vector<30x30xf32>
    %285 = arith.mulf %61, %284 : vector<30x30xf32>
    %286 = arith.addf %282, %285 : vector<30x30xf32>
    %c43 = arith.constant 43 : index
    %287 = memref.load %arg2[%c43] : memref<54xf32, #tpu.memory_space<smem>>
    %288 = vector.broadcast %287 : f32 to vector<30x30xf32>
    %289 = arith.mulf %62, %288 : vector<30x30xf32>
    %290 = arith.addf %286, %289 : vector<30x30xf32>
    %c44 = arith.constant 44 : index
    %291 = memref.load %arg2[%c44] : memref<54xf32, #tpu.memory_space<smem>>
    %292 = vector.broadcast %291 : f32 to vector<30x30xf32>
    %293 = arith.mulf %63, %292 : vector<30x30xf32>
    %294 = arith.addf %290, %293 : vector<30x30xf32>
    %c4_29 = arith.constant 4 : index
    %295 = memref.load %arg3[%c4_29] : memref<6xf32, #tpu.memory_space<smem>>
    %296 = vector.broadcast %295 : f32 to vector<30x30xf32>
    %297 = arith.addf %294, %296 : vector<30x30xf32>
    %cst_30 = arith.constant 0.000000e+00 : f32
    %298 = vector.broadcast %cst_30 : f32 to vector<30x30xf32>
    %299 = arith.maximumf %297, %298 : vector<30x30xf32>
    %300 = vector.extract_strided_slice %299 {offsets = [0, 0], sizes = [30, 29], strides = [1, 1]} : vector<30x30xf32> to vector<30x29xf32>
    %301 = vector.extract_strided_slice %299 {offsets = [0, 1], sizes = [30, 29], strides = [1, 1]} : vector<30x30xf32> to vector<30x29xf32>
    %302 = arith.maximumf %300, %301 : vector<30x29xf32>
    %303 = vector.extract_strided_slice %302 {offsets = [0, 0], sizes = [29, 29], strides = [1, 1]} : vector<30x29xf32> to vector<29x29xf32>
    %304 = vector.extract_strided_slice %302 {offsets = [1, 0], sizes = [29, 29], strides = [1, 1]} : vector<30x29xf32> to vector<29x29xf32>
    %305 = arith.maximumf %303, %304 : vector<29x29xf32>
    %cst_31 = arith.constant dense<0.000000e+00> : vector<15x29xf32>
    %306 = tpu.matmul %6, %305, %cst_31 {dimension_numbers = #tpu.dot_dimension_numbers<[1], [0], [0], [1], [0, 0, 1, 1], [], []>} : vector<15x29xf32>, vector<29x29xf32>, vector<15x29xf32> -> vector<15x29xf32>
    %cst_32 = arith.constant dense<0.000000e+00> : vector<15x15xf32>
    %307 = tpu.matmul %306, %13, %cst_32 {dimension_numbers = #tpu.dot_dimension_numbers<[1], [0], [0], [1], [0, 0, 1, 1], [], []>} : vector<15x29xf32>, vector<29x15xf32>, vector<15x15xf32> -> vector<15x15xf32>
    %c0_33 = arith.constant 0 : index
    %c60 = arith.constant 60 : index
    %308 = vector.load %arg7[%c0_33, %c60] : memref<15x90xf32, #tpu.memory_space<vmem>>, vector<15x15xf32>
    tpu.vector_store %arg7[%c0_33, %c60], %307 {strides = array<i32>} : memref<15x90xf32, #tpu.memory_space<vmem>>, vector<15x15xf32>,
    %c45_34 = arith.constant 45 : index
    %309 = memref.load %arg2[%c45_34] : memref<54xf32, #tpu.memory_space<smem>>
    %310 = vector.broadcast %309 : f32 to vector<30x30xf32>
    %311 = arith.mulf %55, %310 : vector<30x30xf32>
    %c46 = arith.constant 46 : index
    %312 = memref.load %arg2[%c46] : memref<54xf32, #tpu.memory_space<smem>>
    %313 = vector.broadcast %312 : f32 to vector<30x30xf32>
    %314 = arith.mulf %56, %313 : vector<30x30xf32>
    %315 = arith.addf %311, %314 : vector<30x30xf32>
    %c47 = arith.constant 47 : index
    %316 = memref.load %arg2[%c47] : memref<54xf32, #tpu.memory_space<smem>>
    %317 = vector.broadcast %316 : f32 to vector<30x30xf32>
    %318 = arith.mulf %57, %317 : vector<30x30xf32>
    %319 = arith.addf %315, %318 : vector<30x30xf32>
    %c48 = arith.constant 48 : index
    %320 = memref.load %arg2[%c48] : memref<54xf32, #tpu.memory_space<smem>>
    %321 = vector.broadcast %320 : f32 to vector<30x30xf32>
    %322 = arith.mulf %58, %321 : vector<30x30xf32>
    %323 = arith.addf %319, %322 : vector<30x30xf32>
    %c49 = arith.constant 49 : index
    %324 = memref.load %arg2[%c49] : memref<54xf32, #tpu.memory_space<smem>>
    %325 = vector.broadcast %324 : f32 to vector<30x30xf32>
    %326 = arith.mulf %59, %325 : vector<30x30xf32>
    %327 = arith.addf %323, %326 : vector<30x30xf32>
    %c50 = arith.constant 50 : index
    %328 = memref.load %arg2[%c50] : memref<54xf32, #tpu.memory_space<smem>>
    %329 = vector.broadcast %328 : f32 to vector<30x30xf32>
    %330 = arith.mulf %60, %329 : vector<30x30xf32>
    %331 = arith.addf %327, %330 : vector<30x30xf32>
    %c51 = arith.constant 51 : index
    %332 = memref.load %arg2[%c51] : memref<54xf32, #tpu.memory_space<smem>>
    %333 = vector.broadcast %332 : f32 to vector<30x30xf32>
    %334 = arith.mulf %61, %333 : vector<30x30xf32>
    %335 = arith.addf %331, %334 : vector<30x30xf32>
    %c52 = arith.constant 52 : index
    %336 = memref.load %arg2[%c52] : memref<54xf32, #tpu.memory_space<smem>>
    %337 = vector.broadcast %336 : f32 to vector<30x30xf32>
    %338 = arith.mulf %62, %337 : vector<30x30xf32>
    %339 = arith.addf %335, %338 : vector<30x30xf32>
    %c53 = arith.constant 53 : index
    %340 = memref.load %arg2[%c53] : memref<54xf32, #tpu.memory_space<smem>>
    %341 = vector.broadcast %340 : f32 to vector<30x30xf32>
    %342 = arith.mulf %63, %341 : vector<30x30xf32>
    %343 = arith.addf %339, %342 : vector<30x30xf32>
    %c5_35 = arith.constant 5 : index
    %344 = memref.load %arg3[%c5_35] : memref<6xf32, #tpu.memory_space<smem>>
    %345 = vector.broadcast %344 : f32 to vector<30x30xf32>
    %346 = arith.addf %343, %345 : vector<30x30xf32>
    %cst_36 = arith.constant 0.000000e+00 : f32
    %347 = vector.broadcast %cst_36 : f32 to vector<30x30xf32>
    %348 = arith.maximumf %346, %347 : vector<30x30xf32>
    %349 = vector.extract_strided_slice %348 {offsets = [0, 0], sizes = [30, 29], strides = [1, 1]} : vector<30x30xf32> to vector<30x29xf32>
    %350 = vector.extract_strided_slice %348 {offsets = [0, 1], sizes = [30, 29], strides = [1, 1]} : vector<30x30xf32> to vector<30x29xf32>
    %351 = arith.maximumf %349, %350 : vector<30x29xf32>
    %352 = vector.extract_strided_slice %351 {offsets = [0, 0], sizes = [29, 29], strides = [1, 1]} : vector<30x29xf32> to vector<29x29xf32>
    %353 = vector.extract_strided_slice %351 {offsets = [1, 0], sizes = [29, 29], strides = [1, 1]} : vector<30x29xf32> to vector<29x29xf32>
    %354 = arith.maximumf %352, %353 : vector<29x29xf32>
    %cst_37 = arith.constant dense<0.000000e+00> : vector<15x29xf32>
    %355 = tpu.matmul %6, %354, %cst_37 {dimension_numbers = #tpu.dot_dimension_numbers<[1], [0], [0], [1], [0, 0, 1, 1], [], []>} : vector<15x29xf32>, vector<29x29xf32>, vector<15x29xf32> -> vector<15x29xf32>
    %cst_38 = arith.constant dense<0.000000e+00> : vector<15x15xf32>
    %356 = tpu.matmul %355, %13, %cst_38 {dimension_numbers = #tpu.dot_dimension_numbers<[1], [0], [0], [1], [0, 0, 1, 1], [], []>} : vector<15x29xf32>, vector<29x15xf32>, vector<15x15xf32> -> vector<15x15xf32>
    %c0_39 = arith.constant 0 : index
    %c75 = arith.constant 75 : index
    %357 = vector.load %arg7[%c0_39, %c75] : memref<15x90xf32, #tpu.memory_space<vmem>>, vector<15x15xf32>
    tpu.vector_store %arg7[%c0_39, %c75], %356 {strides = array<i32>} : memref<15x90xf32, #tpu.memory_space<vmem>>, vector<15x15xf32>,
    %c0_40 = arith.constant 0 : index
    %c0_41 = arith.constant 0 : index
    %358 = vector.load %arg7[%c0_40, %c0_41] : memref<15x90xf32, #tpu.memory_space<vmem>>, vector<13x88xf32>
    %c0_42 = arith.constant 0 : index
    %c1_43 = arith.constant 1 : index
    %359 = vector.load %arg7[%c0_42, %c1_43] : memref<15x90xf32, #tpu.memory_space<vmem>>, vector<13x88xf32>
    %c0_44 = arith.constant 0 : index
    %c2_45 = arith.constant 2 : index
    %360 = vector.load %arg7[%c0_44, %c2_45] : memref<15x90xf32, #tpu.memory_space<vmem>>, vector<13x88xf32>
    %c1_46 = arith.constant 1 : index
    %c0_47 = arith.constant 0 : index
    %361 = vector.load %arg7[%c1_46, %c0_47] : memref<15x90xf32, #tpu.memory_space<vmem>>, vector<13x88xf32>
    %c1_48 = arith.constant 1 : index
    %c1_49 = arith.constant 1 : index
    %362 = vector.load %arg7[%c1_48, %c1_49] : memref<15x90xf32, #tpu.memory_space<vmem>>, vector<13x88xf32>
    %c1_50 = arith.constant 1 : index
    %c2_51 = arith.constant 2 : index
    %363 = vector.load %arg7[%c1_50, %c2_51] : memref<15x90xf32, #tpu.memory_space<vmem>>, vector<13x88xf32>
    %c2_52 = arith.constant 2 : index
    %c0_53 = arith.constant 0 : index
    %364 = vector.load %arg7[%c2_52, %c0_53] : memref<15x90xf32, #tpu.memory_space<vmem>>, vector<13x88xf32>
    %c2_54 = arith.constant 2 : index
    %c1_55 = arith.constant 1 : index
    %365 = vector.load %arg7[%c2_54, %c1_55] : memref<15x90xf32, #tpu.memory_space<vmem>>, vector<13x88xf32>
    %c2_56 = arith.constant 2 : index
    %c2_57 = arith.constant 2 : index
    %366 = vector.load %arg7[%c2_56, %c2_57] : memref<15x90xf32, #tpu.memory_space<vmem>>, vector<13x88xf32>
    %c0_58 = arith.constant 0 : index
    %c0_59 = arith.constant 0 : index
    %367 = vector.load %arg4[%c0_58, %c0_59] : memref<144x88xf32, #tpu.memory_space<vmem>>, vector<1x88xf32>
    %368 = vector.broadcast %367 : vector<1x88xf32> to vector<13x88xf32>
    %369 = arith.mulf %358, %368 : vector<13x88xf32>
    %c1_60 = arith.constant 1 : index
    %c0_61 = arith.constant 0 : index
    %370 = vector.load %arg4[%c1_60, %c0_61] : memref<144x88xf32, #tpu.memory_space<vmem>>, vector<1x88xf32>
    %371 = vector.broadcast %370 : vector<1x88xf32> to vector<13x88xf32>
    %372 = arith.mulf %359, %371 : vector<13x88xf32>
    %373 = arith.addf %369, %372 : vector<13x88xf32>
    %c2_62 = arith.constant 2 : index
    %c0_63 = arith.constant 0 : index
    %374 = vector.load %arg4[%c2_62, %c0_63] : memref<144x88xf32, #tpu.memory_space<vmem>>, vector<1x88xf32>
    %375 = vector.broadcast %374 : vector<1x88xf32> to vector<13x88xf32>
    %376 = arith.mulf %360, %375 : vector<13x88xf32>
    %377 = arith.addf %373, %376 : vector<13x88xf32>
    %c3_64 = arith.constant 3 : index
    %c0_65 = arith.constant 0 : index
    %378 = vector.load %arg4[%c3_64, %c0_65] : memref<144x88xf32, #tpu.memory_space<vmem>>, vector<1x88xf32>
    %379 = vector.broadcast %378 : vector<1x88xf32> to vector<13x88xf32>
    %380 = arith.mulf %361, %379 : vector<13x88xf32>
    %381 = arith.addf %377, %380 : vector<13x88xf32>
    %c4_66 = arith.constant 4 : index
    %c0_67 = arith.constant 0 : index
    %382 = vector.load %arg4[%c4_66, %c0_67] : memref<144x88xf32, #tpu.memory_space<vmem>>, vector<1x88xf32>
    %383 = vector.broadcast %382 : vector<1x88xf32> to vector<13x88xf32>
    %384 = arith.mulf %362, %383 : vector<13x88xf32>
    %385 = arith.addf %381, %384 : vector<13x88xf32>
    %c5_68 = arith.constant 5 : index
    %c0_69 = arith.constant 0 : index
    %386 = vector.load %arg4[%c5_68, %c0_69] : memref<144x88xf32, #tpu.memory_space<vmem>>, vector<1x88xf32>
    %387 = vector.broadcast %386 : vector<1x88xf32> to vector<13x88xf32>
    %388 = arith.mulf %363, %387 : vector<13x88xf32>
    %389 = arith.addf %385, %388 : vector<13x88xf32>
    %c6_70 = arith.constant 6 : index
    %c0_71 = arith.constant 0 : index
    %390 = vector.load %arg4[%c6_70, %c0_71] : memref<144x88xf32, #tpu.memory_space<vmem>>, vector<1x88xf32>
    %391 = vector.broadcast %390 : vector<1x88xf32> to vector<13x88xf32>
    %392 = arith.mulf %364, %391 : vector<13x88xf32>
    %393 = arith.addf %389, %392 : vector<13x88xf32>
    %c7_72 = arith.constant 7 : index
    %c0_73 = arith.constant 0 : index
    %394 = vector.load %arg4[%c7_72, %c0_73] : memref<144x88xf32, #tpu.memory_space<vmem>>, vector<1x88xf32>
    %395 = vector.broadcast %394 : vector<1x88xf32> to vector<13x88xf32>
    %396 = arith.mulf %365, %395 : vector<13x88xf32>
    %397 = arith.addf %393, %396 : vector<13x88xf32>
    %c8_74 = arith.constant 8 : index
    %c0_75 = arith.constant 0 : index
    %398 = vector.load %arg4[%c8_74, %c0_75] : memref<144x88xf32, #tpu.memory_space<vmem>>, vector<1x88xf32>
    %399 = vector.broadcast %398 : vector<1x88xf32> to vector<13x88xf32>
    %400 = arith.mulf %366, %399 : vector<13x88xf32>
    %401 = arith.addf %397, %400 : vector<13x88xf32>
    %cst_76 = arith.constant dense<0.000000e+00> : vector<13x13xf32>
    %402 = tpu.matmul %401, %52, %cst_76 {dimension_numbers = #tpu.dot_dimension_numbers<[1], [0], [0], [1], [0, 0, 1, 1], [], []>} : vector<13x88xf32>, vector<88x13xf32>, vector<13x13xf32> -> vector<13x13xf32>
    %c0_77 = arith.constant 0 : index
    %403 = memref.load %arg5[%c0_77] : memref<16xf32, #tpu.memory_space<smem>>
    %404 = vector.broadcast %403 : f32 to vector<13x13xf32>
    %405 = arith.addf %402, %404 : vector<13x13xf32>
    %cst_78 = arith.constant 0.000000e+00 : f32
    %406 = vector.broadcast %cst_78 : f32 to vector<13x13xf32>
    %407 = arith.maximumf %405, %406 : vector<13x13xf32>
    %408 = vector.extract_strided_slice %407 {offsets = [0, 0], sizes = [13, 12], strides = [1, 1]} : vector<13x13xf32> to vector<13x12xf32>
    %409 = vector.extract_strided_slice %407 {offsets = [0, 1], sizes = [13, 12], strides = [1, 1]} : vector<13x13xf32> to vector<13x12xf32>
    %410 = arith.maximumf %408, %409 : vector<13x12xf32>
    %411 = vector.extract_strided_slice %410 {offsets = [0, 0], sizes = [12, 12], strides = [1, 1]} : vector<13x12xf32> to vector<12x12xf32>
    %412 = vector.extract_strided_slice %410 {offsets = [1, 0], sizes = [12, 12], strides = [1, 1]} : vector<13x12xf32> to vector<12x12xf32>
    %413 = arith.maximumf %411, %412 : vector<12x12xf32>
    %cst_79 = arith.constant dense<0.000000e+00> : vector<6x12xf32>
    %414 = tpu.matmul %20, %413, %cst_79 {dimension_numbers = #tpu.dot_dimension_numbers<[1], [0], [0], [1], [0, 0, 1, 1], [], []>} : vector<6x12xf32>, vector<12x12xf32>, vector<6x12xf32> -> vector<6x12xf32>
    %cst_80 = arith.constant dense<0.000000e+00> : vector<6x6xf32>
    %415 = tpu.matmul %414, %27, %cst_80 {dimension_numbers = #tpu.dot_dimension_numbers<[1], [0], [0], [1], [0, 0, 1, 1], [], []>} : vector<6x12xf32>, vector<12x6xf32>, vector<6x6xf32> -> vector<6x6xf32>
    %c0_81 = arith.constant 0 : index
    %c0_82 = arith.constant 0 : index
    %c0_83 = arith.constant 0 : index
    %416 = vector.load %arg6[%c0_81, %c0_82, %c0_83] : memref<1x6x96xf32, #tpu.memory_space<vmem>>, vector<1x6x6xf32>
    %417 = vector.shape_cast %416 : vector<1x6x6xf32> to vector<6x6xf32>
    %418 = vector.shape_cast %415 : vector<6x6xf32> to vector<1x6x6xf32>
    tpu.vector_store %arg6[%c0_81, %c0_82, %c0_83], %418 {strides = array<i32>} : memref<1x6x96xf32, #tpu.memory_space<vmem>>, vector<1x6x6xf32>,
    %c9_84 = arith.constant 9 : index
    %c0_85 = arith.constant 0 : index
    %419 = vector.load %arg4[%c9_84, %c0_85] : memref<144x88xf32, #tpu.memory_space<vmem>>, vector<1x88xf32>
    %420 = vector.broadcast %419 : vector<1x88xf32> to vector<13x88xf32>
    %421 = arith.mulf %358, %420 : vector<13x88xf32>
    %c10_86 = arith.constant 10 : index
    %c0_87 = arith.constant 0 : index
    %422 = vector.load %arg4[%c10_86, %c0_87] : memref<144x88xf32, #tpu.memory_space<vmem>>, vector<1x88xf32>
    %423 = vector.broadcast %422 : vector<1x88xf32> to vector<13x88xf32>
    %424 = arith.mulf %359, %423 : vector<13x88xf32>
    %425 = arith.addf %421, %424 : vector<13x88xf32>
    %c11_88 = arith.constant 11 : index
    %c0_89 = arith.constant 0 : index
    %426 = vector.load %arg4[%c11_88, %c0_89] : memref<144x88xf32, #tpu.memory_space<vmem>>, vector<1x88xf32>
    %427 = vector.broadcast %426 : vector<1x88xf32> to vector<13x88xf32>
    %428 = arith.mulf %360, %427 : vector<13x88xf32>
    %429 = arith.addf %425, %428 : vector<13x88xf32>
    %c12_90 = arith.constant 12 : index
    %c0_91 = arith.constant 0 : index
    %430 = vector.load %arg4[%c12_90, %c0_91] : memref<144x88xf32, #tpu.memory_space<vmem>>, vector<1x88xf32>
    %431 = vector.broadcast %430 : vector<1x88xf32> to vector<13x88xf32>
    %432 = arith.mulf %361, %431 : vector<13x88xf32>
    %433 = arith.addf %429, %432 : vector<13x88xf32>
    %c13_92 = arith.constant 13 : index
    %c0_93 = arith.constant 0 : index
    %434 = vector.load %arg4[%c13_92, %c0_93] : memref<144x88xf32, #tpu.memory_space<vmem>>, vector<1x88xf32>
    %435 = vector.broadcast %434 : vector<1x88xf32> to vector<13x88xf32>
    %436 = arith.mulf %362, %435 : vector<13x88xf32>
    %437 = arith.addf %433, %436 : vector<13x88xf32>
    %c14_94 = arith.constant 14 : index
    %c0_95 = arith.constant 0 : index
    %438 = vector.load %arg4[%c14_94, %c0_95] : memref<144x88xf32, #tpu.memory_space<vmem>>, vector<1x88xf32>
    %439 = vector.broadcast %438 : vector<1x88xf32> to vector<13x88xf32>
    %440 = arith.mulf %363, %439 : vector<13x88xf32>
    %441 = arith.addf %437, %440 : vector<13x88xf32>
    %c15_96 = arith.constant 15 : index
    %c0_97 = arith.constant 0 : index
    %442 = vector.load %arg4[%c15_96, %c0_97] : memref<144x88xf32, #tpu.memory_space<vmem>>, vector<1x88xf32>
    %443 = vector.broadcast %442 : vector<1x88xf32> to vector<13x88xf32>
    %444 = arith.mulf %364, %443 : vector<13x88xf32>
    %445 = arith.addf %441, %444 : vector<13x88xf32>
    %c16_98 = arith.constant 16 : index
    %c0_99 = arith.constant 0 : index
    %446 = vector.load %arg4[%c16_98, %c0_99] : memref<144x88xf32, #tpu.memory_space<vmem>>, vector<1x88xf32>
    %447 = vector.broadcast %446 : vector<1x88xf32> to vector<13x88xf32>
    %448 = arith.mulf %365, %447 : vector<13x88xf32>
    %449 = arith.addf %445, %448 : vector<13x88xf32>
    %c17_100 = arith.constant 17 : index
    %c0_101 = arith.constant 0 : index
    %450 = vector.load %arg4[%c17_100, %c0_101] : memref<144x88xf32, #tpu.memory_space<vmem>>, vector<1x88xf32>
    %451 = vector.broadcast %450 : vector<1x88xf32> to vector<13x88xf32>
    %452 = arith.mulf %366, %451 : vector<13x88xf32>
    %453 = arith.addf %449, %452 : vector<13x88xf32>
    %cst_102 = arith.constant dense<0.000000e+00> : vector<13x13xf32>
    %454 = tpu.matmul %453, %52, %cst_102 {dimension_numbers = #tpu.dot_dimension_numbers<[1], [0], [0], [1], [0, 0, 1, 1], [], []>} : vector<13x88xf32>, vector<88x13xf32>, vector<13x13xf32> -> vector<13x13xf32>
    %c1_103 = arith.constant 1 : index
    %455 = memref.load %arg5[%c1_103] : memref<16xf32, #tpu.memory_space<smem>>
    %456 = vector.broadcast %455 : f32 to vector<13x13xf32>
    %457 = arith.addf %454, %456 : vector<13x13xf32>
    %cst_104 = arith.constant 0.000000e+00 : f32
    %458 = vector.broadcast %cst_104 : f32 to vector<13x13xf32>
    %459 = arith.maximumf %457, %458 : vector<13x13xf32>
    %460 = vector.extract_strided_slice %459 {offsets = [0, 0], sizes = [13, 12], strides = [1, 1]} : vector<13x13xf32> to vector<13x12xf32>
    %461 = vector.extract_strided_slice %459 {offsets = [0, 1], sizes = [13, 12], strides = [1, 1]} : vector<13x13xf32> to vector<13x12xf32>
    %462 = arith.maximumf %460, %461 : vector<13x12xf32>
    %463 = vector.extract_strided_slice %462 {offsets = [0, 0], sizes = [12, 12], strides = [1, 1]} : vector<13x12xf32> to vector<12x12xf32>
    %464 = vector.extract_strided_slice %462 {offsets = [1, 0], sizes = [12, 12], strides = [1, 1]} : vector<13x12xf32> to vector<12x12xf32>
    %465 = arith.maximumf %463, %464 : vector<12x12xf32>
    %cst_105 = arith.constant dense<0.000000e+00> : vector<6x12xf32>
    %466 = tpu.matmul %20, %465, %cst_105 {dimension_numbers = #tpu.dot_dimension_numbers<[1], [0], [0], [1], [0, 0, 1, 1], [], []>} : vector<6x12xf32>, vector<12x12xf32>, vector<6x12xf32> -> vector<6x12xf32>
    %cst_106 = arith.constant dense<0.000000e+00> : vector<6x6xf32>
    %467 = tpu.matmul %466, %27, %cst_106 {dimension_numbers = #tpu.dot_dimension_numbers<[1], [0], [0], [1], [0, 0, 1, 1], [], []>} : vector<6x12xf32>, vector<12x6xf32>, vector<6x6xf32> -> vector<6x6xf32>
    %c0_107 = arith.constant 0 : index
    %c0_108 = arith.constant 0 : index
    %c6_109 = arith.constant 6 : index
    %468 = vector.load %arg6[%c0_107, %c0_108, %c6_109] : memref<1x6x96xf32, #tpu.memory_space<vmem>>, vector<1x6x6xf32>
    %469 = vector.shape_cast %468 : vector<1x6x6xf32> to vector<6x6xf32>
    %470 = vector.shape_cast %467 : vector<6x6xf32> to vector<1x6x6xf32>
    tpu.vector_store %arg6[%c0_107, %c0_108, %c6_109], %470 {strides = array<i32>} : memref<1x6x96xf32, #tpu.memory_space<vmem>>, vector<1x6x6xf32>,
    %c18_110 = arith.constant 18 : index
    %c0_111 = arith.constant 0 : index
    %471 = vector.load %arg4[%c18_110, %c0_111] : memref<144x88xf32, #tpu.memory_space<vmem>>, vector<1x88xf32>
    %472 = vector.broadcast %471 : vector<1x88xf32> to vector<13x88xf32>
    %473 = arith.mulf %358, %472 : vector<13x88xf32>
    %c19_112 = arith.constant 19 : index
    %c0_113 = arith.constant 0 : index
    %474 = vector.load %arg4[%c19_112, %c0_113] : memref<144x88xf32, #tpu.memory_space<vmem>>, vector<1x88xf32>
    %475 = vector.broadcast %474 : vector<1x88xf32> to vector<13x88xf32>
    %476 = arith.mulf %359, %475 : vector<13x88xf32>
    %477 = arith.addf %473, %476 : vector<13x88xf32>
    %c20_114 = arith.constant 20 : index
    %c0_115 = arith.constant 0 : index
    %478 = vector.load %arg4[%c20_114, %c0_115] : memref<144x88xf32, #tpu.memory_space<vmem>>, vector<1x88xf32>
    %479 = vector.broadcast %478 : vector<1x88xf32> to vector<13x88xf32>
    %480 = arith.mulf %360, %479 : vector<13x88xf32>
    %481 = arith.addf %477, %480 : vector<13x88xf32>
    %c21_116 = arith.constant 21 : index
    %c0_117 = arith.constant 0 : index
    %482 = vector.load %arg4[%c21_116, %c0_117] : memref<144x88xf32, #tpu.memory_space<vmem>>, vector<1x88xf32>
    %483 = vector.broadcast %482 : vector<1x88xf32> to vector<13x88xf32>
    %484 = arith.mulf %361, %483 : vector<13x88xf32>
    %485 = arith.addf %481, %484 : vector<13x88xf32>
    %c22_118 = arith.constant 22 : index
    %c0_119 = arith.constant 0 : index
    %486 = vector.load %arg4[%c22_118, %c0_119] : memref<144x88xf32, #tpu.memory_space<vmem>>, vector<1x88xf32>
    %487 = vector.broadcast %486 : vector<1x88xf32> to vector<13x88xf32>
    %488 = arith.mulf %362, %487 : vector<13x88xf32>
    %489 = arith.addf %485, %488 : vector<13x88xf32>
    %c23_120 = arith.constant 23 : index
    %c0_121 = arith.constant 0 : index
    %490 = vector.load %arg4[%c23_120, %c0_121] : memref<144x88xf32, #tpu.memory_space<vmem>>, vector<1x88xf32>
    %491 = vector.broadcast %490 : vector<1x88xf32> to vector<13x88xf32>
    %492 = arith.mulf %363, %491 : vector<13x88xf32>
    %493 = arith.addf %489, %492 : vector<13x88xf32>
    %c24_122 = arith.constant 24 : index
    %c0_123 = arith.constant 0 : index
    %494 = vector.load %arg4[%c24_122, %c0_123] : memref<144x88xf32, #tpu.memory_space<vmem>>, vector<1x88xf32>
    %495 = vector.broadcast %494 : vector<1x88xf32> to vector<13x88xf32>
    %496 = arith.mulf %364, %495 : vector<13x88xf32>
    %497 = arith.addf %493, %496 : vector<13x88xf32>
    %c25_124 = arith.constant 25 : index
    %c0_125 = arith.constant 0 : index
    %498 = vector.load %arg4[%c25_124, %c0_125] : memref<144x88xf32, #tpu.memory_space<vmem>>, vector<1x88xf32>
    %499 = vector.broadcast %498 : vector<1x88xf32> to vector<13x88xf32>
    %500 = arith.mulf %365, %499 : vector<13x88xf32>
    %501 = arith.addf %497, %500 : vector<13x88xf32>
    %c26_126 = arith.constant 26 : index
    %c0_127 = arith.constant 0 : index
    %502 = vector.load %arg4[%c26_126, %c0_127] : memref<144x88xf32, #tpu.memory_space<vmem>>, vector<1x88xf32>
    %503 = vector.broadcast %502 : vector<1x88xf32> to vector<13x88xf32>
    %504 = arith.mulf %366, %503 : vector<13x88xf32>
    %505 = arith.addf %501, %504 : vector<13x88xf32>
    %cst_128 = arith.constant dense<0.000000e+00> : vector<13x13xf32>
    %506 = tpu.matmul %505, %52, %cst_128 {dimension_numbers = #tpu.dot_dimension_numbers<[1], [0], [0], [1], [0, 0, 1, 1], [], []>} : vector<13x88xf32>, vector<88x13xf32>, vector<13x13xf32> -> vector<13x13xf32>
    %c2_129 = arith.constant 2 : index
    %507 = memref.load %arg5[%c2_129] : memref<16xf32, #tpu.memory_space<smem>>
    %508 = vector.broadcast %507 : f32 to vector<13x13xf32>
    %509 = arith.addf %506, %508 : vector<13x13xf32>
    %cst_130 = arith.constant 0.000000e+00 : f32
    %510 = vector.broadcast %cst_130 : f32 to vector<13x13xf32>
    %511 = arith.maximumf %509, %510 : vector<13x13xf32>
    %512 = vector.extract_strided_slice %511 {offsets = [0, 0], sizes = [13, 12], strides = [1, 1]} : vector<13x13xf32> to vector<13x12xf32>
    %513 = vector.extract_strided_slice %511 {offsets = [0, 1], sizes = [13, 12], strides = [1, 1]} : vector<13x13xf32> to vector<13x12xf32>
    %514 = arith.maximumf %512, %513 : vector<13x12xf32>
    %515 = vector.extract_strided_slice %514 {offsets = [0, 0], sizes = [12, 12], strides = [1, 1]} : vector<13x12xf32> to vector<12x12xf32>
    %516 = vector.extract_strided_slice %514 {offsets = [1, 0], sizes = [12, 12], strides = [1, 1]} : vector<13x12xf32> to vector<12x12xf32>
    %517 = arith.maximumf %515, %516 : vector<12x12xf32>
    %cst_131 = arith.constant dense<0.000000e+00> : vector<6x12xf32>
    %518 = tpu.matmul %20, %517, %cst_131 {dimension_numbers = #tpu.dot_dimension_numbers<[1], [0], [0], [1], [0, 0, 1, 1], [], []>} : vector<6x12xf32>, vector<12x12xf32>, vector<6x12xf32> -> vector<6x12xf32>
    %cst_132 = arith.constant dense<0.000000e+00> : vector<6x6xf32>
    %519 = tpu.matmul %518, %27, %cst_132 {dimension_numbers = #tpu.dot_dimension_numbers<[1], [0], [0], [1], [0, 0, 1, 1], [], []>} : vector<6x12xf32>, vector<12x6xf32>, vector<6x6xf32> -> vector<6x6xf32>
    %c0_133 = arith.constant 0 : index
    %c0_134 = arith.constant 0 : index
    %c12_135 = arith.constant 12 : index
    %520 = vector.load %arg6[%c0_133, %c0_134, %c12_135] : memref<1x6x96xf32, #tpu.memory_space<vmem>>, vector<1x6x6xf32>
    %521 = vector.shape_cast %520 : vector<1x6x6xf32> to vector<6x6xf32>
    %522 = vector.shape_cast %519 : vector<6x6xf32> to vector<1x6x6xf32>
    tpu.vector_store %arg6[%c0_133, %c0_134, %c12_135], %522 {strides = array<i32>} : memref<1x6x96xf32, #tpu.memory_space<vmem>>, vector<1x6x6xf32>,
    %c27_136 = arith.constant 27 : index
    %c0_137 = arith.constant 0 : index
    %523 = vector.load %arg4[%c27_136, %c0_137] : memref<144x88xf32, #tpu.memory_space<vmem>>, vector<1x88xf32>
    %524 = vector.broadcast %523 : vector<1x88xf32> to vector<13x88xf32>
    %525 = arith.mulf %358, %524 : vector<13x88xf32>
    %c28_138 = arith.constant 28 : index
    %c0_139 = arith.constant 0 : index
    %526 = vector.load %arg4[%c28_138, %c0_139] : memref<144x88xf32, #tpu.memory_space<vmem>>, vector<1x88xf32>
    %527 = vector.broadcast %526 : vector<1x88xf32> to vector<13x88xf32>
    %528 = arith.mulf %359, %527 : vector<13x88xf32>
    %529 = arith.addf %525, %528 : vector<13x88xf32>
    %c29_140 = arith.constant 29 : index
    %c0_141 = arith.constant 0 : index
    %530 = vector.load %arg4[%c29_140, %c0_141] : memref<144x88xf32, #tpu.memory_space<vmem>>, vector<1x88xf32>
    %531 = vector.broadcast %530 : vector<1x88xf32> to vector<13x88xf32>
    %532 = arith.mulf %360, %531 : vector<13x88xf32>
    %533 = arith.addf %529, %532 : vector<13x88xf32>
    %c30_142 = arith.constant 30 : index
    %c0_143 = arith.constant 0 : index
    %534 = vector.load %arg4[%c30_142, %c0_143] : memref<144x88xf32, #tpu.memory_space<vmem>>, vector<1x88xf32>
    %535 = vector.broadcast %534 : vector<1x88xf32> to vector<13x88xf32>
    %536 = arith.mulf %361, %535 : vector<13x88xf32>
    %537 = arith.addf %533, %536 : vector<13x88xf32>
    %c31_144 = arith.constant 31 : index
    %c0_145 = arith.constant 0 : index
    %538 = vector.load %arg4[%c31_144, %c0_145] : memref<144x88xf32, #tpu.memory_space<vmem>>, vector<1x88xf32>
    %539 = vector.broadcast %538 : vector<1x88xf32> to vector<13x88xf32>
    %540 = arith.mulf %362, %539 : vector<13x88xf32>
    %541 = arith.addf %537, %540 : vector<13x88xf32>
    %c32_146 = arith.constant 32 : index
    %c0_147 = arith.constant 0 : index
    %542 = vector.load %arg4[%c32_146, %c0_147] : memref<144x88xf32, #tpu.memory_space<vmem>>, vector<1x88xf32>
    %543 = vector.broadcast %542 : vector<1x88xf32> to vector<13x88xf32>
    %544 = arith.mulf %363, %543 : vector<13x88xf32>
    %545 = arith.addf %541, %544 : vector<13x88xf32>
    %c33_148 = arith.constant 33 : index
    %c0_149 = arith.constant 0 : index
    %546 = vector.load %arg4[%c33_148, %c0_149] : memref<144x88xf32, #tpu.memory_space<vmem>>, vector<1x88xf32>
    %547 = vector.broadcast %546 : vector<1x88xf32> to vector<13x88xf32>
    %548 = arith.mulf %364, %547 : vector<13x88xf32>
    %549 = arith.addf %545, %548 : vector<13x88xf32>
    %c34_150 = arith.constant 34 : index
    %c0_151 = arith.constant 0 : index
    %550 = vector.load %arg4[%c34_150, %c0_151] : memref<144x88xf32, #tpu.memory_space<vmem>>, vector<1x88xf32>
    %551 = vector.broadcast %550 : vector<1x88xf32> to vector<13x88xf32>
    %552 = arith.mulf %365, %551 : vector<13x88xf32>
    %553 = arith.addf %549, %552 : vector<13x88xf32>
    %c35_152 = arith.constant 35 : index
    %c0_153 = arith.constant 0 : index
    %554 = vector.load %arg4[%c35_152, %c0_153] : memref<144x88xf32, #tpu.memory_space<vmem>>, vector<1x88xf32>
    %555 = vector.broadcast %554 : vector<1x88xf32> to vector<13x88xf32>
    %556 = arith.mulf %366, %555 : vector<13x88xf32>
    %557 = arith.addf %553, %556 : vector<13x88xf32>
    %cst_154 = arith.constant dense<0.000000e+00> : vector<13x13xf32>
    %558 = tpu.matmul %557, %52, %cst_154 {dimension_numbers = #tpu.dot_dimension_numbers<[1], [0], [0], [1], [0, 0, 1, 1], [], []>} : vector<13x88xf32>, vector<88x13xf32>, vector<13x13xf32> -> vector<13x13xf32>
    %c3_155 = arith.constant 3 : index
    %559 = memref.load %arg5[%c3_155] : memref<16xf32, #tpu.memory_space<smem>>
    %560 = vector.broadcast %559 : f32 to vector<13x13xf32>
    %561 = arith.addf %558, %560 : vector<13x13xf32>
    %cst_156 = arith.constant 0.000000e+00 : f32
    %562 = vector.broadcast %cst_156 : f32 to vector<13x13xf32>
    %563 = arith.maximumf %561, %562 : vector<13x13xf32>
    %564 = vector.extract_strided_slice %563 {offsets = [0, 0], sizes = [13, 12], strides = [1, 1]} : vector<13x13xf32> to vector<13x12xf32>
    %565 = vector.extract_strided_slice %563 {offsets = [0, 1], sizes = [13, 12], strides = [1, 1]} : vector<13x13xf32> to vector<13x12xf32>
    %566 = arith.maximumf %564, %565 : vector<13x12xf32>
    %567 = vector.extract_strided_slice %566 {offsets = [0, 0], sizes = [12, 12], strides = [1, 1]} : vector<13x12xf32> to vector<12x12xf32>
    %568 = vector.extract_strided_slice %566 {offsets = [1, 0], sizes = [12, 12], strides = [1, 1]} : vector<13x12xf32> to vector<12x12xf32>
    %569 = arith.maximumf %567, %568 : vector<12x12xf32>
    %cst_157 = arith.constant dense<0.000000e+00> : vector<6x12xf32>
    %570 = tpu.matmul %20, %569, %cst_157 {dimension_numbers = #tpu.dot_dimension_numbers<[1], [0], [0], [1], [0, 0, 1, 1], [], []>} : vector<6x12xf32>, vector<12x12xf32>, vector<6x12xf32> -> vector<6x12xf32>
    %cst_158 = arith.constant dense<0.000000e+00> : vector<6x6xf32>
    %571 = tpu.matmul %570, %27, %cst_158 {dimension_numbers = #tpu.dot_dimension_numbers<[1], [0], [0], [1], [0, 0, 1, 1], [], []>} : vector<6x12xf32>, vector<12x6xf32>, vector<6x6xf32> -> vector<6x6xf32>
    %c0_159 = arith.constant 0 : index
    %c0_160 = arith.constant 0 : index
    %c18_161 = arith.constant 18 : index
    %572 = vector.load %arg6[%c0_159, %c0_160, %c18_161] : memref<1x6x96xf32, #tpu.memory_space<vmem>>, vector<1x6x6xf32>
    %573 = vector.shape_cast %572 : vector<1x6x6xf32> to vector<6x6xf32>
    %574 = vector.shape_cast %571 : vector<6x6xf32> to vector<1x6x6xf32>
    tpu.vector_store %arg6[%c0_159, %c0_160, %c18_161], %574 {strides = array<i32>} : memref<1x6x96xf32, #tpu.memory_space<vmem>>, vector<1x6x6xf32>,
    %c36_162 = arith.constant 36 : index
    %c0_163 = arith.constant 0 : index
    %575 = vector.load %arg4[%c36_162, %c0_163] : memref<144x88xf32, #tpu.memory_space<vmem>>, vector<1x88xf32>
    %576 = vector.broadcast %575 : vector<1x88xf32> to vector<13x88xf32>
    %577 = arith.mulf %358, %576 : vector<13x88xf32>
    %c37_164 = arith.constant 37 : index
    %c0_165 = arith.constant 0 : index
    %578 = vector.load %arg4[%c37_164, %c0_165] : memref<144x88xf32, #tpu.memory_space<vmem>>, vector<1x88xf32>
    %579 = vector.broadcast %578 : vector<1x88xf32> to vector<13x88xf32>
    %580 = arith.mulf %359, %579 : vector<13x88xf32>
    %581 = arith.addf %577, %580 : vector<13x88xf32>
    %c38_166 = arith.constant 38 : index
    %c0_167 = arith.constant 0 : index
    %582 = vector.load %arg4[%c38_166, %c0_167] : memref<144x88xf32, #tpu.memory_space<vmem>>, vector<1x88xf32>
    %583 = vector.broadcast %582 : vector<1x88xf32> to vector<13x88xf32>
    %584 = arith.mulf %360, %583 : vector<13x88xf32>
    %585 = arith.addf %581, %584 : vector<13x88xf32>
    %c39_168 = arith.constant 39 : index
    %c0_169 = arith.constant 0 : index
    %586 = vector.load %arg4[%c39_168, %c0_169] : memref<144x88xf32, #tpu.memory_space<vmem>>, vector<1x88xf32>
    %587 = vector.broadcast %586 : vector<1x88xf32> to vector<13x88xf32>
    %588 = arith.mulf %361, %587 : vector<13x88xf32>
    %589 = arith.addf %585, %588 : vector<13x88xf32>
    %c40_170 = arith.constant 40 : index
    %c0_171 = arith.constant 0 : index
    %590 = vector.load %arg4[%c40_170, %c0_171] : memref<144x88xf32, #tpu.memory_space<vmem>>, vector<1x88xf32>
    %591 = vector.broadcast %590 : vector<1x88xf32> to vector<13x88xf32>
    %592 = arith.mulf %362, %591 : vector<13x88xf32>
    %593 = arith.addf %589, %592 : vector<13x88xf32>
    %c41_172 = arith.constant 41 : index
    %c0_173 = arith.constant 0 : index
    %594 = vector.load %arg4[%c41_172, %c0_173] : memref<144x88xf32, #tpu.memory_space<vmem>>, vector<1x88xf32>
    %595 = vector.broadcast %594 : vector<1x88xf32> to vector<13x88xf32>
    %596 = arith.mulf %363, %595 : vector<13x88xf32>
    %597 = arith.addf %593, %596 : vector<13x88xf32>
    %c42_174 = arith.constant 42 : index
    %c0_175 = arith.constant 0 : index
    %598 = vector.load %arg4[%c42_174, %c0_175] : memref<144x88xf32, #tpu.memory_space<vmem>>, vector<1x88xf32>
    %599 = vector.broadcast %598 : vector<1x88xf32> to vector<13x88xf32>
    %600 = arith.mulf %364, %599 : vector<13x88xf32>
    %601 = arith.addf %597, %600 : vector<13x88xf32>
    %c43_176 = arith.constant 43 : index
    %c0_177 = arith.constant 0 : index
    %602 = vector.load %arg4[%c43_176, %c0_177] : memref<144x88xf32, #tpu.memory_space<vmem>>, vector<1x88xf32>
    %603 = vector.broadcast %602 : vector<1x88xf32> to vector<13x88xf32>
    %604 = arith.mulf %365, %603 : vector<13x88xf32>
    %605 = arith.addf %601, %604 : vector<13x88xf32>
    %c44_178 = arith.constant 44 : index
    %c0_179 = arith.constant 0 : index
    %606 = vector.load %arg4[%c44_178, %c0_179] : memref<144x88xf32, #tpu.memory_space<vmem>>, vector<1x88xf32>
    %607 = vector.broadcast %606 : vector<1x88xf32> to vector<13x88xf32>
    %608 = arith.mulf %366, %607 : vector<13x88xf32>
    %609 = arith.addf %605, %608 : vector<13x88xf32>
    %cst_180 = arith.constant dense<0.000000e+00> : vector<13x13xf32>
    %610 = tpu.matmul %609, %52, %cst_180 {dimension_numbers = #tpu.dot_dimension_numbers<[1], [0], [0], [1], [0, 0, 1, 1], [], []>} : vector<13x88xf32>, vector<88x13xf32>, vector<13x13xf32> -> vector<13x13xf32>
    %c4_181 = arith.constant 4 : index
    %611 = memref.load %arg5[%c4_181] : memref<16xf32, #tpu.memory_space<smem>>
    %612 = vector.broadcast %611 : f32 to vector<13x13xf32>
    %613 = arith.addf %610, %612 : vector<13x13xf32>
    %cst_182 = arith.constant 0.000000e+00 : f32
    %614 = vector.broadcast %cst_182 : f32 to vector<13x13xf32>
    %615 = arith.maximumf %613, %614 : vector<13x13xf32>
    %616 = vector.extract_strided_slice %615 {offsets = [0, 0], sizes = [13, 12], strides = [1, 1]} : vector<13x13xf32> to vector<13x12xf32>
    %617 = vector.extract_strided_slice %615 {offsets = [0, 1], sizes = [13, 12], strides = [1, 1]} : vector<13x13xf32> to vector<13x12xf32>
    %618 = arith.maximumf %616, %617 : vector<13x12xf32>
    %619 = vector.extract_strided_slice %618 {offsets = [0, 0], sizes = [12, 12], strides = [1, 1]} : vector<13x12xf32> to vector<12x12xf32>
    %620 = vector.extract_strided_slice %618 {offsets = [1, 0], sizes = [12, 12], strides = [1, 1]} : vector<13x12xf32> to vector<12x12xf32>
    %621 = arith.maximumf %619, %620 : vector<12x12xf32>
    %cst_183 = arith.constant dense<0.000000e+00> : vector<6x12xf32>
    %622 = tpu.matmul %20, %621, %cst_183 {dimension_numbers = #tpu.dot_dimension_numbers<[1], [0], [0], [1], [0, 0, 1, 1], [], []>} : vector<6x12xf32>, vector<12x12xf32>, vector<6x12xf32> -> vector<6x12xf32>
    %cst_184 = arith.constant dense<0.000000e+00> : vector<6x6xf32>
    %623 = tpu.matmul %622, %27, %cst_184 {dimension_numbers = #tpu.dot_dimension_numbers<[1], [0], [0], [1], [0, 0, 1, 1], [], []>} : vector<6x12xf32>, vector<12x6xf32>, vector<6x6xf32> -> vector<6x6xf32>
    %c0_185 = arith.constant 0 : index
    %c0_186 = arith.constant 0 : index
    %c24_187 = arith.constant 24 : index
    %624 = vector.load %arg6[%c0_185, %c0_186, %c24_187] : memref<1x6x96xf32, #tpu.memory_space<vmem>>, vector<1x6x6xf32>
    %625 = vector.shape_cast %624 : vector<1x6x6xf32> to vector<6x6xf32>
    %626 = vector.shape_cast %623 : vector<6x6xf32> to vector<1x6x6xf32>
    tpu.vector_store %arg6[%c0_185, %c0_186, %c24_187], %626 {strides = array<i32>} : memref<1x6x96xf32, #tpu.memory_space<vmem>>, vector<1x6x6xf32>,
    %c45_188 = arith.constant 45 : index
    %c0_189 = arith.constant 0 : index
    %627 = vector.load %arg4[%c45_188, %c0_189] : memref<144x88xf32, #tpu.memory_space<vmem>>, vector<1x88xf32>
    %628 = vector.broadcast %627 : vector<1x88xf32> to vector<13x88xf32>
    %629 = arith.mulf %358, %628 : vector<13x88xf32>
    %c46_190 = arith.constant 46 : index
    %c0_191 = arith.constant 0 : index
    %630 = vector.load %arg4[%c46_190, %c0_191] : memref<144x88xf32, #tpu.memory_space<vmem>>, vector<1x88xf32>
    %631 = vector.broadcast %630 : vector<1x88xf32> to vector<13x88xf32>
    %632 = arith.mulf %359, %631 : vector<13x88xf32>
    %633 = arith.addf %629, %632 : vector<13x88xf32>
    %c47_192 = arith.constant 47 : index
    %c0_193 = arith.constant 0 : index
    %634 = vector.load %arg4[%c47_192, %c0_193] : memref<144x88xf32, #tpu.memory_space<vmem>>, vector<1x88xf32>
    %635 = vector.broadcast %634 : vector<1x88xf32> to vector<13x88xf32>
    %636 = arith.mulf %360, %635 : vector<13x88xf32>
    %637 = arith.addf %633, %636 : vector<13x88xf32>
    %c48_194 = arith.constant 48 : index
    %c0_195 = arith.constant 0 : index
    %638 = vector.load %arg4[%c48_194, %c0_195] : memref<144x88xf32, #tpu.memory_space<vmem>>, vector<1x88xf32>
    %639 = vector.broadcast %638 : vector<1x88xf32> to vector<13x88xf32>
    %640 = arith.mulf %361, %639 : vector<13x88xf32>
    %641 = arith.addf %637, %640 : vector<13x88xf32>
    %c49_196 = arith.constant 49 : index
    %c0_197 = arith.constant 0 : index
    %642 = vector.load %arg4[%c49_196, %c0_197] : memref<144x88xf32, #tpu.memory_space<vmem>>, vector<1x88xf32>
    %643 = vector.broadcast %642 : vector<1x88xf32> to vector<13x88xf32>
    %644 = arith.mulf %362, %643 : vector<13x88xf32>
    %645 = arith.addf %641, %644 : vector<13x88xf32>
    %c50_198 = arith.constant 50 : index
    %c0_199 = arith.constant 0 : index
    %646 = vector.load %arg4[%c50_198, %c0_199] : memref<144x88xf32, #tpu.memory_space<vmem>>, vector<1x88xf32>
    %647 = vector.broadcast %646 : vector<1x88xf32> to vector<13x88xf32>
    %648 = arith.mulf %363, %647 : vector<13x88xf32>
    %649 = arith.addf %645, %648 : vector<13x88xf32>
    %c51_200 = arith.constant 51 : index
    %c0_201 = arith.constant 0 : index
    %650 = vector.load %arg4[%c51_200, %c0_201] : memref<144x88xf32, #tpu.memory_space<vmem>>, vector<1x88xf32>
    %651 = vector.broadcast %650 : vector<1x88xf32> to vector<13x88xf32>
    %652 = arith.mulf %364, %651 : vector<13x88xf32>
    %653 = arith.addf %649, %652 : vector<13x88xf32>
    %c52_202 = arith.constant 52 : index
    %c0_203 = arith.constant 0 : index
    %654 = vector.load %arg4[%c52_202, %c0_203] : memref<144x88xf32, #tpu.memory_space<vmem>>, vector<1x88xf32>
    %655 = vector.broadcast %654 : vector<1x88xf32> to vector<13x88xf32>
    %656 = arith.mulf %365, %655 : vector<13x88xf32>
    %657 = arith.addf %653, %656 : vector<13x88xf32>
    %c53_204 = arith.constant 53 : index
    %c0_205 = arith.constant 0 : index
    %658 = vector.load %arg4[%c53_204, %c0_205] : memref<144x88xf32, #tpu.memory_space<vmem>>, vector<1x88xf32>
    %659 = vector.broadcast %658 : vector<1x88xf32> to vector<13x88xf32>
    %660 = arith.mulf %366, %659 : vector<13x88xf32>
    %661 = arith.addf %657, %660 : vector<13x88xf32>
    %cst_206 = arith.constant dense<0.000000e+00> : vector<13x13xf32>
    %662 = tpu.matmul %661, %52, %cst_206 {dimension_numbers = #tpu.dot_dimension_numbers<[1], [0], [0], [1], [0, 0, 1, 1], [], []>} : vector<13x88xf32>, vector<88x13xf32>, vector<13x13xf32> -> vector<13x13xf32>
    %c5_207 = arith.constant 5 : index
    %663 = memref.load %arg5[%c5_207] : memref<16xf32, #tpu.memory_space<smem>>
    %664 = vector.broadcast %663 : f32 to vector<13x13xf32>
    %665 = arith.addf %662, %664 : vector<13x13xf32>
    %cst_208 = arith.constant 0.000000e+00 : f32
    %666 = vector.broadcast %cst_208 : f32 to vector<13x13xf32>
    %667 = arith.maximumf %665, %666 : vector<13x13xf32>
    %668 = vector.extract_strided_slice %667 {offsets = [0, 0], sizes = [13, 12], strides = [1, 1]} : vector<13x13xf32> to vector<13x12xf32>
    %669 = vector.extract_strided_slice %667 {offsets = [0, 1], sizes = [13, 12], strides = [1, 1]} : vector<13x13xf32> to vector<13x12xf32>
    %670 = arith.maximumf %668, %669 : vector<13x12xf32>
    %671 = vector.extract_strided_slice %670 {offsets = [0, 0], sizes = [12, 12], strides = [1, 1]} : vector<13x12xf32> to vector<12x12xf32>
    %672 = vector.extract_strided_slice %670 {offsets = [1, 0], sizes = [12, 12], strides = [1, 1]} : vector<13x12xf32> to vector<12x12xf32>
    %673 = arith.maximumf %671, %672 : vector<12x12xf32>
    %cst_209 = arith.constant dense<0.000000e+00> : vector<6x12xf32>
    %674 = tpu.matmul %20, %673, %cst_209 {dimension_numbers = #tpu.dot_dimension_numbers<[1], [0], [0], [1], [0, 0, 1, 1], [], []>} : vector<6x12xf32>, vector<12x12xf32>, vector<6x12xf32> -> vector<6x12xf32>
    %cst_210 = arith.constant dense<0.000000e+00> : vector<6x6xf32>
    %675 = tpu.matmul %674, %27, %cst_210 {dimension_numbers = #tpu.dot_dimension_numbers<[1], [0], [0], [1], [0, 0, 1, 1], [], []>} : vector<6x12xf32>, vector<12x6xf32>, vector<6x6xf32> -> vector<6x6xf32>
    %c0_211 = arith.constant 0 : index
    %c0_212 = arith.constant 0 : index
    %c30_213 = arith.constant 30 : index
    %676 = vector.load %arg6[%c0_211, %c0_212, %c30_213] : memref<1x6x96xf32, #tpu.memory_space<vmem>>, vector<1x6x6xf32>
    %677 = vector.shape_cast %676 : vector<1x6x6xf32> to vector<6x6xf32>
    %678 = vector.shape_cast %675 : vector<6x6xf32> to vector<1x6x6xf32>
    tpu.vector_store %arg6[%c0_211, %c0_212, %c30_213], %678 {strides = array<i32>} : memref<1x6x96xf32, #tpu.memory_space<vmem>>, vector<1x6x6xf32>,
    %c54 = arith.constant 54 : index
    %c0_214 = arith.constant 0 : index
    %679 = vector.load %arg4[%c54, %c0_214] : memref<144x88xf32, #tpu.memory_space<vmem>>, vector<1x88xf32>
    %680 = vector.broadcast %679 : vector<1x88xf32> to vector<13x88xf32>
    %681 = arith.mulf %358, %680 : vector<13x88xf32>
    %c55 = arith.constant 55 : index
    %c0_215 = arith.constant 0 : index
    %682 = vector.load %arg4[%c55, %c0_215] : memref<144x88xf32, #tpu.memory_space<vmem>>, vector<1x88xf32>
    %683 = vector.broadcast %682 : vector<1x88xf32> to vector<13x88xf32>
    %684 = arith.mulf %359, %683 : vector<13x88xf32>
    %685 = arith.addf %681, %684 : vector<13x88xf32>
    %c56 = arith.constant 56 : index
    %c0_216 = arith.constant 0 : index
    %686 = vector.load %arg4[%c56, %c0_216] : memref<144x88xf32, #tpu.memory_space<vmem>>, vector<1x88xf32>
    %687 = vector.broadcast %686 : vector<1x88xf32> to vector<13x88xf32>
    %688 = arith.mulf %360, %687 : vector<13x88xf32>
    %689 = arith.addf %685, %688 : vector<13x88xf32>
    %c57 = arith.constant 57 : index
    %c0_217 = arith.constant 0 : index
    %690 = vector.load %arg4[%c57, %c0_217] : memref<144x88xf32, #tpu.memory_space<vmem>>, vector<1x88xf32>
    %691 = vector.broadcast %690 : vector<1x88xf32> to vector<13x88xf32>
    %692 = arith.mulf %361, %691 : vector<13x88xf32>
    %693 = arith.addf %689, %692 : vector<13x88xf32>
    %c58 = arith.constant 58 : index
    %c0_218 = arith.constant 0 : index
    %694 = vector.load %arg4[%c58, %c0_218] : memref<144x88xf32, #tpu.memory_space<vmem>>, vector<1x88xf32>
    %695 = vector.broadcast %694 : vector<1x88xf32> to vector<13x88xf32>
    %696 = arith.mulf %362, %695 : vector<13x88xf32>
    %697 = arith.addf %693, %696 : vector<13x88xf32>
    %c59 = arith.constant 59 : index
    %c0_219 = arith.constant 0 : index
    %698 = vector.load %arg4[%c59, %c0_219] : memref<144x88xf32, #tpu.memory_space<vmem>>, vector<1x88xf32>
    %699 = vector.broadcast %698 : vector<1x88xf32> to vector<13x88xf32>
    %700 = arith.mulf %363, %699 : vector<13x88xf32>
    %701 = arith.addf %697, %700 : vector<13x88xf32>
    %c60_220 = arith.constant 60 : index
    %c0_221 = arith.constant 0 : index
    %702 = vector.load %arg4[%c60_220, %c0_221] : memref<144x88xf32, #tpu.memory_space<vmem>>, vector<1x88xf32>
    %703 = vector.broadcast %702 : vector<1x88xf32> to vector<13x88xf32>
    %704 = arith.mulf %364, %703 : vector<13x88xf32>
    %705 = arith.addf %701, %704 : vector<13x88xf32>
    %c61 = arith.constant 61 : index
    %c0_222 = arith.constant 0 : index
    %706 = vector.load %arg4[%c61, %c0_222] : memref<144x88xf32, #tpu.memory_space<vmem>>, vector<1x88xf32>
    %707 = vector.broadcast %706 : vector<1x88xf32> to vector<13x88xf32>
    %708 = arith.mulf %365, %707 : vector<13x88xf32>
    %709 = arith.addf %705, %708 : vector<13x88xf32>
    %c62 = arith.constant 62 : index
    %c0_223 = arith.constant 0 : index
    %710 = vector.load %arg4[%c62, %c0_223] : memref<144x88xf32, #tpu.memory_space<vmem>>, vector<1x88xf32>
    %711 = vector.broadcast %710 : vector<1x88xf32> to vector<13x88xf32>
    %712 = arith.mulf %366, %711 : vector<13x88xf32>
    %713 = arith.addf %709, %712 : vector<13x88xf32>
    %cst_224 = arith.constant dense<0.000000e+00> : vector<13x13xf32>
    %714 = tpu.matmul %713, %52, %cst_224 {dimension_numbers = #tpu.dot_dimension_numbers<[1], [0], [0], [1], [0, 0, 1, 1], [], []>} : vector<13x88xf32>, vector<88x13xf32>, vector<13x13xf32> -> vector<13x13xf32>
    %c6_225 = arith.constant 6 : index
    %715 = memref.load %arg5[%c6_225] : memref<16xf32, #tpu.memory_space<smem>>
    %716 = vector.broadcast %715 : f32 to vector<13x13xf32>
    %717 = arith.addf %714, %716 : vector<13x13xf32>
    %cst_226 = arith.constant 0.000000e+00 : f32
    %718 = vector.broadcast %cst_226 : f32 to vector<13x13xf32>
    %719 = arith.maximumf %717, %718 : vector<13x13xf32>
    %720 = vector.extract_strided_slice %719 {offsets = [0, 0], sizes = [13, 12], strides = [1, 1]} : vector<13x13xf32> to vector<13x12xf32>
    %721 = vector.extract_strided_slice %719 {offsets = [0, 1], sizes = [13, 12], strides = [1, 1]} : vector<13x13xf32> to vector<13x12xf32>
    %722 = arith.maximumf %720, %721 : vector<13x12xf32>
    %723 = vector.extract_strided_slice %722 {offsets = [0, 0], sizes = [12, 12], strides = [1, 1]} : vector<13x12xf32> to vector<12x12xf32>
    %724 = vector.extract_strided_slice %722 {offsets = [1, 0], sizes = [12, 12], strides = [1, 1]} : vector<13x12xf32> to vector<12x12xf32>
    %725 = arith.maximumf %723, %724 : vector<12x12xf32>
    %cst_227 = arith.constant dense<0.000000e+00> : vector<6x12xf32>
    %726 = tpu.matmul %20, %725, %cst_227 {dimension_numbers = #tpu.dot_dimension_numbers<[1], [0], [0], [1], [0, 0, 1, 1], [], []>} : vector<6x12xf32>, vector<12x12xf32>, vector<6x12xf32> -> vector<6x12xf32>
    %cst_228 = arith.constant dense<0.000000e+00> : vector<6x6xf32>
    %727 = tpu.matmul %726, %27, %cst_228 {dimension_numbers = #tpu.dot_dimension_numbers<[1], [0], [0], [1], [0, 0, 1, 1], [], []>} : vector<6x12xf32>, vector<12x6xf32>, vector<6x6xf32> -> vector<6x6xf32>
    %c0_229 = arith.constant 0 : index
    %c0_230 = arith.constant 0 : index
    %c36_231 = arith.constant 36 : index
    %728 = vector.load %arg6[%c0_229, %c0_230, %c36_231] : memref<1x6x96xf32, #tpu.memory_space<vmem>>, vector<1x6x6xf32>
    %729 = vector.shape_cast %728 : vector<1x6x6xf32> to vector<6x6xf32>
    %730 = vector.shape_cast %727 : vector<6x6xf32> to vector<1x6x6xf32>
    tpu.vector_store %arg6[%c0_229, %c0_230, %c36_231], %730 {strides = array<i32>} : memref<1x6x96xf32, #tpu.memory_space<vmem>>, vector<1x6x6xf32>,
    %c63 = arith.constant 63 : index
    %c0_232 = arith.constant 0 : index
    %731 = vector.load %arg4[%c63, %c0_232] : memref<144x88xf32, #tpu.memory_space<vmem>>, vector<1x88xf32>
    %732 = vector.broadcast %731 : vector<1x88xf32> to vector<13x88xf32>
    %733 = arith.mulf %358, %732 : vector<13x88xf32>
    %c64 = arith.constant 64 : index
    %c0_233 = arith.constant 0 : index
    %734 = vector.load %arg4[%c64, %c0_233] : memref<144x88xf32, #tpu.memory_space<vmem>>, vector<1x88xf32>
    %735 = vector.broadcast %734 : vector<1x88xf32> to vector<13x88xf32>
    %736 = arith.mulf %359, %735 : vector<13x88xf32>
    %737 = arith.addf %733, %736 : vector<13x88xf32>
    %c65 = arith.constant 65 : index
    %c0_234 = arith.constant 0 : index
    %738 = vector.load %arg4[%c65, %c0_234] : memref<144x88xf32, #tpu.memory_space<vmem>>, vector<1x88xf32>
    %739 = vector.broadcast %738 : vector<1x88xf32> to vector<13x88xf32>
    %740 = arith.mulf %360, %739 : vector<13x88xf32>
    %741 = arith.addf %737, %740 : vector<13x88xf32>
    %c66 = arith.constant 66 : index
    %c0_235 = arith.constant 0 : index
    %742 = vector.load %arg4[%c66, %c0_235] : memref<144x88xf32, #tpu.memory_space<vmem>>, vector<1x88xf32>
    %743 = vector.broadcast %742 : vector<1x88xf32> to vector<13x88xf32>
    %744 = arith.mulf %361, %743 : vector<13x88xf32>
    %745 = arith.addf %741, %744 : vector<13x88xf32>
    %c67 = arith.constant 67 : index
    %c0_236 = arith.constant 0 : index
    %746 = vector.load %arg4[%c67, %c0_236] : memref<144x88xf32, #tpu.memory_space<vmem>>, vector<1x88xf32>
    %747 = vector.broadcast %746 : vector<1x88xf32> to vector<13x88xf32>
    %748 = arith.mulf %362, %747 : vector<13x88xf32>
    %749 = arith.addf %745, %748 : vector<13x88xf32>
    %c68 = arith.constant 68 : index
    %c0_237 = arith.constant 0 : index
    %750 = vector.load %arg4[%c68, %c0_237] : memref<144x88xf32, #tpu.memory_space<vmem>>, vector<1x88xf32>
    %751 = vector.broadcast %750 : vector<1x88xf32> to vector<13x88xf32>
    %752 = arith.mulf %363, %751 : vector<13x88xf32>
    %753 = arith.addf %749, %752 : vector<13x88xf32>
    %c69 = arith.constant 69 : index
    %c0_238 = arith.constant 0 : index
    %754 = vector.load %arg4[%c69, %c0_238] : memref<144x88xf32, #tpu.memory_space<vmem>>, vector<1x88xf32>
    %755 = vector.broadcast %754 : vector<1x88xf32> to vector<13x88xf32>
    %756 = arith.mulf %364, %755 : vector<13x88xf32>
    %757 = arith.addf %753, %756 : vector<13x88xf32>
    %c70 = arith.constant 70 : index
    %c0_239 = arith.constant 0 : index
    %758 = vector.load %arg4[%c70, %c0_239] : memref<144x88xf32, #tpu.memory_space<vmem>>, vector<1x88xf32>
    %759 = vector.broadcast %758 : vector<1x88xf32> to vector<13x88xf32>
    %760 = arith.mulf %365, %759 : vector<13x88xf32>
    %761 = arith.addf %757, %760 : vector<13x88xf32>
    %c71 = arith.constant 71 : index
    %c0_240 = arith.constant 0 : index
    %762 = vector.load %arg4[%c71, %c0_240] : memref<144x88xf32, #tpu.memory_space<vmem>>, vector<1x88xf32>
    %763 = vector.broadcast %762 : vector<1x88xf32> to vector<13x88xf32>
    %764 = arith.mulf %366, %763 : vector<13x88xf32>
    %765 = arith.addf %761, %764 : vector<13x88xf32>
    %cst_241 = arith.constant dense<0.000000e+00> : vector<13x13xf32>
    %766 = tpu.matmul %765, %52, %cst_241 {dimension_numbers = #tpu.dot_dimension_numbers<[1], [0], [0], [1], [0, 0, 1, 1], [], []>} : vector<13x88xf32>, vector<88x13xf32>, vector<13x13xf32> -> vector<13x13xf32>
    %c7_242 = arith.constant 7 : index
    %767 = memref.load %arg5[%c7_242] : memref<16xf32, #tpu.memory_space<smem>>
    %768 = vector.broadcast %767 : f32 to vector<13x13xf32>
    %769 = arith.addf %766, %768 : vector<13x13xf32>
    %cst_243 = arith.constant 0.000000e+00 : f32
    %770 = vector.broadcast %cst_243 : f32 to vector<13x13xf32>
    %771 = arith.maximumf %769, %770 : vector<13x13xf32>
    %772 = vector.extract_strided_slice %771 {offsets = [0, 0], sizes = [13, 12], strides = [1, 1]} : vector<13x13xf32> to vector<13x12xf32>
    %773 = vector.extract_strided_slice %771 {offsets = [0, 1], sizes = [13, 12], strides = [1, 1]} : vector<13x13xf32> to vector<13x12xf32>
    %774 = arith.maximumf %772, %773 : vector<13x12xf32>
    %775 = vector.extract_strided_slice %774 {offsets = [0, 0], sizes = [12, 12], strides = [1, 1]} : vector<13x12xf32> to vector<12x12xf32>
    %776 = vector.extract_strided_slice %774 {offsets = [1, 0], sizes = [12, 12], strides = [1, 1]} : vector<13x12xf32> to vector<12x12xf32>
    %777 = arith.maximumf %775, %776 : vector<12x12xf32>
    %cst_244 = arith.constant dense<0.000000e+00> : vector<6x12xf32>
    %778 = tpu.matmul %20, %777, %cst_244 {dimension_numbers = #tpu.dot_dimension_numbers<[1], [0], [0], [1], [0, 0, 1, 1], [], []>} : vector<6x12xf32>, vector<12x12xf32>, vector<6x12xf32> -> vector<6x12xf32>
    %cst_245 = arith.constant dense<0.000000e+00> : vector<6x6xf32>
    %779 = tpu.matmul %778, %27, %cst_245 {dimension_numbers = #tpu.dot_dimension_numbers<[1], [0], [0], [1], [0, 0, 1, 1], [], []>} : vector<6x12xf32>, vector<12x6xf32>, vector<6x6xf32> -> vector<6x6xf32>
    %c0_246 = arith.constant 0 : index
    %c0_247 = arith.constant 0 : index
    %c42_248 = arith.constant 42 : index
    %780 = vector.load %arg6[%c0_246, %c0_247, %c42_248] : memref<1x6x96xf32, #tpu.memory_space<vmem>>, vector<1x6x6xf32>
    %781 = vector.shape_cast %780 : vector<1x6x6xf32> to vector<6x6xf32>
    %782 = vector.shape_cast %779 : vector<6x6xf32> to vector<1x6x6xf32>
    tpu.vector_store %arg6[%c0_246, %c0_247, %c42_248], %782 {strides = array<i32>} : memref<1x6x96xf32, #tpu.memory_space<vmem>>, vector<1x6x6xf32>,
    %c72 = arith.constant 72 : index
    %c0_249 = arith.constant 0 : index
    %783 = vector.load %arg4[%c72, %c0_249] : memref<144x88xf32, #tpu.memory_space<vmem>>, vector<1x88xf32>
    %784 = vector.broadcast %783 : vector<1x88xf32> to vector<13x88xf32>
    %785 = arith.mulf %358, %784 : vector<13x88xf32>
    %c73 = arith.constant 73 : index
    %c0_250 = arith.constant 0 : index
    %786 = vector.load %arg4[%c73, %c0_250] : memref<144x88xf32, #tpu.memory_space<vmem>>, vector<1x88xf32>
    %787 = vector.broadcast %786 : vector<1x88xf32> to vector<13x88xf32>
    %788 = arith.mulf %359, %787 : vector<13x88xf32>
    %789 = arith.addf %785, %788 : vector<13x88xf32>
    %c74 = arith.constant 74 : index
    %c0_251 = arith.constant 0 : index
    %790 = vector.load %arg4[%c74, %c0_251] : memref<144x88xf32, #tpu.memory_space<vmem>>, vector<1x88xf32>
    %791 = vector.broadcast %790 : vector<1x88xf32> to vector<13x88xf32>
    %792 = arith.mulf %360, %791 : vector<13x88xf32>
    %793 = arith.addf %789, %792 : vector<13x88xf32>
    %c75_252 = arith.constant 75 : index
    %c0_253 = arith.constant 0 : index
    %794 = vector.load %arg4[%c75_252, %c0_253] : memref<144x88xf32, #tpu.memory_space<vmem>>, vector<1x88xf32>
    %795 = vector.broadcast %794 : vector<1x88xf32> to vector<13x88xf32>
    %796 = arith.mulf %361, %795 : vector<13x88xf32>
    %797 = arith.addf %793, %796 : vector<13x88xf32>
    %c76 = arith.constant 76 : index
    %c0_254 = arith.constant 0 : index
    %798 = vector.load %arg4[%c76, %c0_254] : memref<144x88xf32, #tpu.memory_space<vmem>>, vector<1x88xf32>
    %799 = vector.broadcast %798 : vector<1x88xf32> to vector<13x88xf32>
    %800 = arith.mulf %362, %799 : vector<13x88xf32>
    %801 = arith.addf %797, %800 : vector<13x88xf32>
    %c77 = arith.constant 77 : index
    %c0_255 = arith.constant 0 : index
    %802 = vector.load %arg4[%c77, %c0_255] : memref<144x88xf32, #tpu.memory_space<vmem>>, vector<1x88xf32>
    %803 = vector.broadcast %802 : vector<1x88xf32> to vector<13x88xf32>
    %804 = arith.mulf %363, %803 : vector<13x88xf32>
    %805 = arith.addf %801, %804 : vector<13x88xf32>
    %c78 = arith.constant 78 : index
    %c0_256 = arith.constant 0 : index
    %806 = vector.load %arg4[%c78, %c0_256] : memref<144x88xf32, #tpu.memory_space<vmem>>, vector<1x88xf32>
    %807 = vector.broadcast %806 : vector<1x88xf32> to vector<13x88xf32>
    %808 = arith.mulf %364, %807 : vector<13x88xf32>
    %809 = arith.addf %805, %808 : vector<13x88xf32>
    %c79 = arith.constant 79 : index
    %c0_257 = arith.constant 0 : index
    %810 = vector.load %arg4[%c79, %c0_257] : memref<144x88xf32, #tpu.memory_space<vmem>>, vector<1x88xf32>
    %811 = vector.broadcast %810 : vector<1x88xf32> to vector<13x88xf32>
    %812 = arith.mulf %365, %811 : vector<13x88xf32>
    %813 = arith.addf %809, %812 : vector<13x88xf32>
    %c80 = arith.constant 80 : index
    %c0_258 = arith.constant 0 : index
    %814 = vector.load %arg4[%c80, %c0_258] : memref<144x88xf32, #tpu.memory_space<vmem>>, vector<1x88xf32>
    %815 = vector.broadcast %814 : vector<1x88xf32> to vector<13x88xf32>
    %816 = arith.mulf %366, %815 : vector<13x88xf32>
    %817 = arith.addf %813, %816 : vector<13x88xf32>
    %cst_259 = arith.constant dense<0.000000e+00> : vector<13x13xf32>
    %818 = tpu.matmul %817, %52, %cst_259 {dimension_numbers = #tpu.dot_dimension_numbers<[1], [0], [0], [1], [0, 0, 1, 1], [], []>} : vector<13x88xf32>, vector<88x13xf32>, vector<13x13xf32> -> vector<13x13xf32>
    %c8_260 = arith.constant 8 : index
    %819 = memref.load %arg5[%c8_260] : memref<16xf32, #tpu.memory_space<smem>>
    %820 = vector.broadcast %819 : f32 to vector<13x13xf32>
    %821 = arith.addf %818, %820 : vector<13x13xf32>
    %cst_261 = arith.constant 0.000000e+00 : f32
    %822 = vector.broadcast %cst_261 : f32 to vector<13x13xf32>
    %823 = arith.maximumf %821, %822 : vector<13x13xf32>
    %824 = vector.extract_strided_slice %823 {offsets = [0, 0], sizes = [13, 12], strides = [1, 1]} : vector<13x13xf32> to vector<13x12xf32>
    %825 = vector.extract_strided_slice %823 {offsets = [0, 1], sizes = [13, 12], strides = [1, 1]} : vector<13x13xf32> to vector<13x12xf32>
    %826 = arith.maximumf %824, %825 : vector<13x12xf32>
    %827 = vector.extract_strided_slice %826 {offsets = [0, 0], sizes = [12, 12], strides = [1, 1]} : vector<13x12xf32> to vector<12x12xf32>
    %828 = vector.extract_strided_slice %826 {offsets = [1, 0], sizes = [12, 12], strides = [1, 1]} : vector<13x12xf32> to vector<12x12xf32>
    %829 = arith.maximumf %827, %828 : vector<12x12xf32>
    %cst_262 = arith.constant dense<0.000000e+00> : vector<6x12xf32>
    %830 = tpu.matmul %20, %829, %cst_262 {dimension_numbers = #tpu.dot_dimension_numbers<[1], [0], [0], [1], [0, 0, 1, 1], [], []>} : vector<6x12xf32>, vector<12x12xf32>, vector<6x12xf32> -> vector<6x12xf32>
    %cst_263 = arith.constant dense<0.000000e+00> : vector<6x6xf32>
    %831 = tpu.matmul %830, %27, %cst_263 {dimension_numbers = #tpu.dot_dimension_numbers<[1], [0], [0], [1], [0, 0, 1, 1], [], []>} : vector<6x12xf32>, vector<12x6xf32>, vector<6x6xf32> -> vector<6x6xf32>
    %c0_264 = arith.constant 0 : index
    %c0_265 = arith.constant 0 : index
    %c48_266 = arith.constant 48 : index
    %832 = vector.load %arg6[%c0_264, %c0_265, %c48_266] : memref<1x6x96xf32, #tpu.memory_space<vmem>>, vector<1x6x6xf32>
    %833 = vector.shape_cast %832 : vector<1x6x6xf32> to vector<6x6xf32>
    %834 = vector.shape_cast %831 : vector<6x6xf32> to vector<1x6x6xf32>
    tpu.vector_store %arg6[%c0_264, %c0_265, %c48_266], %834 {strides = array<i32>} : memref<1x6x96xf32, #tpu.memory_space<vmem>>, vector<1x6x6xf32>,
    %c81 = arith.constant 81 : index
    %c0_267 = arith.constant 0 : index
    %835 = vector.load %arg4[%c81, %c0_267] : memref<144x88xf32, #tpu.memory_space<vmem>>, vector<1x88xf32>
    %836 = vector.broadcast %835 : vector<1x88xf32> to vector<13x88xf32>
    %837 = arith.mulf %358, %836 : vector<13x88xf32>
    %c82 = arith.constant 82 : index
    %c0_268 = arith.constant 0 : index
    %838 = vector.load %arg4[%c82, %c0_268] : memref<144x88xf32, #tpu.memory_space<vmem>>, vector<1x88xf32>
    %839 = vector.broadcast %838 : vector<1x88xf32> to vector<13x88xf32>
    %840 = arith.mulf %359, %839 : vector<13x88xf32>
    %841 = arith.addf %837, %840 : vector<13x88xf32>
    %c83 = arith.constant 83 : index
    %c0_269 = arith.constant 0 : index
    %842 = vector.load %arg4[%c83, %c0_269] : memref<144x88xf32, #tpu.memory_space<vmem>>, vector<1x88xf32>
    %843 = vector.broadcast %842 : vector<1x88xf32> to vector<13x88xf32>
    %844 = arith.mulf %360, %843 : vector<13x88xf32>
    %845 = arith.addf %841, %844 : vector<13x88xf32>
    %c84 = arith.constant 84 : index
    %c0_270 = arith.constant 0 : index
    %846 = vector.load %arg4[%c84, %c0_270] : memref<144x88xf32, #tpu.memory_space<vmem>>, vector<1x88xf32>
    %847 = vector.broadcast %846 : vector<1x88xf32> to vector<13x88xf32>
    %848 = arith.mulf %361, %847 : vector<13x88xf32>
    %849 = arith.addf %845, %848 : vector<13x88xf32>
    %c85 = arith.constant 85 : index
    %c0_271 = arith.constant 0 : index
    %850 = vector.load %arg4[%c85, %c0_271] : memref<144x88xf32, #tpu.memory_space<vmem>>, vector<1x88xf32>
    %851 = vector.broadcast %850 : vector<1x88xf32> to vector<13x88xf32>
    %852 = arith.mulf %362, %851 : vector<13x88xf32>
    %853 = arith.addf %849, %852 : vector<13x88xf32>
    %c86 = arith.constant 86 : index
    %c0_272 = arith.constant 0 : index
    %854 = vector.load %arg4[%c86, %c0_272] : memref<144x88xf32, #tpu.memory_space<vmem>>, vector<1x88xf32>
    %855 = vector.broadcast %854 : vector<1x88xf32> to vector<13x88xf32>
    %856 = arith.mulf %363, %855 : vector<13x88xf32>
    %857 = arith.addf %853, %856 : vector<13x88xf32>
    %c87 = arith.constant 87 : index
    %c0_273 = arith.constant 0 : index
    %858 = vector.load %arg4[%c87, %c0_273] : memref<144x88xf32, #tpu.memory_space<vmem>>, vector<1x88xf32>
    %859 = vector.broadcast %858 : vector<1x88xf32> to vector<13x88xf32>
    %860 = arith.mulf %364, %859 : vector<13x88xf32>
    %861 = arith.addf %857, %860 : vector<13x88xf32>
    %c88 = arith.constant 88 : index
    %c0_274 = arith.constant 0 : index
    %862 = vector.load %arg4[%c88, %c0_274] : memref<144x88xf32, #tpu.memory_space<vmem>>, vector<1x88xf32>
    %863 = vector.broadcast %862 : vector<1x88xf32> to vector<13x88xf32>
    %864 = arith.mulf %365, %863 : vector<13x88xf32>
    %865 = arith.addf %861, %864 : vector<13x88xf32>
    %c89 = arith.constant 89 : index
    %c0_275 = arith.constant 0 : index
    %866 = vector.load %arg4[%c89, %c0_275] : memref<144x88xf32, #tpu.memory_space<vmem>>, vector<1x88xf32>
    %867 = vector.broadcast %866 : vector<1x88xf32> to vector<13x88xf32>
    %868 = arith.mulf %366, %867 : vector<13x88xf32>
    %869 = arith.addf %865, %868 : vector<13x88xf32>
    %cst_276 = arith.constant dense<0.000000e+00> : vector<13x13xf32>
    %870 = tpu.matmul %869, %52, %cst_276 {dimension_numbers = #tpu.dot_dimension_numbers<[1], [0], [0], [1], [0, 0, 1, 1], [], []>} : vector<13x88xf32>, vector<88x13xf32>, vector<13x13xf32> -> vector<13x13xf32>
    %c9_277 = arith.constant 9 : index
    %871 = memref.load %arg5[%c9_277] : memref<16xf32, #tpu.memory_space<smem>>
    %872 = vector.broadcast %871 : f32 to vector<13x13xf32>
    %873 = arith.addf %870, %872 : vector<13x13xf32>
    %cst_278 = arith.constant 0.000000e+00 : f32
    %874 = vector.broadcast %cst_278 : f32 to vector<13x13xf32>
    %875 = arith.maximumf %873, %874 : vector<13x13xf32>
    %876 = vector.extract_strided_slice %875 {offsets = [0, 0], sizes = [13, 12], strides = [1, 1]} : vector<13x13xf32> to vector<13x12xf32>
    %877 = vector.extract_strided_slice %875 {offsets = [0, 1], sizes = [13, 12], strides = [1, 1]} : vector<13x13xf32> to vector<13x12xf32>
    %878 = arith.maximumf %876, %877 : vector<13x12xf32>
    %879 = vector.extract_strided_slice %878 {offsets = [0, 0], sizes = [12, 12], strides = [1, 1]} : vector<13x12xf32> to vector<12x12xf32>
    %880 = vector.extract_strided_slice %878 {offsets = [1, 0], sizes = [12, 12], strides = [1, 1]} : vector<13x12xf32> to vector<12x12xf32>
    %881 = arith.maximumf %879, %880 : vector<12x12xf32>
    %cst_279 = arith.constant dense<0.000000e+00> : vector<6x12xf32>
    %882 = tpu.matmul %20, %881, %cst_279 {dimension_numbers = #tpu.dot_dimension_numbers<[1], [0], [0], [1], [0, 0, 1, 1], [], []>} : vector<6x12xf32>, vector<12x12xf32>, vector<6x12xf32> -> vector<6x12xf32>
    %cst_280 = arith.constant dense<0.000000e+00> : vector<6x6xf32>
    %883 = tpu.matmul %882, %27, %cst_280 {dimension_numbers = #tpu.dot_dimension_numbers<[1], [0], [0], [1], [0, 0, 1, 1], [], []>} : vector<6x12xf32>, vector<12x6xf32>, vector<6x6xf32> -> vector<6x6xf32>
    %c0_281 = arith.constant 0 : index
    %c0_282 = arith.constant 0 : index
    %c54_283 = arith.constant 54 : index
    %884 = vector.load %arg6[%c0_281, %c0_282, %c54_283] : memref<1x6x96xf32, #tpu.memory_space<vmem>>, vector<1x6x6xf32>
    %885 = vector.shape_cast %884 : vector<1x6x6xf32> to vector<6x6xf32>
    %886 = vector.shape_cast %883 : vector<6x6xf32> to vector<1x6x6xf32>
    tpu.vector_store %arg6[%c0_281, %c0_282, %c54_283], %886 {strides = array<i32>} : memref<1x6x96xf32, #tpu.memory_space<vmem>>, vector<1x6x6xf32>,
    %c90 = arith.constant 90 : index
    %c0_284 = arith.constant 0 : index
    %887 = vector.load %arg4[%c90, %c0_284] : memref<144x88xf32, #tpu.memory_space<vmem>>, vector<1x88xf32>
    %888 = vector.broadcast %887 : vector<1x88xf32> to vector<13x88xf32>
    %889 = arith.mulf %358, %888 : vector<13x88xf32>
    %c91 = arith.constant 91 : index
    %c0_285 = arith.constant 0 : index
    %890 = vector.load %arg4[%c91, %c0_285] : memref<144x88xf32, #tpu.memory_space<vmem>>, vector<1x88xf32>
    %891 = vector.broadcast %890 : vector<1x88xf32> to vector<13x88xf32>
    %892 = arith.mulf %359, %891 : vector<13x88xf32>
    %893 = arith.addf %889, %892 : vector<13x88xf32>
    %c92 = arith.constant 92 : index
    %c0_286 = arith.constant 0 : index
    %894 = vector.load %arg4[%c92, %c0_286] : memref<144x88xf32, #tpu.memory_space<vmem>>, vector<1x88xf32>
    %895 = vector.broadcast %894 : vector<1x88xf32> to vector<13x88xf32>
    %896 = arith.mulf %360, %895 : vector<13x88xf32>
    %897 = arith.addf %893, %896 : vector<13x88xf32>
    %c93 = arith.constant 93 : index
    %c0_287 = arith.constant 0 : index
    %898 = vector.load %arg4[%c93, %c0_287] : memref<144x88xf32, #tpu.memory_space<vmem>>, vector<1x88xf32>
    %899 = vector.broadcast %898 : vector<1x88xf32> to vector<13x88xf32>
    %900 = arith.mulf %361, %899 : vector<13x88xf32>
    %901 = arith.addf %897, %900 : vector<13x88xf32>
    %c94 = arith.constant 94 : index
    %c0_288 = arith.constant 0 : index
    %902 = vector.load %arg4[%c94, %c0_288] : memref<144x88xf32, #tpu.memory_space<vmem>>, vector<1x88xf32>
    %903 = vector.broadcast %902 : vector<1x88xf32> to vector<13x88xf32>
    %904 = arith.mulf %362, %903 : vector<13x88xf32>
    %905 = arith.addf %901, %904 : vector<13x88xf32>
    %c95 = arith.constant 95 : index
    %c0_289 = arith.constant 0 : index
    %906 = vector.load %arg4[%c95, %c0_289] : memref<144x88xf32, #tpu.memory_space<vmem>>, vector<1x88xf32>
    %907 = vector.broadcast %906 : vector<1x88xf32> to vector<13x88xf32>
    %908 = arith.mulf %363, %907 : vector<13x88xf32>
    %909 = arith.addf %905, %908 : vector<13x88xf32>
    %c96 = arith.constant 96 : index
    %c0_290 = arith.constant 0 : index
    %910 = vector.load %arg4[%c96, %c0_290] : memref<144x88xf32, #tpu.memory_space<vmem>>, vector<1x88xf32>
    %911 = vector.broadcast %910 : vector<1x88xf32> to vector<13x88xf32>
    %912 = arith.mulf %364, %911 : vector<13x88xf32>
    %913 = arith.addf %909, %912 : vector<13x88xf32>
    %c97 = arith.constant 97 : index
    %c0_291 = arith.constant 0 : index
    %914 = vector.load %arg4[%c97, %c0_291] : memref<144x88xf32, #tpu.memory_space<vmem>>, vector<1x88xf32>
    %915 = vector.broadcast %914 : vector<1x88xf32> to vector<13x88xf32>
    %916 = arith.mulf %365, %915 : vector<13x88xf32>
    %917 = arith.addf %913, %916 : vector<13x88xf32>
    %c98 = arith.constant 98 : index
    %c0_292 = arith.constant 0 : index
    %918 = vector.load %arg4[%c98, %c0_292] : memref<144x88xf32, #tpu.memory_space<vmem>>, vector<1x88xf32>
    %919 = vector.broadcast %918 : vector<1x88xf32> to vector<13x88xf32>
    %920 = arith.mulf %366, %919 : vector<13x88xf32>
    %921 = arith.addf %917, %920 : vector<13x88xf32>
    %cst_293 = arith.constant dense<0.000000e+00> : vector<13x13xf32>
    %922 = tpu.matmul %921, %52, %cst_293 {dimension_numbers = #tpu.dot_dimension_numbers<[1], [0], [0], [1], [0, 0, 1, 1], [], []>} : vector<13x88xf32>, vector<88x13xf32>, vector<13x13xf32> -> vector<13x13xf32>
    %c10_294 = arith.constant 10 : index
    %923 = memref.load %arg5[%c10_294] : memref<16xf32, #tpu.memory_space<smem>>
    %924 = vector.broadcast %923 : f32 to vector<13x13xf32>
    %925 = arith.addf %922, %924 : vector<13x13xf32>
    %cst_295 = arith.constant 0.000000e+00 : f32
    %926 = vector.broadcast %cst_295 : f32 to vector<13x13xf32>
    %927 = arith.maximumf %925, %926 : vector<13x13xf32>
    %928 = vector.extract_strided_slice %927 {offsets = [0, 0], sizes = [13, 12], strides = [1, 1]} : vector<13x13xf32> to vector<13x12xf32>
    %929 = vector.extract_strided_slice %927 {offsets = [0, 1], sizes = [13, 12], strides = [1, 1]} : vector<13x13xf32> to vector<13x12xf32>
    %930 = arith.maximumf %928, %929 : vector<13x12xf32>
    %931 = vector.extract_strided_slice %930 {offsets = [0, 0], sizes = [12, 12], strides = [1, 1]} : vector<13x12xf32> to vector<12x12xf32>
    %932 = vector.extract_strided_slice %930 {offsets = [1, 0], sizes = [12, 12], strides = [1, 1]} : vector<13x12xf32> to vector<12x12xf32>
    %933 = arith.maximumf %931, %932 : vector<12x12xf32>
    %cst_296 = arith.constant dense<0.000000e+00> : vector<6x12xf32>
    %934 = tpu.matmul %20, %933, %cst_296 {dimension_numbers = #tpu.dot_dimension_numbers<[1], [0], [0], [1], [0, 0, 1, 1], [], []>} : vector<6x12xf32>, vector<12x12xf32>, vector<6x12xf32> -> vector<6x12xf32>
    %cst_297 = arith.constant dense<0.000000e+00> : vector<6x6xf32>
    %935 = tpu.matmul %934, %27, %cst_297 {dimension_numbers = #tpu.dot_dimension_numbers<[1], [0], [0], [1], [0, 0, 1, 1], [], []>} : vector<6x12xf32>, vector<12x6xf32>, vector<6x6xf32> -> vector<6x6xf32>
    %c0_298 = arith.constant 0 : index
    %c0_299 = arith.constant 0 : index
    %c60_300 = arith.constant 60 : index
    %936 = vector.load %arg6[%c0_298, %c0_299, %c60_300] : memref<1x6x96xf32, #tpu.memory_space<vmem>>, vector<1x6x6xf32>
    %937 = vector.shape_cast %936 : vector<1x6x6xf32> to vector<6x6xf32>
    %938 = vector.shape_cast %935 : vector<6x6xf32> to vector<1x6x6xf32>
    tpu.vector_store %arg6[%c0_298, %c0_299, %c60_300], %938 {strides = array<i32>} : memref<1x6x96xf32, #tpu.memory_space<vmem>>, vector<1x6x6xf32>,
    %c99 = arith.constant 99 : index
    %c0_301 = arith.constant 0 : index
    %939 = vector.load %arg4[%c99, %c0_301] : memref<144x88xf32, #tpu.memory_space<vmem>>, vector<1x88xf32>
    %940 = vector.broadcast %939 : vector<1x88xf32> to vector<13x88xf32>
    %941 = arith.mulf %358, %940 : vector<13x88xf32>
    %c100 = arith.constant 100 : index
    %c0_302 = arith.constant 0 : index
    %942 = vector.load %arg4[%c100, %c0_302] : memref<144x88xf32, #tpu.memory_space<vmem>>, vector<1x88xf32>
    %943 = vector.broadcast %942 : vector<1x88xf32> to vector<13x88xf32>
    %944 = arith.mulf %359, %943 : vector<13x88xf32>
    %945 = arith.addf %941, %944 : vector<13x88xf32>
    %c101 = arith.constant 101 : index
    %c0_303 = arith.constant 0 : index
    %946 = vector.load %arg4[%c101, %c0_303] : memref<144x88xf32, #tpu.memory_space<vmem>>, vector<1x88xf32>
    %947 = vector.broadcast %946 : vector<1x88xf32> to vector<13x88xf32>
    %948 = arith.mulf %360, %947 : vector<13x88xf32>
    %949 = arith.addf %945, %948 : vector<13x88xf32>
    %c102 = arith.constant 102 : index
    %c0_304 = arith.constant 0 : index
    %950 = vector.load %arg4[%c102, %c0_304] : memref<144x88xf32, #tpu.memory_space<vmem>>, vector<1x88xf32>
    %951 = vector.broadcast %950 : vector<1x88xf32> to vector<13x88xf32>
    %952 = arith.mulf %361, %951 : vector<13x88xf32>
    %953 = arith.addf %949, %952 : vector<13x88xf32>
    %c103 = arith.constant 103 : index
    %c0_305 = arith.constant 0 : index
    %954 = vector.load %arg4[%c103, %c0_305] : memref<144x88xf32, #tpu.memory_space<vmem>>, vector<1x88xf32>
    %955 = vector.broadcast %954 : vector<1x88xf32> to vector<13x88xf32>
    %956 = arith.mulf %362, %955 : vector<13x88xf32>
    %957 = arith.addf %953, %956 : vector<13x88xf32>
    %c104 = arith.constant 104 : index
    %c0_306 = arith.constant 0 : index
    %958 = vector.load %arg4[%c104, %c0_306] : memref<144x88xf32, #tpu.memory_space<vmem>>, vector<1x88xf32>
    %959 = vector.broadcast %958 : vector<1x88xf32> to vector<13x88xf32>
    %960 = arith.mulf %363, %959 : vector<13x88xf32>
    %961 = arith.addf %957, %960 : vector<13x88xf32>
    %c105 = arith.constant 105 : index
    %c0_307 = arith.constant 0 : index
    %962 = vector.load %arg4[%c105, %c0_307] : memref<144x88xf32, #tpu.memory_space<vmem>>, vector<1x88xf32>
    %963 = vector.broadcast %962 : vector<1x88xf32> to vector<13x88xf32>
    %964 = arith.mulf %364, %963 : vector<13x88xf32>
    %965 = arith.addf %961, %964 : vector<13x88xf32>
    %c106 = arith.constant 106 : index
    %c0_308 = arith.constant 0 : index
    %966 = vector.load %arg4[%c106, %c0_308] : memref<144x88xf32, #tpu.memory_space<vmem>>, vector<1x88xf32>
    %967 = vector.broadcast %966 : vector<1x88xf32> to vector<13x88xf32>
    %968 = arith.mulf %365, %967 : vector<13x88xf32>
    %969 = arith.addf %965, %968 : vector<13x88xf32>
    %c107 = arith.constant 107 : index
    %c0_309 = arith.constant 0 : index
    %970 = vector.load %arg4[%c107, %c0_309] : memref<144x88xf32, #tpu.memory_space<vmem>>, vector<1x88xf32>
    %971 = vector.broadcast %970 : vector<1x88xf32> to vector<13x88xf32>
    %972 = arith.mulf %366, %971 : vector<13x88xf32>
    %973 = arith.addf %969, %972 : vector<13x88xf32>
    %cst_310 = arith.constant dense<0.000000e+00> : vector<13x13xf32>
    %974 = tpu.matmul %973, %52, %cst_310 {dimension_numbers = #tpu.dot_dimension_numbers<[1], [0], [0], [1], [0, 0, 1, 1], [], []>} : vector<13x88xf32>, vector<88x13xf32>, vector<13x13xf32> -> vector<13x13xf32>
    %c11_311 = arith.constant 11 : index
    %975 = memref.load %arg5[%c11_311] : memref<16xf32, #tpu.memory_space<smem>>
    %976 = vector.broadcast %975 : f32 to vector<13x13xf32>
    %977 = arith.addf %974, %976 : vector<13x13xf32>
    %cst_312 = arith.constant 0.000000e+00 : f32
    %978 = vector.broadcast %cst_312 : f32 to vector<13x13xf32>
    %979 = arith.maximumf %977, %978 : vector<13x13xf32>
    %980 = vector.extract_strided_slice %979 {offsets = [0, 0], sizes = [13, 12], strides = [1, 1]} : vector<13x13xf32> to vector<13x12xf32>
    %981 = vector.extract_strided_slice %979 {offsets = [0, 1], sizes = [13, 12], strides = [1, 1]} : vector<13x13xf32> to vector<13x12xf32>
    %982 = arith.maximumf %980, %981 : vector<13x12xf32>
    %983 = vector.extract_strided_slice %982 {offsets = [0, 0], sizes = [12, 12], strides = [1, 1]} : vector<13x12xf32> to vector<12x12xf32>
    %984 = vector.extract_strided_slice %982 {offsets = [1, 0], sizes = [12, 12], strides = [1, 1]} : vector<13x12xf32> to vector<12x12xf32>
    %985 = arith.maximumf %983, %984 : vector<12x12xf32>
    %cst_313 = arith.constant dense<0.000000e+00> : vector<6x12xf32>
    %986 = tpu.matmul %20, %985, %cst_313 {dimension_numbers = #tpu.dot_dimension_numbers<[1], [0], [0], [1], [0, 0, 1, 1], [], []>} : vector<6x12xf32>, vector<12x12xf32>, vector<6x12xf32> -> vector<6x12xf32>
    %cst_314 = arith.constant dense<0.000000e+00> : vector<6x6xf32>
    %987 = tpu.matmul %986, %27, %cst_314 {dimension_numbers = #tpu.dot_dimension_numbers<[1], [0], [0], [1], [0, 0, 1, 1], [], []>} : vector<6x12xf32>, vector<12x6xf32>, vector<6x6xf32> -> vector<6x6xf32>
    %c0_315 = arith.constant 0 : index
    %c0_316 = arith.constant 0 : index
    %c66_317 = arith.constant 66 : index
    %988 = vector.load %arg6[%c0_315, %c0_316, %c66_317] : memref<1x6x96xf32, #tpu.memory_space<vmem>>, vector<1x6x6xf32>
    %989 = vector.shape_cast %988 : vector<1x6x6xf32> to vector<6x6xf32>
    %990 = vector.shape_cast %987 : vector<6x6xf32> to vector<1x6x6xf32>
    tpu.vector_store %arg6[%c0_315, %c0_316, %c66_317], %990 {strides = array<i32>} : memref<1x6x96xf32, #tpu.memory_space<vmem>>, vector<1x6x6xf32>,
    %c108 = arith.constant 108 : index
    %c0_318 = arith.constant 0 : index
    %991 = vector.load %arg4[%c108, %c0_318] : memref<144x88xf32, #tpu.memory_space<vmem>>, vector<1x88xf32>
    %992 = vector.broadcast %991 : vector<1x88xf32> to vector<13x88xf32>
    %993 = arith.mulf %358, %992 : vector<13x88xf32>
    %c109 = arith.constant 109 : index
    %c0_319 = arith.constant 0 : index
    %994 = vector.load %arg4[%c109, %c0_319] : memref<144x88xf32, #tpu.memory_space<vmem>>, vector<1x88xf32>
    %995 = vector.broadcast %994 : vector<1x88xf32> to vector<13x88xf32>
    %996 = arith.mulf %359, %995 : vector<13x88xf32>
    %997 = arith.addf %993, %996 : vector<13x88xf32>
    %c110 = arith.constant 110 : index
    %c0_320 = arith.constant 0 : index
    %998 = vector.load %arg4[%c110, %c0_320] : memref<144x88xf32, #tpu.memory_space<vmem>>, vector<1x88xf32>
    %999 = vector.broadcast %998 : vector<1x88xf32> to vector<13x88xf32>
    %1000 = arith.mulf %360, %999 : vector<13x88xf32>
    %1001 = arith.addf %997, %1000 : vector<13x88xf32>
    %c111 = arith.constant 111 : index
    %c0_321 = arith.constant 0 : index
    %1002 = vector.load %arg4[%c111, %c0_321] : memref<144x88xf32, #tpu.memory_space<vmem>>, vector<1x88xf32>
    %1003 = vector.broadcast %1002 : vector<1x88xf32> to vector<13x88xf32>
    %1004 = arith.mulf %361, %1003 : vector<13x88xf32>
    %1005 = arith.addf %1001, %1004 : vector<13x88xf32>
    %c112 = arith.constant 112 : index
    %c0_322 = arith.constant 0 : index
    %1006 = vector.load %arg4[%c112, %c0_322] : memref<144x88xf32, #tpu.memory_space<vmem>>, vector<1x88xf32>
    %1007 = vector.broadcast %1006 : vector<1x88xf32> to vector<13x88xf32>
    %1008 = arith.mulf %362, %1007 : vector<13x88xf32>
    %1009 = arith.addf %1005, %1008 : vector<13x88xf32>
    %c113 = arith.constant 113 : index
    %c0_323 = arith.constant 0 : index
    %1010 = vector.load %arg4[%c113, %c0_323] : memref<144x88xf32, #tpu.memory_space<vmem>>, vector<1x88xf32>
    %1011 = vector.broadcast %1010 : vector<1x88xf32> to vector<13x88xf32>
    %1012 = arith.mulf %363, %1011 : vector<13x88xf32>
    %1013 = arith.addf %1009, %1012 : vector<13x88xf32>
    %c114 = arith.constant 114 : index
    %c0_324 = arith.constant 0 : index
    %1014 = vector.load %arg4[%c114, %c0_324] : memref<144x88xf32, #tpu.memory_space<vmem>>, vector<1x88xf32>
    %1015 = vector.broadcast %1014 : vector<1x88xf32> to vector<13x88xf32>
    %1016 = arith.mulf %364, %1015 : vector<13x88xf32>
    %1017 = arith.addf %1013, %1016 : vector<13x88xf32>
    %c115 = arith.constant 115 : index
    %c0_325 = arith.constant 0 : index
    %1018 = vector.load %arg4[%c115, %c0_325] : memref<144x88xf32, #tpu.memory_space<vmem>>, vector<1x88xf32>
    %1019 = vector.broadcast %1018 : vector<1x88xf32> to vector<13x88xf32>
    %1020 = arith.mulf %365, %1019 : vector<13x88xf32>
    %1021 = arith.addf %1017, %1020 : vector<13x88xf32>
    %c116 = arith.constant 116 : index
    %c0_326 = arith.constant 0 : index
    %1022 = vector.load %arg4[%c116, %c0_326] : memref<144x88xf32, #tpu.memory_space<vmem>>, vector<1x88xf32>
    %1023 = vector.broadcast %1022 : vector<1x88xf32> to vector<13x88xf32>
    %1024 = arith.mulf %366, %1023 : vector<13x88xf32>
    %1025 = arith.addf %1021, %1024 : vector<13x88xf32>
    %cst_327 = arith.constant dense<0.000000e+00> : vector<13x13xf32>
    %1026 = tpu.matmul %1025, %52, %cst_327 {dimension_numbers = #tpu.dot_dimension_numbers<[1], [0], [0], [1], [0, 0, 1, 1], [], []>} : vector<13x88xf32>, vector<88x13xf32>, vector<13x13xf32> -> vector<13x13xf32>
    %c12_328 = arith.constant 12 : index
    %1027 = memref.load %arg5[%c12_328] : memref<16xf32, #tpu.memory_space<smem>>
    %1028 = vector.broadcast %1027 : f32 to vector<13x13xf32>
    %1029 = arith.addf %1026, %1028 : vector<13x13xf32>
    %cst_329 = arith.constant 0.000000e+00 : f32
    %1030 = vector.broadcast %cst_329 : f32 to vector<13x13xf32>
    %1031 = arith.maximumf %1029, %1030 : vector<13x13xf32>
    %1032 = vector.extract_strided_slice %1031 {offsets = [0, 0], sizes = [13, 12], strides = [1, 1]} : vector<13x13xf32> to vector<13x12xf32>
    %1033 = vector.extract_strided_slice %1031 {offsets = [0, 1], sizes = [13, 12], strides = [1, 1]} : vector<13x13xf32> to vector<13x12xf32>
    %1034 = arith.maximumf %1032, %1033 : vector<13x12xf32>
    %1035 = vector.extract_strided_slice %1034 {offsets = [0, 0], sizes = [12, 12], strides = [1, 1]} : vector<13x12xf32> to vector<12x12xf32>
    %1036 = vector.extract_strided_slice %1034 {offsets = [1, 0], sizes = [12, 12], strides = [1, 1]} : vector<13x12xf32> to vector<12x12xf32>
    %1037 = arith.maximumf %1035, %1036 : vector<12x12xf32>
    %cst_330 = arith.constant dense<0.000000e+00> : vector<6x12xf32>
    %1038 = tpu.matmul %20, %1037, %cst_330 {dimension_numbers = #tpu.dot_dimension_numbers<[1], [0], [0], [1], [0, 0, 1, 1], [], []>} : vector<6x12xf32>, vector<12x12xf32>, vector<6x12xf32> -> vector<6x12xf32>
    %cst_331 = arith.constant dense<0.000000e+00> : vector<6x6xf32>
    %1039 = tpu.matmul %1038, %27, %cst_331 {dimension_numbers = #tpu.dot_dimension_numbers<[1], [0], [0], [1], [0, 0, 1, 1], [], []>} : vector<6x12xf32>, vector<12x6xf32>, vector<6x6xf32> -> vector<6x6xf32>
    %c0_332 = arith.constant 0 : index
    %c0_333 = arith.constant 0 : index
    %c72_334 = arith.constant 72 : index
    %1040 = vector.load %arg6[%c0_332, %c0_333, %c72_334] : memref<1x6x96xf32, #tpu.memory_space<vmem>>, vector<1x6x6xf32>
    %1041 = vector.shape_cast %1040 : vector<1x6x6xf32> to vector<6x6xf32>
    %1042 = vector.shape_cast %1039 : vector<6x6xf32> to vector<1x6x6xf32>
    tpu.vector_store %arg6[%c0_332, %c0_333, %c72_334], %1042 {strides = array<i32>} : memref<1x6x96xf32, #tpu.memory_space<vmem>>, vector<1x6x6xf32>,
    %c117 = arith.constant 117 : index
    %c0_335 = arith.constant 0 : index
    %1043 = vector.load %arg4[%c117, %c0_335] : memref<144x88xf32, #tpu.memory_space<vmem>>, vector<1x88xf32>
    %1044 = vector.broadcast %1043 : vector<1x88xf32> to vector<13x88xf32>
    %1045 = arith.mulf %358, %1044 : vector<13x88xf32>
    %c118 = arith.constant 118 : index
    %c0_336 = arith.constant 0 : index
    %1046 = vector.load %arg4[%c118, %c0_336] : memref<144x88xf32, #tpu.memory_space<vmem>>, vector<1x88xf32>
    %1047 = vector.broadcast %1046 : vector<1x88xf32> to vector<13x88xf32>
    %1048 = arith.mulf %359, %1047 : vector<13x88xf32>
    %1049 = arith.addf %1045, %1048 : vector<13x88xf32>
    %c119 = arith.constant 119 : index
    %c0_337 = arith.constant 0 : index
    %1050 = vector.load %arg4[%c119, %c0_337] : memref<144x88xf32, #tpu.memory_space<vmem>>, vector<1x88xf32>
    %1051 = vector.broadcast %1050 : vector<1x88xf32> to vector<13x88xf32>
    %1052 = arith.mulf %360, %1051 : vector<13x88xf32>
    %1053 = arith.addf %1049, %1052 : vector<13x88xf32>
    %c120 = arith.constant 120 : index
    %c0_338 = arith.constant 0 : index
    %1054 = vector.load %arg4[%c120, %c0_338] : memref<144x88xf32, #tpu.memory_space<vmem>>, vector<1x88xf32>
    %1055 = vector.broadcast %1054 : vector<1x88xf32> to vector<13x88xf32>
    %1056 = arith.mulf %361, %1055 : vector<13x88xf32>
    %1057 = arith.addf %1053, %1056 : vector<13x88xf32>
    %c121 = arith.constant 121 : index
    %c0_339 = arith.constant 0 : index
    %1058 = vector.load %arg4[%c121, %c0_339] : memref<144x88xf32, #tpu.memory_space<vmem>>, vector<1x88xf32>
    %1059 = vector.broadcast %1058 : vector<1x88xf32> to vector<13x88xf32>
    %1060 = arith.mulf %362, %1059 : vector<13x88xf32>
    %1061 = arith.addf %1057, %1060 : vector<13x88xf32>
    %c122 = arith.constant 122 : index
    %c0_340 = arith.constant 0 : index
    %1062 = vector.load %arg4[%c122, %c0_340] : memref<144x88xf32, #tpu.memory_space<vmem>>, vector<1x88xf32>
    %1063 = vector.broadcast %1062 : vector<1x88xf32> to vector<13x88xf32>
    %1064 = arith.mulf %363, %1063 : vector<13x88xf32>
    %1065 = arith.addf %1061, %1064 : vector<13x88xf32>
    %c123 = arith.constant 123 : index
    %c0_341 = arith.constant 0 : index
    %1066 = vector.load %arg4[%c123, %c0_341] : memref<144x88xf32, #tpu.memory_space<vmem>>, vector<1x88xf32>
    %1067 = vector.broadcast %1066 : vector<1x88xf32> to vector<13x88xf32>
    %1068 = arith.mulf %364, %1067 : vector<13x88xf32>
    %1069 = arith.addf %1065, %1068 : vector<13x88xf32>
    %c124 = arith.constant 124 : index
    %c0_342 = arith.constant 0 : index
    %1070 = vector.load %arg4[%c124, %c0_342] : memref<144x88xf32, #tpu.memory_space<vmem>>, vector<1x88xf32>
    %1071 = vector.broadcast %1070 : vector<1x88xf32> to vector<13x88xf32>
    %1072 = arith.mulf %365, %1071 : vector<13x88xf32>
    %1073 = arith.addf %1069, %1072 : vector<13x88xf32>
    %c125 = arith.constant 125 : index
    %c0_343 = arith.constant 0 : index
    %1074 = vector.load %arg4[%c125, %c0_343] : memref<144x88xf32, #tpu.memory_space<vmem>>, vector<1x88xf32>
    %1075 = vector.broadcast %1074 : vector<1x88xf32> to vector<13x88xf32>
    %1076 = arith.mulf %366, %1075 : vector<13x88xf32>
    %1077 = arith.addf %1073, %1076 : vector<13x88xf32>
    %cst_344 = arith.constant dense<0.000000e+00> : vector<13x13xf32>
    %1078 = tpu.matmul %1077, %52, %cst_344 {dimension_numbers = #tpu.dot_dimension_numbers<[1], [0], [0], [1], [0, 0, 1, 1], [], []>} : vector<13x88xf32>, vector<88x13xf32>, vector<13x13xf32> -> vector<13x13xf32>
    %c13_345 = arith.constant 13 : index
    %1079 = memref.load %arg5[%c13_345] : memref<16xf32, #tpu.memory_space<smem>>
    %1080 = vector.broadcast %1079 : f32 to vector<13x13xf32>
    %1081 = arith.addf %1078, %1080 : vector<13x13xf32>
    %cst_346 = arith.constant 0.000000e+00 : f32
    %1082 = vector.broadcast %cst_346 : f32 to vector<13x13xf32>
    %1083 = arith.maximumf %1081, %1082 : vector<13x13xf32>
    %1084 = vector.extract_strided_slice %1083 {offsets = [0, 0], sizes = [13, 12], strides = [1, 1]} : vector<13x13xf32> to vector<13x12xf32>
    %1085 = vector.extract_strided_slice %1083 {offsets = [0, 1], sizes = [13, 12], strides = [1, 1]} : vector<13x13xf32> to vector<13x12xf32>
    %1086 = arith.maximumf %1084, %1085 : vector<13x12xf32>
    %1087 = vector.extract_strided_slice %1086 {offsets = [0, 0], sizes = [12, 12], strides = [1, 1]} : vector<13x12xf32> to vector<12x12xf32>
    %1088 = vector.extract_strided_slice %1086 {offsets = [1, 0], sizes = [12, 12], strides = [1, 1]} : vector<13x12xf32> to vector<12x12xf32>
    %1089 = arith.maximumf %1087, %1088 : vector<12x12xf32>
    %cst_347 = arith.constant dense<0.000000e+00> : vector<6x12xf32>
    %1090 = tpu.matmul %20, %1089, %cst_347 {dimension_numbers = #tpu.dot_dimension_numbers<[1], [0], [0], [1], [0, 0, 1, 1], [], []>} : vector<6x12xf32>, vector<12x12xf32>, vector<6x12xf32> -> vector<6x12xf32>
    %cst_348 = arith.constant dense<0.000000e+00> : vector<6x6xf32>
    %1091 = tpu.matmul %1090, %27, %cst_348 {dimension_numbers = #tpu.dot_dimension_numbers<[1], [0], [0], [1], [0, 0, 1, 1], [], []>} : vector<6x12xf32>, vector<12x6xf32>, vector<6x6xf32> -> vector<6x6xf32>
    %c0_349 = arith.constant 0 : index
    %c0_350 = arith.constant 0 : index
    %c78_351 = arith.constant 78 : index
    %1092 = vector.load %arg6[%c0_349, %c0_350, %c78_351] : memref<1x6x96xf32, #tpu.memory_space<vmem>>, vector<1x6x6xf32>
    %1093 = vector.shape_cast %1092 : vector<1x6x6xf32> to vector<6x6xf32>
    %1094 = vector.shape_cast %1091 : vector<6x6xf32> to vector<1x6x6xf32>
    tpu.vector_store %arg6[%c0_349, %c0_350, %c78_351], %1094 {strides = array<i32>} : memref<1x6x96xf32, #tpu.memory_space<vmem>>, vector<1x6x6xf32>,
    %c126 = arith.constant 126 : index
    %c0_352 = arith.constant 0 : index
    %1095 = vector.load %arg4[%c126, %c0_352] : memref<144x88xf32, #tpu.memory_space<vmem>>, vector<1x88xf32>
    %1096 = vector.broadcast %1095 : vector<1x88xf32> to vector<13x88xf32>
    %1097 = arith.mulf %358, %1096 : vector<13x88xf32>
    %c127 = arith.constant 127 : index
    %c0_353 = arith.constant 0 : index
    %1098 = vector.load %arg4[%c127, %c0_353] : memref<144x88xf32, #tpu.memory_space<vmem>>, vector<1x88xf32>
    %1099 = vector.broadcast %1098 : vector<1x88xf32> to vector<13x88xf32>
    %1100 = arith.mulf %359, %1099 : vector<13x88xf32>
    %1101 = arith.addf %1097, %1100 : vector<13x88xf32>
    %c128 = arith.constant 128 : index
    %c0_354 = arith.constant 0 : index
    %1102 = vector.load %arg4[%c128, %c0_354] : memref<144x88xf32, #tpu.memory_space<vmem>>, vector<1x88xf32>
    %1103 = vector.broadcast %1102 : vector<1x88xf32> to vector<13x88xf32>
    %1104 = arith.mulf %360, %1103 : vector<13x88xf32>
    %1105 = arith.addf %1101, %1104 : vector<13x88xf32>
    %c129 = arith.constant 129 : index
    %c0_355 = arith.constant 0 : index
    %1106 = vector.load %arg4[%c129, %c0_355] : memref<144x88xf32, #tpu.memory_space<vmem>>, vector<1x88xf32>
    %1107 = vector.broadcast %1106 : vector<1x88xf32> to vector<13x88xf32>
    %1108 = arith.mulf %361, %1107 : vector<13x88xf32>
    %1109 = arith.addf %1105, %1108 : vector<13x88xf32>
    %c130 = arith.constant 130 : index
    %c0_356 = arith.constant 0 : index
    %1110 = vector.load %arg4[%c130, %c0_356] : memref<144x88xf32, #tpu.memory_space<vmem>>, vector<1x88xf32>
    %1111 = vector.broadcast %1110 : vector<1x88xf32> to vector<13x88xf32>
    %1112 = arith.mulf %362, %1111 : vector<13x88xf32>
    %1113 = arith.addf %1109, %1112 : vector<13x88xf32>
    %c131 = arith.constant 131 : index
    %c0_357 = arith.constant 0 : index
    %1114 = vector.load %arg4[%c131, %c0_357] : memref<144x88xf32, #tpu.memory_space<vmem>>, vector<1x88xf32>
    %1115 = vector.broadcast %1114 : vector<1x88xf32> to vector<13x88xf32>
    %1116 = arith.mulf %363, %1115 : vector<13x88xf32>
    %1117 = arith.addf %1113, %1116 : vector<13x88xf32>
    %c132 = arith.constant 132 : index
    %c0_358 = arith.constant 0 : index
    %1118 = vector.load %arg4[%c132, %c0_358] : memref<144x88xf32, #tpu.memory_space<vmem>>, vector<1x88xf32>
    %1119 = vector.broadcast %1118 : vector<1x88xf32> to vector<13x88xf32>
    %1120 = arith.mulf %364, %1119 : vector<13x88xf32>
    %1121 = arith.addf %1117, %1120 : vector<13x88xf32>
    %c133 = arith.constant 133 : index
    %c0_359 = arith.constant 0 : index
    %1122 = vector.load %arg4[%c133, %c0_359] : memref<144x88xf32, #tpu.memory_space<vmem>>, vector<1x88xf32>
    %1123 = vector.broadcast %1122 : vector<1x88xf32> to vector<13x88xf32>
    %1124 = arith.mulf %365, %1123 : vector<13x88xf32>
    %1125 = arith.addf %1121, %1124 : vector<13x88xf32>
    %c134 = arith.constant 134 : index
    %c0_360 = arith.constant 0 : index
    %1126 = vector.load %arg4[%c134, %c0_360] : memref<144x88xf32, #tpu.memory_space<vmem>>, vector<1x88xf32>
    %1127 = vector.broadcast %1126 : vector<1x88xf32> to vector<13x88xf32>
    %1128 = arith.mulf %366, %1127 : vector<13x88xf32>
    %1129 = arith.addf %1125, %1128 : vector<13x88xf32>
    %cst_361 = arith.constant dense<0.000000e+00> : vector<13x13xf32>
    %1130 = tpu.matmul %1129, %52, %cst_361 {dimension_numbers = #tpu.dot_dimension_numbers<[1], [0], [0], [1], [0, 0, 1, 1], [], []>} : vector<13x88xf32>, vector<88x13xf32>, vector<13x13xf32> -> vector<13x13xf32>
    %c14_362 = arith.constant 14 : index
    %1131 = memref.load %arg5[%c14_362] : memref<16xf32, #tpu.memory_space<smem>>
    %1132 = vector.broadcast %1131 : f32 to vector<13x13xf32>
    %1133 = arith.addf %1130, %1132 : vector<13x13xf32>
    %cst_363 = arith.constant 0.000000e+00 : f32
    %1134 = vector.broadcast %cst_363 : f32 to vector<13x13xf32>
    %1135 = arith.maximumf %1133, %1134 : vector<13x13xf32>
    %1136 = vector.extract_strided_slice %1135 {offsets = [0, 0], sizes = [13, 12], strides = [1, 1]} : vector<13x13xf32> to vector<13x12xf32>
    %1137 = vector.extract_strided_slice %1135 {offsets = [0, 1], sizes = [13, 12], strides = [1, 1]} : vector<13x13xf32> to vector<13x12xf32>
    %1138 = arith.maximumf %1136, %1137 : vector<13x12xf32>
    %1139 = vector.extract_strided_slice %1138 {offsets = [0, 0], sizes = [12, 12], strides = [1, 1]} : vector<13x12xf32> to vector<12x12xf32>
    %1140 = vector.extract_strided_slice %1138 {offsets = [1, 0], sizes = [12, 12], strides = [1, 1]} : vector<13x12xf32> to vector<12x12xf32>
    %1141 = arith.maximumf %1139, %1140 : vector<12x12xf32>
    %cst_364 = arith.constant dense<0.000000e+00> : vector<6x12xf32>
    %1142 = tpu.matmul %20, %1141, %cst_364 {dimension_numbers = #tpu.dot_dimension_numbers<[1], [0], [0], [1], [0, 0, 1, 1], [], []>} : vector<6x12xf32>, vector<12x12xf32>, vector<6x12xf32> -> vector<6x12xf32>
    %cst_365 = arith.constant dense<0.000000e+00> : vector<6x6xf32>
    %1143 = tpu.matmul %1142, %27, %cst_365 {dimension_numbers = #tpu.dot_dimension_numbers<[1], [0], [0], [1], [0, 0, 1, 1], [], []>} : vector<6x12xf32>, vector<12x6xf32>, vector<6x6xf32> -> vector<6x6xf32>
    %c0_366 = arith.constant 0 : index
    %c0_367 = arith.constant 0 : index
    %c84_368 = arith.constant 84 : index
    %1144 = vector.load %arg6[%c0_366, %c0_367, %c84_368] : memref<1x6x96xf32, #tpu.memory_space<vmem>>, vector<1x6x6xf32>
    %1145 = vector.shape_cast %1144 : vector<1x6x6xf32> to vector<6x6xf32>
    %1146 = vector.shape_cast %1143 : vector<6x6xf32> to vector<1x6x6xf32>
    tpu.vector_store %arg6[%c0_366, %c0_367, %c84_368], %1146 {strides = array<i32>} : memref<1x6x96xf32, #tpu.memory_space<vmem>>, vector<1x6x6xf32>,
    %c135 = arith.constant 135 : index
    %c0_369 = arith.constant 0 : index
    %1147 = vector.load %arg4[%c135, %c0_369] : memref<144x88xf32, #tpu.memory_space<vmem>>, vector<1x88xf32>
    %1148 = vector.broadcast %1147 : vector<1x88xf32> to vector<13x88xf32>
    %1149 = arith.mulf %358, %1148 : vector<13x88xf32>
    %c136 = arith.constant 136 : index
    %c0_370 = arith.constant 0 : index
    %1150 = vector.load %arg4[%c136, %c0_370] : memref<144x88xf32, #tpu.memory_space<vmem>>, vector<1x88xf32>
    %1151 = vector.broadcast %1150 : vector<1x88xf32> to vector<13x88xf32>
    %1152 = arith.mulf %359, %1151 : vector<13x88xf32>
    %1153 = arith.addf %1149, %1152 : vector<13x88xf32>
    %c137 = arith.constant 137 : index
    %c0_371 = arith.constant 0 : index
    %1154 = vector.load %arg4[%c137, %c0_371] : memref<144x88xf32, #tpu.memory_space<vmem>>, vector<1x88xf32>
    %1155 = vector.broadcast %1154 : vector<1x88xf32> to vector<13x88xf32>
    %1156 = arith.mulf %360, %1155 : vector<13x88xf32>
    %1157 = arith.addf %1153, %1156 : vector<13x88xf32>
    %c138 = arith.constant 138 : index
    %c0_372 = arith.constant 0 : index
    %1158 = vector.load %arg4[%c138, %c0_372] : memref<144x88xf32, #tpu.memory_space<vmem>>, vector<1x88xf32>
    %1159 = vector.broadcast %1158 : vector<1x88xf32> to vector<13x88xf32>
    %1160 = arith.mulf %361, %1159 : vector<13x88xf32>
    %1161 = arith.addf %1157, %1160 : vector<13x88xf32>
    %c139 = arith.constant 139 : index
    %c0_373 = arith.constant 0 : index
    %1162 = vector.load %arg4[%c139, %c0_373] : memref<144x88xf32, #tpu.memory_space<vmem>>, vector<1x88xf32>
    %1163 = vector.broadcast %1162 : vector<1x88xf32> to vector<13x88xf32>
    %1164 = arith.mulf %362, %1163 : vector<13x88xf32>
    %1165 = arith.addf %1161, %1164 : vector<13x88xf32>
    %c140 = arith.constant 140 : index
    %c0_374 = arith.constant 0 : index
    %1166 = vector.load %arg4[%c140, %c0_374] : memref<144x88xf32, #tpu.memory_space<vmem>>, vector<1x88xf32>
    %1167 = vector.broadcast %1166 : vector<1x88xf32> to vector<13x88xf32>
    %1168 = arith.mulf %363, %1167 : vector<13x88xf32>
    %1169 = arith.addf %1165, %1168 : vector<13x88xf32>
    %c141 = arith.constant 141 : index
    %c0_375 = arith.constant 0 : index
    %1170 = vector.load %arg4[%c141, %c0_375] : memref<144x88xf32, #tpu.memory_space<vmem>>, vector<1x88xf32>
    %1171 = vector.broadcast %1170 : vector<1x88xf32> to vector<13x88xf32>
    %1172 = arith.mulf %364, %1171 : vector<13x88xf32>
    %1173 = arith.addf %1169, %1172 : vector<13x88xf32>
    %c142 = arith.constant 142 : index
    %c0_376 = arith.constant 0 : index
    %1174 = vector.load %arg4[%c142, %c0_376] : memref<144x88xf32, #tpu.memory_space<vmem>>, vector<1x88xf32>
    %1175 = vector.broadcast %1174 : vector<1x88xf32> to vector<13x88xf32>
    %1176 = arith.mulf %365, %1175 : vector<13x88xf32>
    %1177 = arith.addf %1173, %1176 : vector<13x88xf32>
    %c143 = arith.constant 143 : index
    %c0_377 = arith.constant 0 : index
    %1178 = vector.load %arg4[%c143, %c0_377] : memref<144x88xf32, #tpu.memory_space<vmem>>, vector<1x88xf32>
    %1179 = vector.broadcast %1178 : vector<1x88xf32> to vector<13x88xf32>
    %1180 = arith.mulf %366, %1179 : vector<13x88xf32>
    %1181 = arith.addf %1177, %1180 : vector<13x88xf32>
    %cst_378 = arith.constant dense<0.000000e+00> : vector<13x13xf32>
    %1182 = tpu.matmul %1181, %52, %cst_378 {dimension_numbers = #tpu.dot_dimension_numbers<[1], [0], [0], [1], [0, 0, 1, 1], [], []>} : vector<13x88xf32>, vector<88x13xf32>, vector<13x13xf32> -> vector<13x13xf32>
    %c15_379 = arith.constant 15 : index
    %1183 = memref.load %arg5[%c15_379] : memref<16xf32, #tpu.memory_space<smem>>
    %1184 = vector.broadcast %1183 : f32 to vector<13x13xf32>
    %1185 = arith.addf %1182, %1184 : vector<13x13xf32>
    %cst_380 = arith.constant 0.000000e+00 : f32
    %1186 = vector.broadcast %cst_380 : f32 to vector<13x13xf32>
    %1187 = arith.maximumf %1185, %1186 : vector<13x13xf32>
    %1188 = vector.extract_strided_slice %1187 {offsets = [0, 0], sizes = [13, 12], strides = [1, 1]} : vector<13x13xf32> to vector<13x12xf32>
    %1189 = vector.extract_strided_slice %1187 {offsets = [0, 1], sizes = [13, 12], strides = [1, 1]} : vector<13x13xf32> to vector<13x12xf32>
    %1190 = arith.maximumf %1188, %1189 : vector<13x12xf32>
    %1191 = vector.extract_strided_slice %1190 {offsets = [0, 0], sizes = [12, 12], strides = [1, 1]} : vector<13x12xf32> to vector<12x12xf32>
    %1192 = vector.extract_strided_slice %1190 {offsets = [1, 0], sizes = [12, 12], strides = [1, 1]} : vector<13x12xf32> to vector<12x12xf32>
    %1193 = arith.maximumf %1191, %1192 : vector<12x12xf32>
    %cst_381 = arith.constant dense<0.000000e+00> : vector<6x12xf32>
    %1194 = tpu.matmul %20, %1193, %cst_381 {dimension_numbers = #tpu.dot_dimension_numbers<[1], [0], [0], [1], [0, 0, 1, 1], [], []>} : vector<6x12xf32>, vector<12x12xf32>, vector<6x12xf32> -> vector<6x12xf32>
    %cst_382 = arith.constant dense<0.000000e+00> : vector<6x6xf32>
    %1195 = tpu.matmul %1194, %27, %cst_382 {dimension_numbers = #tpu.dot_dimension_numbers<[1], [0], [0], [1], [0, 0, 1, 1], [], []>} : vector<6x12xf32>, vector<12x6xf32>, vector<6x6xf32> -> vector<6x6xf32>
    %c0_383 = arith.constant 0 : index
    %c0_384 = arith.constant 0 : index
    %c90_385 = arith.constant 90 : index
    %1196 = vector.load %arg6[%c0_383, %c0_384, %c90_385] : memref<1x6x96xf32, #tpu.memory_space<vmem>>, vector<1x6x6xf32>
    %1197 = vector.shape_cast %1196 : vector<1x6x6xf32> to vector<6x6xf32>
    %1198 = vector.shape_cast %1195 : vector<6x6xf32> to vector<1x6x6xf32>
    tpu.vector_store %arg6[%c0_383, %c0_384, %c90_385], %1198 {strides = array<i32>} : memref<1x6x96xf32, #tpu.memory_space<vmem>>, vector<1x6x6xf32>,
    return
  }
  func.func @transform_0(%arg0: i32) -> (i32, i32, i32, i32) {
    %c0_i32 = arith.constant 0 : i32
    %c0_i32_0 = arith.constant 0 : i32
    %c0_i32_1 = arith.constant 0 : i32
    %c0_i32_2 = arith.constant 0 : i32
    return %arg0, %c0_i32, %c0_i32_0, %c0_i32_1 : i32, i32, i32, i32
  }
  func.func @transform_1(%arg0: i32) -> i32 {
    %c0_i32 = arith.constant 0 : i32
    %c0_i32_0 = arith.constant 0 : i32
    return %c0_i32 : i32
  }
  func.func @transform_2(%arg0: i32) -> i32 {
    %c0_i32 = arith.constant 0 : i32
    %c0_i32_0 = arith.constant 0 : i32
    return %c0_i32 : i32
  }
  func.func @transform_3(%arg0: i32) -> (i32, i32) {
    %c0_i32 = arith.constant 0 : i32
    %c0_i32_0 = arith.constant 0 : i32
    %c0_i32_1 = arith.constant 0 : i32
    return %c0_i32, %c0_i32_0 : i32, i32
  }
  func.func @transform_4(%arg0: i32) -> i32 {
    %c0_i32 = arith.constant 0 : i32
    %c0_i32_0 = arith.constant 0 : i32
    return %c0_i32 : i32
  }
  func.func @transform_5(%arg0: i32) -> (i32, i32, i32) {
    %c0_i32 = arith.constant 0 : i32
    %c0_i32_0 = arith.constant 0 : i32
    %c0_i32_1 = arith.constant 0 : i32
    return %arg0, %c0_i32, %c0_i32_0 : i32, i32, i32
  }
}

</mosaic_0001>

<bundles_post_ra>
// kernel: net_forward.3
= control target key start
LH: loop header
LB: loop body
LE: loop exit
PB: predicated region body
PF: predicated region fallthrough
CT: control target
= control target key end

     0   :  { %12 = vsyncpa [#allocation3], 0  ;;  %s1163_s0 = inlined_call_operand.vmem [shape: f32[2,576], index: 0, kind: input, shape index: {}]   ;;  %s1164_s1 = inlined_call_operand.hbm [shape: f32[576,128], index: 1, kind: input, shape index: {}]   ;;  %s1165_s2 = inlined_call_operand.vmem [shape: f32[1,128], index: 2, kind: input, shape index: {}]   ;;  %s1166_s3 = inlined_call_operand.vmem [shape: f32[128,128], index: 3, kind: input, shape index: {}]   ;;  %s1167_s4 = inlined_call_operand.vmem [shape: f32[1,128], index: 4, kind: input, shape index: {}]   ;;  %s1168_s5 = inlined_call_operand.vmem [shape: f32[128,128], index: 5, kind: input, shape index: {}]   ;;  %s1169_s6 = inlined_call_operand.vmem [shape: f32[1,128], index: 6, kind: input, shape index: {}]   ;;  %s1170_s7 = inlined_call_operand.hbm [shape: f32[2,128], index: 7, kind: output, shape index: {}]  }
   0x1   :  { %13 = vsyncpa [#allocation4], 0  ;;  %s957_s24 = smov [#allocation2]   ;;  %s909_s28 = scalar_lea.hbm %s1164_s1, 9216 }
   0x2   :  { %s21_s25 = sshll.u32 %s957_s24, 4  ;;  %p910_p0 = scmp.ne.s32.totalorder %s1164_s1, %s909_s28  ;;  %s22_s25 = int_to_ptr.vmem [resolvable:$true] %s21_s25 }
   0x3   :  { %p913_p1 = scmp.lt.u32.totalorder %s909_s28, %s1164_s1 }
   0x5   :  { %p915_p2 = pnand %p913_p1, %p910_p0 }
   0x7   :  { %918 = shalt.err (!%p915_p2)
}
   0x8   :  { %s919_s10 = scalar_lea.vmem %s22_s25, 9216  ;;  %p924_p4 = scmp.lt.s32.totalorder %s22_s25, %s22_s25 }
   0x9   :  { %p920_p3 = scmp.ne.s32.totalorder %s22_s25, %s919_s10  ;;  %p925_p5 = scmp.lt.s32.totalorder %s919_s10, %s919_s10 }
   0xb   :  { %p926_p6 = por %p925_p5, %p924_p4 }
   0xd   :  { %p927_p7 = pnand %p926_p6, %p920_p3 }
   0xf   :  { %930 = shalt.err (!%p927_p7)
}
  0x10   :  { %s958_s11 = smov 128   ;;  %s959_s12 = smov 8  }
  0x11   :  { %27 = dma.hbm_to_vmem [thread:$0]  %s1164_s1, 9216, %s22_s25, [#allocation3], %s958_s11, %s958_s11, %s959_s12  }
  0x12   :  { %953 = dma.done.wait [#allocation3], 9216  }
  0x13   :  { %954 = vsyncadd [#allocation3], 4294958080  ;;  %v59_v0 = vld [vmem:[#allocation2 + $0x80] sm:$0xff]  ;;  %v60_v1 = vld [vmem:[#allocation2 + $0x88] sm:$0xff]  ;;  %v960_v43 = vmov 1983009808   ;;  %v128_v45 = vlaneseq }
  0x14   :  { %v43_v2 = vld [vmem:[#allocation2] sm:$0xff]  ;;  %v776_v3 = vpack.c.bf16 %v60_v1, %v59_v0  ;;  %v44_v4 = vld [vmem:[#allocation2 + $0x8] sm:$0xff]  ;;  %v61_v11 = vld [vmem:[#allocation2 + $0x90] sm:$0xff]  ;;  %v126_v44 = vunpack.c.l.s4 %v960_v43  ;;  %vm962_vm0 = vmmov 0   ;;  %vm152_vm1 = vcmask 523264  }
  0x15   :  { %v91_v5 = vld [vmem:[#allocation2 + $0x180] sm:$0xff]  ;;  %v92_v6 = vld [vmem:[#allocation2 + $0x188] sm:$0xff]  ;;  %v778_v7 = vpack.c.bf16 %v44_v4, %v43_v2  ;;  %v62_v13 = vld [vmem:[#allocation2 + $0x98] sm:$0xff]  ;;  %v129_v60 = vshrl.u32 %v128_v45, 7 }
  0x16   :  { %v808_v8 = vpack.c.bf16 %v92_v6, %v91_v5  ;;  %v75_v9 = vld [vmem:[#allocation2 + $0x100] sm:$0xff]  ;;  %v76_v10 = vld [vmem:[#allocation2 + $0x108] sm:$0xff]  ;;  %777 = vmatprep.subr.bf16.mxu0 %v776_v3  ;;  %v45_v14 = vld [vmem:[#allocation2 + $0x10] sm:$0xff]  ;;  %v780_v16 = vpack.c.bf16 %v62_v13, %v61_v11  ;;  %v127_v59 = vunpack.c.0.s8 %v126_v44 }
  0x17   :  { %v810_v12 = vpack.c.bf16 %v76_v10, %v75_v9  ;;  %v46_v15 = vld [vmem:[#allocation2 + $0x18] sm:$0xff]  ;;  %779 = vmatpush3.bf16.msra.mxu0 %v778_v7  ;;  %v93_v18 = vld [vmem:[#allocation2 + $0x190] sm:$0xff]  ;;  %v63_v23 = vld [vmem:[#allocation2 + $0xa0] sm:$0xff] }
  0x18   :  { %809 = vmatprep.subr.bf16.mxu1 %v808_v8  ;;  %v782_v17 = vpack.c.bf16 %v46_v15, %v45_v14  ;;  %v94_v19 = vld [vmem:[#allocation2 + $0x198] sm:$0xff]  ;;  %v77_v20 = vld [vmem:[#allocation2 + $0x110] sm:$0xff]  ;;  %v64_v24 = vld [vmem:[#allocation2 + $0xa8] sm:$0xff]  ;;  %781 = vmatprep.subr.bf16.mxu0 %v780_v16  ;;  %v130_v10 = vsub.s32 %v127_v59, %v129_v60 }
  0x19   :  { %811 = vmatpush3.bf16.msra.mxu1 %v810_v12  ;;  %v812_v21 = vpack.c.bf16 %v94_v19, %v93_v18  ;;  %v78_v22 = vld [vmem:[#allocation2 + $0x118] sm:$0xff]  ;;  %v784_v26 = vpack.c.bf16 %v64_v24, %v63_v23  ;;  %v47_v27 = vld [vmem:[#allocation2 + $0x20] sm:$0xff]  ;;  %v48_v28 = vld [vmem:[#allocation2 + $0x28] sm:$0xff] }
  0x1a   :  { %v814_v25 = vpack.c.bf16 %v78_v22, %v77_v20  ;;  %v95_v29 = vld [vmem:[#allocation2 + $0x1a0] sm:$0xff]  ;;  %v96_v30 = vld [vmem:[#allocation2 + $0x1a8] sm:$0xff]  ;;  %v786_v33 = vpack.c.bf16 %v48_v28, %v47_v27  ;;  %v65_v35 = vld [vmem:[#allocation2 + $0xb0] sm:$0xff] }
  0x1b   :  { %813 = vmatprep.subr.bf16.mxu1 %v812_v21  ;;  %v79_v31 = vld [vmem:[#allocation2 + $0x120] sm:$0xff]  ;;  %v80_v32 = vld [vmem:[#allocation2 + $0x128] sm:$0xff]  ;;  %783 = vmatpush3.bf16.msra.mxu0 %v782_v17  ;;  %v816_v34 = vpack.c.bf16 %v96_v30, %v95_v29  ;;  %v66_v36 = vld [vmem:[#allocation2 + $0xb8] sm:$0xff] }
  0x1c   :  { %v49_v37 = vld [vmem:[#allocation2 + $0x30] sm:$0xff]  ;;  %785 = vmatprep.subr.bf16.mxu0 %v784_v26  ;;  %v818_v38 = vpack.c.bf16 %v80_v32, %v79_v31  ;;  %v788_v39 = vpack.c.bf16 %v66_v36, %v65_v35  ;;  %v50_v40 = vld [vmem:[#allocation2 + $0x38] sm:$0xff]  ;;  %v67_v49 = vld [vmem:[#allocation2 + $0xc0] sm:$0xff] }
  0x1d   :  { %815 = vmatpush3.bf16.msra.mxu1 %v814_v25  ;;  %v97_v41 = vld [vmem:[#allocation2 + $0x1b0] sm:$0xff]  ;;  %v98_v42 = vld [vmem:[#allocation2 + $0x1b8] sm:$0xff]  ;;  %v68_v50 = vld [vmem:[#allocation2 + $0xc8] sm:$0xff]  ;;  %v790_v51 = vpack.c.bf16 %v50_v40, %v49_v37 }
  0x1e   :  { %817 = vmatprep.subr.bf16.mxu1 %v816_v34  ;;  %v820_v46 = vpack.c.bf16 %v98_v42, %v97_v41  ;;  %v81_v47 = vld [vmem:[#allocation2 + $0x130] sm:$0xff]  ;;  %v82_v48 = vld [vmem:[#allocation2 + $0x138] sm:$0xff]  ;;  %v99_v52 = vld [vmem:[#allocation2 + $0x1c0] sm:$0xff]  ;;  %v792_v55 = vpack.c.bf16 %v68_v50, %v67_v49  ;;  %v961_v49 = vmov 0.0|0.0  }
  0x1f   :  { %787 = vmatpush3.bf16.msra.mxu0 %v786_v33  ;;  %v100_v53 = vld [vmem:[#allocation2 + $0x1c8] sm:$0xff]  ;;  %v822_v54 = vpack.c.bf16 %v82_v48, %v81_v47  ;;  %v51_v56 = vld [vmem:[#allocation2 + $0x40] sm:$0xff]  ;;  %v69_v63 = vld [vmem:[#allocation2 + $0xd0] sm:$0xff] }
  0x20   :  { %789 = vmatprep.subr.bf16.mxu0 %v788_v39  ;;  %v52_v57 = vld [vmem:[#allocation2 + $0x48] sm:$0xff]  ;;  %v83_v58 = vld [vmem:[#allocation2 + $0x140] sm:$0xff]  ;;  %v824_v61 = vpack.c.bf16 %v100_v53, %v99_v52  ;;  %v70_v0 = vld [vmem:[#allocation2 + $0xd8] sm:$0xff] }
  0x21   :  { %819 = vmatpush3.bf16.msra.mxu1 %v818_v38  ;;  %v84_v62 = vld [vmem:[#allocation2 + $0x148] sm:$0xff]  ;;  %v101_v1 = vld [vmem:[#allocation2 + $0x1d0] sm:$0xff]  ;;  %v102_v2 = vld [vmem:[#allocation2 + $0x1d8] sm:$0xff]  ;;  %v794_v3 = vpack.c.bf16 %v52_v57, %v51_v56  ;;  %v796_v6 = vpack.c.bf16 %v70_v0, %v69_v63 }
  0x22   :  { %821 = vmatprep.subr.bf16.mxu1 %v820_v46  ;;  %v53_v4 = vld [vmem:[#allocation2 + $0x50] sm:$0xff]  ;;  %v826_v5 = vpack.c.bf16 %v84_v62, %v83_v58  ;;  %v54_v7 = vld [vmem:[#allocation2 + $0x58] sm:$0xff]  ;;  %v828_v11 = vpack.c.bf16 %v102_v2, %v101_v1  ;;  %v71_v12 = vld [vmem:[#allocation2 + $0xe0] sm:$0xff]  ;;  %v963_v58 = vmov 0.0  }
  0x23   :  { %791 = vmatpush3.bf16.msra.mxu0 %v790_v51  ;;  %v85_v8 = vld [vmem:[#allocation2 + $0x150] sm:$0xff]  ;;  %v86_v9 = vld [vmem:[#allocation2 + $0x158] sm:$0xff]  ;;  %v72_v13 = vld [vmem:[#allocation2 + $0xe8] sm:$0xff]  ;;  %v798_v16 = vpack.c.bf16 %v54_v7, %v53_v4 }
  0x24   :  { %793 = vmatprep.subr.bf16.mxu0 %v792_v55  ;;  %v103_v14 = vld [vmem:[#allocation2 + $0x1e0] sm:$0xff]  ;;  %v104_v15 = vld [vmem:[#allocation2 + $0x1e8] sm:$0xff]  ;;  %v830_v17 = vpack.c.bf16 %v86_v9, %v85_v8  ;;  %v800_v19 = vpack.c.bf16 %v72_v13, %v71_v12  ;;  %v73_v27 = vld [vmem:[#allocation2 + $0xf0] sm:$0xff] }
  0x25   :  { %823 = vmatpush3.bf16.msra.mxu1 %v822_v54  ;;  %v41_v18 = vld [vmem:[%s1163_s0] sm:$0xff]  ;;  %v56_v21 = vld [vmem:[#allocation2 + $0x68] sm:$0xff]  ;;  %v832_v25 = vpack.c.bf16 %v104_v15, %v103_v14  ;;  %v74_v28 = vld [vmem:[#allocation2 + $0xf8] sm:$0xff] }
  0x26   :  { %825 = vmatprep.subr.bf16.mxu1 %v824_v61  ;;  %v55_v20 = vld [vmem:[#allocation2 + $0x60] sm:$0xff]  ;;  %v131_v23 = vrot.slane %v41_v18, %v130_v10  ;;  %v124_v24 = vcombine.high %v41_v18, %v41_v18  ;;  %v88_v26 = vld [vmem:[#allocation2 + $0x168] sm:$0xff]  ;;  %v105_v29 = vld [vmem:[#allocation2 + $0x1f0] sm:$0xff]  ;;  %v804_v35 = vpack.c.bf16 %v74_v28, %v73_v27 }
  0x27   :  { %795 = vmatpush3.bf16.msra.mxu0 %v794_v3  ;;  %v87_v22 = vld [vmem:[#allocation2 + $0x160] sm:$0xff]  ;;  %v106_v30 = vld [vmem:[#allocation2 + $0x1f8] sm:$0xff]  ;;  %v802_v33 = vpack.c.bf16 %v56_v21, %v55_v20  ;;  %v57_v36 = vld [vmem:[#allocation2 + $0x70] sm:$0xff] }
  0x28   :  { %797 = vmatprep.subr.bf16.mxu0 %v796_v6  ;;  %v139_v31 = vcombine.high %v131_v23, %v131_v23  ;;  %v138_v32 = vrot.slane %v124_v24, %v130_v10  ;;  %v834_v34 = vpack.c.bf16 %v88_v26, %v87_v22  ;;  %v58_v37 = vld [vmem:[#allocation2 + $0x78] sm:$0xff]  ;;  %v836_v39 = vpack.c.bf16 %v106_v30, %v105_v29  ;;  %v89_v40 = vld [vmem:[#allocation2 + $0x170] sm:$0xff]  ;;  %v107_v44 = vld [vmem:[#allocation2 + $0x200] sm:$0xff] }
  0x29   :  { %827 = vmatpush3.bf16.msra.mxu1 %v826_v5  ;;  %v90_v41 = vld [vmem:[#allocation2 + $0x178] sm:$0xff]  ;;  %v806_v42 = vpack.c.bf16 %v58_v37, %v57_v36  ;;  %v108_v45 = vld [vmem:[#allocation2 + $0x208] sm:$0xff]  ;;  %v366_v46 = vld [vmem:[%s1166_s3] sm:$0xff] }
  0x2a   :  { %829 = vmatprep.subr.bf16.mxu1 %v828_v11  ;;  %v140_v38 = vcombine.high %v138_v32, %v138_v32  ;;  %219 = vmatprep.mubr.f32.mxu0 %v139_v31  ;;  %v838_v43 = vpack.c.bf16 %v90_v41, %v89_v40  ;;  %v367_v47 = vld [vmem:[%s1166_s3 + $0x8] sm:$0xff]  ;;  %v841_v48 = vpack.c.bf16 %v108_v45, %v107_v44  ;;  %v109_v50 = vld [vmem:[#allocation2 + $0x210] sm:$0xff]  ;;  %v110_v51 = vld [vmem:[#allocation2 + $0x218] sm:$0xff] }
  0x2b   :  { %799 = vmatpush3.bf16.msra.mxu0 %v798_v16  ;;  %v853_v52 = vpack.c.bf16 %v367_v47, %v366_v46  ;;  %v368_v53 = vld [vmem:[%s1166_s3 + $0x10] sm:$0xff]  ;;  %v369_v54 = vld [vmem:[%s1166_s3 + $0x18] sm:$0xff]  ;;  %v844_v55 = vpack.c.bf16 %v110_v51, %v109_v50  ;;  %v111_v56 = vld [vmem:[#allocation2 + $0x220] sm:$0xff] }
  0x2c   :  { %801 = vmatprep.subr.bf16.mxu0 %v800_v19  ;;  %289 = vmatprep.mubr.f32.mxu1 %v140_v38  ;;  %v112_v57 = vld [vmem:[#allocation2 + $0x228] sm:$0xff]  ;;  %v856_v59 = vpack.c.bf16 %v369_v54, %v368_v53  ;;  %v370_v60 = vld [vmem:[%s1166_s3 + $0x20] sm:$0xff]  ;;  %v113_v63 = vld [vmem:[#allocation2 + $0x230] sm:$0xff] }
  0x2d   :  { %831 = vmatpush3.bf16.msra.mxu1 %v830_v17  ;;  %v371_v61 = vld [vmem:[%s1166_s3 + $0x28] sm:$0xff]  ;;  %v847_v62 = vpack.c.bf16 %v112_v57, %v111_v56  ;;  %v114_v0 = vld [vmem:[#allocation2 + $0x238] sm:$0xff]  ;;  %v372_v4 = vld [vmem:[%s1166_s3 + $0x30] sm:$0xff] }
  0x2e   :  { %833 = vmatprep.subr.bf16.mxu1 %v832_v25  ;;  %v859_v1 = vpack.c.bf16 %v371_v61, %v370_v60  ;;  %v850_v2 = vpack.c.bf16 %v114_v0, %v113_v63  ;;  %v570_v3 = vld.sshfl [vmem:[%s1163_s0 + $0x8] sm:$0x3 pattern:$0x76325410]  ;;  %v373_v5 = vld [vmem:[%s1166_s3 + $0x38] sm:$0xff]  ;;  %v374_v7 = vld [vmem:[%s1166_s3 + $0x40] sm:$0xff] }
  0x2f   :  { %803 = vmatpush3.bf16.msra.mxu0 %v802_v33  ;;  %v862_v6 = vpack.c.bf16 %v373_v5, %v372_v4  ;;  %v375_v8 = vld [vmem:[%s1166_s3 + $0x48] sm:$0xff]  ;;  %v376_v10 = vld [vmem:[%s1166_s3 + $0x50] sm:$0xff]  ;;  %v377_v11 = vld [vmem:[%s1166_s3 + $0x58] sm:$0xff]  ;;  %s964_s0 = smov [#allocation5]  }
  0x30   :  { %805 = vmatprep.subr.bf16.mxu0 %v804_v35  ;;  %v865_v9 = vpack.c.bf16 %v375_v8, %v374_v7  ;;  %v868_v12 = vpack.c.bf16 %v377_v11, %v376_v10  ;;  %v378_v13 = vld [vmem:[%s1166_s3 + $0x60] sm:$0xff]  ;;  %v379_v14 = vld [vmem:[%s1166_s3 + $0x68] sm:$0xff]  ;;  %v380_v16 = vld [vmem:[%s1166_s3 + $0x70] sm:$0xff]  ;;  %s560_s12 = sshll.u32 %s964_s0, 4  ;;  %s561_s12 = int_to_ptr.vmem [resolvable:$true] %s560_s12 }
  0x31   :  { %835 = vmatpush3.bf16.msra.mxu1 %v834_v34  ;;  %v871_v15 = vpack.c.bf16 %v379_v14, %v378_v13  ;;  %v381_v17 = vld [vmem:[%s1166_s3 + $0x78] sm:$0xff]  ;;  %v460_v19 = vld [vmem:[%s1168_s5] sm:$0xff]  ;;  %v461_v20 = vld [vmem:[%s1168_s5 + $0x8] sm:$0xff]  ;;  %p936_p9 = scmp.lt.s32.totalorder %s561_s12, %s561_s12 }
  0x32   :  { %837 = vmatprep.subr.bf16.mxu1 %v836_v39  ;;  %v874_v18 = vpack.c.bf16 %v381_v17, %v380_v16  ;;  %v462_v21 = vld [vmem:[%s1168_s5 + $0x10] sm:$0xff]  ;;  %v877_v22 = vpack.c.bf16 %v461_v20, %v460_v19  ;;  %v464_v25 = vld [vmem:[%s1168_s5 + $0x20] sm:$0xff]  ;;  %v465_v26 = vld [vmem:[%s1168_s5 + $0x28] sm:$0xff] }
  0x33   :  { %807 = vmatpush3.bf16.msra.mxu0 %v806_v42  ;;  %v883_v27 = vpack.c.bf16 %v465_v26, %v464_v25  ;;  %v466_v28 = vld [vmem:[%s1168_s5 + $0x30] sm:$0xff]  ;;  %v467_v29 = vld [vmem:[%s1168_s5 + $0x38] sm:$0xff]  ;;  %v468_v31 = vld [vmem:[%s1168_s5 + $0x40] sm:$0xff] }
  0x34   :  { %840 = vmatprep.subr.bf16.mxu0 %v961_v49  ;;  %v886_v30 = vpack.c.bf16 %v467_v29, %v466_v28  ;;  %v470_v34 = vld [vmem:[%s1168_s5 + $0x50] sm:$0xff]  ;;  %v471_v35 = vld [vmem:[%s1168_s5 + $0x58] sm:$0xff]  ;;  %v472_v37 = vld [vmem:[%s1168_s5 + $0x60] sm:$0xff] }
  0x35   :  { %839 = vmatpush3.bf16.msra.mxu1 %v838_v43  ;;  %v892_v36 = vpack.c.bf16 %v471_v35, %v470_v34  ;;  %v473_v38 = vld [vmem:[%s1168_s5 + $0x68] sm:$0xff]  ;;  %v569_v41 = vld [vmem:[%s1165_s2] ss:$0 sm:$0xff]  ;;  %v475_v54 = vld [vmem:[%s1168_s5 + $0x78] sm:$0xff] }
  0x36   :  { %852 = vmatprep.subr.bf16.mxu1 %v961_v49  ;;  %220 = vmatmul.mubr.f32.vlgmr.msra.gmra.mrb[0].mxu0 %v131_v23  ;;  %v463_v23 = vld [vmem:[%s1168_s5 + $0x18] sm:$0xff]  ;;  %v895_v39 = vpack.c.bf16 %v473_v38, %v472_v37  ;;  %v572_v56 = vld [vmem:[%s1167_s4] ss:$0 sm:$0xff] }
  0x37   :  { %842 = vmatpush3.bf16.msra.mxu0 %v841_v48  ;;  %703 = vmatprep.mubr.msk.f32.mxu0 %vm962_vm0, %v963_v58  ;;  %v880_v24 = vpack.c.bf16 %v463_v23, %v462_v21  ;;  %v573_v61 = vld [vmem:[%s1169_s6] ss:$0 sm:$0xff] }
  0x38   :  { %290 = vmatmul.mubr.f32.vlgmr.msra.gmra.mrb[0].mxu1 %v138_v32  ;;  %843 = vmatprep.subr.bf16.mxu0 %v961_v49  ;;  %v469_v32 = vld [vmem:[%s1168_s5 + $0x48] sm:$0xff] }
  0x39   :  { %854 = vmatpush3.bf16.msra.mxu1 %v853_v52  ;;  %738 = vmatprep.mubr.msk.f32.mxu1 %vm962_vm0, %v963_v58  ;;  %v889_v33 = vpack.c.bf16 %v469_v32, %v468_v31 }
  0x3a   :  { %855 = vmatprep.subr.bf16.mxu1 %v961_v49 }
  0x3b   :  { %845 = vmatpush3.bf16.msra.mxu0 %v844_v55 }
  0x3c   :  { %846 = vmatprep.subr.bf16.mxu0 %v961_v49 }
  0x3d   :  { %857 = vmatpush3.bf16.msra.mxu1 %v856_v59 }
  0x3e   :  { %858 = vmatprep.subr.bf16.mxu1 %v961_v49 }
  0x3f   :  { %848 = vmatpush3.bf16.msra.mxu0 %v847_v62 }
  0x40   :  { %849 = vmatprep.subr.bf16.mxu0 %v961_v49 }
  0x41   :  { %860 = vmatpush3.bf16.msra.mxu1 %v859_v1 }
  0x42   :  { %861 = vmatprep.subr.bf16.mxu1 %v961_v49 }
  0x43   :  { %851 = vmatpush3.bf16.msra.mxu0 %v850_v2 }
  0x44   :  { %876 = vmatprep.subr.bf16.mxu0 %v961_v49 }
  0x45   :  { %863 = vmatpush3.bf16.msra.mxu1 %v862_v6 }
  0x46   :  { %704 = vmatmul.mubr.msk.f32.vlgmr.msra.gmra.mrb[2].mxu0 %vm152_vm1, %v570_v3  ;;  %864 = vmatprep.subr.bf16.mxu1 %v961_v49 }
  0x47   :  { %773 = vmatprep.mubr.msk.f32.mxu0 %vm962_vm0, %v963_v58  ;;  %878 = vmatpush3.bf16.msra.mxu0 %v877_v22 }
  0x48   :  { %879 = vmatprep.subr.bf16.mxu0 %v961_v49 }
  0x49   :  { %866 = vmatpush3.bf16.msra.mxu1 %v865_v9 }
  0x4a   :  { %867 = vmatprep.subr.bf16.mxu1 %v961_v49 }
  0x4b   :  { %881 = vmatpush3.bf16.msra.mxu0 %v880_v24 }
  0x4c   :  { %882 = vmatprep.subr.bf16.mxu0 %v961_v49 }
  0x4d   :  { %869 = vmatpush3.bf16.msra.mxu1 %v868_v12 }
  0x4e   :  { %870 = vmatprep.subr.bf16.mxu1 %v961_v49 }
  0x4f   :  { %884 = vmatpush3.bf16.msra.mxu0 %v883_v27 }
  0x50   :  { %885 = vmatprep.subr.bf16.mxu0 %v961_v49 }
  0x51   :  { %872 = vmatpush3.bf16.msra.mxu1 %v871_v15 }
  0x52   :  { %873 = vmatprep.subr.bf16.mxu1 %v961_v49 }
  0x53   :  { %887 = vmatpush3.bf16.msra.mxu0 %v886_v30 }
  0x54   :  { %888 = vmatprep.subr.bf16.mxu0 %v961_v49 }
  0x55   :  { %875 = vmatpush3.bf16.msra.mxu1 %v874_v18 }
  0x57   :  { %890 = vmatpush3.bf16.msra.mxu0 %v889_v33 }
  0x58   :  { %891 = vmatprep.subr.bf16.mxu0 %v961_v49 }
  0x5b   :  { %893 = vmatpush3.bf16.msra.mxu0 %v892_v36 }
  0x5c   :  { %894 = vmatprep.subr.bf16.mxu0 %v961_v49 }
  0x5f   :  { %896 = vmatpush3.bf16.msra.mxu0 %v895_v39 }
  0x60   :  { %897 = vmatprep.subr.bf16.mxu0 %v961_v49  ;;  %v474_v49 = vld [vmem:[%s1168_s5 + $0x70] sm:$0xff]  ;;  %s931_s5 = scalar_lea.vmem %s561_s12, 32 }
  0x61   :  { %v898_v55 = vpack.c.bf16 %v475_v54, %v474_v49  ;;  %p932_p8 = scmp.ne.s32.totalorder %s561_s12, %s931_s5  ;;  %p937_p10 = scmp.lt.s32.totalorder %s931_s5, %s931_s5 }
  0x63   :  { %899 = vmatpush3.bf16.msra.mxu0 %v898_v55  ;;  %p938_p11 = por %p937_p10, %p936_p9 }
  0x65   :  { %p939_p12 = pnand %p938_p11, %p932_p8 }
 0x109   :  { %v606_v40 = vpop.f32.mrb[0].mxu0 }
 0x10a   :  { %v607_v42 = vpop.f32.mrb[1].mxu0 }
 0x10b   :  { %v641_v43 = vpop.f32.mrb[0].mxu1  ;;  %v608_v44 = vadd.f32 %v607_v42, %v606_v40 }
 0x10c   :  { %v642_v45 = vpop.f32.mrb[1].mxu1 }
 0x10d   :  { %v643_v46 = vadd.f32 %v642_v45, %v641_v43  ;;  %v222_v47 = vadd.f32 %v608_v44, %v569_v41 }
 0x10f   :  { %v292_v48 = vadd.f32 %v643_v46, %v222_v47 }
 0x119   :  { %v361_v50 = vpop.f32.mrb[2].mxu0 }
 0x11a   :  { %v362_v51 = vadd.f32 %v361_v50, %v292_v48  ;;  %v705_v52 = vpop.f32.mrb[3].mxu0 }
 0x11c   :  { %v365_v53 = vmax.f32 %v362_v51, 0.0 }
 0x11e   :  { %739 = vmatmul.mubr.f32.vlgmr.msra.gmra.mrb[2].mxu1 %v365_v53 }
 0x1f1   :  { %v455_v57 = vpop.f32.mrb[2].mxu1 }
 0x1f2   :  { %v456_v58 = vadd.f32 %v572_v56, %v455_v57  ;;  %v740_v59 = vpop.f32.mrb[3].mxu1 }
 0x1f4   :  { %v459_v60 = vmax.f32 %v456_v58, 0.0 }
 0x1f6   :  { %774 = vmatmul.mubr.f32.vlgmr.msra.gmra.mrb[4].mxu0 %v459_v60 }
 0x2c9   :  { %v549_v62 = vpop.f32.mrb[4].mxu0 }
 0x2ca   :  { %v550_v63 = vadd.f32 %v573_v61, %v549_v62  ;;  %v775_v0 = vpop.f32.mrb[5].mxu0 }
 0x2cc   :  { %553 = vst [vmem:[#allocation5] sm:$0x3] %v550_v63 }
 0x2cd   :  { %942 = shalt.err (!%p939_p12)
}
 0x2ce   :  { %s943_s14 = scalar_lea.hbm %s1170_s7, 32 }
 0x2cf   :  { %p944_p13 = scmp.ne.s32.totalorder %s1170_s7, %s943_s14  ;;  %p947_p0 = scmp.lt.u32.totalorder %s943_s14, %s1170_s7 }
 0x2d1   :  { %p949_p1 = pnand %p947_p0, %p944_p13 }
 0x2d3   :  { %952 = shalt.err (!%p949_p1)
}
 0x2d4   :  { %563 = dma.vmem_to_hbm [thread:$0]  %s561_s12, 32, %s1170_s7, [#allocation4]  }
 0x2d5   :  { %955 = dma.done.wait [#allocation4], 32  }
 0x2d6   :  { %956 = vsyncadd [#allocation4], 4294967264 }
 0x2d7   :  { %567 = vsyncpa [#allocation3], 1 }
 0x2d8   :  { %568 = vsyncpa [#allocation4], 1 }

// kernel: net_forward.2
= control target key start
LH: loop header
LB: loop body
LE: loop exit
PB: predicated region body
PF: predicated region fallthrough
CT: control target
= control target key end

     0   :  { %10 = vsyncpa [#allocation4], 0  ;;  %s16205_s0 = inlined_call_operand.hbm [shape: f32[2,1,32,32], index: 0, kind: input, shape index: {}]   ;;  %s16206_s1 = inlined_call_operand.vmem [shape: f32[54], index: 1, kind: input, shape index: {}]   ;;  %s16207_s2 = inlined_call_operand.vmem [shape: f32[6], index: 2, kind: input, shape index: {}]   ;;  %s16208_s3 = inlined_call_operand.hbm [shape: f32[144,88], index: 3, kind: input, shape index: {}]   ;;  %s16209_s4 = inlined_call_operand.vmem [shape: f32[16], index: 4, kind: input, shape index: {}]   ;;  %s16210_s5 = inlined_call_operand.vmem [shape: f32[2,6,96], index: 5, kind: output, shape index: {}]  }
   0x1   :  { %12 = vsyncpa [#allocation4 + $0x1], 0 }
   0x2   :  { %13 = vsyncpa [#allocation5], 0 }
   0x3   :  { %14 = vsyncpa [#allocation8], 0 }
   0x4   :  { %15 = vsyncpa [#allocation10], 0  ;;  %s12632_s18 = smov 0   ;;  %s12634_s19 = smov 0  }
   0x5   :  { %s12636_s20 = smov 0   ;;  %s12638_s21 = smov 0  }
   0x6 LB: > { %s12651_s22 = sadd.s32 4294967295, %s12565_s21   ;;  %p41_p0 = scmp.ne.s32.totalorder %s12557_s19, %s12553_s18  ;;  %s12565_s21 = sphi %s12638_s21, %s16573_s21   ;;  %s12561_s20 = sphi %s12636_s20, %s16572_s20   ;;  %s12557_s19 = sphi %s12634_s19, %s16571_s19   ;;  %s12553_s18 = sphi %s12632_s18, %s16570_s18  }
   0x7   : > { %p16211_p1 = scmp.eq.s32.totalorder %s12651_s22, 0  ;;  %p9878_p2 = scmp.ge.s32.totalorder %s12565_s21, 1 }
   0x8   : > { %p162_p3 = scmp.lt.s32.totalorder %s12565_s21, 3  ;;  %s186_s26 = sshll.u32 %s16207_s2, 4  ;;  %s187_s26 = int_to_ptr.vmem [resolvable:$true] %s186_s26 }
   0x9   : > { %p12659_p4 = por %p16211_p1, %p41_p0  ;;  %s175_s30 = sshll.u32 %s16206_s1, 4  ;;  %s176_s30 = int_to_ptr.vmem [resolvable:$true] %s175_s30 }
   0xa   : > { %p12666_p5 = pnand %p9878_p2, %p162_p3  ;;  %s12567_s7 = smov [#allocation9]  }
   0xb   : > { %s16265_s23 = scalar_select %p12659_p4, 1, 0 }
   0xc   : > { %s16266_s27 = scalar_select %p12666_p5, 1, 0 }
   0xd   : > { %p12159_p6 = pneg %p12666_p5  ;;  %s196_s8 = sshll.u32 %s12567_s7, 4  ;;  %s12681_s8 = int_to_ptr.vmem [resolvable:$true] %s196_s8 }
   0xe   : > { %s12412_s9 = scalar_lea.vmem %s187_s26, 16  ;;  %p12420_p12 = scmp.lt.s32.totalorder %s187_s26, %s187_s26 }
   0xf   : > { %p12677_p7 = pnand %p12159_p6, %p16211_p1  ;;  %p12413_p8 = scmp.ne.s32.totalorder %s187_s26, %s12412_s9 }
  0x10   : > { %p12421_p13 = scmp.lt.s32.totalorder %s12412_s9, %s12412_s9 }
  0x11   : > { %p12685_p9 = pneg %p12677_p7 }
  0x12   : > { %p12422_p0 = por %p12421_p13, %p12420_p12 }
  0x13   : > { %p12415_p10 = pnand %p12685_p9, %p12413_p8 }
  0x15   : > { %p12416_p11 = pneg %p12415_p10 }
  0x17   : > { %p12423_p2 = pnand %p12422_p0, %p12416_p11 }
  0x19   : > { %12426 = shalt.err (!%p12423_p2)
}
  0x1a   : > { %s12568_s11 = smov [#allocation7]   ;;  %s12427_s12 = scalar_lea.vmem %s176_s30, 16 }
  0x1b   : > { %12165 = dma.vmem_to_smem (!%p12677_p7), %s187_s26, 16, %s12568_s11, [#allocation8]  }
  0x1c   : > { %p12428_p3 = scmp.ne.s32.totalorder %s176_s30, %s12427_s12  ;;  %p12435_p4 = scmp.lt.s32.totalorder %s176_s30, %s176_s30 }
  0x1d   : > { %p12436_p5 = scmp.lt.s32.totalorder %s12427_s12, %s12427_s12 }
  0x1e   : > { %p12430_p6 = pnand %p12428_p3, %p12685_p9 }
  0x1f   : > { %p12437_p8 = por %p12436_p5, %p12435_p4 }
  0x20   : > { %p12431_p1 = pneg %p12430_p6 }
  0x22   : > { %p12438_p10 = pnand %p12437_p8, %p12431_p1 }
  0x24   : > { %12441 = shalt.err (!%p12438_p10)
}
  0x25   : > { %s12569_s13 = smov [#allocation6]   ;;  %s210_s16 = sshll.u32 %s16209_s4, 4  ;;  %s211_s16 = int_to_ptr.vmem [resolvable:$true] %s210_s16 }
  0x26   : > { %12162 = dma.vmem_to_smem (!%p12677_p7), %s176_s30, 16, %s12569_s13, [#allocation5]  }
  0x27   : > { %s12442_s24 = scalar_lea.hbm %s16208_s3, 2304 }
  0x28   : > { %p12443_p11 = scmp.ne.s32.totalorder %s16208_s3, %s12442_s24  ;;  %p12449_p5 = scmp.lt.u32.totalorder %s12442_s24, %s16208_s3 }
  0x2a   : > { %p12445_p1 = pnand %p12443_p11, %p12685_p9 }
  0x2c   : > { %p12446_p4 = pneg %p12445_p1 }
  0x2e   : > { %p12451_p12 = pnand %p12449_p5, %p12446_p4 }
  0x30   : > { %12454 = shalt.err (!%p12451_p12)
}
  0x31   : > { %s12455_s30 = scalar_lea.vmem %s12681_s8, 2304  ;;  %p12463_p3 = scmp.lt.s32.totalorder %s12681_s8, %s12681_s8 }
  0x32   : > { %p12456_p13 = scmp.ne.s32.totalorder %s12681_s8, %s12455_s30  ;;  %p12464_p6 = scmp.lt.s32.totalorder %s12455_s30, %s12455_s30 }
  0x34   : > { %p12458_p0 = pnand %p12456_p13, %p12685_p9  ;;  %p12465_p8 = por %p12464_p6, %p12463_p3 }
  0x36   : > { %p12459_p2 = pneg %p12458_p0 }
  0x38   : > { %p12466_p10 = pnand %p12465_p8, %p12459_p2 }
  0x3a   : > { %12469 = shalt.err (!%p12466_p10)
}
  0x3b   : > { %s12570_s7 = smov 128   ;;  %s12571_s9 = smov 8  }
  0x3c   : > { %12168 = dma.hbm_to_vmem [thread:$0]  (!%p12677_p7), %s16208_s3, 2304, %s12681_s8, [#allocation10], %s12570_s7, %s12570_s7, %s12571_s9  }
  0x3d   : > { %s12470_s13 = scalar_lea.vmem %s211_s16, 16  ;;  %p12478_p5 = scmp.lt.s32.totalorder %s211_s16, %s211_s16 }
  0x3e   : > { %p12471_p11 = scmp.ne.s32.totalorder %s211_s16, %s12470_s13  ;;  %p12479_p12 = scmp.lt.s32.totalorder %s12470_s13, %s12470_s13 }
  0x40   : > { %p12473_p1 = pnand %p12471_p11, %p12685_p9  ;;  %p12480_p13 = por %p12479_p12, %p12478_p5 }
  0x42   : > { %p12474_p4 = pneg %p12473_p1 }
  0x44   : > { %p12481_p0 = pnand %p12480_p13, %p12474_p4 }
  0x46   : > { %12484 = shalt.err (!%p12481_p0)
}
  0x47   : > { %s12572_s14 = smov [#allocation11]   ;;  %s12731_s8 = sadd.s32 1, %s12565_s21  }
  0x48   : > { %12171 = dma.vmem_to_smem (!%p12677_p7), %s211_s16, 16, %s12572_s14, [#allocation8]  }
  0x49   : > { %s25_s10 = ssub.s32 %s12565_s21, %s12731_s8  ;;  %s28_s15 = sadd.s32 1, %s12561_s20 }
  0x4a   : > { %p26_p9 = scmp.eq.s32.totalorder %s25_s10, 0  ;;  %p35_p2 = scmp.ne.s32.totalorder %s12561_s20, %s12557_s19 }
  0x4b   : > { %p36_p3 = scmp.eq.s32.totalorder %s12565_s21, 0  ;;  %p12180_p8 = scmp.lt.s32.totalorder %s12565_s21, 2 }
  0x4c   : > { %s12740_s6 = scalar_select %p26_p9, %s12561_s20, %s28_s15  }
  0x4d   : > { %p37_p6 = por %p36_p3, %p35_p2  ;;  %s221_s17 = sand.u32 1, %s12561_s20  }
  0x4e   : > { %s10408_s18 = sshll.u32 %s12565_s21, 9  ;;  %s9884_s24 = sshll.u32 %s221_s17, 5 }
  0x4f   : > { %s12748_s28 = scalar_lea.hbm %s16205_s0, %s10408_s18  ;;  %s225_s16 = scalar_lea.vmem [#allocation3], %s9884_s24 }
  0x50   : > { %s232_s29 = sshll.u32 %s225_s16, 4  ;;  %p12750_p7 = pnand %p12180_p8, %p37_p6  ;;  %s12754_s29 = int_to_ptr.vmem [resolvable:$true] %s232_s29 }
  0x51   : > { %s12756_s21 = scalar_lea.sflag [#allocation4], %s221_s17  ;;  %s12485_s11 = scalar_lea.hbm %s12748_s28, 512 }
  0x52   : > { %p12486_p10 = scmp.ne.s32.totalorder %s12748_s28, %s12485_s11  ;;  %p12487_p11 = pneg %p12750_p7 }
  0x53   : > { %s12490_s14 = scalar_lea.hbm %s16205_s0, 1024  ;;  %p12491_p5 = scmp.lt.u32.totalorder %s12748_s28, %s16205_s0 }
  0x54   : > { %p12488_p1 = pnand %p12487_p11, %p12486_p10  ;;  %p12492_p12 = scmp.lt.u32.totalorder %s12490_s14, %s12485_s11 }
  0x55   : > { %p12494_p0 = scmp.lt.u32.totalorder %s12485_s11, %s12748_s28 }
  0x56   : > { %p12489_p4 = pneg %p12488_p1  ;;  %p12493_p13 = por %p12492_p12, %p12491_p5 }
  0x58   : > { %p12495_p9 = por %p12494_p0, %p12493_p13 }
  0x5a   : > { %p12496_p2 = pnand %p12495_p9, %p12489_p4 }
  0x5c   : > { %12499 = shalt.err (!%p12496_p2)
}
  0x5d   : > { %s12500_s17 = scalar_lea.vmem %s12754_s29, 512  ;;  %s12573_s18 = smov [#allocation3]  }
  0x5e   : > { %p12501_p3 = scmp.ne.s32.totalorder %s12754_s29, %s12500_s17  ;;  %s12505_s24 = sshll.u32 %s12573_s18, 4  ;;  %s12506_s24 = int_to_ptr.vmem [resolvable:$false] %s12505_s24 }
  0x5f   : > { %s12507_s25 = scalar_lea.vmem %s12506_s24, 1024  ;;  %p12508_p10 = scmp.lt.s32.totalorder %s12754_s29, %s12506_s24 }
  0x60   : > { %p12503_p6 = pnand %p12501_p3, %p12487_p11  ;;  %p12509_p1 = scmp.lt.s32.totalorder %s12507_s25, %s12500_s17 }
  0x62   : > { %p12504_p8 = pneg %p12503_p6  ;;  %p12510_p5 = por %p12509_p1, %p12508_p10 }
  0x64   : > { %p12511_p12 = pnand %p12510_p5, %p12504_p8 }
  0x66   : > { %12514 = shalt.err (!%p12511_p12)
}
  0x67   : > { %12175 = dma.hbm_to_vmem [thread:$0]  (!%p12750_p7), %s12748_s28, 512, %s12754_s29, %s12756_s21, %s12570_s7, %s12570_s7, %s12571_s9  }
  0x68   : > { %p16270_p11 = scmp.ne.s32.totalorder %s16266_s27, 0 }
  0x6a   : > { %244 = sbr.rel (%p16270_p11) target bundleno = 11003 (0x2afb), region = 40 }
  0x71   : > { %s246_s26 = sand.u32 1, %s12557_s19   ;;  %p16271_p4 = scmp.ne.s32.totalorder %s16265_s23, 0 }
  0x72   : > { %s9888_s16 = sshll.u32 %s246_s26, 5  ;;  %s247_s11 = scalar_lea.sflag [#allocation4], %s246_s26 }
  0x73   : > { %s12790_s12 = scalar_lea.vmem [#allocation3], %s9888_s16 }
  0x74   : > { %12532 = dma.done.wait (%p16271_p4), %s247_s11, 512  }
  0x75   : > { %12534 = vsyncadd (%p16271_p4), %s247_s11, 4294966784  ;;  %p16272_p13 = scmp.eq.s32.totalorder %s12651_s22, 0 }
  0x77   : > { %12536 = dma.done.wait (%p16272_p13), [#allocation5], 16   ;;  %p16273_p7 = pmov %p16272_p13 }
  0x79   : > { %12538 = vsyncadd (%p16273_p7), [#allocation5], 4294967280  ;;  %p16274_p0 = pmov %p16273_p7 }
  0x7b   : > { %12540 = dma.done.wait (%p16274_p0), [#allocation8], 16   ;;  %p16275_p9 = pmov %p16274_p0 }
  0x7c   : > { %p16276_p2 = pmov %p16274_p0 }
  0x7d   : > { %12542 = vsyncadd (%p16275_p9), [#allocation8], 4294967280 }
  0x7e   : > { %12544 = dma.done.wait (%p16276_p2), [#allocation10], 2304   ;;  %p16277_p3 = pmov %p16274_p0 }
  0x7f   : > { %p16278_p6 = pmov %p16274_p0 }
  0x80   : > { %12546 = vsyncadd (%p16277_p3), [#allocation10], 4294964992 }
  0x81   : > { %12548 = dma.done.wait (%p16278_p6), [#allocation8], 16   ;;  %p16279_p8 = pmov %p16274_p0 }
  0x83   : > { %12550 = vsyncadd (%p16279_p8), [#allocation8], 4294967280 }
  0x84   : > { %271 = sfence }
  0x85   : > { %s9911_s23 = sld [smem:[#allocation6 + $0x1]]  ;;  %s9912_s27 = sld [smem:[#allocation6 + $0x2]]  ;;  %v12813_v0 = vld [vmem:[%s12790_s12 + $0x10] sm:$0xff]  ;;  %v12816_v1 = vld [vmem:[%s12790_s12] sm:$0xff]  ;;  %v12819_v3 = vld [vmem:[%s12790_s12 + $0x8] sm:$0xff]  ;;  %vm16259_vm0 = vcmask 1046528  }
  0x86   : > { %s9914_s7 = sld [smem:[#allocation6 + $0x4]]  ;;  %s9915_s9 = sld [smem:[#allocation6 + $0x5]]  ;;  %v12832_v12 = vld [vmem:[%s12790_s12 + $0x18] sm:$0xff]  ;;  %vm644_vm1 = vcmask 1045504   ;;  %vm16258_vm3 = vcmask 236544   ;;  %vm782_vm6 = vcmask 1044480  }
  0x87   : > { %s12574_s28 = smov 127   ;;  %s12575_s29 = smov 126   ;;  %vm16256_vm11 = vmmov 1  }
  0x88   : > { %s9929_s30 = sld [smem:[#allocation6 + $0xa]]  ;;  %s9930_s21 = sld [smem:[#allocation6 + $0xb]]  ;;  %vm14235_vm12 = vmpackc.low %vm782_vm6, %vm16256_vm11 }
  0x89   : > { %s9917_s13 = sld [smem:[#allocation6 + $0x7]]  ;;  %s9918_s14 = sld [smem:[#allocation6 + $0x8]] }
  0x8a   : > { %s9932_s10 = sld [smem:[#allocation6 + $0xd]]  ;;  %s9933_s15 = sld [smem:[#allocation6 + $0xe]] }
  0x8b   : > { %v491_v2 = vstv %s9911_s23  ;;  %v517_v6 = vstv %s9912_s27  ;;  %s9948_s17 = sld [smem:[#allocation6 + $0x13]]  ;;  %s9949_s18 = sld [smem:[#allocation6 + $0x14]] }
  0x8c   : > { %v494_v4 = vmul.f32 %v491_v2, %v12813_v0  ;;  %v492_v5 = vmul.f32 %v491_v2, %v12816_v1  ;;  %v518_v7 = vmul.f32 %v517_v6, %v12816_v1  ;;  %v493_v8 = vmul.f32 %v491_v2, %v12819_v3  ;;  %s9935_s24 = sld [smem:[#allocation6 + $0x10]]  ;;  %s9936_s25 = sld [smem:[#allocation6 + $0x11]] }
  0x8d   : > { %v569_v9 = vstv %s9914_s7  ;;  %v520_v10 = vmul.f32 %v517_v6, %v12813_v0  ;;  %v519_v11 = vmul.f32 %v517_v6, %v12819_v3  ;;  %v602_v16 = vstv %s9915_s9  ;;  %s9951_s26 = sld [smem:[#allocation6 + $0x16]]  ;;  %s9952_s16 = sld [smem:[#allocation6 + $0x17]] }
  0x8e   : > { %504 = vrot.lane.b32.xlu1 %v494_v4, %s12574_s28  ;;  %500 = vrot.lane.b32.xlu0 %v492_v5, %s12574_s28  ;;  %v571_v13 = vmul.f32 %v569_v9, %v12819_v3  ;;  %v572_v14 = vmul.f32 %v569_v9, %v12813_v0  ;;  %v570_v15 = vmul.f32 %v569_v9, %v12816_v1  ;;  %v956_v38 = vstv %s9929_s30  ;;  %s9967_s11 = sld [smem:[#allocation6 + $0x1c]]  ;;  %s9968_s23 = sld [smem:[#allocation6 + $0x1d]] }
  0x8f   : > { %v521_v17 = vmul.f32 %v517_v6, %v12832_v12  ;;  %v495_v18 = vmul.f32 %v491_v2, %v12832_v12  ;;  %v603_v19 = vmul.f32 %v602_v16, %v12816_v1  ;;  %v604_v20 = vmul.f32 %v602_v16, %v12819_v3  ;;  %s9954_s27 = sld [smem:[#allocation6 + $0x19]]  ;;  %s9955_s7 = sld [smem:[#allocation6 + $0x1a]] }
  0x90   : > { %v579_v21 = vrot.slane %v571_v13, 1  ;;  %v581_v22 = vrot.slane %v572_v14, 1  ;;  %v578_v23 = vrot.slane %v570_v15, 1  ;;  %v573_v24 = vmul.f32 %v569_v9, %v12832_v12  ;;  %s9970_s9 = sld [smem:[#allocation6 + $0x1f]]  ;;  %s9971_s30 = sld [smem:[#allocation6 + $0x20]] }
  0x91   : > { %v611_v25 = vrot.slane %v603_v19, 1  ;;  %v605_v26 = vmul.f32 %v602_v16, %v12813_v0  ;;  %v606_v27 = vmul.f32 %v602_v16, %v12832_v12  ;;  %v612_v30 = vrot.slane %v604_v20, 1  ;;  %p293_p10 = scmp.lt.s32.totalorder %s12651_s22, 1 }
  0x92   : > { %526 = vrot.lane.b32.xlu1 %v518_v7, %s12575_s29  ;;  %502 = vrot.lane.b32.xlu0 %v493_v8, %s12574_s28  ;;  %v582_v28 = vsel %vm16259_vm0, %v579_v21, %v581_v22  ;;  %v580_v29 = vsel %vm16259_vm0, %v578_v23, %v579_v21  ;;  %v583_v31 = vrot.slane %v573_v24, 1  ;;  %v958_v39 = vmul.f32 %v956_v38, %v12819_v3 }
  0x93   : > { %v613_v32 = vsel %vm16259_vm0, %v611_v25, %v612_v30  ;;  %v614_v34 = vrot.slane %v605_v26, 1  ;;  %v616_v35 = vrot.slane %v606_v27, 1  ;;  %v957_v40 = vmul.f32 %v956_v38, %v12816_v1  ;;  %s16575_s22 = smov (!%p293_p10, %s12651_s22), 1 }
  0x94   : > { %v584_v33 = vsel %vm16259_vm0, %v581_v22, %v583_v31  ;;  %v959_v41 = vmul.f32 %v956_v38, %v12813_v0  ;;  %v982_v42 = vstv %s9930_s21  ;;  %v661_v43 = vstv %s9917_s13  ;;  %s9986_s21 = sld [smem:[#allocation6 + $0x25]]  ;;  %s9987_s13 = sld [smem:[#allocation6 + $0x26]] }
  0x95   : > { %v617_v36 = vsel %vm16259_vm0, %v614_v34, %v616_v35  ;;  %v615_v37 = vsel %vm16259_vm0, %v612_v30, %v614_v34  ;;  %v984_v44 = vmul.f32 %v982_v42, %v12819_v3  ;;  %v983_v45 = vmul.f32 %v982_v42, %v12816_v1 }
  0x96   : > { %530 = vrot.lane.b32.xlu1 %v520_v10, %s12575_s29  ;;  %528 = vrot.lane.b32.xlu0 %v519_v11, %s12575_s29  ;;  %v663_v46 = vmul.f32 %v661_v43, %v12819_v3  ;;  %v664_v47 = vmul.f32 %v661_v43, %v12813_v0  ;;  %v662_v48 = vmul.f32 %v661_v43, %v12816_v1  ;;  %v694_v54 = vstv %s9918_s14  ;;  %s9973_s14 = sld [smem:[#allocation6 + $0x22]] }
  0x97   : > { %v985_v49 = vmul.f32 %v982_v42, %v12813_v0  ;;  %v665_v50 = vmul.f32 %v661_v43, %v12832_v12  ;;  %v696_v56 = vmul.f32 %v694_v54, %v12819_v3  ;;  %v697_v59 = vmul.f32 %v694_v54, %v12813_v0 }
  0x98   : > { %v671_v51 = vrot.slane %v663_v46, 2  ;;  %v673_v52 = vrot.slane %v664_v47, 2  ;;  %v670_v53 = vrot.slane %v662_v48, 2  ;;  %v695_v60 = vmul.f32 %v694_v54, %v12816_v1 }
  0x99   : > { %v675_v55 = vrot.slane %v665_v50, 2  ;;  %v960_v61 = vmul.f32 %v956_v38, %v12832_v12  ;;  %v698_v62 = vmul.f32 %v694_v54, %v12832_v12  ;;  %v1033_v63 = vstv %s9932_s10  ;;  %s9974_s10 = sld [smem:[#allocation6 + $0x23]] }
  0x9a   : > { %532 = vrot.lane.b32.xlu1 %v521_v17, %s12575_s29  ;;  %506 = vrot.lane.b32.xlu0 %v495_v18, %s12574_s28  ;;  %v674_v57 = vsel %vm644_vm1, %v671_v51, %v673_v52  ;;  %v672_v58 = vsel %vm644_vm1, %v670_v53, %v671_v51  ;;  %v704_v4 = vrot.slane %v696_v56, 2  ;;  %v706_v5 = vrot.slane %v697_v59, 2 }
  0x9b   : > { %v676_v2 = vsel %vm644_vm1, %v673_v52, %v675_v55  ;;  %v703_v6 = vrot.slane %v695_v60, 2  ;;  %v708_v7 = vrot.slane %v698_v62, 2  ;;  %v1035_v8 = vmul.f32 %v1033_v63, %v12819_v3 }
  0x9c   : > { %v707_v9 = vsel %vm644_vm1, %v704_v4, %v706_v5  ;;  %v1036_v11 = vmul.f32 %v1033_v63, %v12813_v0  ;;  %v1034_v13 = vmul.f32 %v1033_v63, %v12816_v1  ;;  %v986_v14 = vmul.f32 %v982_v42, %v12832_v12 }
  0x9d   : > { %v705_v10 = vsel %vm644_vm1, %v703_v6, %v704_v4  ;;  %v1037_v15 = vmul.f32 %v1033_v63, %v12832_v12  ;;  %v1066_v16 = vstv %s9933_s15  ;;  %v709_v17 = vsel %vm644_vm1, %v706_v5, %v708_v7  ;;  %s9989_s15 = sld [smem:[#allocation6 + $0x28]] }
  0x9e   : > { %587 = vrot.lane.b32.xlu1 %v582_v28, %s12574_s28  ;;  %585 = vrot.lane.b32.xlu0 %v580_v29, %s12574_s28  ;;  %v1043_v18 = vrot.slane %v1035_v8, 1  ;;  %v1045_v19 = vrot.slane %v1036_v11, 1  ;;  %v1042_v20 = vrot.slane %v1034_v13, 1  ;;  %v1068_v22 = vmul.f32 %v1066_v16, %v12819_v3 }
  0x9f   : > { %v1047_v21 = vrot.slane %v1037_v15, 1  ;;  %v1069_v25 = vmul.f32 %v1066_v16, %v12813_v0  ;;  %v1067_v26 = vmul.f32 %v1066_v16, %v12816_v1  ;;  %v1416_v34 = vstv %s9948_s17  ;;  %s9990_s17 = sld [smem:[#allocation6 + $0x29]] }
  0xa0   : > { %v1046_v23 = vsel %vm16259_vm0, %v1043_v18, %v1045_v19  ;;  %v1044_v24 = vsel %vm16259_vm0, %v1042_v20, %v1043_v18  ;;  %v1076_v27 = vrot.slane %v1068_v22, 1  ;;  %v1419_v38 = vmul.f32 %v1416_v34, %v12813_v0 }
  0xa1   : > { %v1048_v28 = vsel %vm16259_vm0, %v1045_v19, %v1047_v21  ;;  %v1078_v29 = vrot.slane %v1069_v25, 1  ;;  %v1075_v30 = vrot.slane %v1067_v26, 1  ;;  %v1157_v52 = vstv %s9936_s25  ;;  %s484_s25 = sld [smem:[#allocation6]] }
  0xa2   : > { %618 = vrot.lane.b32.xlu1 %v613_v32, %s12575_s29  ;;  %589 = vrot.lane.b32.xlu0 %v584_v33, %s12574_s28  ;;  %v1159_v53 = vmul.f32 %v1157_v52, %v12819_v3  ;;  %v1160_v54 = vmul.f32 %v1157_v52, %v12813_v0  ;;  %v1420_v59 = vmul.f32 %v1416_v34, %v12832_v12  ;;  %v1493_v4 = vstv %s9951_s26  ;;  %s9916_s26 = sld [smem:[#allocation6 + $0x6]] }
  0xa3   : > { %v1079_v32 = vsel %vm16259_vm0, %v1076_v27, %v1078_v29  ;;  %v1077_v33 = vsel %vm16259_vm0, %v1075_v30, %v1076_v27  ;;  %v1495_v5 = vmul.f32 %v1493_v4, %v12819_v3  ;;  %v1496_v6 = vmul.f32 %v1493_v4, %v12813_v0 }
  0xa4   : > { %v1167_v60 = vrot.slane %v1159_v53, 2  ;;  %v1169_v63 = vrot.slane %v1160_v54, 2  ;;  %v1497_v15 = vmul.f32 %v1493_v4, %v12832_v12  ;;  %v1526_v18 = vstv %s9952_s16  ;;  %s9928_s16 = sld [smem:[#allocation6 + $0x9]] }
  0xa5   : > { %v1503_v13 = vrot.slane %v1495_v5, 1  ;;  %v1528_v22 = vmul.f32 %v1526_v18, %v12819_v3 }
  0xa6   : > { %622 = vrot.lane.b32.xlu1 %v617_v36, %s12575_s29  ;;  %620 = vrot.lane.b32.xlu0 %v615_v37, %s12575_s29  ;;  %v1417_v36 = vmul.f32 %v1416_v34, %v12816_v1  ;;  %v1507_v20 = vrot.slane %v1497_v15, 1 }
  0xa7   : > { %v1536_v26 = vrot.slane %v1528_v22, 1 }
  0xaa   : > { %967 = vrot.lane.b32.xlu1 %v958_v39, %s12574_s28  ;;  %965 = vrot.lane.b32.xlu0 %v957_v40, %s12574_s28  ;;  %v1418_v39 = vmul.f32 %v1416_v34, %v12819_v3  ;;  %v1442_v40 = vstv %s9949_s18  ;;  %s10005_s18 = sld [smem:[#allocation6 + $0x2e]] }
  0xab   : > { %v1444_v42 = vmul.f32 %v1442_v40, %v12819_v3  ;;  %v1443_v43 = vmul.f32 %v1442_v40, %v12816_v1  ;;  %v1445_v47 = vmul.f32 %v1442_v40, %v12813_v0  ;;  %v1446_v11 = vmul.f32 %v1442_v40, %v12832_v12 }
  0xae   : > { %591 = vrot.lane.b32.xlu1 %v583_v31, %s12574_s28  ;;  %969 = vrot.lane.b32.xlu0 %v959_v41, %s12574_s28  ;;  %v1070_v31 = vmul.f32 %v1066_v16, %v12832_v12  ;;  %v1124_v41 = vstv %s9935_s24  ;;  %s9913_s24 = sld [smem:[#allocation6 + $0x3]] }
  0xaf   : > { %v1125_v46 = vmul.f32 %v1124_v41, %v12816_v1  ;;  %v1128_v48 = vmul.f32 %v1124_v41, %v12832_v12 }
  0xb1   : > { %v1133_v51 = vrot.slane %v1125_v46, 2 }
  0xb2   : > { %993 = vrot.lane.b32.xlu1 %v984_v44, %s12575_s29  ;;  %991 = vrot.lane.b32.xlu0 %v983_v45, %s12575_s29  ;;  %v1126_v44 = vmul.f32 %v1124_v41, %v12819_v3  ;;  %v1127_v45 = vmul.f32 %v1124_v41, %v12813_v0 }
  0xb4   : > { %v1136_v50 = vrot.slane %v1127_v45, 2  ;;  %v1584_v45 = vstv %s9954_s27  ;;  %s13237_s27 = sld [smem:[#allocation6 + $0x2b]] }
  0xb6   : > { %624 = vrot.lane.b32.xlu1 %v616_v35, %s12575_s29  ;;  %995 = vrot.lane.b32.xlu0 %v985_v49, %s12575_s29  ;;  %v1080_v35 = vrot.slane %v1070_v31, 1  ;;  %v1134_v49 = vrot.slane %v1126_v44, 2  ;;  %v1902_v44 = vstv %s9968_s23  ;;  %s13232_s23 = sld [smem:[#allocation6 + $0x2f]] }
  0xb8   : > { %v1081_v37 = vsel %vm16259_vm0, %v1078_v29, %v1080_v35  ;;  %v1135_v56 = vsel %vm644_vm1, %v1133_v51, %v1134_v49  ;;  %v1530_v29 = vmul.f32 %v1526_v18, %v12832_v12  ;;  %v1587_v51 = vmul.f32 %v1584_v45, %v12813_v0 }
  0xba   : > { %679 = vrot.lane.b32.xlu1 %v674_v57, %s12574_s28  ;;  %677 = vrot.lane.b32.xlu0 %v672_v58, %s12574_s28  ;;  %v1138_v57 = vrot.slane %v1128_v48, 2  ;;  %v1158_v58 = vmul.f32 %v1157_v52, %v12816_v1  ;;  %v1904_v48 = vmul.f32 %v1902_v44, %v12819_v3 }
  0xbc   : > { %v1139_v62 = vsel %vm644_vm1, %v1136_v50, %v1138_v57 }
  0xbe   : > { %971 = vrot.lane.b32.xlu1 %v960_v61, %s12574_s28  ;;  %681 = vrot.lane.b32.xlu0 %v676_v2, %s12574_s28  ;;  %v12947_v61 = vmul.f32 %v1157_v52, %v12832_v12  ;;  %v1166_v2 = vrot.slane %v1158_v58, 2  ;;  %v1585_v52 = vmul.f32 %v1584_v45, %v12816_v1 }
  0xc0   : > { %v1168_v8 = vsel %vm644_vm1, %v1166_v2, %v1167_v60  ;;  %v1593_v58 = vrot.slane %v1585_v52, 2 }
  0xc2   : > { %712 = vrot.lane.b32.xlu1 %v707_v9, %s12575_s29  ;;  %710 = vrot.lane.b32.xlu0 %v705_v10, %s12575_s29  ;;  %v1171_v9 = vrot.slane %v12947_v61, 2  ;;  %v1494_v10 = vmul.f32 %v1493_v4, %v12816_v1 }
  0xc4   : > { %v1172_v16 = vsel %vm644_vm1, %v1169_v63, %v1171_v9 }
  0xc6   : > { %997 = vrot.lane.b32.xlu1 %v986_v14, %s12575_s29  ;;  %714 = vrot.lane.b32.xlu0 %v709_v17, %s12575_s29  ;;  %v1505_v14 = vrot.slane %v1496_v6, 1  ;;  %v1502_v17 = vrot.slane %v1494_v10, 1 }
  0xc8   : > { %v1506_v19 = vsel %vm16259_vm0, %v1503_v13, %v1505_v14  ;;  %v1508_v25 = vsel %vm16259_vm0, %v1505_v14, %v1507_v20 }
  0xca   : > { %1051 = vrot.lane.b32.xlu1 %v1046_v23, %s12574_s28  ;;  %1049 = vrot.lane.b32.xlu0 %v1044_v24, %s12574_s28  ;;  %v1529_v23 = vmul.f32 %v1526_v18, %v12813_v0  ;;  %v1527_v24 = vmul.f32 %v1526_v18, %v12816_v1 }
  0xcc   : > { %v1538_v27 = vrot.slane %v1529_v23, 1 }
  0xce   : > { %683 = vrot.lane.b32.xlu1 %v675_v55, %s12574_s28  ;;  %1053 = vrot.lane.b32.xlu0 %v1048_v28, %s12574_s28  ;;  %v1137_v55 = vsel %vm644_vm1, %v1134_v49, %v1136_v50  ;;  %v1535_v28 = vrot.slane %v1527_v24, 1  ;;  %v1539_v30 = vsel %vm16259_vm0, %v1536_v26, %v1538_v27  ;;  %v1903_v49 = vmul.f32 %v1902_v44, %v12816_v1 }
  0xcf   : > { %v1586_v50 = vmul.f32 %v1584_v45, %v12819_v3 }
  0xd0   : > { %v1537_v31 = vsel %vm16259_vm0, %v1535_v28, %v1536_v26  ;;  %v1906_v28 = vmul.f32 %v1902_v44, %v12832_v12 }
  0xd2   : > { %1084 = vrot.lane.b32.xlu1 %v1079_v32, %s12575_s29  ;;  %1082 = vrot.lane.b32.xlu0 %v1077_v33, %s12575_s29  ;;  %v1876_v32 = vstv %s9967_s11  ;;  %v1540_v33 = vrot.slane %v1530_v29, 1  ;;  %s13226_s11 = sld [smem:[#allocation6 + $0xc]] }
  0xd3   : > { %v1879_v40 = vmul.f32 %v1876_v32, %v12813_v0  ;;  %v1878_v41 = vmul.f32 %v1876_v32, %v12819_v3  ;;  %v1880_v10 = vmul.f32 %v1876_v32, %v12832_v12 }
  0xd6   : > { %1425 = vrot.lane.b32.xlu1 %v1417_v36, %s12574_s28  ;;  %1086 = vrot.lane.b32.xlu0 %v1081_v37, %s12575_s29  ;;  %v1877_v36 = vmul.f32 %v1876_v32, %v12816_v1  ;;  %v1541_v37 = vsel %vm16259_vm0, %v1538_v27, %v1540_v33 }
  0xda   : > { %1429 = vrot.lane.b32.xlu1 %v1419_v38, %s12574_s28  ;;  %1427 = vrot.lane.b32.xlu0 %v1418_v39, %s12574_s28 }
  0xde   : > { %1055 = vrot.lane.b32.xlu1 %v1047_v21, %s12574_s28  ;;  %716 = vrot.lane.b32.xlu0 %v708_v7, %s12575_s29  ;;  %v1170_v7 = vsel %vm644_vm1, %v1167_v60, %v1169_v63  ;;  %v1504_v21 = vsel %vm16259_vm0, %v1502_v17, %v1503_v13  ;;  %v1617_v60 = vstv %s9955_s7  ;;  %v1953_v17 = vstv %s9970_s9  ;;  %s13266_s7 = sld [smem:[#allocation6 + $0xf]]  ;;  %s13302_s9 = sld [smem:[#allocation6 + $0x2c]] }
  0xdf   : > { %v1619_v2 = vmul.f32 %v1617_v60, %v12819_v3  ;;  %v1620_v6 = vmul.f32 %v1617_v60, %v12813_v0  ;;  %v13041_v13 = vmul.f32 %v1617_v60, %v12832_v12 }
  0xe1   : > { %v1629_v15 = vrot.slane %v1620_v6, 2  ;;  %v1631_v24 = vrot.slane %v13041_v13, 2  ;;  %v2336_v6 = vstv %s9986_s21  ;;  %s13317_s21 = sld [smem:[#allocation6 + $0x12]] }
  0xe2   : > { %1453 = vrot.lane.b32.xlu1 %v1444_v42, %s12575_s29  ;;  %1451 = vrot.lane.b32.xlu0 %v1443_v43, %s12575_s29 }
  0xe3   : > { %v1632_v32 = vsel %vm644_vm1, %v1629_v15, %v1631_v24 }
  0xe6   : > { %1088 = vrot.lane.b32.xlu1 %v1080_v35, %s12575_s29  ;;  %1455 = vrot.lane.b32.xlu0 %v1445_v47, %s12575_s29 }
  0xea   : > { %1142 = vrot.lane.b32.xlu1 %v1137_v55, %s12574_s28  ;;  %1140 = vrot.lane.b32.xlu0 %v1135_v56, %s12574_s28  ;;  %v1905_v55 = vmul.f32 %v1902_v44, %v12813_v0  ;;  %v1594_v56 = vrot.slane %v1586_v50, 2 }
  0xec   : > { %v1595_v4 = vsel %vm644_vm1, %v1593_v58, %v1594_v56 }
  0xee   : > { %1431 = vrot.lane.b32.xlu1 %v1420_v59, %s12574_s28  ;;  %1144 = vrot.lane.b32.xlu0 %v1139_v62, %s12574_s28  ;;  %v13019_v59 = vmul.f32 %v1584_v45, %v12832_v12 }
  0xf0   : > { %v1598_v5 = vrot.slane %v13019_v59, 2 }
  0xf2   : > { %1175 = vrot.lane.b32.xlu1 %v1170_v7, %s12575_s29  ;;  %1173 = vrot.lane.b32.xlu0 %v1168_v8, %s12575_s29  ;;  %v1618_v7 = vmul.f32 %v1617_v60, %v12816_v1 }
  0xf6   : > { %1457 = vrot.lane.b32.xlu1 %v1446_v11, %s12575_s29  ;;  %1177 = vrot.lane.b32.xlu0 %v1172_v16, %s12575_s29  ;;  %v1627_v11 = vrot.slane %v1619_v2, 2  ;;  %v1626_v16 = vrot.slane %v1618_v7, 2 }
  0xf8   : > { %v1630_v22 = vsel %vm644_vm1, %v1627_v11, %v1629_v15  ;;  %v1628_v23 = vsel %vm644_vm1, %v1626_v16, %v1627_v11 }
  0xfa   : > { %1511 = vrot.lane.b32.xlu1 %v1506_v19, %s12574_s28  ;;  %1509 = vrot.lane.b32.xlu0 %v1504_v21, %s12574_s28  ;;  %v1956_v21 = vmul.f32 %v1953_v17, %v12813_v0 }
  0xfe   : > { %1146 = vrot.lane.b32.xlu1 %v1138_v57, %s12574_s28  ;;  %1513 = vrot.lane.b32.xlu0 %v1508_v25, %s12574_s28  ;;  %v1596_v57 = vrot.slane %v1587_v51, 2  ;;  %v1954_v25 = vmul.f32 %v1953_v17, %v12816_v1 }
 0x100   : > { %v12978_v34 = vpop.permute.xlu1 %504  ;;  %v12980_v35 = vpop.permute.xlu0 %500  ;;  %v1597_v63 = vsel %vm644_vm1, %v1594_v56, %v1596_v57  ;;  %v1599_v14 = vsel %vm644_vm1, %v1596_v57, %v1598_v5 }
 0x102   : > { %1544 = vrot.lane.b32.xlu1 %v1539_v30, %s12575_s29  ;;  %1542 = vrot.lane.b32.xlu0 %v1537_v31, %s12575_s29  ;;  %v1965_v30 = vrot.slane %v1956_v21, 1  ;;  %v1957_v31 = vmul.f32 %v1953_v17, %v12832_v12 }
 0x104   : > { %v12986_v38 = vpop.permute.xlu1 %526  ;;  %v12988_v39 = vpop.permute.xlu0 %502  ;;  %v1967_v44 = vrot.slane %v1957_v31, 1 }
 0x106   : > { %1885 = vrot.lane.b32.xlu1 %v1877_v36, %s12574_s28  ;;  %1546 = vrot.lane.b32.xlu0 %v1541_v37, %s12575_s29 }
 0x108   : > { %v12994_v42 = vpop.permute.xlu1 %530  ;;  %v12996_v43 = vpop.permute.xlu0 %528 }
 0x10a   : > { %1889 = vrot.lane.b32.xlu1 %v1879_v40, %s12574_s28  ;;  %1887 = vrot.lane.b32.xlu0 %v1878_v41, %s12574_s28  ;;  %v1986_v40 = vstv %s9971_s30  ;;  %s13313_s30 = sld [smem:[#allocation6 + $0x15]] }
 0x10b   : > { %v1987_v50 = vmul.f32 %v1986_v40, %v12816_v1  ;;  %v1990_v59 = vmul.f32 %v1986_v40, %v12832_v12 }
 0x10c   : > { %v13000_v46 = vpop.permute.xlu1 %532  ;;  %v13002_v47 = vpop.permute.xlu0 %506 }
 0x10d   : > { %v1995_v58 = vrot.slane %v1987_v50, 1  ;;  %v2000_v7 = vrot.slane %v1990_v59, 1 }
 0x10e   : > { %1515 = vrot.lane.b32.xlu1 %v1507_v20, %s12574_s28  ;;  %1179 = vrot.lane.b32.xlu0 %v1171_v9, %s12575_s29  ;;  %v1955_v20 = vmul.f32 %v1953_v17, %v12819_v3  ;;  %v2339_v17 = vmul.f32 %v2336_v6, %v12813_v0 }
 0x110   : > { %v13011_v53 = vpop.permute.xlu1 %587  ;;  %v13013_v54 = vpop.permute.xlu0 %585  ;;  %v1963_v29 = vrot.slane %v1955_v20, 1  ;;  %v2338_v20 = vmul.f32 %v2336_v6, %v12819_v3 }
 0x112   : > { %1913 = vrot.lane.b32.xlu1 %v1904_v48, %s12575_s29  ;;  %1911 = vrot.lane.b32.xlu0 %v1903_v49, %s12575_s29  ;;  %v1966_v41 = vsel %vm16259_vm0, %v1963_v29, %v1965_v30  ;;  %v1988_v48 = vmul.f32 %v1986_v40, %v12819_v3  ;;  %v1989_v49 = vmul.f32 %v1986_v40, %v12813_v0 }
 0x114   : > { %v13021_v61 = vpop.permute.xlu1 %618  ;;  %v13023_v62 = vpop.permute.xlu0 %589  ;;  %v1996_v56 = vrot.slane %v1988_v48, 1  ;;  %v1998_v57 = vrot.slane %v1989_v49, 1 }
 0x116   : > { %1548 = vrot.lane.b32.xlu1 %v1540_v33, %s12575_s29  ;;  %1915 = vrot.lane.b32.xlu0 %v1905_v55, %s12575_s29  ;;  %v1962_v33 = vrot.slane %v1954_v25, 1  ;;  %v1968_v55 = vsel %vm16259_vm0, %v1965_v30, %v1967_v44  ;;  %v1999_v2 = vsel %vm16259_vm0, %v1996_v56, %v1998_v57 }
 0x118   : > { %v13033_v8 = vpop.permute.xlu1 %622  ;;  %v13035_v9 = vpop.permute.xlu0 %620  ;;  %v1964_v45 = vsel %vm16259_vm0, %v1962_v33, %v1963_v29  ;;  %v2044_v29 = vstv %s9973_s14  ;;  %s13399_s14 = sld [smem:[#allocation6 + $0x18]] }
 0x119   : > { %v2047_v33 = vmul.f32 %v2044_v29, %v12813_v0  ;;  %v2045_v40 = vmul.f32 %v2044_v29, %v12816_v1  ;;  %v13137_v50 = vmul.f32 %v2044_v29, %v12832_v12 }
 0x11a   : > { %1602 = vrot.lane.b32.xlu1 %v1597_v63, %s12574_s28  ;;  %1600 = vrot.lane.b32.xlu0 %v1595_v4, %s12574_s28  ;;  %v1997_v4 = vsel %vm16259_vm0, %v1995_v58, %v1996_v56 }
 0x11b   : > { %v2056_v48 = vrot.slane %v2047_v33, 2  ;;  %v2053_v49 = vrot.slane %v2045_v40, 2  ;;  %v2413_v33 = vstv %s9989_s15  ;;  %s13509_s15 = sld [smem:[#allocation6 + $0x34]] }
 0x11c   : > { %v13044_v18 = vpop.permute.xlu1 %967  ;;  %v13046_v19 = vpop.permute.xlu0 %965 }
 0x11e   : > { %1891 = vrot.lane.b32.xlu1 %v1880_v10, %s12574_s28  ;;  %1604 = vrot.lane.b32.xlu0 %v1599_v14, %s12574_s28  ;;  %v2337_v14 = vmul.f32 %v2336_v6, %v12816_v1 }
 0x120   : > { %v13056_v26 = vpop.permute.xlu1 %591  ;;  %v13058_v27 = vpop.permute.xlu0 %969 }
 0x121   : > { %16280 = vst [vmem:[#allocation17_spill] sm:$0xff] %v13056_v26 }
 0x122   : > { %1635 = vrot.lane.b32.xlu1 %v1630_v22, %s12575_s29  ;;  %1633 = vrot.lane.b32.xlu0 %v1628_v23, %s12575_s29  ;;  %v2362_v23 = vstv %s9987_s13  ;;  %s13384_s13 = sld [smem:[#allocation6 + $0x31]] }
 0x123   : > { %v2364_v30 = vmul.f32 %v2362_v23, %v12819_v3  ;;  %v2363_v31 = vmul.f32 %v2362_v23, %v12816_v1  ;;  %v2365_v13 = vmul.f32 %v2362_v23, %v12813_v0 }
 0x124   : > { %v13067_v36 = vpop.permute.xlu1 %993  ;;  %v13069_v37 = vpop.permute.xlu0 %991 }
 0x126   : > { %1917 = vrot.lane.b32.xlu1 %v1906_v28, %s12575_s29  ;;  %1637 = vrot.lane.b32.xlu0 %v1632_v32, %s12575_s29  ;;  %v2046_v32 = vmul.f32 %v2044_v29, %v12819_v3 }
 0x128   : > { %v13078_v51 = vpop.permute.xlu1 %624  ;;  %v13080_v52 = vpop.permute.xlu0 %995 }
 0x129   : > { %16281 = vst [vmem:[#allocation18_spill] sm:$0xff] %v13078_v51 }
 0x12a   : > { %1971 = vrot.lane.b32.xlu1 %v1966_v41, %s12574_s28  ;;  %1969 = vrot.lane.b32.xlu0 %v1964_v45, %s12574_s28 }
 0x12c   : > { %v13086_v60 = vpop.permute.xlu1 %679  ;;  %v13088_v63 = vpop.permute.xlu0 %677 }
 0x12d   : > { %16282 = vst [vmem:[#allocation19_spill] sm:$0xff] %v13086_v60  ;;  %16283 = vst [vmem:[#allocation20_spill] sm:$0xff] %v13088_v63 }
 0x12e   : > { %1606 = vrot.lane.b32.xlu1 %v1598_v5, %s12574_s28  ;;  %1973 = vrot.lane.b32.xlu0 %v1968_v55, %s12574_s28  ;;  %v2001_v5 = vsel %vm16259_vm0, %v1998_v57, %v2000_v7 }
 0x130   : > { %v13094_v10 = vpop.permute.xlu1 %971  ;;  %v13096_v11 = vpop.permute.xlu0 %681 }
 0x131   : > { %16284 = vst [vmem:[#allocation21_spill] sm:$0xff] %v13094_v10  ;;  %16285 = vst [vmem:[#allocation22_spill] sm:$0xff] %v13096_v11  ;;  %v1099_v10 = vstv %s13266_s7  ;;  %s9985_s7 = sld [smem:[#allocation6 + $0x24]] }
 0x132   : > { %2004 = vrot.lane.b32.xlu1 %v1999_v2, %s12575_s29  ;;  %2002 = vrot.lane.b32.xlu0 %v1997_v4, %s12575_s29  ;;  %v2058_v4 = vrot.slane %v13137_v50, 2  ;;  %v2414_v50 = vmul.f32 %v2413_v33, %v12816_v1 }
 0x134   : > { %v13102_v15 = vpop.permute.xlu1 %712  ;;  %v13104_v16 = vpop.permute.xlu0 %710 }
 0x135   : > { %16286 = vst [vmem:[#allocation23_spill] sm:$0xff] %v13102_v15  ;;  %16287 = vst [vmem:[#allocation24_spill] sm:$0xff] %v13104_v16  ;;  %v2504_v15 = vstv %s13237_s27  ;;  %s9988_s27 = sld [smem:[#allocation6 + $0x27]] }
 0x136   : > { %2345 = vrot.lane.b32.xlu1 %v2337_v14, %s12574_s28  ;;  %2006 = vrot.lane.b32.xlu0 %v2001_v5, %s12575_s29 }
 0x138   : > { %v13110_v21 = vpop.permute.xlu1 %997  ;;  %v13112_v22 = vpop.permute.xlu0 %714 }
 0x139   : > { %16288 = vst [vmem:[#allocation25_spill] sm:$0xff] %v13110_v21  ;;  %16289 = vst [vmem:[#allocation26_spill] sm:$0xff] %v13112_v22 }
 0x13a   : > { %2349 = vrot.lane.b32.xlu1 %v2339_v17, %s12574_s28  ;;  %2347 = vrot.lane.b32.xlu0 %v2338_v20, %s12574_s28 }
 0x13c   : > { %v13116_v25 = vpop.permute.xlu1 %1051  ;;  %v13118_v28 = vpop.permute.xlu0 %1049 }
 0x13d   : > { %16290 = vst [vmem:[#allocation27_spill] sm:$0xff] %v13116_v25  ;;  %16291 = vst [vmem:[#allocation28_spill] sm:$0xff] %v13118_v28 }
 0x13e   : > { %1975 = vrot.lane.b32.xlu1 %v1967_v44, %s12574_s28  ;;  %1639 = vrot.lane.b32.xlu0 %v1631_v24, %s12575_s29  ;;  %v2077_v24 = vstv %s9974_s10  ;;  %v2054_v44 = vrot.slane %v2046_v32, 2  ;;  %s13451_s10 = sld [smem:[#allocation6 + $0x32]] }
 0x13f   : > { %v2079_v57 = vmul.f32 %v2077_v24, %v12819_v3  ;;  %v2080_v58 = vmul.f32 %v2077_v24, %v12813_v0  ;;  %v2078_v14 = vmul.f32 %v2077_v24, %v12816_v1  ;;  %v13160_v32 = vmul.f32 %v2077_v24, %v12832_v12 }
 0x140   : > { %v13129_v41 = vpop.permute.xlu1 %683  ;;  %v13131_v45 = vpop.permute.xlu0 %1053  ;;  %v2057_v59 = vsel %vm644_vm1, %v2054_v44, %v2056_v48  ;;  %v2055_v2 = vsel %vm644_vm1, %v2053_v49, %v2054_v44  ;;  %v2416_v44 = vmul.f32 %v2413_v33, %v12813_v0 }
 0x141   : > { %16292 = vst [vmem:[#allocation29_spill] sm:$0xff] %v13129_v41  ;;  %16293 = vst [vmem:[#allocation30_spill] sm:$0xff] %v13131_v45  ;;  %v2087_v20 = vrot.slane %v2079_v57, 2  ;;  %v2089_v29 = vrot.slane %v2080_v58, 2  ;;  %v16214_v24 = vrot.slane %v13160_v32, 2 }
 0x142   : > { %2373 = vrot.lane.b32.xlu1 %v2364_v30, %s12575_s29  ;;  %2371 = vrot.lane.b32.xlu0 %v2363_v31, %s12575_s29  ;;  %v2059_v30 = vsel %vm644_vm1, %v2056_v48, %v2058_v4  ;;  %v2086_v31 = vrot.slane %v2078_v14, 2  ;;  %v2425_v14 = vrot.slane %v2416_v44, 1 }
 0x143   : > { %v2090_v48 = vsel %vm644_vm1, %v2087_v20, %v2089_v29 }
 0x144   : > { %v13139_v55 = vpop.permute.xlu1 %1084  ;;  %v13141_v56 = vpop.permute.xlu0 %1082  ;;  %v2088_v49 = vsel %vm644_vm1, %v2086_v31, %v2087_v20  ;;  %v2092_v20 = vsel %vm644_vm1, %v2089_v29, %v16214_v24 }
 0x145   : > { %16294 = vst [vmem:[#allocation31_spill] sm:$0xff] %v13139_v55  ;;  %16295 = vst [vmem:[#allocation32_spill] sm:$0xff] %v13141_v56  ;;  %v950_v55 = vstv %s9928_s16  ;;  %s13741_s16 = sld [smem:[#allocation7 + $0x2]] }
 0x146   : > { %2008 = vrot.lane.b32.xlu1 %v2000_v7, %s12575_s29  ;;  %2375 = vrot.lane.b32.xlu0 %v2365_v13, %s12575_s29  ;;  %v2340_v7 = vmul.f32 %v2336_v6, %v12832_v12  ;;  %v2415_v6 = vmul.f32 %v2413_v33, %v12819_v3  ;;  %v13349_v21 = vmul.f32 %v950_v55, %v12832_v12 }
 0x148   : > { %v13151_v5 = vpop.permute.xlu1 %1425  ;;  %v13153_v17 = vpop.permute.xlu0 %1086  ;;  %16320 = vst [vmem:[#allocation54_spill] sm:$0xff] %v13349_v21 }
 0x149   : > { %16296 = vst [vmem:[#allocation33_spill] sm:$0xff] %v13151_v5  ;;  %16297 = vst [vmem:[#allocation34_spill] sm:$0xff] %v13153_v17  ;;  %v2537_v5 = vstv %s13302_s9  ;;  %s9991_s9 = sld [smem:[#allocation6 + $0x2a]] }
 0x14a   : > { %2062 = vrot.lane.b32.xlu1 %v2057_v59, %s12574_s28  ;;  %2060 = vrot.lane.b32.xlu0 %v2055_v2, %s12574_s28  ;;  %v2366_v59 = vmul.f32 %v2362_v23, %v12832_v12  ;;  %v2423_v2 = vrot.slane %v2415_v6, 1 }
 0x14c   : > { %v13162_v40 = vpop.permute.xlu1 %1429  ;;  %v13164_v13 = vpop.permute.xlu0 %1427  ;;  %v2426_v23 = vsel %vm16259_vm0, %v2423_v2, %v2425_v14 }
 0x14d   : > { %16298 = vst [vmem:[#allocation35_spill] sm:$0xff] %v13162_v40  ;;  %16299 = vst [vmem:[#allocation36_spill] sm:$0xff] %v13164_v13 }
 0x14e   : > { %2351 = vrot.lane.b32.xlu1 %v2340_v7, %s12574_s28  ;;  %2064 = vrot.lane.b32.xlu0 %v2059_v30, %s12574_s28  ;;  %v13182_v7 = vmul.f32 %v2413_v33, %v12832_v12  ;;  %v2422_v30 = vrot.slane %v2414_v50, 1 }
 0x150   : > { %v13174_v57 = vpop.permute.xlu1 %1055  ;;  %v13176_v58 = vpop.permute.xlu0 %716  ;;  %v16215_v6 = vrot.slane %v13182_v7, 1  ;;  %v2424_v33 = vsel %vm16259_vm0, %v2422_v30, %v2423_v2 }
 0x151   : > { %16300 = vst [vmem:[#allocation37_spill] sm:$0xff] %v13174_v57  ;;  %16301 = vst [vmem:[#allocation38_spill] sm:$0xff] %v13176_v58  ;;  %v2446_v58 = vstv %s9990_s17  ;;  %s13520_s17 = sld [smem:[#allocation6 + $0x35]] }
 0x152   : > { %2095 = vrot.lane.b32.xlu1 %v2090_v48, %s12575_s29  ;;  %2093 = vrot.lane.b32.xlu0 %v2088_v49, %s12575_s29  ;;  %v2448_v44 = vmul.f32 %v2446_v58, %v12819_v3  ;;  %v2449_v29 = vmul.f32 %v2446_v58, %v12813_v0  ;;  %v2447_v48 = vmul.f32 %v2446_v58, %v12816_v1 }
 0x153   : > { %v13209_v24 = vmul.f32 %v2446_v58, %v12832_v12 }
 0x154   : > { %v13187_v31 = vpop.permute.xlu1 %1453  ;;  %v13189_v41 = vpop.permute.xlu0 %1451  ;;  %v2456_v2 = vrot.slane %v2448_v44, 1  ;;  %v2455_v30 = vrot.slane %v2447_v48, 1  ;;  %v543_v48 = vstv %s9913_s24  ;;  %s13691_s24 = sld [smem:[#allocation6 + $0x1e]] }
 0x155   : > { %16302 = vst [vmem:[#allocation39_spill] sm:$0xff] %v13187_v31  ;;  %16303 = vst [vmem:[#allocation40_spill] sm:$0xff] %v13189_v41  ;;  %v16216_v44 = vrot.slane %v13209_v24, 1  ;;  %v13331_v31 = vld [vmem:[%s12790_s12 + $0x8] sm:$0xff] }
 0x156   : > { %2377 = vrot.lane.b32.xlu1 %v2366_v59, %s12575_s29  ;;  %2097 = vrot.lane.b32.xlu0 %v2092_v20, %s12575_s29  ;;  %v2428_v59 = vsel %vm16259_vm0, %v2425_v14, %v16215_v6  ;;  %v2458_v20 = vrot.slane %v2449_v29, 1  ;;  %v2457_v14 = vsel %vm16259_vm0, %v2455_v30, %v2456_v2  ;;  %v546_v30 = vmul.f32 %v543_v48, %v12813_v0 }
 0x157   : > { %v544_v6 = vmul.f32 %v543_v48, %v12816_v1 }
 0x158   : > { %v13199_v49 = vpop.permute.xlu1 %1088  ;;  %v13201_v50 = vpop.permute.xlu0 %1455 }
 0x159   : > { %16304 = vst [vmem:[#allocation41_spill] sm:$0xff] %v13199_v49  ;;  %16305 = vst [vmem:[#allocation42_spill] sm:$0xff] %v13201_v50  ;;  %v553_v57 = vrot.slane %v544_v6, 1 }
 0x15a   : > { %2431 = vrot.lane.b32.xlu1 %v2426_v23, %s12574_s28  ;;  %2429 = vrot.lane.b32.xlu0 %v2424_v33, %s12574_s28  ;;  %v2459_v23 = vsel %vm16259_vm0, %v2456_v2, %v2458_v20  ;;  %v13219_v33 = vstv %s10005_s18  ;;  %v545_v2 = vmul.f32 %v543_v48, %v12819_v3  ;;  %s13627_s18 = sld [smem:[#allocation7]] }
 0x15c   : > { %v13211_v22 = vpop.permute.xlu1 %1142  ;;  %v13213_v49 = vpop.permute.xlu0 %1140 }
 0x15d   : > { %16306 = vst [vmem:[#allocation43_spill] sm:$0xff] %v13211_v22  ;;  %16307 = vst [vmem:[#allocation44_spill] sm:$0xff] %v13213_v49  ;;  %v485_v22 = vstv %s484_s25  ;;  %v556_v49 = vrot.slane %v546_v30, 1  ;;  %v1008_v30 = vstv %s13226_s11  ;;  %s13701_s25 = sld [smem:[#allocation7 + $0x1]] }
 0x15e   : > { %2066 = vrot.lane.b32.xlu1 %v2058_v4, %s12574_s28  ;;  %2433 = vrot.lane.b32.xlu0 %v2428_v59, %s12574_s28  ;;  %v2797_v4 = vmul.f32 %v13219_v33, %v12816_v1  ;;  %v2461_v59 = vsel %vm16259_vm0, %v2458_v20, %v16216_v44  ;;  %v2799_v20 = vmul.f32 %v13219_v33, %v12813_v0  ;;  %s13810_s11 = sld [smem:[#allocation6 + $0x21]] }
 0x15f   : > { %v2798_v44 = vmul.f32 %v13219_v33, %v12819_v3  ;;  %v13264_v11 = vmul.f32 %v485_v22, %v12816_v1  ;;  %v13285_v17 = vmul.f32 %v485_v22, %v12832_v12  ;;  %v13308_v63 = vmul.f32 %v1008_v30, %v12819_v3 }
 0x160   : > { %v13222_v58 = vpop.permute.xlu1 %1431  ;;  %v13224_v29 = vpop.permute.xlu0 %1144 }
 0x161   : > { %16308 = vst [vmem:[#allocation45_spill] sm:$0xff] %v13222_v58  ;;  %16309 = vst [vmem:[#allocation46_spill] sm:$0xff] %v13224_v29  ;;  %v635_v29 = vstv %s9916_s26  ;;  %s13705_s26 = sld [smem:[#allocation6 + $0x1b]] }
 0x162   : > { %2464 = vrot.lane.b32.xlu1 %v2459_v23, %s12575_s29  ;;  %2462 = vrot.lane.b32.xlu0 %v2457_v14, %s12575_s29  ;;  %v13243_v23 = vmul.f32 %v543_v48, %v12832_v12  ;;  %v554_v48 = vrot.slane %v545_v2, 1  ;;  %v13269_v2 = vmul.f32 %v485_v22, %v12819_v3  ;;  %v637_v6 = vmul.f32 %v635_v29, %v12819_v3 }
 0x163   : > { %v13281_v16 = vmul.f32 %v635_v29, %v12832_v12 }
 0x164   : > { %v13245_v14 = vpop.permute.xlu1 %1175  ;;  %v13247_v58 = vpop.permute.xlu0 %1173  ;;  %v13288_v56 = vsel %vm16259_vm0, %v554_v48, %v556_v49 }
 0x165   : > { %16310 = vst [vmem:[#allocation47_spill] sm:$0xff] %v13245_v14  ;;  %16311 = vst [vmem:[#allocation48_spill] sm:$0xff] %v13247_v58  ;;  %v13276_v14 = vstv %s13232_s23  ;;  %s9975_s23 = sld [smem:[#allocation7 + $0x3]] }
 0x166   : > { %2805 = vrot.lane.b32.xlu1 %v2797_v4, %s12574_s28  ;;  %2466 = vrot.lane.b32.xlu0 %v2461_v59, %s12575_s29  ;;  %v13261_v59 = vmul.f32 %v485_v22, %v12813_v0  ;;  %16314 = vst [vmem:[#allocation51_spill] sm:$0xff] %v13281_v16  ;;  %v13305_v22 = vmul.f32 %v950_v55, %v12819_v3 }
 0x168   : > { %v13256_v58 = vpop.permute.xlu1 %1457  ;;  %v13258_v4 = vpop.permute.xlu0 %1177 }
 0x169   : > { %16312 = vst [vmem:[#allocation49_spill] sm:$0xff] %v13256_v58  ;;  %16313 = vst [vmem:[#allocation50_spill] sm:$0xff] %v13258_v4  ;;  %v638_v58 = vmul.f32 %v635_v29, %v12813_v0  ;;  %v636_v4 = vmul.f32 %v635_v29, %v12816_v1 }
 0x16a   : > { %2809 = vrot.lane.b32.xlu1 %v2799_v20, %s12574_s28  ;;  %2807 = vrot.lane.b32.xlu0 %v2798_v44, %s12574_s28  ;;  %v13291_v20 = vsel %vm16259_vm0, %v553_v57, %v554_v48  ;;  %v16315_v44 = vrot.slane %v13243_v23, 1  ;;  %v13311_v57 = vmul.f32 %v1008_v30, %v12813_v0  ;;  %v646_v48 = vrot.slane %v637_v6, 2  ;;  %v13335_v6 = vld [vmem:[%s12790_s12 + $0x10] sm:$0xff] }
 0x16b   : > { %v645_v60 = vrot.slane %v636_v4, 2  ;;  %v13346_v28 = vmul.f32 %v13335_v6, %v950_v55  ;;  %v2825_v12 = vmul.f32 %v13335_v6, %v13276_v14  ;;  %v2540_v26 = vmul.f32 %v13335_v6, %v2537_v5 }
 0x16c   : > { %v13296_v25 = vsel %vm16259_vm0, %v556_v49, %v16315_v44  ;;  %v13298_v1 = vpop.permute.xlu1 %1511  ;;  %v13300_v29 = vpop.permute.xlu0 %1509  ;;  %v2824_v49 = vmul.f32 %v13276_v14, %v12819_v3  ;;  %v16318_v44 = vrot.slane %v13182_v7, 1  ;;  %v2506_v3 = vmul.f32 %v13331_v31, %v2504_v15 }
 0x16d   : > { %16316 = vst [vmem:[#allocation52_spill] sm:$0xff] %v13298_v1  ;;  %16317 = vst [vmem:[#allocation53_spill] sm:$0xff] %v13300_v29  ;;  %v16319_v1 = vrot.slane %v13160_v32, 2  ;;  %v13326_v29 = vld [vmem:[%s12790_s12] sm:$0xff]  ;;  %v13338_v7 = vmul.f32 %v13335_v6, %v2504_v15  ;;  %v1020_v4 = vrot.slane %v13311_v57, 1  ;;  %v13359_v32 = vld [vmem:[%s12790_s12 + $0x18] sm:$0xff] }
 0x16e   : > { %2435 = vrot.lane.b32.xlu1 %v16318_v44, %s12574_s28  ;;  %v2823_v0 = vmul.f32 %v13326_v29, %v13276_v14  ;;  %v648_v44 = vrot.slane %v638_v58, 2  ;;  %v13343_v45 = vmul.f32 %v13326_v29, %v950_v55  ;;  %v1009_v51 = vmul.f32 %v13326_v29, %v1008_v30 }
 0x16f   : > { %2099 = vrot.lane.b32.xlu0 %v16319_v1, %s12575_s29  ;;  %v2505_v1 = vmul.f32 %v13326_v29, %v2504_v15  ;;  %v1018_v58 = vrot.slane %v13308_v63, 1  ;;  %v13362_v13 = vmul.f32 %v13359_v32, %v1008_v30  ;;  %v2514_v55 = vrot.slane %v2506_v3, 2 }
 0x170   : > { %v13352_v50 = vpop.permute.xlu1 %1146  ;;  %v13354_v41 = vpop.permute.xlu0 %1513  ;;  %v13371_v63 = vmul.f32 %v13359_v32, %v2504_v15  ;;  %v13374_v57 = vsel %vm644_vm1, %v646_v48, %v648_v44  ;;  %v13377_v30 = vsel %vm644_vm1, %v645_v60, %v646_v48  ;;  %v1017_v3 = vrot.slane %v1009_v51, 1 }
 0x171   : > { %16321 = vst [vmem:[#allocation55_spill] sm:$0xff] %v13352_v50  ;;  %16322 = vst [vmem:[#allocation56_spill] sm:$0xff] %v13354_v41  ;;  %v2516_v50 = vrot.slane %v13338_v7, 2  ;;  %v2513_v41 = vrot.slane %v2505_v1, 2  ;;  %v1101_v7 = vmul.f32 %v13331_v31, %v1099_v10  ;;  %v1102_v15 = vmul.f32 %v13335_v6, %v1099_v10 }
 0x172   : > { %16323 = vst [vmem:[#allocation57_spill] sm:$0xff] %v13362_v13  ;;  %2833 = vrot.lane.b32.xlu1 %v2824_v49, %s12575_s29  ;;  %16324 = vst [vmem:[#allocation58_spill] sm:$0xff] %v13374_v57  ;;  %v16326_v49 = vrot.slane %v13281_v16, 2  ;;  %v13394_v60 = vsel %vm16259_vm0, %v1018_v58, %v1020_v4  ;;  %v1468_v1 = vstv %s13313_s30  ;;  %v13402_v51 = vstv %s13317_s21  ;;  %s9994_s30 = sld [smem:[#allocation7 + $0x4]]  ;;  %s10007_s21 = sld [smem:[#allocation6 + $0x30]] }
 0x173   : > { %2831 = vrot.lane.b32.xlu0 %v2823_v0, %s12575_s29  ;;  %16325 = vst [vmem:[#allocation59_spill] sm:$0xff] %v13377_v30  ;;  %16330 = vst [vmem:[#allocation63_spill] sm:$0xff] %v13394_v60  ;;  %v2515_v16 = vsel %vm644_vm1, %v2513_v41, %v2514_v55  ;;  %v2539_v60 = vmul.f32 %v13331_v31, %v2537_v5  ;;  %v1109_v30 = vrot.slane %v1101_v7, 2  ;;  %v16337_v41 = vrot.slane %v13362_v13, 1 }
 0x174   : > { %v13382_v0 = vsel %vm644_vm1, %v648_v44, %v16326_v49  ;;  %v13388_v21 = vpop.permute.xlu1 %1544  ;;  %v13390_v40 = vpop.permute.xlu0 %1542  ;;  %v1100_v44 = vmul.f32 %v13326_v29, %v1099_v10  ;;  %16331 = vst [vmem:[#allocation64_spill] sm:$0xff] %v13402_v51  ;;  %v13405_v49 = vmul.f32 %v13359_v32, %v1099_v10  ;;  %v13418_v10 = vsel %vm16259_vm0, %v1017_v3, %v1018_v58 }
 0x175   : > { %16327 = vst [vmem:[#allocation60_spill] sm:$0xff] %v13382_v0  ;;  %16328 = vst [vmem:[#allocation61_spill] sm:$0xff] %v13388_v21  ;;  %v16333_v21 = vrot.slane %v13209_v24, 1  ;;  %v2538_v0 = vmul.f32 %v13326_v29, %v2537_v5  ;;  %v1111_v24 = vrot.slane %v1102_v15, 2  ;;  %v13434_v57 = vmul.f32 %v13326_v29, %v13402_v51 }
 0x176   : > { %16329 = vst [vmem:[#allocation62_spill] sm:$0xff] %v13390_v40  ;;  %16332 = vst [vmem:[#allocation65_spill] sm:$0xff] %v13405_v49  ;;  %v2517_v40 = vsel %vm644_vm1, %v2514_v55, %v2516_v50  ;;  %v13430_v55 = vsel %vm16259_vm0, %v1020_v4, %v16337_v41  ;;  %v1108_v58 = vrot.slane %v1100_v44, 2  ;;  %v13437_v3 = vmul.f32 %v13335_v6, %v1468_v1 }
 0x177   : > { %2468 = vrot.lane.b32.xlu1 %v16333_v21, %s12575_s29  ;;  %2835 = vrot.lane.b32.xlu0 %v2825_v12, %s12575_s29  ;;  %16334 = vst [vmem:[#allocation66_spill] sm:$0xff] %v13418_v10  ;;  %v13421_v21 = vmul.f32 %v13331_v31, %v1468_v1  ;;  %16338 = vst [vmem:[#allocation69_spill] sm:$0xff] %v13430_v55  ;;  %v2800_v15 = vmul.f32 %v13359_v32, %v13219_v33  ;;  %v16339_v4 = vrot.slane %v13371_v63, 2 }
 0x178   : > { %v13423_v12 = vpop.permute.xlu1 %1885  ;;  %v13425_v48 = vpop.permute.xlu0 %1546  ;;  %v2547_v44 = vrot.slane %v2539_v60, 2  ;;  %v2546_v13 = vrot.slane %v2538_v0, 2  ;;  %v2873_v55 = vstv %s13384_s13  ;;  %v1480_v0 = vrot.slane %v13437_v3, 1  ;;  %s10004_s13 = sld [smem:[#allocation6 + $0x2d]] }
 0x179   : > { %16335 = vst [vmem:[#allocation67_spill] sm:$0xff] %v13423_v12  ;;  %16336 = vst [vmem:[#allocation68_spill] sm:$0xff] %v13425_v48  ;;  %v2519_v41 = vsel %vm644_vm1, %v2516_v50, %v16339_v4  ;;  %v13448_v12 = vmul.f32 %v13359_v32, %v2537_v5  ;;  %v2549_v48 = vrot.slane %v2540_v26, 2  ;;  %v13462_v50 = vsel %vm644_vm1, %v1109_v30, %v1111_v24 }
 0x17a   : > { %16341 = vst [vmem:[#allocation71_spill] sm:$0xff] %v13462_v50  ;;  %v1478_v5 = vrot.slane %v13421_v21, 1  ;;  %v1469_v60 = vmul.f32 %v13326_v29, %v1468_v1  ;;  %v13472_v4 = vmul.f32 %v13359_v32, %v1468_v1  ;;  %v1559_v7 = vstv %s13399_s14  ;;  %s10010_s14 = sld [smem:[#allocation6 + $0x33]] }
 0x17b   : > { %2522 = vrot.lane.b32.xlu1 %v2517_v40, %s12574_s28  ;;  %2520 = vrot.lane.b32.xlu0 %v2515_v16, %s12574_s28  ;;  %v13455_v16 = vmul.f32 %v13335_v6, %v13402_v51  ;;  %v13459_v40 = vmul.f32 %v13331_v31, %v13402_v51  ;;  %v13476_v51 = vsel %vm644_vm1, %v1108_v58, %v1109_v30 }
 0x17c   : > { %v13465_v33 = vpop.permute.xlu1 %1889  ;;  %v13467_v26 = vpop.permute.xlu0 %1887  ;;  %16344 = vst [vmem:[#allocation74_spill] sm:$0xff] %v13476_v51  ;;  %v2875_v3 = vmul.f32 %v13331_v31, %v2873_v55  ;;  %v2550_v1 = vsel %vm644_vm1, %v2547_v44, %v2549_v48  ;;  %v13490_v30 = vmul.f32 %v13335_v6, %v2873_v55  ;;  %v2874_v58 = vmul.f32 %v13326_v29, %v2873_v55 }
 0x17d   : > { %16340 = vst [vmem:[#allocation70_spill] sm:$0xff] %v13459_v40  ;;  %16342 = vst [vmem:[#allocation72_spill] sm:$0xff] %v13465_v33  ;;  %v16345_v40 = vrot.slane %v13405_v49, 2  ;;  %v2548_v33 = vsel %vm644_vm1, %v2546_v13, %v2547_v44  ;;  %v13501_v21 = vmul.f32 %v13359_v32, %v1559_v7  ;;  %v512_v13 = vadd.f32 %v12980_v35, %v13264_v11 }
 0x17e   : > { %16343 = vst [vmem:[#allocation73_spill] sm:$0xff] %v13467_v26  ;;  %v13506_v44 = vsel %vm16259_vm0, %v1478_v5, %v1480_v0  ;;  %v1477_v49 = vrot.slane %v1469_v60, 1  ;;  %v16350_v35 = vrot.slane %v13448_v12, 2  ;;  %v2885_v60 = vrot.slane %v13490_v30, 1 }
 0x17f   : > { %v13481_v50 = vsel %vm644_vm1, %v1111_v24, %v16345_v40  ;;  %2811 = vrot.lane.b32.xlu1 %v2800_v15, %s12574_s28  ;;  %2524 = vrot.lane.b32.xlu0 %v2519_v41, %s12574_s28  ;;  %v1561_v15 = vmul.f32 %v13331_v31, %v1559_v7  ;;  %v1562_v41 = vmul.f32 %v13335_v6, %v1559_v7  ;;  %v16221_v10 = vrot.slane %v13501_v21, 2 }
 0x180   : > { %16346 = vst [vmem:[#allocation75_spill] sm:$0xff] %v13481_v50  ;;  %v13493_v26 = vpop.permute.xlu1 %1515  ;;  %v13495_v24 = vpop.permute.xlu0 %1179  ;;  %v1560_v40 = vmul.f32 %v13326_v29, %v1559_v7  ;;  %16349 = vst [vmem:[#allocation78_spill] sm:$0xff] %v13506_v44  ;;  %v2826_v7 = vmul.f32 %v13359_v32, %v13276_v14  ;;  %v2552_v11 = vsel %vm644_vm1, %v2549_v48, %v16350_v35  ;;  %v2883_v50 = vrot.slane %v2875_v3, 1 }
 0x181   : > { %16347 = vst [vmem:[#allocation76_spill] sm:$0xff] %v13493_v26  ;;  %16348 = vst [vmem:[#allocation77_spill] sm:$0xff] %v13495_v24  ;;  %v513_v24 = vadd.f32 %v12988_v39, %v13269_v2  ;;  %v2882_v26 = vrot.slane %v2874_v58, 1  ;;  %v13524_v51 = vmul.f32 %v13359_v32, %v2873_v55  ;;  %v2906_v39 = vstv %s13451_s10  ;;  %s12580_s10 = smov 15  }
 0x182   : > { %v1571_v14 = vrot.slane %v1562_v41, 2  ;;  %v1568_v44 = vrot.slane %v1560_v40, 2  ;;  %v514_v48 = vadd.f32 %v12978_v34, %v13261_v59  ;;  %v538_v3 = vadd.f32 %v12986_v38, %v512_v13 }
 0x183   : > { %2555 = vrot.lane.b32.xlu1 %v2550_v1, %s12575_s29  ;;  %2553 = vrot.lane.b32.xlu0 %v2548_v33, %s12575_s29  ;;  %v1569_v1 = vrot.slane %v1561_v15, 2  ;;  %v539_v30 = vadd.f32 %v12996_v43, %v513_v24  ;;  %v515_v55 = vadd.f32 %v13002_v47, %v13285_v17  ;;  %v2908_v58 = vmul.f32 %v13331_v31, %v2906_v39 }
 0x184   : > { %v13527_v2 = vpop.permute.xlu1 %1913  ;;  %v13529_v33 = vpop.permute.xlu0 %1911  ;;  %v13542_v15 = vmul.f32 %v13335_v6, %v2906_v39  ;;  %v2907_v41 = vmul.f32 %v13326_v29, %v2906_v39  ;;  %v540_v34 = vadd.f32 %v12994_v42, %v514_v48  ;;  %v2886_v38 = vsel %vm16259_vm0, %v2883_v50, %v2885_v60 }
 0x185   : > { %v2884_v43 = vsel %vm16259_vm0, %v2882_v26, %v2883_v50  ;;  %v2887_v47 = vrot.slane %v13524_v51, 1  ;;  %v13550_v17 = vsel %vm16259_vm0, %v1477_v49, %v1478_v5  ;;  %v16351_v59 = vrot.slane %v13472_v4, 1 }
 0x186   : > { %v13562_v42 = vsel %vm644_vm1, %v1569_v1, %v1571_v14  ;;  %v13565_v50 = vsel %vm644_vm1, %v1568_v44, %v1569_v1  ;;  %v541_v26 = vadd.f32 %v13000_v46, %v515_v55  ;;  %v565_v49 = vadd.f32 %v13288_v56, %v539_v30 }
 0x187   : > { %2837 = vrot.lane.b32.xlu1 %v2826_v7, %s12575_s29  ;;  %2557 = vrot.lane.b32.xlu0 %v2552_v11, %s12575_s29  ;;  %v13555_v24 = vsel %vm16259_vm0, %v1480_v0, %v16351_v59  ;;  %v13572_v5 = vsel %vm644_vm1, %v1571_v14, %v16221_v10  ;;  %v2964_v0 = vstv %s13509_s15  ;;  %v2916_v7 = vrot.slane %v2908_v58, 1  ;;  %s12581_s15 = smov 30  }
 0x188   : > { %v13557_v40 = vpop.permute.xlu1 %1548  ;;  %v13559_v13 = vpop.permute.xlu0 %1915  ;;  %v2918_v35 = vrot.slane %v13542_v15, 1  ;;  %v2915_v11 = vrot.slane %v2907_v41, 1  ;;  %v2997_v44 = vstv %s13520_s17  ;;  %v564_v1 = vadd.f32 %v13291_v20, %v538_v3  ;;  %s12582_s17 = smov 45  }
 0x189   : > { %v566_v46 = vadd.f32 %v13296_v25, %v540_v34  ;;  %v2888_v56 = vsel %vm16259_vm0, %v2885_v60, %v2887_v47  ;;  %v13585_v14 = vmul.f32 %v13359_v32, %v2906_v39  ;;  %v598_v48 = vadd.f32 %v13011_v53, %v565_v49 }
 0x18a   : > { %v2966_v58 = vmul.f32 %v13331_v31, %v2964_v0  ;;  %v2967_v15 = vmul.f32 %v13335_v6, %v2964_v0  ;;  %v2965_v20 = vmul.f32 %v13326_v29, %v2964_v0  ;;  %v597_v25 = vadd.f32 %v13013_v54, %v564_v1 }
 0x18b   : > { %2891 = vrot.lane.b32.xlu1 %v2886_v38, %s12574_s28  ;;  %2889 = vrot.lane.b32.xlu0 %v2884_v43, %s12574_s28  ;;  %v599_v3 = vadd.f32 %v13023_v62, %v566_v46  ;;  %v2998_v60 = vmul.f32 %v13326_v29, %v2997_v44  ;;  %v13599_v39 = vmul.f32 %v13331_v31, %v2997_v44  ;;  %v16352_v53 = vrot.slane %v13243_v23, 1 }
 0x18c   : > { %v13588_v30 = vpop.permute.xlu1 %1602  ;;  %v13590_v55 = vpop.permute.xlu0 %1600  ;;  %v16353_v34 = vrot.slane %v13371_v63, 2  ;;  %v2919_v38 = vsel %vm16259_vm0, %v2916_v7, %v2918_v35  ;;  %v2917_v54 = vsel %vm16259_vm0, %v2915_v11, %v2916_v7  ;;  %v630_v62 = vadd.f32 %v13021_v61, %v597_v25 }
 0x18d   : > { %v567_v41 = vadd.f32 %v16352_v53, %v541_v26  ;;  %v632_v43 = vadd.f32 %v13033_v8, %v599_v3  ;;  %v2920_v59 = vrot.slane %v13585_v14, 1  ;;  %v13613_v49 = vmul.f32 %v13359_v32, %v2964_v0 }
 0x18e   : > { %v631_v23 = vadd.f32 %v13035_v9, %v598_v48  ;;  %v2974_v1 = vrot.slane %v2966_v58, 2  ;;  %v2976_v46 = vrot.slane %v2967_v15, 2  ;;  %v977_v7 = vadd.f32 %v13046_v19, %v13343_v45  ;;  %v16355_v58 = vld [vmem:[#allocation59_spill] sm:$0xff] }
 0x18f   : > { %2526 = vrot.lane.b32.xlu1 %v16353_v34, %s12574_s28  ;;  %2893 = vrot.lane.b32.xlu0 %v2888_v56, %s12574_s28  ;;  %v2973_v56 = vrot.slane %v2965_v20, 2  ;;  %v979_v61 = vadd.f32 %v13058_v27, %v13346_v28  ;;  %v3006_v8 = vrot.slane %v2998_v60, 2  ;;  %v3007_v11 = vrot.slane %v13599_v39, 2  ;;  %v16356_v20 = vld [vmem:[#allocation60_spill] sm:$0xff]  ;;  %v16357_v60 = vld [vmem:[#allocation17_spill] sm:$0xff]  ;;  %v16359_v34 = vld [vmem:[#allocation35_spill] sm:$0xff] }
 0x190   : > { %v13616_v26 = vpop.permute.xlu1 %1891  ;;  %v13618_v63 = vpop.permute.xlu0 %1604  ;;  %v978_v0 = vadd.f32 %v13044_v18, %v13305_v22  ;;  %v3000_v9 = vmul.f32 %v13335_v6, %v2997_v44  ;;  %v13633_v14 = vmul.f32 %v13359_v32, %v2997_v44  ;;  %v1003_v19 = vadd.f32 %v13069_v37, %v977_v7  ;;  %v16354_v22 = vld [vmem:[#allocation58_spill] sm:$0xff] }
 0x191   : > { %v1005_v27 = vadd.f32 %v13080_v52, %v979_v61  ;;  %v2921_v28 = vsel %vm16259_vm0, %v2918_v35, %v2920_v59  ;;  %v2978_v45 = vrot.slane %v13613_v49, 2  ;;  %v657_v48 = vadd.f32 %v16354_v22, %v631_v23  ;;  %v16362_v23 = vld [vmem:[#allocation21_spill] sm:$0xff]  ;;  %v16367_v22 = vld [vmem:[#allocation36_spill] sm:$0xff] }
 0x192   : > { %v1004_v18 = vadd.f32 %v13067_v36, %v978_v0  ;;  %v656_v15 = vadd.f32 %v16355_v58, %v630_v62  ;;  %v658_v25 = vadd.f32 %v16356_v20, %v632_v43  ;;  %v600_v37 = vadd.f32 %v16357_v60, %v567_v41  ;;  %v16358_v36 = vld [vmem:[#allocation33_spill] sm:$0xff]  ;;  %v16361_v43 = vld [vmem:[#allocation54_spill] sm:$0xff] }
 0x193   : > { %2924 = vrot.lane.b32.xlu1 %v2919_v38, %s12575_s29  ;;  %2922 = vrot.lane.b32.xlu0 %v2917_v54, %s12575_s29  ;;  %v2977_v52 = vsel %vm644_vm1, %v2974_v1, %v2976_v46  ;;  %v2975_v35 = vsel %vm644_vm1, %v2973_v56, %v2974_v1  ;;  %v13651_v39 = vsel %vm644_vm1, %v3006_v8, %v3007_v11  ;;  %v16360_v54 = vrot.slane %v13448_v12, 2  ;;  %v16363_v56 = vld [vmem:[#allocation66_spill] sm:$0xff]  ;;  %v16364_v61 = vld [vmem:[#allocation69_spill] sm:$0xff]  ;;  %v16365_v8 = vld [vmem:[#allocation63_spill] sm:$0xff] }
 0x194   : > { %v13643_v3 = vpop.permute.xlu1 %1635  ;;  %v13645_v44 = vpop.permute.xlu0 %1633  ;;  %v1437_v53 = vadd.f32 %v16358_v36, %v13434_v57  ;;  %v1439_v38 = vadd.f32 %v16359_v34, %v13455_v16  ;;  %v3009_v41 = vrot.slane %v3000_v9, 2  ;;  %v3011_v62 = vrot.slane %v13633_v14, 2  ;;  %v16366_v0 = vld [vmem:[#allocation70_spill] sm:$0xff]  ;;  %v16368_v9 = vld [vmem:[#allocation40_spill] sm:$0xff] }
 0x195   : > { %v980_v1 = vadd.f32 %v16362_v23, %v16361_v43  ;;  %v1028_v7 = vadd.f32 %v16363_v56, %v1003_v19  ;;  %v1030_v57 = vadd.f32 %v16364_v61, %v1005_v27  ;;  %v2979_v16 = vsel %vm644_vm1, %v2976_v46, %v2978_v45  ;;  %v16369_v20 = vld [vmem:[#allocation42_spill] sm:$0xff]  ;;  %v16371_v27 = vld [vmem:[#allocation25_spill] sm:$0xff]  ;;  %v16372_v23 = vld [vmem:[#allocation28_spill] sm:$0xff] }
 0x196   : > { %v1029_v12 = vadd.f32 %v16365_v8, %v1004_v18  ;;  %v1463_v58 = vadd.f32 %v16368_v9, %v1437_v53  ;;  %v1465_v60 = vadd.f32 %v16369_v20, %v1439_v38  ;;  %v16370_v19 = vld [vmem:[#allocation18_spill] sm:$0xff]  ;;  %v16374_v18 = vld [vmem:[#allocation19_spill] sm:$0xff]  ;;  %v13684_v10 = vstv %s13627_s18  ;;  %v16376_v38 = vld [vmem:[#allocation20_spill] sm:$0xff]  ;;  %s12583_s18 = smov 60  }
 0x197   : > { %2559 = vrot.lane.b32.xlu1 %v16360_v54, %s12575_s29  ;;  %2926 = vrot.lane.b32.xlu0 %v2921_v28, %s12575_s29  ;;  %v1438_v28 = vadd.f32 %v16367_v22, %v16366_v0  ;;  %v633_v54 = vadd.f32 %v16370_v19, %v600_v37  ;;  %v1006_v43 = vadd.f32 %v16371_v27, %v980_v1  ;;  %v16373_v46 = vld [vmem:[#allocation30_spill] sm:$0xff]  ;;  %v16375_v0 = vld [vmem:[#allocation39_spill] sm:$0xff] }
 0x198   : > { %v13674_v36 = vpop.permute.xlu1 %1917  ;;  %v13676_v34 = vpop.permute.xlu0 %1637  ;;  %v1061_v56 = vadd.f32 %v16372_v23, %v1028_v7  ;;  %v1063_v61 = vadd.f32 %v16373_v46, %v1030_v57  ;;  %v690_v8 = vadd.f32 %v16374_v18, %v657_v48  ;;  %v3012_v37 = vsel %vm644_vm1, %v3009_v41, %v3011_v62  ;;  %v16377_v7 = vld [vmem:[#allocation27_spill] sm:$0xff]  ;;  %v16378_v57 = vld [vmem:[#allocation32_spill] sm:$0xff]  ;;  %v16379_v9 = vld [vmem:[#allocation34_spill] sm:$0xff] }
 0x199   : > { %v1464_v53 = vadd.f32 %v16375_v0, %v1438_v28  ;;  %v689_v1 = vadd.f32 %v16376_v38, %v656_v15  ;;  %v1062_v48 = vadd.f32 %v16377_v7, %v1029_v12  ;;  %v16380_v20 = vld [vmem:[#allocation23_spill] sm:$0xff]  ;;  %v1488_v51 = vadd.f32 %v13550_v17, %v1463_v58  ;;  %v16381_v12 = vld [vmem:[#allocation24_spill] sm:$0xff]  ;;  %v16385_v0 = vld [vmem:[#allocation57_spill] sm:$0xff] }
 0x19a   : > { %v1094_v22 = vadd.f32 %v16378_v57, %v1061_v56  ;;  %v1096_v28 = vadd.f32 %v16379_v9, %v1063_v61  ;;  %v3010_v15 = vsel %vm644_vm1, %v3007_v11, %v3009_v41  ;;  %v16382_v56 = vld [vmem:[#allocation51_spill] sm:$0xff]  ;;  %v16386_v38 = vrot.slane %v16385_v0, 1  ;;  %v16387_v58 = vld [vmem:[#allocation78_spill] sm:$0xff]  ;;  %v16389_v57 = vld [vmem:[#allocation56_spill] sm:$0xff] }
 0x19b   : > { %2928 = vrot.lane.b32.xlu1 %v2920_v59, %s12575_s29  ;;  %2895 = vrot.lane.b32.xlu0 %v2887_v47, %s12574_s28  ;;  %v723_v59 = vadd.f32 %v16380_v20, %v690_v8  ;;  %v1490_v47 = vadd.f32 %v13555_v24, %v1465_v60  ;;  %v722_v23 = vadd.f32 %v16381_v12, %v689_v1  ;;  %v16383_v46 = vrot.slane %v16382_v56, 2  ;;  %v16384_v18 = vld [vmem:[#allocation31_spill] sm:$0xff]  ;;  %v16388_v60 = vld [vmem:[#allocation53_spill] sm:$0xff]  ;;  %v16390_v11 = vld [vmem:[#allocation22_spill] sm:$0xff] }
 0x19c   : > { %v13707_v19 = vpop.permute.xlu1 %1971  ;;  %v13709_v27 = vpop.permute.xlu0 %1969  ;;  %v1095_v8 = vadd.f32 %v16384_v18, %v1062_v48  ;;  %v1031_v17 = vadd.f32 %v16386_v38, %v1006_v43  ;;  %v1489_v24 = vadd.f32 %v16387_v58, %v1464_v53  ;;  %v1521_v7 = vadd.f32 %v16388_v60, %v1488_v51  ;;  %v16391_v1 = vld [vmem:[#allocation37_spill] sm:$0xff]  ;;  %v16393_v48 = vld [vmem:[#allocation75_spill] sm:$0xff]  ;;  %v16394_v53 = vld [vmem:[#allocation52_spill] sm:$0xff] }
 0x19d   : > { %v659_v61 = vadd.f32 %v16383_v46, %v633_v54  ;;  %v1523_v9 = vadd.f32 %v16389_v57, %v1490_v47  ;;  %v691_v41 = vadd.f32 %v16390_v11, %v658_v25  ;;  %v16392_v54 = vld [vmem:[#allocation74_spill] sm:$0xff]  ;;  %v1121_v56 = vadd.f32 %v16393_v48, %v1096_v28  ;;  %v16396_v18 = vld [vmem:[#allocation68_spill] sm:$0xff]  ;;  %v16397_v25 = vld [vmem:[#allocation41_spill] sm:$0xff] }
 0x19e   : > { %v1064_v20 = vadd.f32 %v16391_v1, %v1031_v17  ;;  %v1119_v12 = vadd.f32 %v16392_v54, %v1094_v22  ;;  %v13728_v43 = vadd.f32 %v13684_v10, %v723_v59  ;;  %v1522_v51 = vadd.f32 %v16394_v53, %v1489_v24  ;;  %v16395_v46 = vld [vmem:[#allocation62_spill] sm:$0xff]  ;;  %v16398_v22 = vld [vmem:[#allocation71_spill] sm:$0xff]  ;;  %v16399_v28 = vld [vmem:[#allocation44_spill] sm:$0xff] }
 0x19f   : > { %2982 = vrot.lane.b32.xlu1 %v2977_v52, %s12574_s28  ;;  %2980 = vrot.lane.b32.xlu0 %v2975_v35, %s12574_s28  ;;  %v1554_v47 = vadd.f32 %v16395_v46, %v1521_v7  ;;  %v1556_v52 = vadd.f32 %v16396_v18, %v1523_v9  ;;  %v1120_v17 = vadd.f32 %v16398_v22, %v1095_v8  ;;  %v16400_v59 = vld [vmem:[#allocation46_spill] sm:$0xff]  ;;  %v16402_v9 = vld [vmem:[#allocation61_spill] sm:$0xff]  ;;  %v13749_v1 = vstv %s13691_s24  ;;  %v16404_v54 = vld [vmem:[#allocation43_spill] sm:$0xff]  ;;  %s12584_s24 = smov 75  }
 0x1a0   : > { %v13733_v0 = vpop.permute.xlu1 %1606  ;;  %v13735_v35 = vpop.permute.xlu0 %1973  ;;  %v1097_v38 = vadd.f32 %v16397_v25, %v1064_v20  ;;  %v1152_v58 = vadd.f32 %v16399_v28, %v1119_v12  ;;  %v1154_v60 = vadd.f32 %v16400_v59, %v1121_v56  ;;  %v13744_v24 = vadd.f32 %v13684_v10, %v722_v23  ;;  %v16401_v7 = vld [vmem:[#allocation26_spill] sm:$0xff]  ;;  %v16403_v8 = vld [vmem:[#allocation29_spill] sm:$0xff]  ;;  %v16405_v48 = vld [vmem:[#allocation48_spill] sm:$0xff] }
 0x1a1   : > { %v724_v57 = vadd.f32 %v16401_v7, %v691_v41  ;;  %v1555_v11 = vadd.f32 %v16402_v9, %v1522_v51  ;;  %v692_v20 = vadd.f32 %v16403_v8, %v659_v61  ;;  %v1153_v12 = vadd.f32 %v16404_v54, %v1120_v17  ;;  %v16406_v53 = vld [vmem:[#allocation50_spill] sm:$0xff]  ;;  %v16408_v61 = vld [vmem:[#allocation47_spill] sm:$0xff]  ;;  %v16409_v17 = vld [vmem:[#allocation65_spill] sm:$0xff] }
 0x1a2   : > { %v1185_v56 = vadd.f32 %v16405_v48, %v1152_v58  ;;  %v1187_v23 = vadd.f32 %v16406_v53, %v1154_v60  ;;  %v1190_v46 = vstv %s13701_s25  ;;  %v13760_v18 = vstv %s13705_s26  ;;  %v16413_v53 = vld [vmem:[#allocation64_spill] sm:$0xff]  ;;  %s12585_s25 = smov 2   ;;  %s12586_s26 = smov 1  }
 0x1a3   : > { %3013 = vrot.lane.b32.xlu1 %v13651_v39, %s12575_s29  ;;  %2984 = vrot.lane.b32.xlu0 %v2979_v16, %s12574_s28  ;;  %v1579_v41 = vadd.f32 %v13565_v50, %v1554_v47  ;;  %v1581_v51 = vadd.f32 %v13572_v5, %v1556_v52  ;;  %v16407_v16 = vld [vmem:[#allocation38_spill] sm:$0xff]  ;;  %v1186_v28 = vadd.f32 %v16408_v61, %v1153_v12  ;;  %v16410_v59 = vrot.slane %v16409_v17, 2 }
 0x1a4   : > { %v13764_v25 = vpop.permute.xlu1 %2004  ;;  %v13766_v39 = vpop.permute.xlu0 %2002  ;;  %v725_v22 = vadd.f32 %v16407_v16, %v692_v20  ;;  %v13774_v60 = vmul.f32 %v13331_v31, %v13749_v1  ;;  %v16226_v7 = vmax.f32 %v13728_v43, 0.0  ;;  %v1580_v50 = vadd.f32 %v13562_v42, %v1555_v11  ;;  %v16411_v20 = vld [vmem:[#allocation55_spill] sm:$0xff] }
 0x1a5   : > { %v1122_v58 = vadd.f32 %v16410_v59, %v1097_v38  ;;  %v1612_v5 = vadd.f32 %v13590_v55, %v1579_v41  ;;  %v1614_v47 = vadd.f32 %v13618_v63, %v1581_v51  ;;  %v16227_v52 = vmax.f32 %v13744_v24, 0.0 }
 0x1a6   : > { %v13784_v38 = vadd.f32 %v13684_v10, %v724_v57  ;;  %v13786_v9 = vadd.f32 %v1190_v46, %v1185_v56  ;;  %v13788_v8 = vadd.f32 %v1190_v46, %v1187_v23  ;;  %v1613_v11 = vadd.f32 %v13588_v30, %v1580_v50 }
 0x1a7   : > { %3017 = vrot.lane.b32.xlu1 %v3012_v37, %s12575_s29  ;;  %3015 = vrot.lane.b32.xlu0 %v3010_v15, %s12575_s29  ;;  %v1155_v42 = vadd.f32 %v16411_v20, %v1122_v58  ;;  %v1645_v55 = vadd.f32 %v13645_v44, %v1612_v5  ;;  %v1647_v63 = vadd.f32 %v13676_v34, %v1614_v47  ;;  %v13802_v57 = vstv %s13741_s16  ;;  %v16412_v34 = vld [vmem:[#allocation77_spill] sm:$0xff]  ;;  %s3406_s16 = sld [smem:[#allocation11]] }
 0x1a8   : > { %v13794_v37 = vpop.permute.xlu1 %2345  ;;  %v13796_v15 = vpop.permute.xlu0 %2006  ;;  %v13799_v54 = vadd.f32 %v13684_v10, %v725_v22  ;;  %v13806_v12 = vmul.f32 %v13335_v6, %v13749_v1  ;;  %v1929_v30 = vmul.f32 %v13326_v29, %v13749_v1  ;;  %v13812_v44 = vadd.f32 %v1190_v46, %v1186_v28  ;;  %v16417_v47 = vld [vmem:[#allocation45_spill] sm:$0xff] }
 0x1a9   : > { %v1188_v48 = vadd.f32 %v16412_v34, %v1155_v42  ;;  %v1646_v56 = vadd.f32 %v13643_v3, %v1613_v11  ;;  %v12251_v10 = vpack.i.bf16 %v16226_v7, %v16227_v52  ;;  %v1414_v23 = vmul.f32 %v13359_v32, %v16413_v53 }
 0x1aa   : > { %v16223_v41 = vmax.f32 %v13786_v9, 0.0  ;;  %v1871_v3 = vmul.f32 %v13326_v29, %v13760_v18  ;;  %v16230_v14 = vmax.f32 %v13784_v38, 0.0  ;;  %v13834_v49 = vadd.f32 %v13802_v57, %v1645_v55 }
 0x1ab   : > { %3019 = vrot.lane.b32.xlu1 %v3011_v62, %s12575_s29  ;;  %2986 = vrot.lane.b32.xlu0 %v2978_v45, %s12574_s28  ;;  %v16225_v62 = vmax.f32 %v13788_v8, 0.0  ;;  %v13837_v45 = vadd.f32 %v13802_v57, %v1647_v63  ;;  %v16222_v22 = vmax.f32 %v13799_v54, 0.0  ;;  %v1938_v61 = vrot.slane %v13774_v60, 1 }
 0x1ac   : > { %16414 = vst [vmem:[#allocation58_spill] sm:$0xff] %v13834_v49  ;;  %v13839_v51 = vpop.permute.xlu1 %2349  ;;  %v13841_v16 = vpop.permute.xlu0 %2347  ;;  %v1940_v28 = vrot.slane %v13806_v12, 1  ;;  %v1937_v17 = vrot.slane %v1929_v30, 1  ;;  %v16224_v59 = vmax.f32 %v13812_v44, 0.0  ;;  %v13847_v58 = vadd.f32 %v1190_v46, %v1188_v48  ;;  %v16418_v48 = vld [vmem:[#allocation49_spill] sm:$0xff] }
 0x1ad   : > { %v13850_v50 = vadd.f32 %v13802_v57, %v1646_v56  ;;  %v297_v5 = vlaneseq  ;;  %v1440_v60 = vadd.f32 %v16417_v47, %v1414_v23  ;;  %v12256_v20 = vpack.i.bf16 %v16223_v41, %v16222_v22 }
 0x1ae   : > { %16415 = vst [vmem:[#allocation59_spill] sm:$0xff] %v13847_v58  ;;  %v1872_v46 = vmul.f32 %v13331_v31, %v13760_v18  ;;  %v13865_v42 = vmul.f32 %v13359_v32, %v13749_v1  ;;  %v12261_v11 = vpack.i.bf16 %v16225_v62, %v16224_v59  ;;  %v16229_v55 = vmax.f32 %v13834_v49, 0.0  ;;  %v16419_v59 = vld [vmem:[#allocation67_spill] sm:$0xff] }
 0x1af   : > { %16416 = vst [vmem:[#allocation60_spill] sm:$0xff] %v13850_v50  ;;  %744 = vrot.lane.b32.xlu1 %v16230_v14, %s12574_s28  ;;  %12252 = vrot.lane.b32.xlu0 %v12251_v10, %s12574_s28  ;;  %v16232_v63 = vmax.f32 %v13837_v45, 0.0  ;;  %v13877_v34 = vshrl.u32 %v297_v5, 7  ;;  %v1466_v56 = vadd.f32 %v16418_v48, %v1440_v60  ;;  %v1873_v1 = vmul.f32 %v13335_v6, %v13760_v18  ;;  %v16420_v48 = vld [vmem:[#allocation73_spill] sm:$0xff] }
 0x1b0   : > { %v13873_v12 = vpop.permute.xlu1 %1975  ;;  %v13875_v30 = vpop.permute.xlu0 %1639  ;;  %v2019_v10 = vstv %s13810_s11  ;;  %v13883_v53 = vand.u32 127, %v297_v5  ;;  %v16228_v23 = vmax.f32 %v13847_v58, 0.0  ;;  %v16231_v47 = vmax.f32 %v13850_v50, 0.0  ;;  %s9893_s11 = sshll.u32 %s16575_s22, 3  ;;  %s10079_s22 = sld [smem:[#allocation11 + $0x2]] }
 0x1b1   : > { %v1941_v22 = vsel %vm16259_vm0, %v1938_v61, %v1940_v28  ;;  %v1939_v41 = vsel %vm16259_vm0, %v1937_v17, %v1938_v61  ;;  %v1897_v60 = vadd.f32 %v16419_v59, %v1871_v3  ;;  %v1898_v62 = vadd.f32 %v16420_v48, %v1872_v46 }
 0x1b2   : > { %v302_v5 = vmul.u32 2, %v13877_v34  ;;  %v12266_v52 = vpack.i.bf16 %v16229_v55, %v16228_v23  ;;  %v12271_v61 = vpack.i.bf16 %v16232_v63, %v16231_v47  ;;  %v2021_v3 = vmul.f32 %v13331_v31, %v2019_v10  ;;  %v16422_v55 = vld [vmem:[#allocation72_spill] sm:$0xff] }
 0x1b3   : > { %12262 = vrot.lane.b32.xlu1 %v12261_v11, %s12574_s28  ;;  %12257 = vrot.lane.b32.xlu0 %v12256_v20, %s12574_s28  ;;  %v2022_v59 = vmul.f32 %v13335_v6, %v2019_v10  ;;  %v16421_v46 = vrot.slane %v13472_v4, 1  ;;  %v1924_v48 = vadd.f32 %v13527_v2, %v1898_v62  ;;  %v1923_v23 = vadd.f32 %v13529_v33, %v1897_v60  ;;  %v16423_v63 = vld [vmem:[#allocation76_spill] sm:$0xff] }
 0x1b4   : > { %v13903_v17 = vpop.permute.xlu1 %2373  ;;  %v13905_v20 = vpop.permute.xlu0 %2371  ;;  %vm304_vm2 = vcmp.eq.s32.totalorder %v13883_v53, %v302_v5  ;;  %v1899_v14 = vadd.f32 %v16422_v55, %v1873_v1  ;;  %v2020_v47 = vmul.f32 %v13326_v29, %v2019_v10  ;;  %v16234_v58 = vmov 0.0  }
 0x1b5   : > { %v1491_v11 = vadd.f32 %v16421_v46, %v1466_v56  ;;  %v13920_v4 = vsel %vm304_vm2, 1.0, %v16234_v58  ;;  %v16425_v33 = vrot.slane %v13865_v42, 1  ;;  %v1948_v1 = vadd.f32 %v1939_v41, %v1923_v23 }
 0x1b6   : > { %16424 = vst [vmem:[#allocation17_spill] sm:$0xff] %v13920_v4  ;;  %v1925_v2 = vadd.f32 %v13559_v13, %v1899_v14  ;;  %10793 = vmatprep.mubr.msk.f32.mxu0 %vm16258_vm3, %v13920_v4  ;;  %v13934_v60 = vmul.f32 %v13359_v32, %v2019_v10  ;;  %v2029_v5 = vrot.slane %v2021_v3, 2  ;;  %v2031_v13 = vrot.slane %v2022_v59, 2 }
 0x1b7   : > { %12272 = vrot.lane.b32.xlu1 %v12271_v61, %s12574_s28  ;;  %12267 = vrot.lane.b32.xlu0 %v12266_v52, %s12574_s28  ;;  %v1524_v7 = vadd.f32 %v16423_v63, %v1491_v11  ;;  %v1943_v62 = vsel %vm16259_vm0, %v1940_v28, %v16425_v33  ;;  %v1949_v63 = vadd.f32 %v1941_v22, %v1924_v48  ;;  %v2028_v14 = vrot.slane %v2020_v47, 2 }
 0x1b8   : > { %v13926_v55 = vpop.permute.xlu1 %2008  ;;  %v13928_v56 = vpop.permute.xlu0 %2375  ;;  %v1981_v28 = vadd.f32 %v13709_v27, %v1948_v1  ;;  %v1950_v46 = vadd.f32 %v1943_v62, %v1925_v2  ;;  %v16426_v58 = vrot.slane %v13501_v21, 2  ;;  %v16244_v41 = vrot.slane %v13934_v60, 2 }
 0x1b9   : > { %v1557_v52 = vadd.f32 %v13557_v40, %v1524_v7  ;;  %v1982_v61 = vadd.f32 %v13707_v19, %v1949_v63  ;;  %v2032_v10 = vsel %vm644_vm1, %v2029_v5, %v2031_v13  ;;  %v2030_v19 = vsel %vm644_vm1, %v2028_v14, %v2029_v5 }
 0x1ba   : > { %v2014_v7 = vadd.f32 %v13766_v39, %v1981_v28  ;;  %v1983_v22 = vadd.f32 %v13735_v35, %v1950_v46  ;;  %v2034_v35 = vsel %vm644_vm1, %v2031_v13, %v16244_v41  ;;  %v13958_v59 = vadd.s32 8, %v13877_v34 }
 0x1bb   : > { %v1582_v4 = vadd.f32 %v16426_v58, %v1557_v52  ;;  %v2015_v40 = vadd.f32 %v13764_v25, %v1982_v61  ;;  %v13951_v58 = vmul.u32 2, %v13883_v53  ;;  %v16428_v1 = vmov 0.0  }
 0x1bc   : > { %v2063_v11 = vpop.permute.xlu1 %2062  ;;  %v2061_v33 = vpop.permute.xlu0 %2060  ;;  %v2016_v23 = vadd.f32 %v13796_v15, %v1983_v22  ;;  %v2039_v3 = vadd.f32 %v2030_v19, %v2014_v7  ;;  %v16242_v46 = vmov 1.0   ;;  %v16433_v49 = vrot.slane %v13865_v42, 1 }
 0x1bd   : > { %v1615_v27 = vadd.f32 %v13733_v0, %v1582_v4  ;;  %v2040_v39 = vadd.f32 %v2032_v10, %v2015_v40  ;;  %v13960_v4 = vstv %s9975_s23  ;;  %vm314_vm4 = vcmp.eq.s32.totalorder %v13958_v59, %v13951_v58  ;;  %s10343_s23 = sld [smem:[#allocation11 + $0xd]] }
 0x1be   : > { %v2072_v48 = vadd.f32 %v2061_v33, %v2039_v3  ;;  %v2041_v15 = vadd.f32 %v2034_v35, %v2016_v23  ;;  %v9897_v5 = vsel %vm314_vm4, 1.0, %v16428_v1  ;;  %vm16255_vm7 = vcmp.eq.s32.totalorder %v13877_v34, %v13951_v58 }
 0x1bf   : > { %v1648_v25 = vadd.f32 %v13875_v30, %v1615_v27  ;;  %v2073_v0 = vadd.f32 %v2063_v11, %v2040_v39  ;;  %v13977_v11 = vpack.c.bf16 %v9897_v5, %v16242_v46  ;;  %vm14197_vm10 = vmpackc.low %vm314_vm4, %vm16255_vm7 }
 0x1c0   : > { %v13948_v47 = vpop.permute.xlu1 %2351  ;;  %v2065_v21 = vpop.permute.xlu0 %2064 }
 0x1c1   : > { %v13965_v30 = vadd.f32 %v13802_v57, %v1648_v25  ;;  %v2074_v13 = vadd.f32 %v2065_v21, %v2041_v15  ;;  %16430 = vst [vmem:[#allocation54_spill] sm:$0xff] %v13977_v11 }
 0x1c3   : > { %16427 = vst [vmem:[#allocation33_spill] sm:$0xff] %v13965_v30  ;;  %v16241_v57 = vmax.f32 %v13965_v30, 0.0 }
 0x1c4   : > { %v2096_v2 = vpop.permute.xlu1 %2095  ;;  %v2094_v62 = vpop.permute.xlu0 %2093 }
 0x1c5   : > { %v2106_v52 = vadd.f32 %v2096_v2, %v2073_v0  ;;  %v2105_v63 = vadd.f32 %v2094_v62, %v2072_v48  ;;  %v2388_v2 = vstv %s9988_s27  ;;  %v1874_v62 = vmul.f32 %v13359_v32, %v13760_v18  ;;  %s12590_s27 = smov 18  }
 0x1c7   : > { %v13972_v14 = vadd.f32 %v13960_v4, %v2105_v63  ;;  %v13981_v33 = vadd.f32 %v13960_v4, %v2106_v52  ;;  %v14009_v52 = vstv %s9985_s7  ;;  %s14907_s7 = scalar_lea.vmem %s16210_s5, %s9893_s11  ;;  %s10319_s11 = sld [smem:[#allocation11 + $0xc]] }
 0x1c8   : > { %v13974_v61 = vpop.permute.xlu1 %2377  ;;  %v2098_v28 = vpop.permute.xlu0 %2097  ;;  %v2332_v18 = vmul.f32 %v13331_v31, %v14009_v52 }
 0x1c9   : > { %16429 = vst [vmem:[#allocation35_spill] sm:$0xff] %v13972_v14  ;;  %16431 = vst [vmem:[#allocation21_spill] sm:$0xff] %v13981_v33  ;;  %v16240_v40 = vmax.f32 %v13972_v14, 0.0  ;;  %v2107_v7 = vadd.f32 %v2098_v28, %v2074_v13  ;;  %v16238_v23 = vmax.f32 %v13981_v33, 0.0  ;;  %v2390_v13 = vmul.f32 %v13331_v31, %v2388_v2 }
 0x1ca   : > { %v2391_v28 = vmul.f32 %v13335_v6, %v2388_v2 }
 0x1cb   : > { %v12276_v22 = vpack.i.bf16 %v16240_v40, %v16241_v57  ;;  %v13989_v10 = vadd.f32 %v13960_v4, %v2107_v7  ;;  %v2389_v7 = vmul.f32 %v13326_v29, %v2388_v2  ;;  %v2398_v46 = vrot.slane %v2390_v13, 1 }
 0x1cc   : > { %v2432_v19 = vpop.permute.xlu1 %2431  ;;  %v2430_v27 = vpop.permute.xlu0 %2429  ;;  %v2400_v41 = vrot.slane %v2391_v28, 1 }
 0x1cd   : > { %16432 = vst [vmem:[#allocation66_spill] sm:$0xff] %v13989_v10  ;;  %v16239_v21 = vmax.f32 %v13989_v10, 0.0  ;;  %12277 = vrot.lane.b32.xlu0 %v12276_v22, %s12574_s28  ;;  %v1900_v22 = vadd.f32 %v13616_v26, %v1874_v62  ;;  %v2397_v11 = vrot.slane %v2389_v7, 1  ;;  %v2333_v26 = vmul.f32 %v13335_v6, %v14009_v52 }
 0x1ce   : > { %v2358_v62 = vadd.f32 %v13841_v16, %v2332_v18  ;;  %v2479_v10 = vstv %s9991_s9  ;;  %s10055_s9 = sld [smem:[#allocation11 + $0x1]] }
 0x1cf   : > { %v12281_v25 = vpack.i.bf16 %v16239_v21, %v16238_v23  ;;  %v14024_v23 = vmul.f32 %v13359_v32, %v2388_v2  ;;  %v1926_v57 = vadd.f32 %v13674_v36, %v1900_v22  ;;  %v2399_v7 = vsel %vm16259_vm0, %v2397_v11, %v2398_v46 }
 0x1d0   : > { %v13998_v39 = vpop.permute.xlu1 %2066  ;;  %v14000_v3 = vpop.permute.xlu0 %2433  ;;  %v2384_v13 = vadd.f32 %v13903_v17, %v2358_v62  ;;  %v2481_v16 = vmul.f32 %v13331_v31, %v2479_v10  ;;  %v2482_v22 = vmul.f32 %v13335_v6, %v2479_v10  ;;  %v2359_v18 = vadd.f32 %v13839_v51, %v2333_v26 }
 0x1d1   : > { %12282 = vrot.lane.b32.xlu1 %v12281_v25, %s12574_s28  ;;  %v2331_v25 = vmul.f32 %v13326_v29, %v14009_v52  ;;  %v1951_v36 = vadd.f32 %v16433_v49, %v1926_v57  ;;  %v16434_v49 = vrot.slane %v14024_v23, 1  ;;  %v14059_v51 = vmul.f32 %v13359_v32, %v2479_v10 }
 0x1d2   : > { %v2385_v31 = vadd.f32 %v13928_v56, %v2359_v18  ;;  %v2489_v57 = vrot.slane %v2481_v16, 2 }
 0x1d3   : > { %v2357_v33 = vadd.f32 %v13794_v37, %v2331_v25  ;;  %v2401_v37 = vsel %vm16259_vm0, %v2398_v46, %v2400_v41  ;;  %v2480_v25 = vmul.f32 %v13326_v29, %v2479_v10  ;;  %v1984_v14 = vadd.f32 %v13873_v12, %v1951_v36 }
 0x1d4   : > { %v2465_v35 = vpop.permute.xlu1 %2464  ;;  %v2463_v0 = vpop.permute.xlu0 %2462  ;;  %v2403_v42 = vsel %vm16259_vm0, %v2400_v41, %v16434_v49  ;;  %v2409_v11 = vadd.f32 %v2401_v37, %v2384_v13  ;;  %v2491_v29 = vrot.slane %v2482_v22, 2  ;;  %v16435_v36 = vrot.slane %v13934_v60, 2 }
 0x1d5   : > { %v2383_v28 = vadd.f32 %v13905_v20, %v2357_v33  ;;  %v2017_v46 = vadd.f32 %v13926_v55, %v1984_v14  ;;  %v2488_v33 = vrot.slane %v2480_v25, 2  ;;  %v2410_v50 = vadd.f32 %v2403_v42, %v2385_v31 }
 0x1d6   : > { %v2442_v12 = vadd.f32 %v2432_v19, %v2409_v11  ;;  %v2492_v56 = vsel %vm644_vm1, %v2489_v57, %v2491_v29 }
 0x1d7   : > { %v2408_v6 = vadd.f32 %v2399_v7, %v2383_v28  ;;  %v2042_v49 = vadd.f32 %v16435_v36, %v2017_v46  ;;  %v2490_v13 = vsel %vm644_vm1, %v2488_v33, %v2489_v57  ;;  %v2493_v28 = vrot.slane %v14059_v51, 2  ;;  %v12390_v33 = vld [vmem:[%s12790_s12 + $0x18] sm:$0xff] }
 0x1d8   : > { %v14003_v48 = vpop.permute.xlu1 %2805  ;;  %v14005_v15 = vpop.permute.xlu0 %2466  ;;  %v2475_v55 = vadd.f32 %v2465_v35, %v2442_v12  ;;  %v2443_v10 = vadd.f32 %v14000_v3, %v2410_v50  ;;  %v2334_v12 = vmul.f32 %v12390_v33, %v14009_v52  ;;  %v2790_v36 = vstv %s10004_s13  ;;  %v12391_v52 = vld [vmem:[%s12790_s12 + $0x8] sm:$0xff]  ;;  %s10151_s13 = sld [smem:[#allocation11 + $0x5]] }
 0x1d9   : > { %v2441_v26 = vadd.f32 %v2430_v27, %v2408_v6  ;;  %v2075_v32 = vadd.f32 %v13998_v39, %v2042_v49  ;;  %v2494_v35 = vsel %vm644_vm1, %v2491_v29, %v2493_v28  ;;  %v14074_v39 = vstv %s9994_s30  ;;  %s10103_s30 = sld [smem:[#allocation11 + $0x3]] }
 0x1da   : > { %v2476_v37 = vadd.f32 %v14005_v15, %v2443_v10  ;;  %v2500_v7 = vadd.f32 %v2492_v56, %v2475_v55 }
 0x1db   : > { %v2474_v14 = vadd.f32 %v2463_v0, %v2441_v26 }
 0x1dc   : > { %v14011_v63 = vpop.permute.xlu1 %2809  ;;  %v14013_v5 = vpop.permute.xlu0 %2807  ;;  %v2501_v15 = vadd.f32 %v2494_v35, %v2476_v37 }
 0x1dd   : > { %v2499_v16 = vadd.f32 %v2490_v13, %v2474_v14 }
 0x1e0   : > { %v14026_v21 = vpop.permute.xlu1 %2435 }
 0x1e1   : > { %v2100_v40 = vpop.permute.xlu0 %2099 }
 0x1e2   : > { %v2108_v60 = vadd.f32 %v2100_v40, %v2075_v32  ;;  %v12392_v32 = vld [vmem:[%s12790_s12] sm:$0xff] }
 0x1e3   : > { %v2791_v37 = vmul.f32 %v12392_v32, %v2790_v36 }
 0x1e4   : > { %v14034_v2 = vpop.permute.xlu1 %2833  ;;  %v14077_v25 = vadd.f32 %v13960_v4, %v2108_v60 }
 0x1e5   : > { %v14036_v30 = vpop.permute.xlu0 %2831 }
 0x1e6   : > { %v2118_v6 = vmax.f32 %v14077_v25, 0.0 }
 0x1e9   : > { %v14052_v17 = vpop.permute.xlu1 %2468  ;;  %v14054_v20 = vpop.permute.xlu0 %2835 }
 0x1ed   : > { %v2523_v62 = vpop.permute.xlu1 %2522  ;;  %v2521_v41 = vpop.permute.xlu0 %2520 }
 0x1ee   : > { %v2533_v0 = vadd.f32 %v2523_v62, %v2500_v7  ;;  %v2532_v22 = vadd.f32 %v2521_v41, %v2499_v16  ;;  %v2848_v41 = vstv %s10007_s21  ;;  %v12393_v7 = vld [vmem:[%s12790_s12 + $0x10] sm:$0xff]  ;;  %s10013_s12 = sld [smem:[#allocation7 + $0x5]]  ;;  %s10127_s21 = sld [smem:[#allocation11 + $0x4]] }
 0x1ef   : > { %v2850_v13 = vmul.f32 %v12391_v52, %v2848_v41  ;;  %v2849_v10 = vmul.f32 %v12392_v32, %v2848_v41  ;;  %v2851_v16 = vmul.f32 %v12393_v7, %v2848_v41 }
 0x1f1   : > { %v14068_v19 = vpop.permute.xlu1 %2811  ;;  %v2525_v27 = vpop.permute.xlu0 %2524 }
 0x1f2   : > { %v2534_v42 = vadd.f32 %v2525_v27, %v2501_v15  ;;  %v2360_v27 = vadd.f32 %v13948_v47, %v2334_v12  ;;  %v2857_v15 = vrot.slane %v2849_v10, 1  ;;  %v2793_v47 = vmul.f32 %v12393_v7, %v2790_v36 }
 0x1f4   : > { %v2819_v10 = vadd.f32 %v14011_v63, %v2793_v47 }
 0x1f5   : > { %v2556_v50 = vpop.permute.xlu1 %2555  ;;  %v2554_v3 = vpop.permute.xlu0 %2553 }
 0x1f6   : > { %v2566_v40 = vadd.f32 %v2556_v50, %v2533_v0  ;;  %v2565_v18 = vadd.f32 %v2554_v3, %v2532_v22  ;;  %v2852_v0 = vmul.f32 %v12390_v33, %v2848_v41  ;;  %v2386_v50 = vadd.f32 %v13974_v61, %v2360_v27 }
 0x1f7   : > { %v2858_v3 = vrot.slane %v2850_v13, 1 }
 0x1f8   : > { %v14080_v46 = vadd.f32 %v14074_v39, %v2565_v18  ;;  %v14086_v57 = vadd.f32 %v14074_v39, %v2566_v40  ;;  %v2817_v40 = vadd.f32 %v14003_v48, %v2791_v37  ;;  %v2792_v18 = vmul.f32 %v12391_v52, %v2790_v36 }
 0x1f9   : > { %v14082_v31 = vpop.permute.xlu1 %2837  ;;  %v2558_v11 = vpop.permute.xlu0 %2557  ;;  %v2859_v61 = vsel %vm16259_vm0, %v2857_v15, %v2858_v3 }
 0x1fa   : > { %v16254_v29 = vmax.f32 %v14080_v46, 0.0  ;;  %v2567_v4 = vadd.f32 %v2558_v11, %v2534_v42  ;;  %v16252_v14 = vmax.f32 %v14086_v57, 0.0  ;;  %v2939_v42 = vstv %s10010_s14  ;;  %s10175_s14 = sld [smem:[#allocation11 + $0x6]] }
 0x1fb   : > { %v2860_v11 = vrot.slane %v2851_v16, 1  ;;  %v2843_v41 = vadd.f32 %v14036_v30, %v2817_v40  ;;  %v2941_v27 = vmul.f32 %v12391_v52, %v2939_v42  ;;  %v2940_v13 = vmul.f32 %v12392_v32, %v2939_v42 }
 0x1fc   : > { %v12286_v26 = vpack.i.bf16 %v16254_v29, %v2118_v6  ;;  %v14096_v62 = vadd.f32 %v14074_v39, %v2567_v4  ;;  %v2862_v4 = vrot.slane %v2852_v0, 1  ;;  %v2794_v29 = vmul.f32 %v12390_v33, %v2790_v36 }
 0x1fd   : > { %v14098_v49 = vpop.permute.xlu1 %2891  ;;  %v2890_v55 = vpop.permute.xlu0 %2889  ;;  %v2818_v48 = vadd.f32 %v14013_v5, %v2792_v18  ;;  %v2845_v52 = vadd.f32 %v14054_v20, %v2819_v10  ;;  %v2868_v32 = vadd.f32 %v2859_v61, %v2843_v41  ;;  %v2948_v5 = vrot.slane %v2940_v13, 2 }
 0x1fe   : > { %v16253_v56 = vmax.f32 %v14096_v62, 0.0  ;;  %12287 = vrot.lane.b32.xlu0 %v12286_v26, %s12574_s28  ;;  %v2863_v16 = vsel %vm16259_vm0, %v2860_v11, %v2862_v4  ;;  %v2820_v63 = vadd.f32 %v14068_v19, %v2794_v29  ;;  %v2943_v15 = vmul.f32 %v12390_v33, %v2939_v42 }
 0x1ff   : > { %v2844_v30 = vadd.f32 %v14034_v2, %v2818_v48  ;;  %v3030_v48 = vstv %s10013_s12  ;;  %s10199_s12 = sld [smem:[#allocation11 + $0x7]] }
 0x200   : > { %v12291_v60 = vpack.i.bf16 %v16253_v56, %v16252_v14  ;;  %v16436_v14 = vrot.slane %v14024_v23, 1 }
 0x201   : > { %v2527_v35 = vpop.permute.xlu1 %2526  ;;  %v2894_v22 = vpop.permute.xlu0 %2893 }
 0x202   : > { %12292 = vrot.lane.b32.xlu1 %v12291_v60, %s12574_s28  ;;  %v2411_v56 = vadd.f32 %v16436_v14, %v2386_v50  ;;  %v2861_v60 = vsel %vm16259_vm0, %v2858_v3, %v2860_v11  ;;  %v2942_v14 = vmul.f32 %v12393_v7, %v2939_v42  ;;  %v2949_v50 = vrot.slane %v2941_v27, 2 }
 0x203   : > { %v2869_v47 = vadd.f32 %v2861_v60, %v2844_v30  ;;  %v2870_v7 = vadd.f32 %v2863_v16, %v2845_v52  ;;  %v2953_v11 = vrot.slane %v2943_v15, 2 }
 0x204   : > { %v2444_v37 = vadd.f32 %v14026_v21, %v2411_v56  ;;  %v2901_v21 = vadd.f32 %v2890_v55, %v2868_v32  ;;  %v2846_v56 = vadd.f32 %v14082_v31, %v2820_v63  ;;  %v2951_v18 = vrot.slane %v2942_v14, 2 }
 0x205   : > { %v2925_v12 = vpop.permute.xlu1 %2924  ;;  %v2923_v26 = vpop.permute.xlu0 %2922  ;;  %v2950_v20 = vsel %vm644_vm1, %v2948_v5, %v2949_v50  ;;  %v2902_v19 = vadd.f32 %v14098_v49, %v2869_v47  ;;  %v2903_v33 = vadd.f32 %v2894_v22, %v2870_v7 }
 0x206   : > { %v2477_v36 = vadd.f32 %v14052_v17, %v2444_v37  ;;  %v2934_v17 = vadd.f32 %v2923_v26, %v2901_v21  ;;  %v2871_v55 = vadd.f32 %v2862_v4, %v2846_v56  ;;  %v2952_v51 = vsel %vm644_vm1, %v2949_v50, %v2951_v18 }
 0x207   : > { %v2935_v41 = vadd.f32 %v2925_v12, %v2902_v19 }
 0x208   : > { %v2502_v2 = vadd.f32 %v2493_v28, %v2477_v36  ;;  %v2959_v13 = vadd.f32 %v2950_v20, %v2934_v17  ;;  %v2954_v28 = vsel %vm644_vm1, %v2951_v18, %v2953_v11 }
 0x209   : > { %v2560_v0 = vpop.permute.xlu1 %2559  ;;  %v2927_v23 = vpop.permute.xlu0 %2926 }
 0x20a   : > { %v2535_v29 = vadd.f32 %v2527_v35, %v2502_v2  ;;  %v2936_v27 = vadd.f32 %v2927_v23, %v2903_v33  ;;  %v2960_v35 = vadd.f32 %v2952_v51, %v2935_v41  ;;  %v14153_v2 = vadd.s32 24, %v13877_v34 }
 0x20b   : > { %v16437_v33 = vmax.f32 %v13784_v38, 0.0  ;;  %v16438_v41 = vmax.f32 %v13744_v24, 0.0  ;;  %v14179_v38 = vadd.s32 30, %v13883_v53 }
 0x20c   : > { %v2568_v61 = vadd.f32 %v2560_v0, %v2535_v29  ;;  %v2961_v4 = vadd.f32 %v2954_v28, %v2936_v27  ;;  %vm316_vm5 = vcmp.eq.s32.totalorder %v14153_v2, %v13951_v58  ;;  %v16439_v27 = vmax.f32 %v13728_v43, 0.0 }
 0x20d   : > { %v2929_v3 = vpop.permute.xlu1 %2928  ;;  %v2896_v40 = vpop.permute.xlu0 %2895  ;;  %vm335_vm8 = vcmp.eq.s32.totalorder %v14153_v2, %v13883_v53  ;;  %vm370_vm14 = vcmp.eq.s32.totalorder %v14153_v2, %v14179_v38 }
 0x20e   : > { %v2904_v26 = vadd.f32 %v2896_v40, %v2871_v55  ;;  %v14135_v49 = vadd.f32 %v14074_v39, %v2568_v61 }
 0x210   : > { %v2937_v16 = vadd.f32 %v2929_v3, %v2904_v26  ;;  %v2578_v36 = vmax.f32 %v14135_v49, 0.0  ;;  %v303_v26 = vmul.u32 2, %v13958_v59 }
 0x211   : > { %v2983_v42 = vpop.permute.xlu1 %2982  ;;  %v2981_v31 = vpop.permute.xlu0 %2980 }
 0x212   : > { %v2992_v10 = vadd.f32 %v2981_v31, %v2959_v13  ;;  %v2993_v12 = vadd.f32 %v2983_v42, %v2960_v35  ;;  %v2962_v15 = vadd.f32 %v2953_v11, %v2937_v16  ;;  %v14169_v42 = vadd.s32 15, %v13883_v53 }
 0x213   : > { %v16442_v16 = vmax.f32 %v13788_v8, 0.0  ;;  %vm305_vm2 = vcmp.eq.s32.totalorder %v13883_v53, %v303_v26 }
 0x214   : > { %vm347_vm9 = vcmp.eq.s32.totalorder %v14153_v2, %v14169_v42  ;;  %v14286_v2 = vsel %vm305_vm2, 1.0, %v16428_v1  ;;  %vm333_vm2 = vcmp.eq.s32.totalorder %v13958_v59, %v13883_v53 }
 0x215   : > { %v3014_v37 = vpop.permute.xlu1 %3013  ;;  %v2985_v60 = vpop.permute.xlu0 %2984  ;;  %vm14247_vm13 = vmor %vm335_vm8, %vm347_vm9 }
 0x216   : > { %v3025_v22 = vadd.f32 %v3014_v37, %v2992_v10  ;;  %v2994_v23 = vadd.f32 %v2985_v60, %v2961_v4  ;;  %v9899_v10 = vsel %vm316_vm5, 1.0, %v16428_v1  ;;  %v16440_v4 = vmov 0  ;;  %vm381_vm4 = vmor %vm14247_vm13, %vm370_vm14 }
 0x217   : > { %v16441_v4 = vsel %vm14197_vm10, 4294967295, %v16440_v4 }
 0x218   : > { %v14137_v0 = vadd.f32 %v3030_v48, %v3025_v22 }
 0x219   : > { %v3018_v14 = vpop.permute.xlu1 %3017  ;;  %v3016_v30 = vpop.permute.xlu0 %3015 }
 0x21a   : > { %v3035_v52 = vmax.f32 %v14137_v0, 0.0  ;;  %v3027_v32 = vadd.f32 %v3018_v14, %v2994_v23  ;;  %v3026_v63 = vadd.f32 %v3016_v30, %v2993_v12  ;;  %v16443_v23 = vmax.f32 %v13812_v44, 0.0 }
 0x21b   : > { %v16444_v30 = vmax.f32 %v13786_v9, 0.0 }
 0x21c   : > { %v12296_v39 = vpack.i.bf16 %v3035_v52, %v2578_v36  ;;  %v14145_v50 = vadd.f32 %v3030_v48, %v3027_v32  ;;  %v14147_v5 = vadd.f32 %v3030_v48, %v3026_v63  ;;  %v16445_v63 = vmax.f32 %v13799_v54, 0.0 }
 0x21d   : > { %v3020_v21 = vpop.permute.xlu1 %3019  ;;  %v2987_v56 = vpop.permute.xlu0 %2986 }
 0x21e   : > { %v3037_v3 = vmax.f32 %v14145_v50, 0.0  ;;  %v3036_v40 = vmax.f32 %v14147_v5, 0.0  ;;  %v2995_v47 = vadd.f32 %v2987_v56, %v2962_v15  ;;  %12297 = vrot.lane.b32.xlu0 %v12296_v39, %s12574_s28  ;;  %v16476_v50 = vmov 0 }
 0x220   : > { %v12301_v7 = vpack.i.bf16 %v3037_v3, %v3036_v40  ;;  %v3028_v17 = vadd.f32 %v3020_v21, %v2995_v47 }
 0x221   : > { %v745_v18 = vpop.permute.xlu1 %744  ;;  %v12253_v20 = vpop.permute.xlu0 %12252 }
 0x222   : > { %v14159_v11 = vadd.f32 %v3030_v48, %v3028_v17  ;;  %v12255_v19 = vunpack.i.h.bf16 %v12253_v20  ;;  %v12254_v29 = vunpack.i.l.bf16 %v12253_v20  ;;  %12302 = vrot.lane.b32.xlu1 %v12301_v7, %s12574_s28  ;;  %v14166_v55 = vmax.f32 %v16437_v33, %v745_v18 }
 0x223   : > { %v310_v7 = vadd.s32 16, %v13877_v34  ;;  %v12578_v20 = vmov 1.0|1.0  }
 0x224   : > { %v3038_v31 = vmax.f32 %v14159_v11, 0.0  ;;  %v752_v61 = vmax.f32 %v16438_v41, %v12254_v29  ;;  %v753_v13 = vmax.f32 %v16439_v27, %v12255_v19  ;;  %v763_v60 = vrot.slane %v14166_v55, 1  ;;  %11552 = vmatprep.subr.msk.bf16.mxu1 %vm14197_vm10, %v12578_v20 }
 0x225   : > { %v12263_v51 = vpop.permute.xlu1 %12262  ;;  %v12258_v28 = vpop.permute.xlu0 %12257  ;;  %11554 = vmatpush3.bf16.msk.msra.mxu1 %vm14197_vm10, %v12578_v20  ;;  %vm315_vm15 = vcmp.eq.s32.totalorder %v310_v7, %v13951_v58  ;;  %vm334_vm5 = vcmp.eq.s32.totalorder %v310_v7, %v13883_v53 }
 0x226   : > { %v12265_v24 = vunpack.i.h.bf16 %v12263_v51  ;;  %v12264_v48 = vunpack.i.l.bf16 %v12263_v51  ;;  %v12260_v37 = vunpack.i.h.bf16 %v12258_v28  ;;  %v12259_v43 = vunpack.i.l.bf16 %v12258_v28  ;;  %3049 = vrot.lane.b32.xlu0 %v3038_v31, %s12574_s28  ;;  %vm14260_vm1 = vmpackc.low %vm782_vm6, %vm315_vm15 }
 0x227   : > { %v760_v35 = vrot.slane %v752_v61, 1  ;;  %v761_v22 = vrot.slane %v753_v13, 1  ;;  %v16446_v28 = vmax.f32 %v13837_v45, 0.0  ;;  %vm346_vm6 = vcmp.eq.s32.totalorder %v310_v7, %v14169_v42 }
 0x228   : > { %v14203_v12 = vmax.f32 %v16442_v16, %v12265_v24  ;;  %v1216_v14 = vmax.f32 %v16443_v23, %v12264_v48  ;;  %v1215_v32 = vmax.f32 %v16444_v30, %v12260_v37  ;;  %v755_v39 = vmax.f32 %v16445_v63, %v12259_v43  ;;  %v16447_v48 = vld [vmem:[#allocation60_spill] sm:$0xff]  ;;  %v16451_v23 = vld [vmem:[#allocation59_spill] sm:$0xff]  ;;  %vm357_vm8 = vmor %vm334_vm5, %vm346_vm6 }
 0x229   : > { %v12273_v15 = vpop.permute.xlu1 %12272  ;;  %v12268_v21 = vpop.permute.xlu0 %12267  ;;  %v762_v56 = vsel %vm16259_vm0, %v760_v35, %v761_v22  ;;  %v764_v47 = vsel %vm16259_vm0, %v761_v22, %v763_v60  ;;  %v16448_v37 = vmax.f32 %v16447_v48, 0.0  ;;  %v16449_v35 = vld [vmem:[#allocation58_spill] sm:$0xff]  ;;  %v16452_v30 = vmax.f32 %v16451_v23, 0.0  ;;  %vm14290_vm9 = vmpackc.low %vm381_vm4, %vm357_vm8  ;;  %v16465_v23 = vld [vmem:[#allocation35_spill] sm:$0xff] }
 0x22a   : > { %v1226_v8 = vrot.slane %v14203_v12, 1  ;;  %v1224_v17 = vrot.slane %v1216_v14, 1  ;;  %v1223_v18 = vrot.slane %v1215_v32, 1  ;;  %v765_v44 = vrot.slane %v755_v39, 1 }
 0x22b   : > { %v12275_v9 = vunpack.i.h.bf16 %v12273_v15  ;;  %v12274_v54 = vunpack.i.l.bf16 %v12273_v15  ;;  %v12270_v19 = vunpack.i.h.bf16 %v12268_v21  ;;  %v12269_v29 = vunpack.i.l.bf16 %v12268_v21 }
 0x22c   : > { %v774_v33 = vmax.f32 %v755_v39, %v765_v44  ;;  %v771_v41 = vmax.f32 %v752_v61, %v762_v56  ;;  %v772_v27 = vmax.f32 %v753_v13, %v764_v47  ;;  %v766_v51 = vsel %vm16259_vm0, %v763_v60, %v765_v44 }
 0x22d   : > { %v14224_v24 = vmax.f32 %v16446_v28, %v12275_v9  ;;  %v1676_v43 = vmax.f32 %v16448_v37, %v12274_v54  ;;  %v16450_v22 = vmax.f32 %v16449_v35, 0.0  ;;  %v1218_v63 = vmax.f32 %v16452_v30, %v12269_v29 }
 0x22e   : > { %v11541_v15 = vpack.c.bf16 %v772_v27, %v771_v41  ;;  %v773_v39 = vmax.f32 %v14166_v55, %v766_v51  ;;  %v1225_v45 = vsel %vm16259_vm0, %v1223_v18, %v1224_v17  ;;  %v1227_v13 = vsel %vm16259_vm0, %v1224_v17, %v1226_v8  ;;  %v16462_v27 = vld [vmem:[#allocation17_spill] sm:$0xff] }
 0x22f   : > { %v1675_v16 = vmax.f32 %v16450_v22, %v12270_v19  ;;  %v1228_v60 = vrot.slane %v1218_v63, 1  ;;  %v16457_v21 = vmov 1.0   ;;  %v1234_v17 = vmax.f32 %v1215_v32, %v1225_v45 }
 0x230   : > { %v14254_v56 = vpack.c.bf16 %v9899_v10, %v16457_v21  ;;  %11542 = vmatprep.subr.bf16.mxu0 %v11541_v15  ;;  %v11545_v47 = vpack.c.bf16 %v774_v33, %v773_v39  ;;  %v1235_v18 = vmax.f32 %v1216_v14, %v1227_v13  ;;  %v1686_v44 = vrot.slane %v14224_v24, 1 }
 0x231   : > { %v1684_v9 = vrot.slane %v1676_v43, 1  ;;  %v1683_v54 = vrot.slane %v1675_v16, 1  ;;  %11544 = vmatpush3.bf16.msra.mxu0 %v11541_v15  ;;  %v1229_v19 = vsel %vm16259_vm0, %v1226_v8, %v1228_v60  ;;  %v16458_v29 = vmov 0 }
 0x232   : > { %v16459_v29 = vsel %vm14260_vm1, 4294967295, %v16458_v29  ;;  %11547 = vmatprep.subr.msk.bf16.mxu0 %vm14235_vm12, %v11545_v47  ;;  %11557 = vmatprep.subr.msk.bf16.mxu1 %vm14260_vm1, %v14254_v56  ;;  %v1237_v10 = vmax.f32 %v1218_v63, %v1228_v60  ;;  %v11561_v14 = vpack.c.bf16 %v1235_v18, %v1234_v17  ;;  %v1236_v32 = vmax.f32 %v14203_v12, %v1229_v19  ;;  %v16467_v60 = vld [vmem:[#allocation66_spill] sm:$0xff]  ;;  %v16469_v17 = vld [vmem:[#allocation21_spill] sm:$0xff] }
 0x233   : > { %11560 = vmatpush3.bf16.msk.msra.mxu1 %vm14260_vm1, %v14254_v56  ;;  %v1685_v26 = vsel %vm16259_vm0, %v1683_v54, %v1684_v9  ;;  %v1687_v7 = vsel %vm16259_vm0, %v1684_v9, %v1686_v44  ;;  %v16460_v8 = vmov 0  ;;  %v16466_v30 = vmax.f32 %v16465_v23, 0.0 }
 0x234   : > { %v16461_v8 = vsel %vm14290_vm9, 4294967295, %v16460_v8  ;;  %11572 = vmatprep.subr.msk.bf16.mxu1 %vm14197_vm10, %v12578_v20  ;;  %v11565_v12 = vpack.c.bf16 %v1237_v10, %v1236_v32  ;;  %v1694_v33 = vmax.f32 %v1675_v16, %v1685_v26  ;;  %v1695_v41 = vmax.f32 %v1676_v43, %v1687_v7  ;;  %v16463_v43 = vld [vmem:[#allocation33_spill] sm:$0xff] }
 0x235   : > { %11550 = vmatpush3.bf16.msk.msra.mxu0 %vm14235_vm12, %v11545_v47  ;;  %v16464_v35 = vmax.f32 %v16463_v43, 0.0  ;;  %v16468_v55 = vmax.f32 %v16467_v60, 0.0  ;;  %v16470_v18 = vmax.f32 %v16469_v17, 0.0  ;;  %v16471_v43 = vmax.f32 %v14080_v46, 0.0 }
 0x236   : > { %11562 = vmatprep.subr.bf16.mxu0 %v11561_v14  ;;  %v11581_v51 = vpack.c.bf16 %v1695_v41, %v1694_v33  ;;  %vm345_vm5 = vcmp.eq.s32.totalorder %v13958_v59, %v14169_v42  ;;  %vm16495_vm1 = vcmask 1046528  }
 0x237   : > { %vm14423_vm8 = vmor %vm333_vm2, %vm345_vm5 }
 0x238   : > { %10794 = vmatmul.mubr.msk.f32.vlgmr.msra.gmra.mrb[0].mxu0 %vm16258_vm3, %v14286_v2  ;;  %v16477_v50 = vsel %vm14423_vm8, 4294967295, %v16476_v50 }
 0x239   : > { %11564 = vmatpush3.bf16.msra.mxu0 %v11561_v14  ;;  %10815 = vmatprep.mubr.msk.f32.mxu0 %vm16258_vm3, %v16462_v27 }
 0x23a   : > { %11567 = vmatprep.subr.msk.bf16.mxu0 %vm14235_vm12, %v11565_v12 }
 0x23d   : > { %11570 = vmatpush3.bf16.msk.msra.mxu0 %vm14235_vm12, %v11565_v12 }
 0x23e   : > { %11582 = vmatprep.subr.bf16.mxu0 %v11581_v51 }
 0x23f   : > { %v12278_v28 = vpop.permute.xlu0 %12277 }
 0x240   : > { %10816 = vmatmul.mubr.msk.f32.vlgmr.msra.gmra.mrb[2].mxu0 %vm16258_vm3, %v14286_v2  ;;  %v12280_v48 = vunpack.i.h.bf16 %v12278_v28  ;;  %v12279_v37 = vunpack.i.l.bf16 %v12278_v28 }
 0x241   : > { %11584 = vmatpush3.bf16.msra.mxu0 %v11581_v51  ;;  %10837 = vmatprep.mubr.msk.f32.mxu0 %vm16258_vm3, %v16462_v27 }
 0x242   : > { %v1678_v22 = vmax.f32 %v16464_v35, %v12279_v37  ;;  %v2135_v63 = vmax.f32 %v16466_v30, %v12280_v48 }
 0x243   : > { %v12283_v16 = vpop.permute.xlu1 %12282 }
 0x244   : > { %v1688_v15 = vrot.slane %v1678_v22, 1  ;;  %v12285_v39 = vunpack.i.h.bf16 %v12283_v16  ;;  %v12284_v45 = vunpack.i.l.bf16 %v12283_v16  ;;  %v2143_v10 = vrot.slane %v2135_v63, 1 }
 0x246   : > { %v1697_v13 = vmax.f32 %v1678_v22, %v1688_v15  ;;  %v2137_v47 = vmax.f32 %v16468_v55, %v12285_v39  ;;  %v2136_v9 = vmax.f32 %v16470_v18, %v12284_v45  ;;  %v1689_v54 = vsel %vm16259_vm0, %v1686_v44, %v1688_v15 }
 0x247   : > { %v1696_v19 = vmax.f32 %v14224_v24, %v1689_v54  ;;  %v16473_v39 = vmax.f32 %v14086_v57, 0.0  ;;  %v14355_v54 = vadd.s32 32, %v13877_v34 }
 0x248   : > { %v2146_v14 = vrot.slane %v2137_v47, 1  ;;  %v2144_v32 = vrot.slane %v2136_v9, 1 }
 0x249   : > { %v11585_v26 = vpack.c.bf16 %v1697_v13, %v1696_v19  ;;  %vm336_vm4 = vcmp.eq.s32.totalorder %v14355_v54, %v13883_v53  ;;  %vm348_vm11 = vcmp.eq.s32.totalorder %v14355_v54, %v14169_v42 }
 0x24a   : > { %v2145_v7 = vsel %vm16259_vm0, %v2143_v10, %v2144_v32  ;;  %v2147_v12 = vsel %vm16259_vm0, %v2144_v32, %v2146_v14  ;;  %v14362_v32 = vadd.s32 40, %v13877_v34  ;;  %vm14440_vm7 = vmor %vm336_vm4, %vm348_vm11 }
 0x24b   : > { %11587 = vmatprep.subr.msk.bf16.mxu0 %vm14235_vm12, %v11585_v26  ;;  %v2154_v33 = vmax.f32 %v2135_v63, %v2145_v7  ;;  %v2155_v41 = vmax.f32 %v2136_v9, %v2147_v12  ;;  %v16472_v63 = vmax.f32 %v14096_v62, 0.0  ;;  %v14370_v7 = vadd.s32 64, %v13877_v34 }
 0x24c   : > { %11590 = vmatpush3.bf16.msk.msra.mxu0 %vm14235_vm12, %v11585_v26  ;;  %v14365_v26 = vadd.s32 56, %v13877_v34  ;;  %v14373_v12 = vadd.s32 72, %v13877_v34  ;;  %vm16482_vm11 = vcmp.eq.s32.totalorder %v14362_v32, %v13883_v53  ;;  %vm16500_vm9 = vcmp.eq.s32.totalorder %v14362_v32, %v14179_v38 }
 0x24d   : > { %v11601_v51 = vpack.c.bf16 %v2155_v41, %v2154_v33  ;;  %v14378_v41 = vadd.s32 80, %v13877_v34  ;;  %vm375_vm10 = vcmp.eq.s32.totalorder %v14370_v7, %v14179_v38 }
 0x24e   : > { %vm353_vm5 = vcmp.eq.s32.totalorder %v14373_v12, %v14169_v42 }
 0x24f   : > { %11602 = vmatprep.subr.bf16.mxu0 %v11601_v51  ;;  %10838 = vmatmul.mubr.msk.f32.vlgmr.msra.gmra.mrb[4].mxu0 %vm16258_vm3, %v14286_v2 }
 0x250   : > { %11604 = vmatpush3.bf16.msra.mxu0 %v11601_v51  ;;  %10859 = vmatprep.mubr.msk.f32.mxu0 %vm16258_vm3, %v16462_v27 }
 0x270   : > { %v12288_v24 = vpop.permute.xlu0 %12287 }
 0x271   : > { %v12290_v44 = vunpack.i.h.bf16 %v12288_v24  ;;  %v12289_v28 = vunpack.i.l.bf16 %v12288_v24 }
 0x273   : > { %v2138_v48 = vmax.f32 %v2118_v6, %v12289_v28  ;;  %v2595_v35 = vmax.f32 %v16471_v43, %v12290_v44 }
 0x274   : > { %v12293_v37 = vpop.permute.xlu1 %12292 }
 0x275   : > { %v2148_v22 = vrot.slane %v2138_v48, 1  ;;  %v12295_v16 = vunpack.i.h.bf16 %v12293_v37  ;;  %v12294_v23 = vunpack.i.l.bf16 %v12293_v37  ;;  %v2603_v25 = vrot.slane %v2595_v35, 1 }
 0x277   : > { %v2157_v30 = vmax.f32 %v2138_v48, %v2148_v22  ;;  %v14335_v15 = vmax.f32 %v16472_v63, %v12295_v16  ;;  %v2596_v45 = vmax.f32 %v16473_v39, %v12294_v23  ;;  %v2149_v13 = vsel %vm16259_vm0, %v2146_v14, %v2148_v22 }
 0x278   : > { %v2156_v60 = vmax.f32 %v2137_v47, %v2149_v13  ;;  %v14352_v47 = vadd.s32 48, %v13877_v34  ;;  %v389_v39 = vadd.s32 45, %v13883_v53 }
 0x279   : > { %v2606_v6 = vrot.slane %v14335_v15, 1  ;;  %v2604_v55 = vrot.slane %v2596_v45, 1 }
 0x27a   : > { %v11605_v46 = vpack.c.bf16 %v2157_v30, %v2156_v60  ;;  %vm338_vm13 = vcmp.eq.s32.totalorder %v14352_v47, %v13883_v53  ;;  %vm350_vm14 = vcmp.eq.s32.totalorder %v14352_v47, %v14169_v42  ;;  %vm373_vm15 = vcmp.eq.s32.totalorder %v14352_v47, %v14179_v38 }
 0x27b   : > { %v2605_v17 = vsel %vm16259_vm0, %v2603_v25, %v2604_v55  ;;  %v2607_v18 = vsel %vm16259_vm0, %v2604_v55, %v2606_v6  ;;  %vm14394_vm6 = vmor %vm338_vm13, %vm350_vm14  ;;  %vm351_vm14 = vcmp.eq.s32.totalorder %v14365_v26, %v14169_v42 }
 0x27c   : > { %11607 = vmatprep.subr.msk.bf16.mxu0 %vm14235_vm12, %v11605_v46  ;;  %v2614_v62 = vmax.f32 %v2595_v35, %v2605_v17  ;;  %v2615_v9 = vmax.f32 %v2596_v45, %v2607_v18  ;;  %vm14433_vm13 = vmor %vm14394_vm6, %vm373_vm15  ;;  %vm16485_vm15 = vcmp.eq.s32.totalorder %v14365_v26, %v13883_v53 }
 0x27d   : > { %11610 = vmatpush3.bf16.msk.msra.mxu0 %vm14235_vm12, %v11605_v46  ;;  %vm14470_vm2 = vmor %vm16485_vm15, %vm351_vm14  ;;  %vm16492_vm15 = vcmp.eq.s32.totalorder %v14373_v12, %v13883_v53  ;;  %vm16496_vm14 = vcmp.eq.s32.totalorder %v14378_v41, %v14169_v42 }
 0x27e   : > { %v11621_v57 = vpack.c.bf16 %v2615_v9, %v2614_v62  ;;  %v16503_v62 = vmov 0 }
 0x280   : > { %11622 = vmatprep.subr.bf16.mxu0 %v11621_v57  ;;  %10860 = vmatmul.mubr.msk.f32.vlgmr.msra.gmra.mrb[6].mxu0 %vm16258_vm3, %v14286_v2 }
 0x281   : > { %11624 = vmatpush3.bf16.msra.mxu0 %v11621_v57  ;;  %10881 = vmatprep.mubr.msk.f32.mxu0 %vm16258_vm3, %v16462_v27  ;;  %vm349_vm3 = vcmp.eq.s32.totalorder %v14362_v32, %v14169_v42 }
 0x282   : > { %vm14458_vm4 = vmor %vm16482_vm11, %vm349_vm3  ;;  %vm16488_vm3 = vcmp.eq.s32.totalorder %v14370_v7, %v14169_v42  ;;  %vm16489_vm11 = vcmp.eq.s32.totalorder %v14370_v7, %v13883_v53 }
 0x283   : > { %vm14483_vm6 = vmor %vm16489_vm11, %vm16488_vm3  ;;  %vm371_vm3 = vcmp.eq.s32.totalorder %v14355_v54, %v14179_v38  ;;  %vm374_vm11 = vcmp.eq.s32.totalorder %v14365_v26, %v14179_v38  ;;  %v16508_v54 = vmov 0 }
 0x284   : > { %vm14534_vm8 = vmor %vm14440_vm7, %vm371_vm3  ;;  %vm395_vm7 = vcmp.eq.s32.totalorder %v14362_v32, %v389_v39  ;;  %vm16511_vm3 = vcmp.eq.s32.totalorder %v14373_v12, %v14179_v38  ;;  %v435_v32 = vadd.s32 75, %v13883_v53 }
 0x285   : > { %v16504_v62 = vsel %vm14534_vm8, 4294967295, %v16503_v62 }
 0x290   : > { %v12298_v19 = vpop.permute.xlu0 %12297 }
 0x291   : > { %v12300_v10 = vunpack.i.h.bf16 %v12298_v19  ;;  %v12299_v14 = vunpack.i.l.bf16 %v12298_v19  ;;  %v412_v19 = vadd.s32 60, %v13883_v53 }
 0x293   : > { %v2598_v33 = vmax.f32 %v2578_v36, %v12299_v14  ;;  %v3055_v24 = vmax.f32 %v3035_v52, %v12300_v10  ;;  %v16521_v14 = vmov 0 }
 0x294   : > { %v12303_v51 = vpop.permute.xlu1 %12302 }
 0x295   : > { %v2608_v44 = vrot.slane %v2598_v33, 1  ;;  %v12305_v28 = vunpack.i.h.bf16 %v12303_v51  ;;  %v12304_v49 = vunpack.i.l.bf16 %v12303_v51  ;;  %v3063_v43 = vrot.slane %v3055_v24, 1 }
 0x297   : > { %v2617_v0 = vmax.f32 %v2598_v33, %v2608_v44  ;;  %v3057_v52 = vmax.f32 %v3037_v3, %v12305_v28  ;;  %v3056_v48 = vmax.f32 %v3036_v40, %v12304_v49  ;;  %v2609_v37 = vsel %vm16259_vm0, %v2606_v6, %v2608_v44 }
 0x298   : > { %v3050_v5 = vpop.permute.xlu0 %3049  ;;  %v2616_v3 = vmax.f32 %v14335_v15, %v2609_v37  ;;  %v16478_v40 = vmov 0 }
 0x299   : > { %v16479_v40 = vsel %vm14433_vm13, 4294967295, %v16478_v40  ;;  %v3066_v35 = vrot.slane %v3057_v52, 1  ;;  %v3064_v22 = vrot.slane %v3056_v48, 1  ;;  %v3058_v16 = vmax.f32 %v3038_v31, %v3050_v5  ;;  %vm14524_vm13 = vmor %vm14458_vm4, %vm16500_vm9  ;;  %v10024_v31 = vld [vmem:[#allocation9 + $0x1] ss:$0 sm:$0xff] }
 0x29a   : > { %v11625_v11 = vpack.c.bf16 %v2617_v0, %v2616_v3  ;;  %vm16507_vm9 = vcmask 236544   ;;  %vm396_vm4 = vcmp.eq.s32.totalorder %v14352_v47, %v389_v39  ;;  %v16512_v47 = vmov 0 }
 0x29b   : > { %v3068_v30 = vrot.slane %v3058_v16, 1  ;;  %v3065_v63 = vsel %vm16259_vm0, %v3063_v43, %v3064_v22  ;;  %v3067_v15 = vsel %vm16259_vm0, %v3064_v22, %v3066_v35  ;;  %vm14494_vm0 = vmor %vm16492_vm15, %vm353_vm5  ;;  %vm16497_vm5 = vcmp.eq.s32.totalorder %v14378_v41, %v13883_v53 }
 0x29c   : > { %11627 = vmatprep.subr.msk.bf16.mxu0 %vm14235_vm12, %v11625_v11  ;;  %v3074_v13 = vmax.f32 %v3055_v24, %v3065_v63  ;;  %v3075_v60 = vmax.f32 %v3056_v48, %v3067_v15  ;;  %vm14511_vm15 = vmor %vm16497_vm5, %vm16496_vm14  ;;  %vm377_vm5 = vcmp.eq.s32.totalorder %v14378_v41, %v14179_v38  ;;  %vm16518_vm8 = vnez %v16479_v40  ;;  %v10027_v63 = vld [vmem:[#allocation9 + $0x4] ss:$0 sm:$0xff]  ;;  %v10031_v15 = vld [vmem:[#allocation9 + $0x8] ss:$0 sm:$0xff] }
 0x29d   : > { %v3069_v6 = vsel %vm16495_vm1, %v3066_v35, %v3068_v30  ;;  %v3077_v55 = vmax.f32 %v3058_v16, %v3068_v30  ;;  %11630 = vmatpush3.bf16.msk.msra.mxu0 %vm14235_vm12, %v11625_v11  ;;  %vm14540_vm1 = vmor %vm14470_vm2, %vm374_vm11  ;;  %v16519_v38 = vmov 0  ;;  %v10025_v11 = vld [vmem:[#allocation9 + $0x2] ss:$0 sm:$0xff]  ;;  %v10028_v30 = vld [vmem:[#allocation9 + $0x5] ss:$0 sm:$0xff] }
 0x29e   : > { %v3076_v17 = vmax.f32 %v3057_v52, %v3069_v6  ;;  %v11641_v18 = vpack.c.bf16 %v3075_v60, %v3074_v13  ;;  %vm14549_vm14 = vmor %vm14483_vm6, %vm375_vm10  ;;  %vm399_vm6 = vcmp.eq.s32.totalorder %v14373_v12, %v389_v39 }
 0x29f   : > { %v16509_v54 = vsel %vm14549_vm14, 4294967295, %v16508_v54  ;;  %vm16510_vm2 = vmmov %vm16507_vm9 }
 0x2a0   : > { %v11645_v57 = vpack.c.bf16 %v3077_v55, %v3076_v17  ;;  %10882 = vmatmul.mubr.msk.f32.vlgmr.msra.gmra.mrb[8].mxu0 %vm16507_vm9, %v14286_v2  ;;  %11642 = vmatprep.subr.bf16.mxu0 %v11641_v18  ;;  %vm387_vm11 = vmor %vm14494_vm0, %vm16511_vm3  ;;  %vm397_vm9 = vcmp.eq.s32.totalorder %v14365_v26, %v389_v39  ;;  %vm16515_vm0 = vnez %v16477_v50 }
 0x2a1   : > { %11644 = vmatpush3.bf16.msra.mxu0 %v11641_v18  ;;  %10903 = vmatprep.mubr.msk.f32.mxu0 %vm16510_vm2, %v16462_v27  ;;  %vm14570_vm10 = vmor %vm14511_vm15, %vm377_vm5  ;;  %vm16514_vm2 = vcmp.eq.s32.totalorder %v13877_v34, %v13883_v53  ;;  %vm398_vm15 = vcmp.eq.s32.totalorder %v14370_v7, %v389_v39 }
 0x2a2   : > { %11647 = vmatprep.subr.msk.bf16.mxu0 %vm14235_vm12, %v11645_v57  ;;  %v16513_v47 = vsel %vm14570_vm10, 4294967295, %v16512_v47  ;;  %vm14580_vm3 = vmpackc.low %vm16515_vm0, %vm16514_vm2  ;;  %vm420_vm0 = vcmp.eq.s32.totalorder %v14365_v26, %v412_v19 }
 0x2a3   : > { %vm14586_vm14 = vmor %vm16518_vm8, %vm396_vm4  ;;  %vm422_vm4 = vcmp.eq.s32.totalorder %v14373_v12, %v412_v19 }
 0x2a4   : > { %v16520_v38 = vsel %vm14586_vm14, 4294967295, %v16519_v38  ;;  %vm14593_vm5 = vmor %vm14524_vm13, %vm395_vm7  ;;  %vm16523_vm13 = vnez %v16509_v54  ;;  %vm421_vm14 = vcmp.eq.s32.totalorder %v14370_v7, %v412_v19 }
 0x2a5   : > { %v16522_v14 = vsel %vm14593_vm5, 4294967295, %v16521_v14  ;;  %vm408_vm2 = vmor %vm14540_vm1, %vm397_vm9  ;;  %11650 = vmatpush3.bf16.msk.msra.mxu0 %vm14235_vm12, %v11645_v57  ;;  %vm16524_vm9 = vcmask 236544   ;;  %vm445_vm5 = vcmp.eq.s32.totalorder %v14373_v12, %v435_v32 }
 0x2a6   : > { %vm410_vm8 = vmor %vm387_vm11, %vm399_vm6  ;;  %11662 = vmatprep.subr.msk.bf16.mxu0 %vm14580_vm3, %v12578_v20  ;;  %vm16525_vm11 = vnez %v16461_v8  ;;  %vm400_vm6 = vcmp.eq.s32.totalorder %v14378_v41, %v389_v39  ;;  %v10030_v39 = vld [vmem:[#allocation9 + $0x7] ss:$0 sm:$0xff] }
 0x2a7   : > { %vm409_vm7 = vmor %vm16523_vm13, %vm398_vm15  ;;  %vm16526_vm15 = vnez %v16504_v62  ;;  %vm423_vm13 = vcmp.eq.s32.totalorder %v14378_v41, %v412_v19 }
 0x2a8   : > { %vm431_vm1 = vmor %vm408_vm2, %vm420_vm0  ;;  %10904 = vmatmul.mubr.msk.f32.vlgmr.msra.gmra.mrb[10].mxu0 %vm16524_vm9, %v14286_v2  ;;  %vm16527_vm2 = vnez %v16522_v14  ;;  %vm446_vm9 = vcmp.eq.s32.totalorder %v14378_v41, %v435_v32 }
 0x2a9   : > { %vm433_vm10 = vmor %vm410_vm8, %vm422_vm4  ;;  %11664 = vmatpush3.bf16.msk.msra.mxu0 %vm14580_vm3, %v12578_v20  ;;  %v9907_v53 = vsel %vm431_vm1, 1.0, %v16428_v1  ;;  %vm16532_vm1 = vmmov 1  }
 0x2aa   : > { %vm432_vm12 = vmor %vm409_vm7, %vm421_vm14  ;;  %11666 = vmatprep.subr.msk.bf16.mxu0 %vm16525_vm11, %v12578_v20  ;;  %vm16530_vm14 = vnez %v16513_v47  ;;  %v14636_v2 = vpack.c.bf16 %v9907_v53, %v16457_v21  ;;  %vm16531_vm7 = vnez %v16520_v38 }
 0x2ab   : > { %vm14625_vm0 = vmpackc.low %vm16527_vm2, %vm16526_vm15  ;;  %v9908_v7 = vsel %vm432_vm12, 1.0, %v16428_v1  ;;  %vm16535_vm12 = vcmask 236544   ;;  %vm16537_vm2 = vnez %v16441_v4 }
 0x2ac   : > { %vm456_vm8 = vmor %vm433_vm10, %vm445_vm5 }
 0x2ad   : > { %11668 = vmatpush3.bf16.msk.msra.mxu0 %vm16525_vm11, %v12578_v20  ;;  %vm411_vm4 = vmor %vm16530_vm14, %vm400_vm6  ;;  %v9909_v12 = vsel %vm456_vm8, 1.0, %v16428_v1  ;;  %vm16538_vm8 = vnez %v16459_v29 }
 0x2ae   : > { %11670 = vmatprep.subr.msk.bf16.mxu0 %vm14625_vm0, %v12578_v20  ;;  %vm14644_vm10 = vmpackc.low %vm16532_vm1, %vm16531_vm7  ;;  %v14654_v21 = vpack.c.bf16 %v9909_v12, %v9908_v7 }
 0x2af   : > { %vm434_vm5 = vmor %vm411_vm4, %vm423_vm13 }
 0x2b0   : > { %vm457_vm6 = vmor %vm434_vm5, %vm446_vm9 }
 0x2b1   : > { %11672 = vmatpush3.bf16.msk.msra.mxu0 %vm14625_vm0, %v12578_v20  ;;  %v14664_v33 = vsel %vm457_vm6, 1.0, %v16428_v1  ;;  %vm16536_vm15 = vmmov %vm16535_vm12 }
 0x2b2   : > { %11675 = vmatprep.subr.msk.bf16.mxu0 %vm14644_vm10, %v14636_v2  ;;  %vm16539_vm14 = vmmov %vm16535_vm12 }
 0x2b3   : > { %vm16540_vm4 = vmmov %vm16535_vm12 }
 0x2b4   : > { %vm16541_vm13 = vmmov %vm16540_vm4 }
 0x2b5   : > { %11678 = vmatpush3.bf16.msk.msra.mxu0 %vm14644_vm10, %v14636_v2  ;;  %vm16542_vm7 = vmmov %vm16540_vm4 }
 0x2b6   : > { %11680 = vmatprep.subr.bf16.mxu0 %v14654_v21  ;;  %vm16543_vm5 = vmmov %vm16540_vm4 }
 0x2b7   : > { %vm16544_vm9 = vmmov %vm16540_vm4 }
 0x2b8   : > { %vm16545_vm6 = vmmov %vm16540_vm4 }
 0x2b9   : > { %11682 = vmatpush3.bf16.msra.mxu0 %v14654_v21 }
 0x2ba   : > { %10937 = vmatprep.subr.mxu0 %v14664_v33 }
 0x2bd   : > { %10938 = vmatpush3.msra.mxu0 %v14664_v33 }
 0x30b   : > { %v10795_v41 = vpop.f32.mrb[0].mxu0 }
 0x30c   : > { %v852_v51 = vpop.f32.mrb[1].mxu0 }
 0x30d   : > { %10804 = vmatprep.mubr.msk.f32.mxu1 %vm16535_vm12, %v852_v51  ;;  %vm16546_vm12 = vmmov %vm16540_vm4 }
 0x30e   : > { %10805 = vmatmul.mubr.msk.f32.vlgmr.msra.gmra.mrb[0].mxu1 %vm16536_vm15, %v10795_v41  ;;  %vm16547_vm15 = vmmov %vm16540_vm4 }
 0x30f   : > { %11574 = vmatpush3.bf16.msk.msra.mxu1 %vm16537_vm2, %v12578_v20 }
 0x310   : > { %11577 = vmatprep.subr.msk.bf16.mxu1 %vm16538_vm8, %v14254_v56 }
 0x313   : > { %v10817_v24 = vpop.f32.mrb[2].mxu0  ;;  %11580 = vmatpush3.bf16.msk.msra.mxu1 %vm16538_vm8, %v14254_v56 }
 0x314   : > { %v1307_v44 = vpop.f32.mrb[3].mxu0  ;;  %11592 = vmatprep.subr.msk.bf16.mxu1 %vm16537_vm2, %v12578_v20 }
 0x315   : > { %10826 = vmatprep.mubr.msk.f32.mxu1 %vm16539_vm14, %v1307_v44  ;;  %vm16548_vm14 = vmmov %vm16540_vm4 }
 0x316   : > { %10827 = vmatmul.mubr.msk.f32.vlgmr.msra.gmra.mrb[2].mxu1 %vm16540_vm4, %v10817_v24  ;;  %vm947_vm4 = vcmask 120832  }
 0x317   : > { %11594 = vmatpush3.bf16.msk.msra.mxu1 %vm16537_vm2, %v12578_v20 }
 0x318   : > { %11597 = vmatprep.subr.msk.bf16.mxu1 %vm16538_vm8, %v14254_v56 }
 0x31b   : > { %11600 = vmatpush3.bf16.msk.msra.mxu1 %vm16538_vm8, %v14254_v56 }
 0x31c   : > { %11612 = vmatprep.subr.msk.bf16.mxu1 %vm16537_vm2, %v12578_v20 }
 0x322   : > { %v10839_v28 = vpop.f32.mrb[4].mxu0 }
 0x323   : > { %v1767_v49 = vpop.f32.mrb[5].mxu0 }
 0x324   : > { %10848 = vmatprep.mubr.msk.f32.mxu1 %vm16541_vm13, %v1767_v49  ;;  %vm945_vm13 = vcmask 121856  }
 0x325   : > { %10849 = vmatmul.mubr.msk.f32.vlgmr.msra.gmra.mrb[4].mxu1 %vm16542_vm7, %v10839_v28  ;;  %vm1867_vm7 = vcmask 366832  }
 0x326   : > { %11614 = vmatpush3.bf16.msk.msra.mxu1 %vm16537_vm2, %v12578_v20 }
 0x327   : > { %11617 = vmatprep.subr.msk.bf16.mxu1 %vm16538_vm8, %v14254_v56 }
 0x32a   : > { %11620 = vmatpush3.bf16.msk.msra.mxu1 %vm16538_vm8, %v14254_v56 }
 0x32b   : > { %11632 = vmatprep.subr.msk.bf16.mxu1 %vm16537_vm2, %v12578_v20 }
 0x353   : > { %v10861_v36 = vpop.f32.mrb[6].mxu0 }
 0x354   : > { %v2227_v0 = vpop.f32.mrb[7].mxu0 }
 0x355   : > { %10870 = vmatprep.mubr.msk.f32.mxu1 %vm16543_vm5, %v2227_v0  ;;  %vm1865_vm5 = vcmask 367856  }
 0x356   : > { %10871 = vmatmul.mubr.msk.f32.vlgmr.msra.gmra.mrb[6].mxu1 %vm16544_vm9, %v10861_v36  ;;  %vm2327_vm9 = vcmask 489832  }
 0x357   : > { %11634 = vmatpush3.bf16.msk.msra.mxu1 %vm16537_vm2, %v12578_v20 }
 0x358   : > { %11637 = vmatprep.subr.msk.bf16.mxu1 %vm16538_vm8, %v14254_v56 }
 0x35b   : > { %11640 = vmatpush3.bf16.msk.msra.mxu1 %vm16538_vm8, %v14254_v56 }
 0x35c   : > { %11652 = vmatprep.subr.msk.bf16.mxu1 %vm16537_vm2, %v12578_v20 }
 0x373   : > { %v10883_v52 = vpop.f32.mrb[8].mxu0 }
 0x374   : > { %v2687_v48 = vpop.f32.mrb[9].mxu0 }
 0x375   : > { %10892 = vmatprep.mubr.msk.f32.mxu1 %vm16545_vm6, %v2687_v48  ;;  %vm2325_vm6 = vcmask 490856  }
 0x376   : > { %10893 = vmatmul.mubr.msk.f32.vlgmr.msra.gmra.mrb[8].mxu1 %vm16546_vm12, %v10883_v52  ;;  %vm2787_vm12 = vcmask 612832  }
 0x377   : > { %11654 = vmatpush3.bf16.msk.msra.mxu1 %vm16537_vm2, %v12578_v20  ;;  %vm1407_vm2 = vcmask 243832  }
 0x378   : > { %11657 = vmatprep.subr.msk.bf16.mxu1 %vm16538_vm8, %v14254_v56 }
 0x37b   : > { %v10905_v37 = vpop.f32.mrb[10].mxu0  ;;  %11660 = vmatpush3.bf16.msk.msra.mxu1 %vm16538_vm8, %v14254_v56  ;;  %vm1405_vm8 = vcmask 244856  }
 0x37c   : > { %v3147_v50 = vpop.f32.mrb[11].mxu0 }
 0x37d   : > { %10914 = vmatprep.mubr.msk.f32.mxu1 %vm16547_vm15, %v3147_v50  ;;  %vm2785_vm15 = vcmask 613856  }
 0x37e   : > { %10915 = vmatmul.mubr.msk.f32.vlgmr.msra.gmra.mrb[10].mxu1 %vm16548_vm14, %v10905_v37  ;;  %vm3247_vm14 = vcmask 735832  }
 0x3e1   : > { %v10806_v5 = vpop.f32.mrb[0].mxu1 }
 0x3e2   : > { %948 = vst.msk [vmem:[#allocation2 + $0x8] sm:$0x7f] %vm947_vm4, %v10806_v5  ;;  %v936_v4 = vpop.f32.mrb[1].mxu1  ;;  %vm3245_vm4 = vcmask 736856   ;;  %v10047_v5 = vld [vmem:[#allocation9 + $0xa] ss:$0 sm:$0xff] }
 0x3e3   : > { %946 = vst.msk [vmem:[#allocation2] sm:$0xff] %vm945_vm13, %v936_v4  ;;  %v10050_v4 = vld [vmem:[#allocation9 + $0xd] ss:$0 sm:$0xff]  ;;  %vm3408_vm13 = vcmask 719872  }
 0x3e9   : > { %v10828_v3 = vpop.f32.mrb[2].mxu1 }
 0x3ea   : > { %v1388_v40 = vpop.f32.mrb[3].mxu1  ;;  %1401 = vrot.lane.b32.xlu0 %v10828_v3, %s12580_s10  ;;  %v10053_v3 = vld [vmem:[#allocation9 + $0x10] ss:$0 sm:$0xff] }
 0x3eb   : > { %1399 = vrot.lane.b32.xlu1 %v1388_v40, %s12580_s10  ;;  %v10023_v40 = vld [vmem:[#allocation9] ss:$0 sm:$0xff]  ;;  %s10223_s10 = sld [smem:[#allocation11 + $0x8]] }
 0x3f8   : > { %v10850_v59 = vpop.f32.mrb[4].mxu1 }
 0x3f9   : > { %v1848_v43 = vpop.f32.mrb[5].mxu1  ;;  %1861 = vrot.lane.b32.xlu0 %v10850_v59, %s12581_s15 }
 0x3fa   : > { %1859 = vrot.lane.b32.xlu1 %v1848_v43, %s12581_s15 }
 0x429   : > { %v10872_v56 = vpop.f32.mrb[6].mxu1 }
 0x42a   : > { %v2308_v29 = vpop.f32.mrb[7].mxu1  ;;  %2321 = vrot.lane.b32.xlu0 %v10872_v56, %s12582_s17 }
 0x42b   : > { %2319 = vrot.lane.b32.xlu1 %v2308_v29, %s12582_s17  ;;  %s10247_s17 = sld [smem:[#allocation11 + $0x9]] }
 0x449   : > { %v10894_v35 = vpop.f32.mrb[8].mxu1 }
 0x44a   : > { %2781 = vrot.lane.b32.xlu0 %v10894_v35, %s12583_s18  ;;  %v2768_v22 = vpop.f32.mrb[9].mxu1  ;;  %v10026_v35 = vld [vmem:[#allocation9 + $0x3] ss:$0 sm:$0xff] }
 0x44b   : > { %2779 = vrot.lane.b32.xlu1 %v2768_v22, %s12583_s18 }
 0x451   : > { %v10916_v16 = vpop.f32.mrb[10].mxu1 }
 0x452   : > { %3241 = vrot.lane.b32.xlu0 %v10916_v16, %s12584_s24  ;;  %v3228_v23 = vpop.f32.mrb[11].mxu1 }
 0x453   : > { %3239 = vrot.lane.b32.xlu1 %v3228_v23, %s12584_s24  ;;  %s10271_s24 = sld [smem:[#allocation11 + $0xa]] }
 0x456   : > { %3289 = vrot.lane.b32.xlu0 %v10025_v11, %s12585_s25 }
 0x457   : > { %3268 = vrot.lane.b32.xlu1 %v10024_v31, %s12586_s26 }
 0x45a   : > { %3340 = vrot.lane.b32.xlu0 %v10028_v30, %s12585_s25 }
 0x45b   : > { %3319 = vrot.lane.b32.xlu1 %v10027_v63, %s12586_s26 }
 0x45c   : > { %v1402_v45 = vpop.permute.xlu0 %1401 }
 0x45d   : > { %1408 = vst.msk [vmem:[#allocation2 + $0x8] sm:$0x7f] %vm1407_vm2, %v1402_v45  ;;  %v1400_v13 = vpop.permute.xlu1 %1399  ;;  %vm12588_vm2 = vmmov 0  }
 0x45e   : > { %3391 = vrot.lane.b32.xlu0 %v10031_v15, %s12585_s25  ;;  %1406 = vst.msk [vmem:[#allocation2] sm:$0xff] %vm1405_vm8, %v1400_v13  ;;  %10946 = vmatprep.mubr.msk.f32.mxu1 %vm12588_vm2, %v16428_v1  ;;  %vm3514_vm8 = vcmask 1043456  }
 0x45f   : > { %3370 = vrot.lane.b32.xlu1 %v10030_v39, %s12586_s26 }
 0x46b   : > { %v1862_v60 = vpop.permute.xlu0 %1861 }
 0x46c   : > { %1868 = vst.msk [vmem:[#allocation2 + $0x8] sm:$0x7f] %vm1867_vm7, %v1862_v60  ;;  %v1860_v25 = vpop.permute.xlu1 %1859  ;;  %vm16549_vm7 = vcmask 1046528  }
 0x46d   : > { %1866 = vst.msk [vmem:[#allocation2] sm:$0xff] %vm1865_vm5, %v1860_v25  ;;  %vm14816_vm5 = vmpackc.low %vm3514_vm8, %vm16532_vm1  ;;  %vm3511_vm1 = vcmask 97280  }
 0x49c   : > { %v2322_v6 = vpop.permute.xlu0 %2321 }
 0x49d   : > { %2328 = vst.msk [vmem:[#allocation2 + $0x8] sm:$0x7f] %vm2327_vm9, %v2322_v6  ;;  %v2320_v55 = vpop.permute.xlu1 %2319  ;;  %v10029_v6 = vld [vmem:[#allocation9 + $0x6] ss:$0 sm:$0xff]  ;;  %vm16552_vm9 = vcmp.eq.s32.totalorder %v13877_v34, %v13951_v58 }
 0x49e   : > { %2326 = vst.msk [vmem:[#allocation2] sm:$0xff] %vm2325_vm6, %v2320_v55  ;;  %vm14833_vm6 = vmpackc.low %vm3514_vm8, %vm16552_vm9 }
 0x4bc   : > { %v2782_v46 = vpop.permute.xlu0 %2781 }
 0x4bd   : > { %2788 = vst.msk [vmem:[#allocation2 + $0x8] sm:$0x7f] %vm2787_vm12, %v2782_v46  ;;  %v2780_v17 = vpop.permute.xlu1 %2779  ;;  %vm3664_vm12 = vcmask 46080  }
 0x4be   : > { %2786 = vst.msk [vmem:[#allocation2] sm:$0xff] %vm2785_vm15, %v2780_v17  ;;  %vm16556_vm15 = vmmov %vm16549_vm7 }
 0x4c4   : > { %v3242_v18 = vpop.permute.xlu0 %3241 }
 0x4c5   : > { %3248 = vst.msk [vmem:[#allocation2 + $0x8] sm:$0x7f] %vm3247_vm14, %v3242_v18  ;;  %v3240_v42 = vpop.permute.xlu1 %3239  ;;  %vm16557_vm14 = vmmov %vm16549_vm7 }
 0x4c6   : > { %3246 = vst.msk [vmem:[#allocation2] sm:$0xff] %vm3245_vm4, %v3240_v42  ;;  %vm16558_vm4 = vmmov %vm16549_vm7 }
 0x4c7   : > { %vm16559_vm8 = vmmov %vm16558_vm4 }
 0x4c8   : > { %v3290_v47 = vpop.permute.xlu0 %3289  ;;  %vm16561_vm9 = vmmov %vm16558_vm4 }
 0x4c9   : > { %v3269_v9 = vpop.permute.xlu1 %3268 }
 0x4cc   : > { %v14748_v62 = vld [vmem:[#allocation2 + $0x8] sm:$0x1f]  ;;  %v3341_v41 = vpop.permute.xlu0 %3340 }
 0x4cd   : > { %v14750_v57 = vld [vmem:[#allocation2] sm:$0xff]  ;;  %v3272_v54 = vmul.f32 %v3269_v9, %v14748_v62  ;;  %v3293_v38 = vmul.f32 %v3290_v47, %v14748_v62  ;;  %v14757_v14 = vld [vmem:[#allocation2 + $0x9] sm:$0x1f]  ;;  %v3320_v53 = vpop.permute.xlu1 %3319  ;;  %v3261_v43 = vmul.f32 %v10023_v40, %v14748_v62 }
 0x4ce   : > { %v3271_v19 = vmul.f32 %v3269_v9, %v14750_v57  ;;  %v3292_v32 = vmul.f32 %v3290_v47, %v14750_v57  ;;  %v14760_v7 = vld [vmem:[#allocation2 + $0x1] sm:$0xff]  ;;  %v3323_v12 = vmul.f32 %v3320_v53, %v14757_v14  ;;  %v3344_v24 = vmul.f32 %v3341_v41, %v14757_v14  ;;  %v14771_v49 = vld [vmem:[#allocation2 + $0xa] sm:$0x1f] }
 0x4cf   : > { %3277 = vrot.lane.b32.xlu0 %v3272_v54, %s12574_s28  ;;  %v3322_v51 = vmul.f32 %v3320_v53, %v14760_v7  ;;  %v3343_v44 = vmul.f32 %v3341_v41, %v14760_v7  ;;  %v14774_v36 = vld [vmem:[#allocation2 + $0x2] sm:$0xff]  ;;  %v3260_v29 = vmul.f32 %v10023_v40, %v14750_v57  ;;  %v3310_v30 = vmul.f32 %v10026_v35, %v14757_v14 }
 0x4d0   : > { %3275 = vrot.lane.b32.xlu1 %v3271_v19, %s12574_s28  ;;  %v3392_v52 = vpop.permute.xlu0 %3391  ;;  %v3309_v15 = vmul.f32 %v10026_v35, %v14760_v7  ;;  %v3360_v9 = vmul.f32 %v10029_v6, %v14774_v36  ;;  %v3361_v54 = vmul.f32 %v10029_v6, %v14771_v49  ;;  %v12587_v40 = vmov 0.0|0.0  }
 0x4d1   : > { %v3371_v28 = vpop.permute.xlu1 %3370  ;;  %v3395_v37 = vmul.f32 %v3392_v52, %v14771_v49  ;;  %v3394_v50 = vmul.f32 %v3392_v52, %v14774_v36  ;;  %v3407_v52 = vstv %s3406_s16  ;;  %11683 = vmatprep.subr.bf16.mxu1 %v12587_v40  ;;  %11713 = vmatprep.subr.bf16.mxu0 %v12587_v40  ;;  %s10295_s16 = sld [smem:[#allocation11 + $0xb]] }
 0x4d2   : > { %v3374_v0 = vmul.f32 %v3371_v28, %v14771_v49  ;;  %v3373_v48 = vmul.f32 %v3371_v28, %v14774_v36 }
 0x4d3   : > { %3298 = vrot.lane.b32.xlu0 %v3293_v38, %s12575_s29 }
 0x4d4   : > { %3296 = vrot.lane.b32.xlu1 %v3292_v32, %s12575_s29 }
 0x4d7   : > { %3328 = vrot.lane.b32.xlu0 %v3323_v12, %s12574_s28 }
 0x4d8   : > { %3326 = vrot.lane.b32.xlu1 %v3322_v51, %s12574_s28 }
 0x4db   : > { %3349 = vrot.lane.b32.xlu0 %v3344_v24, %s12575_s29 }
 0x4dc   : > { %3347 = vrot.lane.b32.xlu1 %v3343_v44, %s12575_s29 }
 0x4df   : > { %3379 = vrot.lane.b32.xlu0 %v3374_v0, %s12574_s28 }
 0x4e0   : > { %3377 = vrot.lane.b32.xlu1 %v3373_v48, %s12574_s28 }
 0x4e3   : > { %3400 = vrot.lane.b32.xlu0 %v3395_v37, %s12575_s29 }
 0x4e4   : > { %3398 = vrot.lane.b32.xlu1 %v3394_v50, %s12575_s29 }
 0x4e7   : > { %3679 = vrot.lane.b32.xlu0 %v10047_v5, %s12586_s26 }
 0x4eb   : > { %3730 = vrot.lane.b32.xlu0 %v10050_v4, %s12586_s26 }
 0x4ef   : > { %3781 = vrot.lane.b32.xlu0 %v10053_v3, %s12586_s26 }
 0x541   : > { %v3278_v59 = vpop.permute.xlu0 %3277 }
 0x542   : > { %v3276_v56 = vpop.permute.xlu1 %3275  ;;  %v3282_v22 = vadd.f32 %v3278_v59, %v3261_v43  ;;  %v10048_v43 = vld [vmem:[#allocation9 + $0xb] ss:$0 sm:$0xff] }
 0x543   : > { %v3281_v16 = vadd.f32 %v3276_v56, %v3260_v29  ;;  %v10051_v56 = vld [vmem:[#allocation9 + $0xe] ss:$0 sm:$0xff]  ;;  %v10054_v29 = vld [vmem:[#allocation9 + $0x11] ss:$0 sm:$0xff] }
 0x545   : > { %v3299_v23 = vpop.permute.xlu0 %3298 }
 0x546   : > { %v3303_v11 = vadd.f32 %v3299_v23, %v3282_v22  ;;  %v3297_v31 = vpop.permute.xlu1 %3296 }
 0x547   : > { %v3302_v63 = vadd.f32 %v3297_v31, %v3281_v16 }
 0x548   : > { %v3312_v39 = vadd.f32 %v3310_v30, %v3303_v11 }
 0x549   : > { %v3329_v45 = vpop.permute.xlu0 %3328  ;;  %v3311_v13 = vadd.f32 %v3309_v15, %v3302_v63 }
 0x54a   : > { %v3327_v60 = vpop.permute.xlu1 %3326  ;;  %v3333_v25 = vadd.f32 %v3329_v45, %v3312_v39 }
 0x54b   : > { %v3332_v55 = vadd.f32 %v3327_v60, %v3311_v13 }
 0x54d   : > { %v3350_v46 = vpop.permute.xlu0 %3349 }
 0x54e   : > { %v3354_v17 = vadd.f32 %v3350_v46, %v3333_v25  ;;  %v3348_v18 = vpop.permute.xlu1 %3347 }
 0x54f   : > { %v3353_v42 = vadd.f32 %v3348_v18, %v3332_v55 }
 0x550   : > { %v3363_v38 = vadd.f32 %v3361_v54, %v3354_v17 }
 0x551   : > { %v3380_v19 = vpop.permute.xlu0 %3379  ;;  %v3362_v47 = vadd.f32 %v3360_v9, %v3353_v42 }
 0x552   : > { %v3378_v32 = vpop.permute.xlu1 %3377  ;;  %v3384_v41 = vadd.f32 %v3380_v19, %v3363_v38 }
 0x553   : > { %v3383_v53 = vadd.f32 %v3378_v32, %v3362_v47 }
 0x555   : > { %v3401_v12 = vpop.permute.xlu0 %3400 }
 0x556   : > { %v3399_v51 = vpop.permute.xlu1 %3398  ;;  %v3405_v44 = vadd.f32 %v3401_v12, %v3384_v41  ;;  %v10071_v41 = vld [vmem:[#allocation9 + $0x13] ss:$0 sm:$0xff] }
 0x557   : > { %v3404_v24 = vadd.f32 %v3399_v51, %v3383_v53  ;;  %v16555_v53 = vld [vmem:[#allocation54_spill] sm:$0xff]  ;;  %v10074_v51 = vld [vmem:[#allocation9 + $0x16] ss:$0 sm:$0xff] }
 0x559   : > { %v3680_v28 = vpop.permute.xlu0 %3679  ;;  %10939 = vmatprep.mubr.msk.f32.mxu0 %vm3408_vm13, %v3404_v24  ;;  %v10077_v24 = vld [vmem:[#allocation9 + $0x19] ss:$0 sm:$0xff] }
 0x55a   : > { %v3682_v0 = vmul.f32 %v3680_v28, %v14750_v57  ;;  %10940 = vmatmul.mubr.msk.f32.vlgmr.msra.gmra.mrb[12].mxu0 %vm3408_vm13, %v3405_v44  ;;  %v3683_v35 = vmul.f32 %v3680_v28, %v14748_v62 }
 0x55b   : > { %10985 = vmatprep.mubr.msk.f32.mxu0 %vm12588_vm2, %v16428_v1 }
 0x55c   : > { %3686 = vrot.lane.b32.xlu0 %v3682_v0, %s12574_s28 }
 0x55d   : > { %v3731_v13 = vpop.permute.xlu0 %3730 }
 0x55e   : > { %v3733_v46 = vmul.f32 %v3731_v13, %v14760_v7  ;;  %v3734_v17 = vmul.f32 %v3731_v13, %v14757_v14 }
 0x561   : > { %v3782_v47 = vpop.permute.xlu0 %3781 }
 0x562   : > { %v3784_v38 = vmul.f32 %v3782_v47, %v14774_v36  ;;  %v3785_v32 = vmul.f32 %v3782_v47, %v14771_v49 }
 0x62d   : > { %v10941_v48 = vpop.f32.mrb[12].mxu0 }
 0x62e   : > { %v3487_v37 = vadd.f32 %v10941_v48, %v3407_v52  ;;  %v3481_v50 = vpop.f32.mrb[13].mxu0 }
 0x62f   : > { %v3482_v5 = vadd.f32 %v3481_v50, %v3407_v52 }
 0x630   : > { %v3491_v4 = vmax.f32 %v3487_v37, 0.0 }
 0x631   : > { %v3490_v3 = vmax.f32 %v3482_v5, 0.0 }
 0x633   : > { %v12306_v59 = vpack.i.bf16 %v3491_v4, %v3490_v3 }
 0x635   : > { %12307 = vrot.lane.b32.xlu1 %v12306_v59, %s12574_s28 }
 0x639   : > { %3700 = vrot.lane.b32.xlu1 %v10048_v43, %s12585_s25 }
 0x63d   : > { %3751 = vrot.lane.b32.xlu1 %v10051_v56, %s12585_s25 }
 0x641   : > { %3802 = vrot.lane.b32.xlu1 %v10054_v29, %s12585_s25  ;;  %v10049_v29 = vld [vmem:[#allocation9 + $0xc] ss:$0 sm:$0xff] }
 0x645   : > { %3688 = vrot.lane.b32.xlu1 %v3683_v35, %s12574_s28 }
 0x6a7   : > { %v12308_v22 = vpop.permute.xlu1 %12307 }
 0x6a8   : > { %v12310_v16 = vunpack.i.h.bf16 %v12308_v22  ;;  %v12309_v23 = vunpack.i.l.bf16 %v12308_v22 }
 0x6aa   : > { %v3501_v11 = vmax.f32 %v3491_v4, %v12310_v16  ;;  %v3500_v31 = vmax.f32 %v3490_v3, %v12309_v23  ;;  %v3687_v4 = vpop.permute.xlu0 %3686  ;;  %v10046_v3 = vld [vmem:[#allocation9 + $0x9] ss:$0 sm:$0xff]  ;;  %v3720_v16 = vmul.f32 %v10049_v29, %v14760_v7 }
 0x6ab   : > { %v3701_v30 = vpop.permute.xlu1 %3700  ;;  %v3671_v43 = vmul.f32 %v10046_v3, %v14750_v57  ;;  %v3672_v13 = vmul.f32 %v10046_v3, %v14748_v62  ;;  %v10075_v3 = vld [vmem:[#allocation9 + $0x17] ss:$0 sm:$0xff] }
 0x6ac   : > { %v3505_v63 = vrot.slane %v3501_v11, 1  ;;  %v3504_v15 = vrot.slane %v3500_v31, 1  ;;  %v3703_v39 = vmul.f32 %v3701_v30, %v14750_v57  ;;  %v3704_v45 = vmul.f32 %v3701_v30, %v14748_v62  ;;  %v10052_v30 = vld [vmem:[#allocation9 + $0xf] ss:$0 sm:$0xff] }
 0x6ad   : > { %v3692_v56 = vadd.f32 %v3687_v4, %v3671_v43  ;;  %v10072_v4 = vld [vmem:[#allocation9 + $0x14] ss:$0 sm:$0xff] }
 0x6ae   : > { %v3510_v60 = vmax.f32 %v3501_v11, %v3505_v63  ;;  %v3506_v25 = vsel %vm16549_vm7, %v3504_v15, %v3505_v63  ;;  %3709 = vrot.lane.b32.xlu1 %v3704_v45, %s12575_s29  ;;  %3707 = vrot.lane.b32.xlu0 %v3703_v39, %s12575_s29  ;;  %v3771_v39 = vmul.f32 %v10052_v30, %v14774_v36  ;;  %vm16560_vm7 = vmmov %vm16558_vm4 }
 0x6af   : > { %v3509_v6 = vmax.f32 %v3500_v31, %v3506_v25  ;;  %v3752_v42 = vpop.permute.xlu1 %3751 }
 0x6b0   : > { %v3754_v9 = vmul.f32 %v3752_v42, %v14760_v7  ;;  %v3755_v54 = vmul.f32 %v3752_v42, %v14757_v14 }
 0x6b1   : > { %v11684_v18 = vpack.c.bf16 %v3510_v60, %v3509_v6 }
 0x6b2   : > { %3739 = vrot.lane.b32.xlu1 %v3734_v17, %s12574_s28  ;;  %3737 = vrot.lane.b32.xlu0 %v3733_v46, %s12574_s28 }
 0x6b3   : > { %11686 = vmatpush3.bf16.msk.msra.mxu1 %vm14816_vm5, %v11684_v18  ;;  %v3803_v34 = vpop.permute.xlu1 %3802 }
 0x6b4   : > { %11687 = vmatprep.subr.bf16.mxu1 %v12587_v40  ;;  %v3805_v58 = vmul.f32 %v3803_v34, %v14774_v36  ;;  %v3806_v12 = vmul.f32 %v3803_v34, %v14771_v49 }
 0x6b6   : > { %3760 = vrot.lane.b32.xlu1 %v3755_v54, %s12575_s29  ;;  %3758 = vrot.lane.b32.xlu0 %v3754_v9, %s12575_s29  ;;  %v3721_v9 = vmul.f32 %v10049_v29, %v14757_v14 }
 0x6b7   : > { %10947 = vmatmul.mubr.msk.f32.vlgmr.msra.gmra.mrb[12].mxu1 %vm3511_vm1, %v16462_v27  ;;  %v3689_v44 = vpop.permute.xlu1 %3688 }
 0x6b8   : > { %11690 = vmatpush3.bf16.msk.msra.mxu1 %vm14833_vm6, %v16555_v53  ;;  %10953 = vmatprep.mubr.msk.f32.mxu1 %vm12588_vm2, %v16428_v1  ;;  %v3693_v6 = vadd.f32 %v3689_v44, %v3672_v13 }
 0x6b9   : > { %11692 = vmatprep.subr.msk.bf16.mxu1 %vm14580_vm3, %v12578_v20 }
 0x6ba   : > { %3790 = vrot.lane.b32.xlu1 %v3785_v32, %s12574_s28  ;;  %3788 = vrot.lane.b32.xlu0 %v3784_v38, %s12574_s28  ;;  %v3772_v32 = vmul.f32 %v10052_v30, %v14771_v49 }
 0x6be   : > { %3811 = vrot.lane.b32.xlu1 %v3806_v12, %s12575_s29  ;;  %3809 = vrot.lane.b32.xlu0 %v3805_v58, %s12575_s29 }
 0x6c2   : > { %4086 = vrot.lane.b32.xlu1 %v10071_v41, %s12586_s26 }
 0x6c6   : > { %4137 = vrot.lane.b32.xlu1 %v10074_v51, %s12586_s26 }
 0x6ca   : > { %4188 = vrot.lane.b32.xlu1 %v10077_v24, %s12586_s26  ;;  %v3818_v24 = vstv %s10055_s9  ;;  %s12591_s9 = smov 42  }
 0x720   : > { %v3710_v28 = vpop.permute.xlu1 %3709  ;;  %v3708_v59 = vpop.permute.xlu0 %3707 }
 0x721   : > { %v3713_v22 = vadd.f32 %v3708_v59, %v3692_v56  ;;  %v3714_v18 = vadd.f32 %v3710_v28, %v3693_v6  ;;  %v10078_v59 = vld [vmem:[#allocation9 + $0x1a] ss:$0 sm:$0xff] }
 0x723   : > { %v3722_v23 = vadd.f32 %v3720_v16, %v3713_v22  ;;  %v3723_v54 = vadd.f32 %v3721_v9, %v3714_v18 }
 0x724   : > { %v3740_v0 = vpop.permute.xlu1 %3739  ;;  %v3738_v35 = vpop.permute.xlu0 %3737 }
 0x725   : > { %v3743_v31 = vadd.f32 %v3738_v35, %v3722_v23  ;;  %v3744_v47 = vadd.f32 %v3740_v0, %v3723_v54 }
 0x728   : > { %v3761_v52 = vpop.permute.xlu1 %3760  ;;  %v3759_v11 = vpop.permute.xlu0 %3758 }
 0x729   : > { %v3764_v63 = vadd.f32 %v3759_v11, %v3743_v31  ;;  %v3765_v38 = vadd.f32 %v3761_v52, %v3744_v47 }
 0x72b   : > { %v3773_v45 = vadd.f32 %v3771_v39, %v3764_v63  ;;  %v3774_v34 = vadd.f32 %v3772_v32, %v3765_v38  ;;  %v10095_v32 = vld [vmem:[#allocation9 + $0x1c] ss:$0 sm:$0xff] }
 0x72c   : > { %v3791_v48 = vpop.permute.xlu1 %3790  ;;  %v3789_v15 = vpop.permute.xlu0 %3788 }
 0x72d   : > { %v3794_v25 = vadd.f32 %v3789_v15, %v3773_v45  ;;  %v3795_v58 = vadd.f32 %v3791_v48, %v3774_v34  ;;  %v10098_v34 = vld [vmem:[#allocation9 + $0x1f] ss:$0 sm:$0xff] }
 0x730   : > { %v3812_v37 = vpop.permute.xlu1 %3811  ;;  %v3810_v60 = vpop.permute.xlu0 %3809 }
 0x731   : > { %v3815_v46 = vadd.f32 %v3810_v60, %v3794_v25  ;;  %v3816_v12 = vadd.f32 %v3812_v37, %v3795_v58  ;;  %v10101_v58 = vld [vmem:[#allocation9 + $0x22] ss:$0 sm:$0xff] }
 0x734   : > { %v14860_v50 = vpop.permute.xlu1 %4086 }
 0x735   : > { %v4089_v5 = vmul.f32 %v14860_v50, %v14750_v57  ;;  %v4090_v43 = vmul.f32 %v14860_v50, %v14748_v62 }
 0x737   : > { %4093 = vrot.lane.b32.xlu1 %v4089_v5, %s12574_s28 }
 0x738   : > { %v4138_v15 = vpop.permute.xlu1 %4137 }
 0x739   : > { %v4140_v13 = vmul.f32 %v4138_v15, %v14760_v7  ;;  %v4141_v60 = vmul.f32 %v4138_v15, %v14757_v14 }
 0x73c   : > { %v4189_v18 = vpop.permute.xlu1 %4188 }
 0x73d   : > { %v4192_v9 = vmul.f32 %v4189_v18, %v14771_v49 }
 0x78a   : > { %v3584_v17 = vpop.f32.mrb[12].mxu1 }
 0x78b   : > { %v10948_v42 = vpop.f32.mrb[13].mxu1  ;;  %10954 = vmatmul.mubr.msk.f32.vlgmr.msra.gmra.mrb[14].mxu1 %vm3511_vm1, %v3584_v17 }
 0x78c   : > { %11694 = vmatpush3.bf16.msk.msra.mxu1 %vm14580_vm3, %v12578_v20  ;;  %10978 = vmatprep.mubr.msk.f32.mxu1 %vm3408_vm13, %v3815_v46  ;;  %v4191_v42 = vmul.f32 %v4189_v18, %v14774_v36 }
 0x78d   : > { %11696 = vmatprep.subr.msk.bf16.mxu1 %vm16525_vm11, %v12578_v20 }
 0x790   : > { %11698 = vmatpush3.bf16.msk.msra.mxu1 %vm16525_vm11, %v12578_v20 }
 0x791   : > { %11700 = vmatprep.subr.msk.bf16.mxu1 %vm14625_vm0, %v12578_v20 }
 0x794   : > { %11702 = vmatpush3.bf16.msk.msra.mxu1 %vm14625_vm0, %v12578_v20 }
 0x795   : > { %11705 = vmatprep.subr.msk.bf16.mxu1 %vm14644_vm10, %v14636_v2 }
 0x798   : > { %11708 = vmatpush3.bf16.msk.msra.mxu1 %vm14644_vm10, %v14636_v2 }
 0x799   : > { %11710 = vmatprep.subr.bf16.mxu1 %v14654_v21 }
 0x79c   : > { %11712 = vmatpush3.bf16.msra.mxu1 %v14654_v21 }
 0x79d   : > { %10976 = vmatprep.subr.mxu1 %v14664_v33 }
 0x7a0   : > { %10977 = vmatpush3.msra.mxu1 %v14664_v33 }
 0x7a1   : > { %10979 = vmatmul.mubr.msk.f32.vlgmr.msra.gmra.mrb[16].mxu1 %vm3408_vm13, %v3816_v12  ;;  %11743 = vmatprep.subr.bf16.mxu1 %v12587_v40 }
 0x7a2   : > { %11024 = vmatprep.mubr.msk.f32.mxu1 %vm12588_vm2, %v16428_v1 }
 0x85e   : > { %v3660_v41 = vpop.f32.mrb[14].mxu1 }
 0x85f   : > { %3665 = vst.msk [vmem:[%s14907_s7] sm:$0x3f] %vm3664_vm12, %v3660_v41  ;;  %v10955_v51 = vpop.f32.mrb[15].mxu1  ;;  %vm16562_vm12 = vmmov %vm16558_vm4 }
 0x874   : > { %v10980_v44 = vpop.f32.mrb[16].mxu1 }
 0x875   : > { %v3897_v28 = vadd.f32 %v10980_v44, %v3818_v24  ;;  %v3891_v0 = vpop.f32.mrb[17].mxu1 }
 0x876   : > { %v3892_v52 = vadd.f32 %v3891_v0, %v3818_v24 }
 0x877   : > { %v3901_v48 = vmax.f32 %v3897_v28, 0.0 }
 0x878   : > { %v3900_v37 = vmax.f32 %v3892_v52, 0.0 }
 0x87a   : > { %v12311_v5 = vpack.i.bf16 %v3901_v48, %v3900_v37 }
 0x87c   : > { %12312 = vrot.lane.b32.xlu0 %v12311_v5, %s12574_s28 }
 0x880   : > { %4107 = vrot.lane.b32.xlu0 %v10072_v4, %s12585_s25 }
 0x884   : > { %4158 = vrot.lane.b32.xlu0 %v10075_v3, %s12585_s25 }
 0x888   : > { %4209 = vrot.lane.b32.xlu0 %v10078_v59, %s12585_s25  ;;  %v10073_v59 = vld [vmem:[#allocation9 + $0x15] ss:$0 sm:$0xff] }
 0x88c   : > { %4095 = vrot.lane.b32.xlu0 %v4090_v43, %s12574_s28 }
 0x8ee   : > { %v12313_v56 = vpop.permute.xlu0 %12312 }
 0x8ef   : > { %v12315_v29 = vunpack.i.h.bf16 %v12313_v56  ;;  %v12314_v35 = vunpack.i.l.bf16 %v12313_v56 }
 0x8f1   : > { %v3911_v22 = vmax.f32 %v3901_v48, %v12315_v29  ;;  %v3910_v16 = vmax.f32 %v3900_v37, %v12314_v35  ;;  %v4094_v48 = vpop.permute.xlu1 %4093  ;;  %v10070_v37 = vld [vmem:[#allocation9 + $0x12] ss:$0 sm:$0xff]  ;;  %v4127_v29 = vmul.f32 %v10073_v59, %v14760_v7 }
 0x8f2   : > { %v4108_v23 = vpop.permute.xlu0 %4107  ;;  %v4078_v4 = vmul.f32 %v10070_v37, %v14750_v57  ;;  %v4079_v15 = vmul.f32 %v10070_v37, %v14748_v62  ;;  %v10099_v37 = vld [vmem:[#allocation9 + $0x20] ss:$0 sm:$0xff] }
 0x8f3   : > { %v3915_v11 = vrot.slane %v3911_v22, 1  ;;  %v3914_v31 = vrot.slane %v3910_v16, 1  ;;  %v4110_v30 = vmul.f32 %v4108_v23, %v14750_v57  ;;  %v4111_v63 = vmul.f32 %v4108_v23, %v14748_v62  ;;  %v10076_v23 = vld [vmem:[#allocation9 + $0x18] ss:$0 sm:$0xff] }
 0x8f4   : > { %v4099_v3 = vadd.f32 %v4094_v48, %v4078_v4  ;;  %v10096_v48 = vld [vmem:[#allocation9 + $0x1d] ss:$0 sm:$0xff] }
 0x8f5   : > { %v3920_v39 = vmax.f32 %v3911_v22, %v3915_v11  ;;  %v3916_v45 = vsel %vm16556_vm15, %v3914_v31, %v3915_v11  ;;  %4116 = vrot.lane.b32.xlu0 %v4111_v63, %s12575_s29  ;;  %4114 = vrot.lane.b32.xlu1 %v4110_v30, %s12575_s29  ;;  %v4178_v30 = vmul.f32 %v10076_v23, %v14774_v36  ;;  %vm16563_vm15 = vmmov %vm16558_vm4 }
 0x8f6   : > { %v3919_v50 = vmax.f32 %v3910_v16, %v3916_v45  ;;  %v4159_v6 = vpop.permute.xlu0 %4158 }
 0x8f7   : > { %v4161_v46 = vmul.f32 %v4159_v6, %v14760_v7  ;;  %v4162_v17 = vmul.f32 %v4159_v6, %v14757_v14 }
 0x8f8   : > { %v11714_v25 = vpack.c.bf16 %v3920_v39, %v3919_v50 }
 0x8f9   : > { %4146 = vrot.lane.b32.xlu0 %v4141_v60, %s12574_s28  ;;  %4144 = vrot.lane.b32.xlu1 %v4140_v13, %s12574_s28 }
 0x8fa   : > { %11716 = vmatpush3.bf16.msk.msra.mxu0 %vm14816_vm5, %v11714_v25  ;;  %v4210_v54 = vpop.permute.xlu0 %4209 }
 0x8fb   : > { %11717 = vmatprep.subr.bf16.mxu0 %v12587_v40  ;;  %v4212_v47 = vmul.f32 %v4210_v54, %v14774_v36  ;;  %v4213_v38 = vmul.f32 %v4210_v54, %v14771_v49 }
 0x8fd   : > { %4167 = vrot.lane.b32.xlu0 %v4162_v17, %s12575_s29  ;;  %4165 = vrot.lane.b32.xlu1 %v4161_v46, %s12575_s29  ;;  %v4128_v46 = vmul.f32 %v10073_v59, %v14757_v14 }
 0x8fe   : > { %10986 = vmatmul.mubr.msk.f32.vlgmr.msra.gmra.mrb[14].mxu0 %vm3511_vm1, %v16462_v27  ;;  %v4096_v12 = vpop.permute.xlu0 %4095 }
 0x8ff   : > { %11720 = vmatpush3.bf16.msk.msra.mxu0 %vm14833_vm6, %v16555_v53  ;;  %10992 = vmatprep.mubr.msk.f32.mxu0 %vm12588_vm2, %v16428_v1  ;;  %v4100_v50 = vadd.f32 %v4096_v12, %v4079_v15 }
 0x900   : > { %11722 = vmatprep.subr.msk.bf16.mxu0 %vm14580_vm3, %v12578_v20 }
 0x901   : > { %4197 = vrot.lane.b32.xlu0 %v4192_v9, %s12574_s28  ;;  %4195 = vrot.lane.b32.xlu1 %v4191_v42, %s12574_s28  ;;  %v4179_v9 = vmul.f32 %v10076_v23, %v14771_v49 }
 0x905   : > { %4218 = vrot.lane.b32.xlu0 %v4213_v38, %s12575_s29  ;;  %4216 = vrot.lane.b32.xlu1 %v4212_v47, %s12575_s29 }
 0x909   : > { %4493 = vrot.lane.b32.xlu0 %v10095_v32, %s12586_s26 }
 0x90d   : > { %4544 = vrot.lane.b32.xlu0 %v10098_v34, %s12586_s26 }
 0x911   : > { %4595 = vrot.lane.b32.xlu0 %v10101_v58, %s12586_s26  ;;  %v4225_v58 = vstv %s10079_s22  ;;  %s12592_s22 = smov 54  }
 0x967   : > { %v4117_v41 = vpop.permute.xlu0 %4116  ;;  %v4115_v5 = vpop.permute.xlu1 %4114 }
 0x968   : > { %v4120_v56 = vadd.f32 %v4115_v5, %v4099_v3  ;;  %v4121_v25 = vadd.f32 %v4117_v41, %v4100_v50  ;;  %v10102_v5 = vld [vmem:[#allocation9 + $0x23] ss:$0 sm:$0xff] }
 0x96a   : > { %v4129_v35 = vadd.f32 %v4127_v29, %v4120_v56  ;;  %v4130_v17 = vadd.f32 %v4128_v46, %v4121_v25 }
 0x96b   : > { %v4147_v51 = vpop.permute.xlu0 %4146  ;;  %v4145_v43 = vpop.permute.xlu1 %4144 }
 0x96c   : > { %v4150_v16 = vadd.f32 %v4145_v43, %v4129_v35  ;;  %v4151_v18 = vadd.f32 %v4147_v51, %v4130_v17 }
 0x96f   : > { %v4168_v24 = vpop.permute.xlu0 %4167  ;;  %v4166_v22 = vpop.permute.xlu1 %4165 }
 0x970   : > { %v4171_v11 = vadd.f32 %v4166_v22, %v4150_v16  ;;  %v4172_v42 = vadd.f32 %v4168_v24, %v4151_v18 }
 0x972   : > { %v4180_v63 = vadd.f32 %v4178_v30, %v4171_v11  ;;  %v4181_v54 = vadd.f32 %v4179_v9, %v4172_v42  ;;  %v10119_v9 = vld [vmem:[#allocation9 + $0x25] ss:$0 sm:$0xff] }
 0x973   : > { %v4198_v44 = vpop.permute.xlu0 %4197  ;;  %v4196_v31 = vpop.permute.xlu1 %4195 }
 0x974   : > { %v4201_v45 = vadd.f32 %v4196_v31, %v4180_v63  ;;  %v4202_v47 = vadd.f32 %v4198_v44, %v4181_v54  ;;  %v10122_v54 = vld [vmem:[#allocation9 + $0x28] ss:$0 sm:$0xff] }
 0x977   : > { %v4219_v28 = vpop.permute.xlu0 %4218  ;;  %v4217_v39 = vpop.permute.xlu1 %4216 }
 0x978   : > { %v4222_v13 = vadd.f32 %v4217_v39, %v4201_v45  ;;  %v4223_v38 = vadd.f32 %v4219_v28, %v4202_v47  ;;  %v10125_v47 = vld [vmem:[#allocation9 + $0x2b] ss:$0 sm:$0xff] }
 0x97b   : > { %v14954_v0 = vpop.permute.xlu0 %4493 }
 0x97c   : > { %v4496_v52 = vmul.f32 %v14954_v0, %v14750_v57  ;;  %v4497_v4 = vmul.f32 %v14954_v0, %v14748_v62 }
 0x97e   : > { %4500 = vrot.lane.b32.xlu0 %v4496_v52, %s12574_s28 }
 0x97f   : > { %v4545_v31 = vpop.permute.xlu0 %4544 }
 0x980   : > { %v4547_v15 = vmul.f32 %v4545_v31, %v14760_v7  ;;  %v4548_v39 = vmul.f32 %v4545_v31, %v14757_v14 }
 0x983   : > { %v4596_v25 = vpop.permute.xlu0 %4595 }
 0x984   : > { %v4599_v46 = vmul.f32 %v4596_v25, %v14771_v49 }
 0x9d1   : > { %v3990_v60 = vpop.f32.mrb[14].mxu0 }
 0x9d2   : > { %v10987_v6 = vpop.f32.mrb[15].mxu0  ;;  %10993 = vmatmul.mubr.msk.f32.vlgmr.msra.gmra.mrb[16].mxu0 %vm3511_vm1, %v3990_v60 }
 0x9d3   : > { %11724 = vmatpush3.bf16.msk.msra.mxu0 %vm14580_vm3, %v12578_v20  ;;  %11017 = vmatprep.mubr.msk.f32.mxu0 %vm3408_vm13, %v4222_v13  ;;  %v4598_v6 = vmul.f32 %v4596_v25, %v14774_v36 }
 0x9d4   : > { %11726 = vmatprep.subr.msk.bf16.mxu0 %vm16525_vm11, %v12578_v20 }
 0x9d7   : > { %11728 = vmatpush3.bf16.msk.msra.mxu0 %vm16525_vm11, %v12578_v20 }
 0x9d8   : > { %11730 = vmatprep.subr.msk.bf16.mxu0 %vm14625_vm0, %v12578_v20 }
 0x9db   : > { %11732 = vmatpush3.bf16.msk.msra.mxu0 %vm14625_vm0, %v12578_v20 }
 0x9dc   : > { %11735 = vmatprep.subr.msk.bf16.mxu0 %vm14644_vm10, %v14636_v2 }
 0x9df   : > { %11738 = vmatpush3.bf16.msk.msra.mxu0 %vm14644_vm10, %v14636_v2 }
 0x9e0   : > { %11740 = vmatprep.subr.bf16.mxu0 %v14654_v21 }
 0x9e3   : > { %11742 = vmatpush3.bf16.msra.mxu0 %v14654_v21 }
 0x9e4   : > { %11015 = vmatprep.subr.mxu0 %v14664_v33 }
 0x9e7   : > { %11016 = vmatpush3.msra.mxu0 %v14664_v33 }
 0x9e8   : > { %11018 = vmatmul.mubr.msk.f32.vlgmr.msra.gmra.mrb[18].mxu0 %vm3408_vm13, %v4223_v38  ;;  %11773 = vmatprep.subr.bf16.mxu0 %v12587_v40 }
 0x9e9   : > { %11063 = vmatprep.mubr.msk.f32.mxu0 %vm12588_vm2, %v16428_v1 }
 0xaa5   : > { %v14996_v32 = vpop.f32.mrb[16].mxu0 }
 0xaa6   : > { %v10994_v34 = vpop.f32.mrb[17].mxu0 }
 0xabb   : > { %v11019_v12 = vpop.f32.mrb[18].mxu0 }
 0xabc   : > { %v4304_v41 = vadd.f32 %v11019_v12, %v4225_v58  ;;  %v4298_v51 = vpop.f32.mrb[19].mxu0 }
 0xabd   : > { %v4299_v24 = vadd.f32 %v4298_v51, %v4225_v58 }
 0xabe   : > { %v4308_v44 = vmax.f32 %v4304_v41, 0.0 }
 0xabf   : > { %v4307_v28 = vmax.f32 %v4299_v24, 0.0 }
 0xac1   : > { %v12316_v52 = vpack.i.bf16 %v4308_v44, %v4307_v28 }
 0xac3   : > { %12317 = vrot.lane.b32.xlu1 %v12316_v52, %s12574_s28  ;;  %v10094_v52 = vld [vmem:[#allocation9 + $0x1b] ss:$0 sm:$0xff] }
 0xac7   : > { %4514 = vrot.lane.b32.xlu1 %v10096_v48, %s12585_s25 }
 0xacb   : > { %4565 = vrot.lane.b32.xlu1 %v10099_v37, %s12585_s25  ;;  %v4485_v37 = vmul.f32 %v10094_v52, %v14750_v57 }
 0xacf   : > { %4616 = vrot.lane.b32.xlu1 %v10102_v5, %s12585_s25 }
 0xad3   : > { %4502 = vrot.lane.b32.xlu1 %v4497_v4, %s12574_s28  ;;  %v10097_v4 = vld [vmem:[#allocation9 + $0x1e] ss:$0 sm:$0xff] }
 0xb35   : > { %v12318_v3 = vpop.permute.xlu1 %12317 }
 0xb36   : > { %v12320_v59 = vunpack.i.h.bf16 %v12318_v3  ;;  %v12319_v43 = vunpack.i.l.bf16 %v12318_v3 }
 0xb38   : > { %v4318_v56 = vmax.f32 %v4308_v44, %v12320_v59  ;;  %v4317_v29 = vmax.f32 %v4307_v28, %v12319_v43  ;;  %v4501_v28 = vpop.permute.xlu0 %4500  ;;  %v4534_v43 = vmul.f32 %v10097_v4, %v14760_v7 }
 0xb39   : > { %v4515_v35 = vpop.permute.xlu1 %4514  ;;  %v4506_v5 = vadd.f32 %v4501_v28, %v4485_v37  ;;  %v10126_v37 = vld [vmem:[#allocation9 + $0x2c] ss:$0 sm:$0xff] }
 0xb3a   : > { %v4322_v22 = vrot.slane %v4318_v56, 1  ;;  %v4321_v16 = vrot.slane %v4317_v29, 1  ;;  %v4517_v23 = vmul.f32 %v4515_v35, %v14750_v57  ;;  %v4518_v11 = vmul.f32 %v4515_v35, %v14748_v62 }
 0xb3c   : > { %v4327_v30 = vmax.f32 %v4318_v56, %v4322_v22  ;;  %v4323_v63 = vsel %vm16557_vm14, %v4321_v16, %v4322_v22  ;;  %4523 = vrot.lane.b32.xlu1 %v4518_v11, %s12575_s29  ;;  %4521 = vrot.lane.b32.xlu0 %v4517_v23, %s12575_s29  ;;  %v10100_v22 = vld [vmem:[#allocation9 + $0x21] ss:$0 sm:$0xff]  ;;  %vm16564_vm14 = vmmov %vm16558_vm4 }
 0xb3d   : > { %v4326_v0 = vmax.f32 %v4317_v29, %v4323_v63  ;;  %v4566_v50 = vpop.permute.xlu1 %4565  ;;  %v4585_v11 = vmul.f32 %v10100_v22, %v14774_v36 }
 0xb3e   : > { %v4568_v13 = vmul.f32 %v4566_v50, %v14760_v7  ;;  %v4569_v60 = vmul.f32 %v4566_v50, %v14757_v14 }
 0xb3f   : > { %v11744_v45 = vpack.c.bf16 %v4327_v30, %v4326_v0  ;;  %v4486_v30 = vmul.f32 %v10094_v52, %v14748_v62  ;;  %v10120_v52 = vld [vmem:[#allocation9 + $0x26] ss:$0 sm:$0xff] }
 0xb40   : > { %4553 = vrot.lane.b32.xlu1 %v4548_v39, %s12574_s28  ;;  %4551 = vrot.lane.b32.xlu0 %v4547_v15, %s12574_s28 }
 0xb41   : > { %11746 = vmatpush3.bf16.msk.msra.mxu1 %vm14816_vm5, %v11744_v45  ;;  %v4617_v17 = vpop.permute.xlu1 %4616 }
 0xb42   : > { %11747 = vmatprep.subr.bf16.mxu1 %v12587_v40  ;;  %v4619_v18 = vmul.f32 %v4617_v17, %v14774_v36  ;;  %v4620_v42 = vmul.f32 %v4617_v17, %v14771_v49  ;;  %v4586_v17 = vmul.f32 %v10100_v22, %v14771_v49 }
 0xb44   : > { %4574 = vrot.lane.b32.xlu1 %v4569_v60, %s12575_s29  ;;  %4572 = vrot.lane.b32.xlu0 %v4568_v13, %s12575_s29  ;;  %v4535_v60 = vmul.f32 %v10097_v4, %v14757_v14 }
 0xb45   : > { %11025 = vmatmul.mubr.msk.f32.vlgmr.msra.gmra.mrb[18].mxu1 %vm3511_vm1, %v16462_v27  ;;  %v4503_v38 = vpop.permute.xlu1 %4502 }
 0xb46   : > { %11750 = vmatpush3.bf16.msk.msra.mxu1 %vm14833_vm6, %v16555_v53  ;;  %11031 = vmatprep.mubr.msk.f32.mxu1 %vm12588_vm2, %v16428_v1  ;;  %v4507_v15 = vadd.f32 %v4503_v38, %v4486_v30  ;;  %v4632_v38 = vstv %s10103_s30  ;;  %s12593_s30 = smov 66  }
 0xb47   : > { %11752 = vmatprep.subr.msk.bf16.mxu1 %vm14580_vm3, %v12578_v20 }
 0xb48   : > { %4604 = vrot.lane.b32.xlu1 %v4599_v46, %s12574_s28  ;;  %4602 = vrot.lane.b32.xlu0 %v4598_v6, %s12574_s28 }
 0xb4c   : > { %4625 = vrot.lane.b32.xlu1 %v4620_v42, %s12575_s29  ;;  %4623 = vrot.lane.b32.xlu0 %v4619_v18, %s12575_s29 }
 0xb50   : > { %4900 = vrot.lane.b32.xlu1 %v10119_v9, %s12586_s26 }
 0xb54   : > { %4951 = vrot.lane.b32.xlu1 %v10122_v54, %s12586_s26 }
 0xb58   : > { %5002 = vrot.lane.b32.xlu1 %v10125_v47, %s12586_s26 }
 0xbae   : > { %v4524_v34 = vpop.permute.xlu1 %4523  ;;  %v4522_v48 = vpop.permute.xlu0 %4521 }
 0xbaf   : > { %v4527_v59 = vadd.f32 %v4522_v48, %v4506_v5  ;;  %v4528_v50 = vadd.f32 %v4524_v34, %v4507_v15  ;;  %v10123_v48 = vld [vmem:[#allocation9 + $0x29] ss:$0 sm:$0xff] }
 0xbb1   : > { %v4536_v56 = vadd.f32 %v4534_v43, %v4527_v59  ;;  %v4537_v25 = vadd.f32 %v4535_v60, %v4528_v50 }
 0xbb2   : > { %v4554_v58 = vpop.permute.xlu1 %4553  ;;  %v4552_v3 = vpop.permute.xlu0 %4551 }
 0xbb3   : > { %v4557_v35 = vadd.f32 %v4552_v3, %v4536_v56  ;;  %v4558_v6 = vadd.f32 %v4554_v58, %v4537_v25  ;;  %v15126_v25 = vld [vmem:[#allocation2 + $0xa] sm:$0x1f] }
 0xbb6   : > { %v4575_v12 = vpop.permute.xlu1 %4574  ;;  %v4573_v29 = vpop.permute.xlu0 %4572 }
 0xbb7   : > { %v4578_v16 = vadd.f32 %v4573_v29, %v4557_v35  ;;  %v4579_v46 = vadd.f32 %v4575_v12, %v4558_v6  ;;  %v10143_v6 = vld [vmem:[#allocation9 + $0x2e] ss:$0 sm:$0xff] }
 0xbb9   : > { %v4587_v31 = vadd.f32 %v4585_v11, %v4578_v16  ;;  %v4588_v18 = vadd.f32 %v4586_v17, %v4579_v46  ;;  %v10146_v46 = vld [vmem:[#allocation9 + $0x31] ss:$0 sm:$0xff]  ;;  %v10149_v17 = vld [vmem:[#allocation9 + $0x34] ss:$0 sm:$0xff] }
 0xbba   : > { %v4605_v41 = vpop.permute.xlu1 %4604  ;;  %v4603_v23 = vpop.permute.xlu0 %4602 }
 0xbbb   : > { %v4608_v0 = vadd.f32 %v4603_v23, %v4587_v31  ;;  %v4609_v42 = vadd.f32 %v4605_v41, %v4588_v18 }
 0xbbe   : > { %v4626_v51 = vpop.permute.xlu1 %4625  ;;  %v4624_v63 = vpop.permute.xlu0 %4623 }
 0xbbf   : > { %v4629_v39 = vadd.f32 %v4624_v63, %v4608_v0  ;;  %v4630_v9 = vadd.f32 %v4626_v51, %v4609_v42 }
 0xbc2   : > { %v15042_v24 = vpop.permute.xlu1 %4900 }
 0xbc3   : > { %v4903_v44 = vmul.f32 %v15042_v24, %v14750_v57  ;;  %v4904_v5 = vmul.f32 %v15042_v24, %v14748_v62 }
 0xbc5   : > { %4907 = vrot.lane.b32.xlu1 %v4903_v44, %s12574_s28 }
 0xbc6   : > { %v4952_v11 = vpop.permute.xlu1 %4951 }
 0xbc7   : > { %v4954_v63 = vmul.f32 %v4952_v11, %v14760_v7  ;;  %v4955_v0 = vmul.f32 %v4952_v11, %v14757_v14 }
 0xbca   : > { %v5003_v50 = vpop.permute.xlu1 %5002 }
 0xbcb   : > { %v5005_v14 = vmul.f32 %v5003_v50, %v14774_v36 }
 0xc18   : > { %v4397_v45 = vpop.f32.mrb[18].mxu1 }
 0xc19   : > { %v11026_v13 = vpop.f32.mrb[19].mxu1  ;;  %11032 = vmatmul.mubr.msk.f32.vlgmr.msra.gmra.mrb[20].mxu1 %vm3511_vm1, %v4397_v45 }
 0xc1a   : > { %11754 = vmatpush3.bf16.msk.msra.mxu1 %vm14580_vm3, %v12578_v20  ;;  %11056 = vmatprep.mubr.msk.f32.mxu1 %vm3408_vm13, %v4629_v39  ;;  %v5006_v13 = vmul.f32 %v5003_v50, %v14771_v49 }
 0xc1b   : > { %11756 = vmatprep.subr.msk.bf16.mxu1 %vm16525_vm11, %v12578_v20 }
 0xc1e   : > { %11758 = vmatpush3.bf16.msk.msra.mxu1 %vm16525_vm11, %v12578_v20 }
 0xc1f   : > { %11760 = vmatprep.subr.msk.bf16.mxu1 %vm14625_vm0, %v12578_v20 }
 0xc22   : > { %11762 = vmatpush3.bf16.msk.msra.mxu1 %vm14625_vm0, %v12578_v20 }
 0xc23   : > { %11765 = vmatprep.subr.msk.bf16.mxu1 %vm14644_vm10, %v14636_v2 }
 0xc26   : > { %11768 = vmatpush3.bf16.msk.msra.mxu1 %vm14644_vm10, %v14636_v2 }
 0xc27   : > { %11770 = vmatprep.subr.bf16.mxu1 %v14654_v21 }
 0xc2a   : > { %11772 = vmatpush3.bf16.msra.mxu1 %v14654_v21 }
 0xc2b   : > { %11054 = vmatprep.subr.mxu1 %v14664_v33 }
 0xc2e   : > { %11055 = vmatpush3.msra.mxu1 %v14664_v33 }
 0xc2f   : > { %11057 = vmatmul.mubr.msk.f32.vlgmr.msra.gmra.mrb[22].mxu1 %vm3408_vm13, %v4630_v9  ;;  %11803 = vmatprep.subr.bf16.mxu1 %v12587_v40 }
 0xc30   : > { %11102 = vmatprep.mubr.msk.f32.mxu1 %vm12588_vm2, %v16428_v1 }
 0xcec   : > { %v15084_v54 = vpop.f32.mrb[20].mxu1 }
 0xced   : > { %v11033_v47 = vpop.f32.mrb[21].mxu1 }
 0xd02   : > { %v11058_v34 = vpop.f32.mrb[22].mxu1 }
 0xd03   : > { %v4711_v58 = vadd.f32 %v11058_v34, %v4632_v38  ;;  %v4705_v12 = vpop.f32.mrb[23].mxu1 }
 0xd04   : > { %v4706_v41 = vadd.f32 %v4705_v12, %v4632_v38 }
 0xd05   : > { %v4715_v44 = vmax.f32 %v4711_v58, 0.0  ;;  %v15136_v58 = vld [vmem:[#allocation2] sm:$0xff] }
 0xd06   : > { %v4714_v51 = vmax.f32 %v4706_v41, 0.0  ;;  %v4908_v41 = vpop.permute.xlu1 %4907 }
 0xd08   : > { %v12321_v28 = vpack.i.bf16 %v4715_v44, %v4714_v51 }
 0xd0a   : > { %12322 = vrot.lane.b32.xlu0 %v12321_v28, %s12574_s28 }
 0xd0e   : > { %4921 = vrot.lane.b32.xlu0 %v10120_v52, %s12585_s25 }
 0xd12   : > { %4972 = vrot.lane.b32.xlu0 %v10123_v48, %s12585_s25  ;;  %v10121_v48 = vld [vmem:[#allocation9 + $0x27] ss:$0 sm:$0xff] }
 0xd16   : > { %5023 = vrot.lane.b32.xlu0 %v10126_v37, %s12585_s25 }
 0xd1a   : > { %4909 = vrot.lane.b32.xlu0 %v4904_v5, %s12574_s28 }
 0xd7c   : > { %v12323_v4 = vpop.permute.xlu0 %12322 }
 0xd7d   : > { %v12325_v3 = vunpack.i.h.bf16 %v12323_v4  ;;  %v12324_v59 = vunpack.i.l.bf16 %v12323_v4  ;;  %v15142_v4 = vld [vmem:[#allocation2 + $0x1] sm:$0xff] }
 0xd7f   : > { %v4725_v43 = vmax.f32 %v4715_v44, %v12325_v3  ;;  %v4724_v56 = vmax.f32 %v4714_v51, %v12324_v59  ;;  %v10118_v44 = vld [vmem:[#allocation9 + $0x24] ss:$0 sm:$0xff]  ;;  %v4941_v3 = vmul.f32 %v15142_v4, %v10121_v48 }
 0xd80   : > { %v4922_v29 = vpop.permute.xlu0 %4921  ;;  %v4892_v28 = vmul.f32 %v15136_v58, %v10118_v44 }
 0xd81   : > { %v4729_v35 = vrot.slane %v4725_v43, 1  ;;  %v4728_v22 = vrot.slane %v4724_v56, 1  ;;  %v4924_v16 = vmul.f32 %v4922_v29, %v14750_v57  ;;  %v4925_v23 = vmul.f32 %v4922_v29, %v14748_v62  ;;  %v15105_v57 = vld [vmem:[#allocation2 + $0x9] sm:$0x1f]  ;;  %v10124_v29 = vld [vmem:[#allocation9 + $0x2a] ss:$0 sm:$0xff] }
 0xd82   : > { %v4913_v52 = vadd.f32 %v4908_v41, %v4892_v28  ;;  %v4942_v50 = vmul.f32 %v15105_v57, %v10121_v48  ;;  %v10147_v28 = vld [vmem:[#allocation9 + $0x32] ss:$0 sm:$0xff] }
 0xd83   : > { %v4734_v31 = vmax.f32 %v4725_v43, %v4729_v35  ;;  %v4730_v30 = vsel %vm16558_vm4, %v4728_v22, %v4729_v35  ;;  %4930 = vrot.lane.b32.xlu0 %v4925_v23, %s12575_s29  ;;  %4928 = vrot.lane.b32.xlu1 %v4924_v16, %s12575_s29  ;;  %v15145_v16 = vld [vmem:[#allocation2 + $0x2] sm:$0xff] }
 0xd84   : > { %v4733_v24 = vmax.f32 %v4724_v56, %v4730_v30  ;;  %v4973_v39 = vpop.permute.xlu0 %4972  ;;  %v4992_v23 = vmul.f32 %v15145_v16, %v10124_v29 }
 0xd85   : > { %v4975_v62 = vmul.f32 %v4973_v39, %v14760_v7  ;;  %v4976_v45 = vmul.f32 %v15105_v57, %v4973_v39 }
 0xd86   : > { %v11774_v15 = vpack.c.bf16 %v4734_v31, %v4733_v24  ;;  %v15148_v31 = vld [vmem:[#allocation2 + $0x8] sm:$0x1f] }
 0xd87   : > { %4960 = vrot.lane.b32.xlu0 %v4955_v0, %s12574_s28  ;;  %4958 = vrot.lane.b32.xlu1 %v4954_v63, %s12574_s28  ;;  %v4893_v30 = vmul.f32 %v15148_v31, %v10118_v44 }
 0xd88   : > { %11776 = vmatpush3.bf16.msk.msra.mxu0 %vm14816_vm5, %v11774_v15  ;;  %v5024_v7 = vpop.permute.xlu0 %5023 }
 0xd89   : > { %11777 = vmatprep.subr.bf16.mxu0 %v12587_v40  ;;  %v5026_v60 = vmul.f32 %v5024_v7, %v14774_v36  ;;  %v5027_v49 = vmul.f32 %v15126_v25, %v5024_v7 }
 0xd8b   : > { %4981 = vrot.lane.b32.xlu0 %v4976_v45, %s12575_s29  ;;  %4979 = vrot.lane.b32.xlu1 %v4975_v62, %s12575_s29 }
 0xd8c   : > { %11064 = vmatmul.mubr.msk.f32.vlgmr.msra.gmra.mrb[20].mxu0 %vm3511_vm1, %v16462_v27  ;;  %v4910_v18 = vpop.permute.xlu0 %4909 }
 0xd8d   : > { %11780 = vmatpush3.bf16.msk.msra.mxu0 %vm14833_vm6, %v16555_v53  ;;  %11070 = vmatprep.mubr.msk.f32.mxu0 %vm12588_vm2, %v16428_v1  ;;  %v4914_v0 = vadd.f32 %v4910_v18, %v4893_v30 }
 0xd8e   : > { %11782 = vmatprep.subr.msk.bf16.mxu0 %vm14580_vm3, %v12578_v20 }
 0xd8f   : > { %5011 = vrot.lane.b32.xlu0 %v5006_v13, %s12574_s28  ;;  %5009 = vrot.lane.b32.xlu1 %v5005_v14, %s12574_s28 }
 0xd93   : > { %5032 = vrot.lane.b32.xlu0 %v5027_v49, %s12575_s29  ;;  %5030 = vrot.lane.b32.xlu1 %v5026_v60, %s12575_s29  ;;  %v4993_v60 = vmul.f32 %v15126_v25, %v10124_v29 }
 0xd97   : > { %5307 = vrot.lane.b32.xlu0 %v10143_v6, %s12586_s26 }
 0xd9b   : > { %5358 = vrot.lane.b32.xlu0 %v10146_v46, %s12586_s26 }
 0xd9f   : > { %5409 = vrot.lane.b32.xlu0 %v10149_v17, %s12586_s26 }
 0xdf5   : > { %v4931_v42 = vpop.permute.xlu0 %4930  ;;  %v4929_v51 = vpop.permute.xlu1 %4928 }
 0xdf6   : > { %v4934_v5 = vadd.f32 %v4929_v51, %v4913_v52  ;;  %v4935_v62 = vadd.f32 %v4931_v42, %v4914_v0  ;;  %v5039_v42 = vstv %s10127_s21  ;;  %v10144_v51 = vld [vmem:[#allocation9 + $0x2f] ss:$0 sm:$0xff]  ;;  %v10150_v52 = vld [vmem:[#allocation9 + $0x35] ss:$0 sm:$0xff]  ;;  %s12594_s21 = smov 78  }
 0xdf8   : > { %v4943_v59 = vadd.f32 %v4941_v3, %v4934_v5  ;;  %v4944_v14 = vadd.f32 %v4942_v50, %v4935_v62 }
 0xdf9   : > { %v4961_v36 = vpop.permute.xlu0 %4960  ;;  %v4959_v37 = vpop.permute.xlu1 %4958 }
 0xdfa   : > { %v4964_v56 = vadd.f32 %v4959_v37, %v4943_v59  ;;  %v4965_v13 = vadd.f32 %v4961_v36, %v4944_v14 }
 0xdfd   : > { %v4982_v9 = vpop.permute.xlu0 %4981  ;;  %v4980_v43 = vpop.permute.xlu1 %4979 }
 0xdfe   : > { %v4985_v35 = vadd.f32 %v4980_v43, %v4964_v56  ;;  %v4986_v7 = vadd.f32 %v4982_v9, %v4965_v13 }
 0xe00   : > { %v4994_v11 = vadd.f32 %v4992_v23, %v4985_v35  ;;  %v4995_v49 = vadd.f32 %v4993_v60, %v4986_v7 }
 0xe01   : > { %v5012_v47 = vpop.permute.xlu0 %5011  ;;  %v5010_v22 = vpop.permute.xlu1 %5009 }
 0xe02   : > { %v5015_v63 = vadd.f32 %v5010_v22, %v4994_v11  ;;  %v5016_v6 = vadd.f32 %v5012_v47, %v4995_v49 }
 0xe05   : > { %v5033_v38 = vpop.permute.xlu0 %5032  ;;  %v5031_v24 = vpop.permute.xlu1 %5030 }
 0xe06   : > { %v5036_v15 = vadd.f32 %v5031_v24, %v5015_v63  ;;  %v5037_v46 = vadd.f32 %v5033_v38, %v5016_v6  ;;  %v10167_v6 = vld [vmem:[#allocation9 + $0x37] ss:$0 sm:$0xff] }
 0xe09   : > { %v15134_v34 = vpop.permute.xlu0 %5307 }
 0xe0a   : > { %v5310_v12 = vmul.f32 %v15136_v58, %v15134_v34  ;;  %v5311_v48 = vmul.f32 %v15148_v31, %v15134_v34 }
 0xe0c   : > { %5314 = vrot.lane.b32.xlu0 %v5310_v12, %s12574_s28 }
 0xe0d   : > { %v5359_v11 = vpop.permute.xlu0 %5358 }
 0xe0e   : > { %v5361_v63 = vmul.f32 %v15142_v4, %v5359_v11  ;;  %v5362_v0 = vmul.f32 %v15105_v57, %v5359_v11 }
 0xe11   : > { %v5410_v50 = vpop.permute.xlu0 %5409 }
 0xe12   : > { %v5412_v14 = vmul.f32 %v15145_v16, %v5410_v50  ;;  %v5413_v13 = vmul.f32 %v15126_v25, %v5410_v50 }
 0xe5f   : > { %v4804_v39 = vpop.f32.mrb[20].mxu0 }
 0xe60   : > { %v11065_v45 = vpop.f32.mrb[21].mxu0  ;;  %11071 = vmatmul.mubr.msk.f32.vlgmr.msra.gmra.mrb[22].mxu0 %vm3511_vm1, %v4804_v39 }
 0xe61   : > { %11784 = vmatpush3.bf16.msk.msra.mxu0 %vm14580_vm3, %v12578_v20  ;;  %11095 = vmatprep.mubr.msk.f32.mxu0 %vm3408_vm13, %v5036_v15 }
 0xe62   : > { %11786 = vmatprep.subr.msk.bf16.mxu0 %vm16525_vm11, %v12578_v20 }
 0xe65   : > { %11788 = vmatpush3.bf16.msk.msra.mxu0 %vm16525_vm11, %v12578_v20 }
 0xe66   : > { %11790 = vmatprep.subr.msk.bf16.mxu0 %vm14625_vm0, %v12578_v20 }
 0xe69   : > { %11792 = vmatpush3.bf16.msk.msra.mxu0 %vm14625_vm0, %v12578_v20 }
 0xe6a   : > { %11795 = vmatprep.subr.msk.bf16.mxu0 %vm14644_vm10, %v14636_v2 }
 0xe6d   : > { %11798 = vmatpush3.bf16.msk.msra.mxu0 %vm14644_vm10, %v14636_v2 }
 0xe6e   : > { %11800 = vmatprep.subr.bf16.mxu0 %v14654_v21 }
 0xe71   : > { %11802 = vmatpush3.bf16.msra.mxu0 %v14654_v21 }
 0xe72   : > { %11093 = vmatprep.subr.mxu0 %v14664_v33 }
 0xe75   : > { %11094 = vmatpush3.msra.mxu0 %v14664_v33 }
 0xe76   : > { %11096 = vmatmul.mubr.msk.f32.vlgmr.msra.gmra.mrb[24].mxu0 %vm3408_vm13, %v5037_v46  ;;  %11833 = vmatprep.subr.bf16.mxu0 %v12587_v40  ;;  %v10170_v46 = vld [vmem:[#allocation9 + $0x3a] ss:$0 sm:$0xff] }
 0xe77   : > { %11141 = vmatprep.mubr.msk.f32.mxu0 %vm12588_vm2, %v16428_v1 }
 0xf33   : > { %v15184_v17 = vpop.f32.mrb[22].mxu0 }
 0xf34   : > { %v11072_v18 = vpop.f32.mrb[23].mxu0 }
 0xf35   : > { %v10173_v18 = vld [vmem:[#allocation9 + $0x3d] ss:$0 sm:$0xff] }
 0xf49   : > { %v11097_v36 = vpop.f32.mrb[24].mxu0 }
 0xf4a   : > { %v5118_v9 = vadd.f32 %v11097_v36, %v5039_v42  ;;  %v5112_v47 = vpop.f32.mrb[25].mxu0 }
 0xf4b   : > { %v5113_v12 = vadd.f32 %v5112_v47, %v5039_v42 }
 0xf4c   : > { %v5122_v41 = vmax.f32 %v5118_v9, 0.0 }
 0xf4d   : > { %v5121_v38 = vmax.f32 %v5113_v12, 0.0 }
 0xf4f   : > { %v12326_v44 = vpack.i.bf16 %v5122_v41, %v5121_v38 }
 0xf51   : > { %12327 = vrot.lane.b32.xlu1 %v12326_v44, %s12574_s28 }
 0xf55   : > { %5328 = vrot.lane.b32.xlu1 %v10144_v51, %s12585_s25  ;;  %v5315_v51 = vpop.permute.xlu0 %5314 }
 0xf59   : > { %5379 = vrot.lane.b32.xlu1 %v10147_v28, %s12585_s25  ;;  %v10142_v28 = vld [vmem:[#allocation9 + $0x2d] ss:$0 sm:$0xff] }
 0xf5d   : > { %5430 = vrot.lane.b32.xlu1 %v10150_v52, %s12585_s25 }
 0xf61   : > { %5316 = vrot.lane.b32.xlu1 %v5311_v48, %s12574_s28  ;;  %v5299_v48 = vmul.f32 %v15136_v58, %v10142_v28 }
 0xfc3   : > { %v12328_v37 = vpop.permute.xlu1 %12327 }
 0xfc4   : > { %v12330_v5 = vunpack.i.h.bf16 %v12328_v37  ;;  %v12329_v3 = vunpack.i.l.bf16 %v12328_v37  ;;  %v5320_v37 = vadd.f32 %v5315_v51, %v5299_v48  ;;  %v10168_v48 = vld [vmem:[#allocation9 + $0x38] ss:$0 sm:$0xff] }
 0xfc6   : > { %v5132_v59 = vmax.f32 %v5122_v41, %v12330_v5  ;;  %v5131_v43 = vmax.f32 %v5121_v38, %v12329_v3  ;;  %v10145_v5 = vld [vmem:[#allocation9 + $0x30] ss:$0 sm:$0xff] }
 0xfc7   : > { %v5329_v56 = vpop.permute.xlu1 %5328 }
 0xfc8   : > { %v5136_v29 = vrot.slane %v5132_v59, 1  ;;  %v5135_v35 = vrot.slane %v5131_v43, 1  ;;  %v5331_v22 = vmul.f32 %v15136_v58, %v5329_v56  ;;  %v5332_v23 = vmul.f32 %v15148_v31, %v5329_v56 }
 0xfca   : > { %v5141_v30 = vmax.f32 %v5132_v59, %v5136_v29  ;;  %v5137_v24 = vsel %vm16559_vm8, %v5135_v35, %v5136_v29  ;;  %5337 = vrot.lane.b32.xlu1 %v5332_v23, %s12575_s29  ;;  %5335 = vrot.lane.b32.xlu0 %v5331_v22, %s12575_s29  ;;  %v10148_v22 = vld [vmem:[#allocation9 + $0x33] ss:$0 sm:$0xff]  ;;  %vm16565_vm8 = vmmov %vm16558_vm4 }
 0xfcb   : > { %v5140_v34 = vmax.f32 %v5131_v43, %v5137_v24  ;;  %v5380_v39 = vpop.permute.xlu1 %5379  ;;  %v5348_v43 = vmul.f32 %v15142_v4, %v10145_v5 }
 0xfcc   : > { %v5382_v62 = vmul.f32 %v15142_v4, %v5380_v39  ;;  %v5383_v45 = vmul.f32 %v15105_v57, %v5380_v39 }
 0xfcd   : > { %v11804_v15 = vpack.c.bf16 %v5141_v30, %v5140_v34  ;;  %v5399_v30 = vmul.f32 %v15145_v16, %v10148_v22  ;;  %v5300_v34 = vmul.f32 %v15148_v31, %v10142_v28 }
 0xfce   : > { %5367 = vrot.lane.b32.xlu1 %v5362_v0, %s12574_s28  ;;  %5365 = vrot.lane.b32.xlu0 %v5361_v63, %s12574_s28 }
 0xfcf   : > { %11806 = vmatpush3.bf16.msk.msra.mxu1 %vm14816_vm5, %v11804_v15  ;;  %v5431_v7 = vpop.permute.xlu1 %5430 }
 0xfd0   : > { %11807 = vmatprep.subr.bf16.mxu1 %v12587_v40  ;;  %v5433_v60 = vmul.f32 %v15145_v16, %v5431_v7  ;;  %v5434_v49 = vmul.f32 %v15126_v25, %v5431_v7 }
 0xfd2   : > { %5388 = vrot.lane.b32.xlu1 %v5383_v45, %s12575_s29  ;;  %5386 = vrot.lane.b32.xlu0 %v5382_v62, %s12575_s29 }
 0xfd3   : > { %11103 = vmatmul.mubr.msk.f32.vlgmr.msra.gmra.mrb[24].mxu1 %vm3511_vm1, %v16462_v27  ;;  %v5317_v42 = vpop.permute.xlu1 %5316 }
 0xfd4   : > { %11810 = vmatpush3.bf16.msk.msra.mxu1 %vm14833_vm6, %v16555_v53  ;;  %11109 = vmatprep.mubr.msk.f32.mxu1 %vm12588_vm2, %v16428_v1  ;;  %v5321_v15 = vadd.f32 %v5317_v42, %v5300_v34 }
 0xfd5   : > { %11812 = vmatprep.subr.msk.bf16.mxu1 %vm14580_vm3, %v12578_v20 }
 0xfd6   : > { %5418 = vrot.lane.b32.xlu1 %v5413_v13, %s12574_s28  ;;  %5416 = vrot.lane.b32.xlu0 %v5412_v14, %s12574_s28  ;;  %v5349_v14 = vmul.f32 %v15105_v57, %v10145_v5  ;;  %v10174_v5 = vld [vmem:[#allocation9 + $0x3e] ss:$0 sm:$0xff] }
 0xfda   : > { %5439 = vrot.lane.b32.xlu1 %v5434_v49, %s12575_s29  ;;  %5437 = vrot.lane.b32.xlu0 %v5433_v60, %s12575_s29  ;;  %v5400_v49 = vmul.f32 %v15126_v25, %v10148_v22 }
 0xfde   : > { %5714 = vrot.lane.b32.xlu1 %v10167_v6, %s12586_s26 }
 0xfe2   : > { %5765 = vrot.lane.b32.xlu1 %v10170_v46, %s12586_s26 }
 0xfe6   : > { %5816 = vrot.lane.b32.xlu1 %v10173_v18, %s12586_s26 }
0x103c   : > { %v5338_v36 = vpop.permute.xlu1 %5337  ;;  %v5336_v52 = vpop.permute.xlu0 %5335 }
0x103d   : > { %v5341_v59 = vadd.f32 %v5336_v52, %v5320_v37  ;;  %v5342_v45 = vadd.f32 %v5338_v36, %v5321_v15  ;;  %v10171_v37 = vld [vmem:[#allocation9 + $0x3b] ss:$0 sm:$0xff] }
0x103f   : > { %v5350_v56 = vadd.f32 %v5348_v43, %v5341_v59  ;;  %v5351_v13 = vadd.f32 %v5349_v14, %v5342_v45 }
0x1040   : > { %v5368_v9 = vpop.permute.xlu1 %5367  ;;  %v5366_v3 = vpop.permute.xlu0 %5365 }
0x1041   : > { %v5371_v35 = vadd.f32 %v5366_v3, %v5350_v56  ;;  %v5372_v7 = vadd.f32 %v5368_v9, %v5351_v13  ;;  %v5446_v9 = vstv %s10151_s13  ;;  %s12596_s13 = smov 24  }
0x1044   : > { %v5389_v47 = vpop.permute.xlu1 %5388  ;;  %v5387_v29 = vpop.permute.xlu0 %5386 }
0x1045   : > { %v5392_v23 = vadd.f32 %v5387_v29, %v5371_v35  ;;  %v5393_v60 = vadd.f32 %v5389_v47, %v5372_v7 }
0x1047   : > { %v5401_v24 = vadd.f32 %v5399_v30, %v5392_v23  ;;  %v5402_v6 = vadd.f32 %v5400_v49, %v5393_v60 }
0x1048   : > { %v5419_v12 = vpop.permute.xlu1 %5418  ;;  %v5417_v11 = vpop.permute.xlu0 %5416 }
0x1049   : > { %v5422_v0 = vadd.f32 %v5417_v11, %v5401_v24  ;;  %v5423_v46 = vadd.f32 %v5419_v12, %v5402_v6 }
0x104c   : > { %v5440_v41 = vpop.permute.xlu1 %5439  ;;  %v5438_v63 = vpop.permute.xlu0 %5437 }
0x104d   : > { %v5443_v39 = vadd.f32 %v5438_v63, %v5422_v0  ;;  %v5444_v18 = vadd.f32 %v5440_v41, %v5423_v46 }
0x1050   : > { %v15230_v38 = vpop.permute.xlu1 %5714 }
0x1051   : > { %v5717_v44 = vmul.f32 %v15136_v58, %v15230_v38  ;;  %v5718_v3 = vmul.f32 %v15148_v31, %v15230_v38 }
0x1053   : > { %5721 = vrot.lane.b32.xlu1 %v5717_v44, %s12574_s28 }
0x1054   : > { %v5766_v34 = vpop.permute.xlu1 %5765 }
0x1055   : > { %v5768_v15 = vmul.f32 %v15142_v4, %v5766_v34 }
0x1058   : > { %v5817_v13 = vpop.permute.xlu1 %5816 }
0x1059   : > { %v5819_v7 = vmul.f32 %v15145_v16, %v5817_v13  ;;  %v5820_v60 = vmul.f32 %v15126_v25, %v5817_v13 }
0x10a6   : > { %v5211_v62 = vpop.f32.mrb[24].mxu1 }
0x10a7   : > { %v11104_v50 = vpop.f32.mrb[25].mxu1  ;;  %11110 = vmatmul.mubr.msk.f32.vlgmr.msra.gmra.mrb[26].mxu1 %vm3511_vm1, %v5211_v62 }
0x10a8   : > { %11814 = vmatpush3.bf16.msk.msra.mxu1 %vm14580_vm3, %v12578_v20  ;;  %11134 = vmatprep.mubr.msk.f32.mxu1 %vm3408_vm13, %v5443_v39  ;;  %v5769_v39 = vmul.f32 %v15105_v57, %v5766_v34 }
0x10a9   : > { %11816 = vmatprep.subr.msk.bf16.mxu1 %vm16525_vm11, %v12578_v20 }
0x10ac   : > { %11818 = vmatpush3.bf16.msk.msra.mxu1 %vm16525_vm11, %v12578_v20 }
0x10ad   : > { %11820 = vmatprep.subr.msk.bf16.mxu1 %vm14625_vm0, %v12578_v20 }
0x10b0   : > { %11822 = vmatpush3.bf16.msk.msra.mxu1 %vm14625_vm0, %v12578_v20 }
0x10b1   : > { %11825 = vmatprep.subr.msk.bf16.mxu1 %vm14644_vm10, %v14636_v2 }
0x10b4   : > { %11828 = vmatpush3.bf16.msk.msra.mxu1 %vm14644_vm10, %v14636_v2 }
0x10b5   : > { %11830 = vmatprep.subr.bf16.mxu1 %v14654_v21 }
0x10b8   : > { %11832 = vmatpush3.bf16.msra.mxu1 %v14654_v21 }
0x10b9   : > { %11132 = vmatprep.subr.mxu1 %v14664_v33 }
0x10bc   : > { %11133 = vmatpush3.msra.mxu1 %v14664_v33 }
0x10bd   : > { %11135 = vmatmul.mubr.msk.f32.vlgmr.msra.gmra.mrb[28].mxu1 %vm3408_vm13, %v5444_v18  ;;  %11863 = vmatprep.subr.bf16.mxu1 %v12587_v40  ;;  %v10191_v18 = vld [vmem:[#allocation9 + $0x40] ss:$0 sm:$0xff] }
0x10be   : > { %11180 = vmatprep.mubr.msk.f32.mxu1 %vm12588_vm2, %v16428_v1 }
0x117a   : > { %v15272_v42 = vpop.f32.mrb[26].mxu1 }
0x117b   : > { %v11111_v36 = vpop.f32.mrb[27].mxu1 }
0x117c   : > { %v10194_v36 = vld [vmem:[#allocation9 + $0x43] ss:$0 sm:$0xff] }
0x1190   : > { %v11136_v47 = vpop.f32.mrb[28].mxu1 }
0x1191   : > { %v5525_v44 = vadd.f32 %v11136_v47, %v5446_v9  ;;  %v5519_v12 = vpop.f32.mrb[29].mxu1 }
0x1192   : > { %v5520_v51 = vadd.f32 %v5519_v12, %v5446_v9  ;;  %v10197_v9 = vld [vmem:[#allocation9 + $0x46] ss:$0 sm:$0xff] }
0x1193   : > { %v5529_v28 = vmax.f32 %v5525_v44, 0.0 }
0x1194   : > { %v5528_v41 = vmax.f32 %v5520_v51, 0.0 }
0x1196   : > { %v12331_v52 = vpack.i.bf16 %v5529_v28, %v5528_v41 }
0x1198   : > { %12332 = vrot.lane.b32.xlu0 %v12331_v52, %s12574_s28 }
0x119c   : > { %5735 = vrot.lane.b32.xlu0 %v10168_v48, %s12585_s25 }
0x11a0   : > { %5786 = vrot.lane.b32.xlu0 %v10171_v37, %s12585_s25  ;;  %v5722_v37 = vpop.permute.xlu1 %5721 }
0x11a4   : > { %5837 = vrot.lane.b32.xlu0 %v10174_v5, %s12585_s25  ;;  %v10166_v5 = vld [vmem:[#allocation9 + $0x36] ss:$0 sm:$0xff] }
0x11a8   : > { %5723 = vrot.lane.b32.xlu0 %v5718_v3, %s12574_s28 }
0x120a   : > { %v12333_v59 = vpop.permute.xlu0 %12332 }
0x120b   : > { %v12335_v43 = vunpack.i.h.bf16 %v12333_v59  ;;  %v12334_v56 = vunpack.i.l.bf16 %v12333_v59  ;;  %v5706_v59 = vmul.f32 %v15136_v58, %v10166_v5 }
0x120d   : > { %v5539_v29 = vmax.f32 %v5529_v28, %v12335_v43  ;;  %v5538_v35 = vmax.f32 %v5528_v41, %v12334_v56  ;;  %v5727_v43 = vadd.f32 %v5722_v37, %v5706_v59  ;;  %v10169_v56 = vld [vmem:[#allocation9 + $0x39] ss:$0 sm:$0xff] }
0x120e   : > { %v5736_v22 = vpop.permute.xlu0 %5735 }
0x120f   : > { %v5543_v23 = vrot.slane %v5539_v29, 1  ;;  %v5542_v11 = vrot.slane %v5538_v35, 1  ;;  %v5738_v30 = vmul.f32 %v15136_v58, %v5736_v22  ;;  %v5739_v24 = vmul.f32 %v15148_v31, %v5736_v22 }
0x1210   : > { %v5755_v22 = vmul.f32 %v15142_v4, %v10169_v56 }
0x1211   : > { %v5548_v63 = vmax.f32 %v5539_v29, %v5543_v23  ;;  %v5544_v0 = vsel %vm16560_vm7, %v5542_v11, %v5543_v23  ;;  %5744 = vrot.lane.b32.xlu0 %v5739_v24, %s12575_s29  ;;  %5742 = vrot.lane.b32.xlu1 %v5738_v30, %s12575_s29  ;;  %v10172_v24 = vld [vmem:[#allocation9 + $0x3c] ss:$0 sm:$0xff]  ;;  %vm16566_vm7 = vmmov %vm16558_vm4 }
0x1212   : > { %v5547_v38 = vmax.f32 %v5538_v35, %v5544_v0  ;;  %v5787_v45 = vpop.permute.xlu0 %5786  ;;  %v5806_v0 = vmul.f32 %v15145_v16, %v10172_v24 }
0x1213   : > { %v5789_v50 = vmul.f32 %v15142_v4, %v5787_v45  ;;  %v5790_v14 = vmul.f32 %v15105_v57, %v5787_v45 }
0x1214   : > { %v11834_v62 = vpack.c.bf16 %v5548_v63, %v5547_v38 }
0x1215   : > { %5774 = vrot.lane.b32.xlu0 %v5769_v39, %s12574_s28  ;;  %5772 = vrot.lane.b32.xlu1 %v5768_v15, %s12574_s28  ;;  %v5707_v15 = vmul.f32 %v15148_v31, %v10166_v5 }
0x1216   : > { %11836 = vmatpush3.bf16.msk.msra.mxu0 %vm14816_vm5, %v11834_v62  ;;  %v5838_v49 = vpop.permute.xlu0 %5837 }
0x1217   : > { %11837 = vmatprep.subr.bf16.mxu0 %v12587_v40  ;;  %v5840_v6 = vmul.f32 %v15145_v16, %v5838_v49  ;;  %v5841_v46 = vmul.f32 %v15126_v25, %v5838_v49 }
0x1219   : > { %5795 = vrot.lane.b32.xlu0 %v5790_v14, %s12575_s29  ;;  %5793 = vrot.lane.b32.xlu1 %v5789_v50, %s12575_s29 }
0x121a   : > { %11142 = vmatmul.mubr.msk.f32.vlgmr.msra.gmra.mrb[26].mxu0 %vm3511_vm1, %v16462_v27  ;;  %v5724_v47 = vpop.permute.xlu0 %5723 }
0x121b   : > { %11840 = vmatpush3.bf16.msk.msra.mxu0 %vm14833_vm6, %v16555_v53  ;;  %11148 = vmatprep.mubr.msk.f32.mxu0 %vm12588_vm2, %v16428_v1  ;;  %v5728_v45 = vadd.f32 %v5724_v47, %v5707_v15 }
0x121c   : > { %11842 = vmatprep.subr.msk.bf16.mxu0 %vm14580_vm3, %v12578_v20 }
0x121d   : > { %5825 = vrot.lane.b32.xlu0 %v5820_v60, %s12574_s28  ;;  %5823 = vrot.lane.b32.xlu1 %v5819_v7, %s12574_s28  ;;  %v5756_v60 = vmul.f32 %v15105_v57, %v10169_v56  ;;  %v10195_v56 = vld [vmem:[#allocation9 + $0x44] ss:$0 sm:$0xff] }
0x1221   : > { %5846 = vrot.lane.b32.xlu0 %v5841_v46, %s12575_s29  ;;  %5844 = vrot.lane.b32.xlu1 %v5840_v6, %s12575_s29 }
0x1225   : > { %6121 = vrot.lane.b32.xlu0 %v10191_v18, %s12586_s26  ;;  %v5807_v18 = vmul.f32 %v15126_v25, %v10172_v24 }
0x1229   : > { %6172 = vrot.lane.b32.xlu0 %v10194_v36, %s12586_s26 }
0x122d   : > { %6223 = vrot.lane.b32.xlu0 %v10197_v9, %s12586_s26 }
0x1283   : > { %v5745_v44 = vpop.permute.xlu0 %5744  ;;  %v5743_v3 = vpop.permute.xlu1 %5742 }
0x1284   : > { %v5748_v35 = vadd.f32 %v5743_v3, %v5727_v43  ;;  %v5749_v13 = vadd.f32 %v5745_v44, %v5728_v45  ;;  %v10192_v43 = vld [vmem:[#allocation9 + $0x41] ss:$0 sm:$0xff] }
0x1286   : > { %v5757_v23 = vadd.f32 %v5755_v22, %v5748_v35  ;;  %v5758_v49 = vadd.f32 %v5756_v60, %v5749_v13 }
0x1287   : > { %v5775_v12 = vpop.permute.xlu0 %5774  ;;  %v5773_v29 = vpop.permute.xlu1 %5772 }
0x1288   : > { %v5778_v30 = vadd.f32 %v5773_v29, %v5757_v23  ;;  %v5779_v6 = vadd.f32 %v5775_v12, %v5758_v49  ;;  %v10198_v29 = vld [vmem:[#allocation9 + $0x47] ss:$0 sm:$0xff] }
0x128b   : > { %v5796_v51 = vpop.permute.xlu0 %5795  ;;  %v5794_v11 = vpop.permute.xlu1 %5793 }
0x128c   : > { %v5799_v34 = vadd.f32 %v5794_v11, %v5778_v30  ;;  %v5800_v46 = vadd.f32 %v5796_v51, %v5779_v6  ;;  %v5853_v51 = vstv %s10175_s14  ;;  %s12597_s14 = smov 36  }
0x128e   : > { %v5808_v38 = vadd.f32 %v5806_v0, %v5799_v34  ;;  %v5809_v36 = vadd.f32 %v5807_v18, %v5800_v46 }
0x128f   : > { %v5826_v28 = vpop.permute.xlu0 %5825  ;;  %v5824_v63 = vpop.permute.xlu1 %5823 }
0x1290   : > { %v5829_v62 = vadd.f32 %v5824_v63, %v5808_v38  ;;  %v5830_v9 = vadd.f32 %v5826_v28, %v5809_v36 }
0x1293   : > { %v5847_v41 = vpop.permute.xlu0 %5846  ;;  %v5845_v39 = vpop.permute.xlu1 %5844 }
0x1294   : > { %v5850_v50 = vadd.f32 %v5845_v39, %v5829_v62  ;;  %v5851_v47 = vadd.f32 %v5847_v41, %v5830_v9 }
0x1297   : > { %v15318_v52 = vpop.permute.xlu0 %6121 }
0x1298   : > { %v6124_v48 = vmul.f32 %v15136_v58, %v15318_v52  ;;  %v6125_v35 = vmul.f32 %v15148_v31, %v15318_v52 }
0x129a   : > { %6128 = vrot.lane.b32.xlu0 %v6124_v48, %s12574_s28 }
0x129b   : > { %v6173_v39 = vpop.permute.xlu0 %6172 }
0x129f   : > { %v6224_v6 = vpop.permute.xlu0 %6223 }
0x12a0   : > { %v6226_v46 = vmul.f32 %v15145_v16, %v6224_v6  ;;  %v6227_v18 = vmul.f32 %v15126_v25, %v6224_v6 }
0x12ed   : > { %v5618_v14 = vpop.f32.mrb[26].mxu0 }
0x12ee   : > { %v11143_v7 = vpop.f32.mrb[27].mxu0  ;;  %11149 = vmatmul.mubr.msk.f32.vlgmr.msra.gmra.mrb[28].mxu0 %vm3511_vm1, %v5618_v14  ;;  %v6176_v14 = vmul.f32 %v15105_v57, %v6173_v39 }
0x12ef   : > { %11844 = vmatpush3.bf16.msk.msra.mxu0 %vm14580_vm3, %v12578_v20  ;;  %11173 = vmatprep.mubr.msk.f32.mxu0 %vm3408_vm13, %v5850_v50  ;;  %v6175_v50 = vmul.f32 %v15142_v4, %v6173_v39  ;;  %v10196_v39 = vld [vmem:[#allocation9 + $0x45] ss:$0 sm:$0xff] }
0x12f0   : > { %11846 = vmatprep.subr.msk.bf16.mxu0 %vm16525_vm11, %v12578_v20 }
0x12f3   : > { %11848 = vmatpush3.bf16.msk.msra.mxu0 %vm16525_vm11, %v12578_v20 }
0x12f4   : > { %11850 = vmatprep.subr.msk.bf16.mxu0 %vm14625_vm0, %v12578_v20 }
0x12f7   : > { %11852 = vmatpush3.bf16.msk.msra.mxu0 %vm14625_vm0, %v12578_v20 }
0x12f8   : > { %11855 = vmatprep.subr.msk.bf16.mxu0 %vm14644_vm10, %v14636_v2 }
0x12fb   : > { %11858 = vmatpush3.bf16.msk.msra.mxu0 %vm14644_vm10, %v14636_v2 }
0x12fc   : > { %11860 = vmatprep.subr.bf16.mxu0 %v14654_v21 }
0x12ff   : > { %11862 = vmatpush3.bf16.msra.mxu0 %v14654_v21 }
0x1300   : > { %11171 = vmatprep.subr.mxu0 %v14664_v33 }
0x1303   : > { %11172 = vmatpush3.msra.mxu0 %v14664_v33 }
0x1304   : > { %11174 = vmatmul.mubr.msk.f32.vlgmr.msra.gmra.mrb[30].mxu0 %vm3408_vm13, %v5851_v47  ;;  %11893 = vmatprep.subr.bf16.mxu0 %v12587_v40 }
0x1305   : > { %11219 = vmatprep.mubr.msk.f32.mxu0 %vm12588_vm2, %v16428_v1 }
0x13c1   : > { %v15360_v44 = vpop.f32.mrb[28].mxu0 }
0x13c2   : > { %v11150_v12 = vpop.f32.mrb[29].mxu0 }
0x13c3   : > { %v10215_v12 = vld [vmem:[#allocation9 + $0x49] ss:$0 sm:$0xff] }
0x13d7   : > { %v11175_v48 = vpop.f32.mrb[30].mxu0 }
0x13d8   : > { %v5932_v37 = vadd.f32 %v11175_v48, %v5853_v51  ;;  %v5926_v28 = vpop.f32.mrb[31].mxu0  ;;  %v10221_v48 = vld [vmem:[#allocation9 + $0x4f] ss:$0 sm:$0xff] }
0x13d9   : > { %v5927_v5 = vadd.f32 %v5926_v28, %v5853_v51  ;;  %v10218_v51 = vld [vmem:[#allocation9 + $0x4c] ss:$0 sm:$0xff] }
0x13da   : > { %v5936_v3 = vmax.f32 %v5932_v37, 0.0 }
0x13db   : > { %v5935_v41 = vmax.f32 %v5927_v5, 0.0 }
0x13dd   : > { %v12336_v59 = vpack.i.bf16 %v5936_v3, %v5935_v41 }
0x13df   : > { %12337 = vrot.lane.b32.xlu1 %v12336_v59, %s12574_s28 }
0x13e3   : > { %6142 = vrot.lane.b32.xlu1 %v10192_v43, %s12585_s25 }
0x13e7   : > { %6193 = vrot.lane.b32.xlu1 %v10195_v56, %s12585_s25 }
0x13eb   : > { %6244 = vrot.lane.b32.xlu1 %v10198_v29, %s12585_s25  ;;  %v6129_v29 = vpop.permute.xlu0 %6128 }
0x13ef   : > { %6130 = vrot.lane.b32.xlu1 %v6125_v35, %s12574_s28  ;;  %v10190_v35 = vld [vmem:[#allocation9 + $0x3f] ss:$0 sm:$0xff] }
0x1451   : > { %v12338_v22 = vpop.permute.xlu1 %12337 }
0x1452   : > { %v12340_v23 = vunpack.i.h.bf16 %v12338_v22  ;;  %v12339_v11 = vunpack.i.l.bf16 %v12338_v22 }
0x1454   : > { %v5946_v30 = vmax.f32 %v5936_v3, %v12340_v23  ;;  %v5945_v24 = vmax.f32 %v5935_v41, %v12339_v11  ;;  %v6113_v23 = vmul.f32 %v15136_v58, %v10190_v35 }
0x1455   : > { %v6143_v34 = vpop.permute.xlu1 %6142 }
0x1456   : > { %v5950_v63 = vrot.slane %v5946_v30, 1  ;;  %v5949_v0 = vrot.slane %v5945_v24, 1  ;;  %v6145_v38 = vmul.f32 %v15136_v58, %v6143_v34  ;;  %v6146_v15 = vmul.f32 %v15148_v31, %v6143_v34 }
0x1457   : > { %v6134_v11 = vadd.f32 %v6129_v29, %v6113_v23 }
0x1458   : > { %v5955_v62 = vmax.f32 %v5946_v30, %v5950_v63  ;;  %v5951_v45 = vsel %vm16561_vm9, %v5949_v0, %v5950_v63  ;;  %6151 = vrot.lane.b32.xlu1 %v6146_v15, %s12575_s29  ;;  %6149 = vrot.lane.b32.xlu0 %v6145_v38, %s12575_s29  ;;  %v10193_v30 = vld [vmem:[#allocation9 + $0x42] ss:$0 sm:$0xff]  ;;  %vm16567_vm9 = vmmov %vm16558_vm4 }
0x1459   : > { %v5954_v52 = vmax.f32 %v5945_v24, %v5951_v45  ;;  %v6194_v7 = vpop.permute.xlu1 %6193  ;;  %v6162_v63 = vmul.f32 %v15142_v4, %v10193_v30 }
0x145a   : > { %v6196_v60 = vmul.f32 %v15142_v4, %v6194_v7  ;;  %v6197_v49 = vmul.f32 %v15105_v57, %v6194_v7 }
0x145b   : > { %v11864_v13 = vpack.c.bf16 %v5955_v62, %v5954_v52  ;;  %v6213_v52 = vmul.f32 %v15145_v16, %v10196_v39 }
0x145c   : > { %6181 = vrot.lane.b32.xlu1 %v6176_v14, %s12574_s28  ;;  %6179 = vrot.lane.b32.xlu0 %v6175_v50, %s12574_s28  ;;  %v6114_v14 = vmul.f32 %v15148_v31, %v10190_v35 }
0x145d   : > { %11866 = vmatpush3.bf16.msk.msra.mxu1 %vm14816_vm5, %v11864_v13  ;;  %v6245_v36 = vpop.permute.xlu1 %6244 }
0x145e   : > { %11867 = vmatprep.subr.bf16.mxu1 %v12587_v40  ;;  %v6247_v9 = vmul.f32 %v15145_v16, %v6245_v36  ;;  %v6248_v47 = vmul.f32 %v15126_v25, %v6245_v36  ;;  %v6163_v36 = vmul.f32 %v15105_v57, %v10193_v30  ;;  %v10216_v30 = vld [vmem:[#allocation9 + $0x4a] ss:$0 sm:$0xff] }
0x1460   : > { %6202 = vrot.lane.b32.xlu1 %v6197_v49, %s12575_s29  ;;  %6200 = vrot.lane.b32.xlu0 %v6196_v60, %s12575_s29 }
0x1461   : > { %11181 = vmatmul.mubr.msk.f32.vlgmr.msra.gmra.mrb[30].mxu1 %vm3511_vm1, %v16462_v27  ;;  %v6131_v37 = vpop.permute.xlu1 %6130 }
0x1462   : > { %11870 = vmatpush3.bf16.msk.msra.mxu1 %vm14833_vm6, %v16555_v53  ;;  %11187 = vmatprep.mubr.msk.f32.mxu1 %vm12588_vm2, %v16428_v1  ;;  %v6135_v60 = vadd.f32 %v6131_v37, %v6114_v14 }
0x1463   : > { %11872 = vmatprep.subr.msk.bf16.mxu1 %vm14580_vm3, %v12578_v20 }
0x1464   : > { %6232 = vrot.lane.b32.xlu1 %v6227_v18, %s12574_s28  ;;  %6230 = vrot.lane.b32.xlu0 %v6226_v46, %s12574_s28 }
0x1468   : > { %6253 = vrot.lane.b32.xlu1 %v6248_v47, %s12575_s29  ;;  %6251 = vrot.lane.b32.xlu0 %v6247_v9, %s12575_s29 }
0x146c   : > { %6528 = vrot.lane.b32.xlu1 %v10215_v12, %s12586_s26 }
0x1470   : > { %6579 = vrot.lane.b32.xlu1 %v10218_v51, %s12586_s26  ;;  %v6214_v51 = vmul.f32 %v15126_v25, %v10196_v39 }
0x1474   : > { %6630 = vrot.lane.b32.xlu1 %v10221_v48, %s12586_s26 }
0x14ca   : > { %v6152_v28 = vpop.permute.xlu1 %6151  ;;  %v6150_v22 = vpop.permute.xlu0 %6149 }
0x14cb   : > { %v6155_v34 = vadd.f32 %v6150_v22, %v6134_v11  ;;  %v6156_v46 = vadd.f32 %v6152_v28, %v6135_v60 }
0x14cd   : > { %v6164_v0 = vadd.f32 %v6162_v63, %v6155_v34  ;;  %v6165_v9 = vadd.f32 %v6163_v36, %v6156_v46  ;;  %v10222_v34 = vld [vmem:[#allocation9 + $0x50] ss:$0 sm:$0xff] }
0x14ce   : > { %v6182_v5 = vpop.permute.xlu1 %6181  ;;  %v6180_v24 = vpop.permute.xlu0 %6179 }
0x14cf   : > { %v6185_v15 = vadd.f32 %v6180_v24, %v6164_v0  ;;  %v6186_v47 = vadd.f32 %v6182_v5, %v6165_v9  ;;  %v10219_v24 = vld [vmem:[#allocation9 + $0x4d] ss:$0 sm:$0xff] }
0x14d2   : > { %v6203_v3 = vpop.permute.xlu1 %6202  ;;  %v6201_v38 = vpop.permute.xlu0 %6200 }
0x14d3   : > { %v6206_v62 = vadd.f32 %v6201_v38, %v6185_v15  ;;  %v6207_v12 = vadd.f32 %v6203_v3, %v6186_v47 }
0x14d5   : > { %v6215_v50 = vadd.f32 %v6213_v52, %v6206_v62  ;;  %v6216_v48 = vadd.f32 %v6214_v51, %v6207_v12 }
0x14d6   : > { %v6233_v41 = vpop.permute.xlu1 %6232  ;;  %v6231_v45 = vpop.permute.xlu0 %6230 }
0x14d7   : > { %v6236_v7 = vadd.f32 %v6231_v45, %v6215_v50  ;;  %v6237_v37 = vadd.f32 %v6233_v41, %v6216_v48 }
0x14da   : > { %v6254_v59 = vpop.permute.xlu1 %6253  ;;  %v6252_v13 = vpop.permute.xlu0 %6251 }
0x14db   : > { %v6257_v49 = vadd.f32 %v6252_v13, %v6236_v7  ;;  %v6258_v28 = vadd.f32 %v6254_v59, %v6237_v37 }
0x14de   : > { %v15406_v43 = vpop.permute.xlu1 %6528 }
0x14df   : > { %v6531_v56 = vmul.f32 %v15136_v58, %v15406_v43  ;;  %v6532_v63 = vmul.f32 %v15148_v31, %v15406_v43 }
0x14e1   : > { %6535 = vrot.lane.b32.xlu1 %v6531_v56, %s12574_s28  ;;  %v6260_v56 = vstv %s10199_s12  ;;  %s12598_s12 = smov 48  }
0x14e2   : > { %v6580_v7 = vpop.permute.xlu1 %6579 }
0x14e3   : > { %v6583_v46 = vmul.f32 %v15105_v57, %v6580_v7 }
0x14e6   : > { %v6631_v12 = vpop.permute.xlu1 %6630 }
0x14e7   : > { %v6633_v51 = vmul.f32 %v15145_v16, %v6631_v12  ;;  %v6634_v48 = vmul.f32 %v15126_v25, %v6631_v12 }
0x1534   : > { %v6025_v6 = vpop.f32.mrb[30].mxu1 }
0x1535   : > { %v11182_v18 = vpop.f32.mrb[31].mxu1  ;;  %11188 = vmatmul.mubr.msk.f32.vlgmr.msra.gmra.mrb[32].mxu1 %vm3511_vm1, %v6025_v6  ;;  %v6582_v6 = vmul.f32 %v15142_v4, %v6580_v7 }
0x1536   : > { %11874 = vmatpush3.bf16.msk.msra.mxu1 %vm14580_vm3, %v12578_v20  ;;  %11212 = vmatprep.mubr.msk.f32.mxu1 %vm3408_vm13, %v6257_v49 }
0x1537   : > { %11876 = vmatprep.subr.msk.bf16.mxu1 %vm16525_vm11, %v12578_v20 }
0x153a   : > { %11878 = vmatpush3.bf16.msk.msra.mxu1 %vm16525_vm11, %v12578_v20 }
0x153b   : > { %11880 = vmatprep.subr.msk.bf16.mxu1 %vm14625_vm0, %v12578_v20 }
0x153e   : > { %11882 = vmatpush3.bf16.msk.msra.mxu1 %vm14625_vm0, %v12578_v20 }
0x153f   : > { %11885 = vmatprep.subr.msk.bf16.mxu1 %vm14644_vm10, %v14636_v2 }
0x1542   : > { %11888 = vmatpush3.bf16.msk.msra.mxu1 %vm14644_vm10, %v14636_v2 }
0x1543   : > { %11890 = vmatprep.subr.bf16.mxu1 %v14654_v21 }
0x1546   : > { %11892 = vmatpush3.bf16.msra.mxu1 %v14654_v21 }
0x1547   : > { %11210 = vmatprep.subr.mxu1 %v14664_v33 }
0x154a   : > { %11211 = vmatpush3.msra.mxu1 %v14664_v33 }
0x154b   : > { %11213 = vmatmul.mubr.msk.f32.vlgmr.msra.gmra.mrb[34].mxu1 %vm3408_vm13, %v6258_v28  ;;  %11923 = vmatprep.subr.bf16.mxu1 %v12587_v40 }
0x154c   : > { %11258 = vmatprep.mubr.msk.f32.mxu1 %vm12588_vm2, %v16428_v1 }
0x1608   : > { %v15448_v5 = vpop.f32.mrb[32].mxu1 }
0x1609   : > { %v11189_v3 = vpop.f32.mrb[33].mxu1 }
0x160a   : > { %v10239_v3 = vld [vmem:[#allocation9 + $0x52] ss:$0 sm:$0xff] }
0x161e   : > { %v11214_v29 = vpop.f32.mrb[34].mxu1 }
0x161f   : > { %v6339_v35 = vadd.f32 %v11214_v29, %v6260_v56  ;;  %v6333_v41 = vpop.f32.mrb[35].mxu1  ;;  %v10245_v29 = vld [vmem:[#allocation9 + $0x58] ss:$0 sm:$0xff] }
0x1620   : > { %v6334_v22 = vadd.f32 %v6333_v41, %v6260_v56  ;;  %v10242_v56 = vld [vmem:[#allocation9 + $0x55] ss:$0 sm:$0xff] }
0x1621   : > { %v6343_v23 = vmax.f32 %v6339_v35, 0.0 }
0x1622   : > { %v6342_v59 = vmax.f32 %v6334_v22, 0.0 }
0x1624   : > { %v12341_v11 = vpack.i.bf16 %v6343_v23, %v6342_v59 }
0x1626   : > { %12342 = vrot.lane.b32.xlu0 %v12341_v11, %s12574_s28 }
0x162a   : > { %6549 = vrot.lane.b32.xlu0 %v10216_v30, %s12585_s25 }
0x162e   : > { %6600 = vrot.lane.b32.xlu0 %v10219_v24, %s12585_s25  ;;  %v6536_v24 = vpop.permute.xlu1 %6535 }
0x1632   : > { %6651 = vrot.lane.b32.xlu0 %v10222_v34, %s12585_s25  ;;  %v10214_v34 = vld [vmem:[#allocation9 + $0x48] ss:$0 sm:$0xff] }
0x1636   : > { %6537 = vrot.lane.b32.xlu0 %v6532_v63, %s12574_s28 }
0x1698   : > { %v12343_v0 = vpop.permute.xlu0 %12342 }
0x1699   : > { %v12345_v38 = vunpack.i.h.bf16 %v12343_v0  ;;  %v12344_v15 = vunpack.i.l.bf16 %v12343_v0  ;;  %v6520_v0 = vmul.f32 %v15136_v58, %v10214_v34 }
0x169b   : > { %v6353_v39 = vmax.f32 %v6343_v23, %v12345_v38  ;;  %v6352_v62 = vmax.f32 %v6342_v59, %v12344_v15  ;;  %v6541_v38 = vadd.f32 %v6536_v24, %v6520_v0  ;;  %v10217_v15 = vld [vmem:[#allocation9 + $0x4b] ss:$0 sm:$0xff]  ;;  %v10243_v0 = vld [vmem:[#allocation9 + $0x56] ss:$0 sm:$0xff] }
0x169c   : > { %v6550_v45 = vpop.permute.xlu0 %6549 }
0x169d   : > { %v6357_v52 = vrot.slane %v6353_v39, 1  ;;  %v6356_v50 = vrot.slane %v6352_v62, 1  ;;  %v6552_v14 = vmul.f32 %v15136_v58, %v6550_v45  ;;  %v6553_v13 = vmul.f32 %v15148_v31, %v6550_v45 }
0x169e   : > { %v6569_v45 = vmul.f32 %v15142_v4, %v10217_v15 }
0x169f   : > { %v6362_v60 = vmax.f32 %v6353_v39, %v6357_v52  ;;  %v6358_v49 = vsel %vm16562_vm12, %v6356_v50, %v6357_v52  ;;  %6558 = vrot.lane.b32.xlu0 %v6553_v13, %s12575_s29  ;;  %6556 = vrot.lane.b32.xlu1 %v6552_v14, %s12575_s29  ;;  %v10220_v13 = vld [vmem:[#allocation9 + $0x4e] ss:$0 sm:$0xff]  ;;  %vm16568_vm12 = vmmov %vm16558_vm4 }
0x16a0   : > { %v6361_v43 = vmax.f32 %v6352_v62, %v6358_v49  ;;  %v6601_v36 = vpop.permute.xlu0 %6600  ;;  %v6620_v49 = vmul.f32 %v15145_v16, %v10220_v13 }
0x16a1   : > { %v6603_v9 = vmul.f32 %v15142_v4, %v6601_v36  ;;  %v6604_v47 = vmul.f32 %v15105_v57, %v6601_v36  ;;  %v15508_v4 = vld [vmem:[#allocation2 + $0x9] sm:$0x1f] }
0x16a2   : > { %v11894_v18 = vpack.c.bf16 %v6362_v60, %v6361_v43 }
0x16a3   : > { %6588 = vrot.lane.b32.xlu0 %v6583_v46, %s12574_s28  ;;  %6586 = vrot.lane.b32.xlu1 %v6582_v6, %s12574_s28  ;;  %v6521_v6 = vmul.f32 %v15148_v31, %v10214_v34 }
0x16a4   : > { %11896 = vmatpush3.bf16.msk.msra.mxu0 %vm14816_vm5, %v11894_v18  ;;  %v6652_v57 = vpop.permute.xlu0 %6651 }
0x16a5   : > { %11897 = vmatprep.subr.bf16.mxu0 %v12587_v40  ;;  %v6654_v37 = vmul.f32 %v15145_v16, %v6652_v57  ;;  %v6655_v28 = vmul.f32 %v15126_v25, %v6652_v57  ;;  %v6570_v16 = vmul.f32 %v15508_v4, %v10217_v15  ;;  %v15526_v57 = vld [vmem:[#allocation2 + $0xa] sm:$0x1f] }
0x16a6   : > { %v15546_v15 = vld [vmem:[#allocation2 + $0x8] sm:$0x1f] }
0x16a7   : > { %6609 = vrot.lane.b32.xlu0 %v6604_v47, %s12575_s29  ;;  %6607 = vrot.lane.b32.xlu1 %v6603_v9, %s12575_s29 }
0x16a8   : > { %11220 = vmatmul.mubr.msk.f32.vlgmr.msra.gmra.mrb[32].mxu0 %vm3511_vm1, %v16462_v27  ;;  %v6538_v35 = vpop.permute.xlu0 %6537 }
0x16a9   : > { %11900 = vmatpush3.bf16.msk.msra.mxu0 %vm14833_vm6, %v16555_v53  ;;  %11226 = vmatprep.mubr.msk.f32.mxu0 %vm12588_vm2, %v16428_v1 }
0x16aa   : > { %11902 = vmatprep.subr.msk.bf16.mxu0 %vm14580_vm3, %v12578_v20 }
0x16ab   : > { %6639 = vrot.lane.b32.xlu0 %v6634_v48, %s12574_s28  ;;  %6637 = vrot.lane.b32.xlu1 %v6633_v51, %s12574_s28 }
0x16af   : > { %6660 = vrot.lane.b32.xlu0 %v6655_v28, %s12575_s29  ;;  %6658 = vrot.lane.b32.xlu1 %v6654_v37, %s12575_s29  ;;  %v6621_v37 = vmul.f32 %v15526_v57, %v10220_v13 }
0x16b3   : > { %6935 = vrot.lane.b32.xlu0 %v10239_v3, %s12586_s26 }
0x16b7   : > { %6986 = vrot.lane.b32.xlu0 %v10242_v56, %s12586_s26 }
0x16bb   : > { %7037 = vrot.lane.b32.xlu0 %v10245_v29, %s12586_s26 }
0x1711   : > { %v6559_v41 = vpop.permute.xlu0 %6558  ;;  %v6557_v63 = vpop.permute.xlu1 %6556 }
0x1712   : > { %v6562_v62 = vadd.f32 %v6557_v63, %v6541_v38  ;;  %v10240_v63 = vld [vmem:[#allocation9 + $0x53] ss:$0 sm:$0xff]  ;;  %v10246_v38 = vld [vmem:[#allocation9 + $0x59] ss:$0 sm:$0xff] }
0x1714   : > { %v6571_v52 = vadd.f32 %v6569_v45, %v6562_v62 }
0x1715   : > { %v6589_v22 = vpop.permute.xlu0 %6588  ;;  %v6587_v39 = vpop.permute.xlu1 %6586 }
0x1716   : > { %v6592_v14 = vadd.f32 %v6587_v39, %v6571_v52 }
0x1719   : > { %v6610_v23 = vpop.permute.xlu0 %6609  ;;  %v6608_v50 = vpop.permute.xlu1 %6607 }
0x171a   : > { %v6613_v7 = vadd.f32 %v6608_v50, %v6592_v14 }
0x171c   : > { %v6622_v43 = vadd.f32 %v6620_v49, %v6613_v7  ;;  %v15551_v49 = vld [vmem:[#allocation2] sm:$0xff] }
0x171d   : > { %v6640_v59 = vpop.permute.xlu0 %6639  ;;  %v6638_v60 = vpop.permute.xlu1 %6637 }
0x171e   : > { %v6643_v18 = vadd.f32 %v6638_v60, %v6622_v43 }
0x1721   : > { %v6661_v11 = vpop.permute.xlu0 %6660  ;;  %v6659_v46 = vpop.permute.xlu1 %6658 }
0x1722   : > { %v6664_v36 = vadd.f32 %v6659_v46, %v6643_v18 }
0x1725   : > { %v15494_v25 = vpop.permute.xlu0 %6935 }
0x1726   : > { %v6938_v30 = vmul.f32 %v15136_v58, %v15494_v25  ;;  %v6542_v58 = vadd.f32 %v6538_v35, %v6521_v6  ;;  %v6939_v39 = vmul.f32 %v15546_v15, %v15494_v25 }
0x1728   : > { %6942 = vrot.lane.b32.xlu0 %v6938_v30, %s12574_s28  ;;  %v6563_v47 = vadd.f32 %v6559_v41, %v6542_v58  ;;  %v6667_v41 = vstv %s10223_s10  ;;  %s12599_s10 = smov 72  }
0x1729   : > { %v6987_v46 = vpop.permute.xlu0 %6986 }
0x172a   : > { %v6572_v31 = vadd.f32 %v6570_v16, %v6563_v47  ;;  %v6990_v47 = vmul.f32 %v15508_v4, %v6987_v46 }
0x172c   : > { %v6593_v51 = vadd.f32 %v6589_v22, %v6572_v31 }
0x172e   : > { %v6614_v48 = vadd.f32 %v6610_v23, %v6593_v51 }
0x1730   : > { %v6623_v28 = vadd.f32 %v6621_v37, %v6614_v48  ;;  %v7038_v48 = vpop.permute.xlu0 %7037  ;;  %v15573_v37 = vld [vmem:[#allocation2 + $0x2] sm:$0xff] }
0x1732   : > { %v6644_v3 = vadd.f32 %v6640_v59, %v6623_v28  ;;  %v7040_v28 = vmul.f32 %v15573_v37, %v7038_v48 }
0x1734   : > { %v6665_v56 = vadd.f32 %v6661_v11, %v6644_v3  ;;  %v7041_v3 = vmul.f32 %v15526_v57, %v7038_v48 }
0x177b   : > { %v6432_v9 = vpop.f32.mrb[32].mxu0 }
0x177c   : > { %v11221_v12 = vpop.f32.mrb[33].mxu0  ;;  %11227 = vmatmul.mubr.msk.f32.vlgmr.msra.gmra.mrb[34].mxu0 %vm3511_vm1, %v6432_v9 }
0x177d   : > { %11904 = vmatpush3.bf16.msk.msra.mxu0 %vm14580_vm3, %v12578_v20  ;;  %11251 = vmatprep.mubr.msk.f32.mxu0 %vm3408_vm13, %v6664_v36  ;;  %v15558_v36 = vld [vmem:[#allocation2 + $0x1] sm:$0xff] }
0x177e   : > { %11906 = vmatprep.subr.msk.bf16.mxu0 %vm16525_vm11, %v12578_v20  ;;  %v6989_v9 = vmul.f32 %v15558_v36, %v6987_v46 }
0x1781   : > { %11908 = vmatpush3.bf16.msk.msra.mxu0 %vm16525_vm11, %v12578_v20 }
0x1782   : > { %11910 = vmatprep.subr.msk.bf16.mxu0 %vm14625_vm0, %v12578_v20 }
0x1785   : > { %11912 = vmatpush3.bf16.msk.msra.mxu0 %vm14625_vm0, %v12578_v20 }
0x1786   : > { %11915 = vmatprep.subr.msk.bf16.mxu0 %vm14644_vm10, %v14636_v2 }
0x1789   : > { %11918 = vmatpush3.bf16.msk.msra.mxu0 %vm14644_vm10, %v14636_v2 }
0x178a   : > { %11920 = vmatprep.subr.bf16.mxu0 %v14654_v21 }
0x178d   : > { %11922 = vmatpush3.bf16.msra.mxu0 %v14654_v21 }
0x178e   : > { %11249 = vmatprep.subr.mxu0 %v14664_v33 }
0x1791   : > { %11250 = vmatpush3.msra.mxu0 %v14664_v33 }
0x1792   : > { %11252 = vmatmul.mubr.msk.f32.vlgmr.msra.gmra.mrb[36].mxu0 %vm3408_vm13, %v6665_v56  ;;  %11953 = vmatprep.subr.bf16.mxu0 %v12587_v40 }
0x1793   : > { %11297 = vmatprep.mubr.msk.f32.mxu0 %vm12588_vm2, %v16428_v1 }
0x184f   : > { %v15540_v29 = vpop.f32.mrb[34].mxu0 }
0x1850   : > { %v11228_v35 = vpop.f32.mrb[35].mxu0 }
0x1865   : > { %v11253_v22 = vpop.f32.mrb[36].mxu0 }
0x1866   : > { %v6746_v23 = vadd.f32 %v11253_v22, %v6667_v41  ;;  %v6740_v59 = vpop.f32.mrb[37].mxu0  ;;  %v10263_v22 = vld [vmem:[#allocation9 + $0x5b] ss:$0 sm:$0xff] }
0x1867   : > { %v6741_v30 = vadd.f32 %v6740_v59, %v6667_v41  ;;  %v10269_v59 = vld [vmem:[#allocation9 + $0x61] ss:$0 sm:$0xff] }
0x1868   : > { %v6750_v24 = vmax.f32 %v6746_v23, 0.0  ;;  %v10266_v23 = vld [vmem:[#allocation9 + $0x5e] ss:$0 sm:$0xff] }
0x1869   : > { %v6749_v11 = vmax.f32 %v6741_v30, 0.0 }
0x186b   : > { %v12346_v34 = vpack.i.bf16 %v6750_v24, %v6749_v11 }
0x186d   : > { %12347 = vrot.lane.b32.xlu1 %v12346_v34, %s12574_s28 }
0x1871   : > { %6956 = vrot.lane.b32.xlu1 %v10240_v63, %s12585_s25 }
0x1875   : > { %7007 = vrot.lane.b32.xlu1 %v10243_v0, %s12585_s25 }
0x1879   : > { %7058 = vrot.lane.b32.xlu1 %v10246_v38, %s12585_s25 }
0x187d   : > { %6944 = vrot.lane.b32.xlu1 %v6939_v39, %s12574_s28 }
0x18df   : > { %v12348_v62 = vpop.permute.xlu1 %12347 }
0x18e0   : > { %v12350_v45 = vunpack.i.h.bf16 %v12348_v62  ;;  %v12349_v52 = vunpack.i.l.bf16 %v12348_v62  ;;  %v6943_v62 = vpop.permute.xlu0 %6942 }
0x18e2   : > { %v6760_v50 = vmax.f32 %v6750_v24, %v12350_v45  ;;  %v6759_v14 = vmax.f32 %v6749_v11, %v12349_v52  ;;  %v10238_v45 = vld [vmem:[#allocation9 + $0x51] ss:$0 sm:$0xff] }
0x18e3   : > { %v6957_v13 = vpop.permute.xlu1 %6956 }
0x18e4   : > { %v6764_v7 = vrot.slane %v6760_v50, 1  ;;  %v6763_v60 = vrot.slane %v6759_v14, 1  ;;  %v6959_v43 = vmul.f32 %v15551_v49, %v6957_v13  ;;  %v6960_v6 = vmul.f32 %v15546_v15, %v6957_v13  ;;  %v10241_v13 = vld [vmem:[#allocation9 + $0x54] ss:$0 sm:$0xff] }
0x18e6   : > { %v6769_v18 = vmax.f32 %v6760_v50, %v6764_v7  ;;  %v6765_v25 = vsel %vm16563_vm15, %v6763_v60, %v6764_v7  ;;  %6965 = vrot.lane.b32.xlu1 %v6960_v6, %s12575_s29  ;;  %6963 = vrot.lane.b32.xlu0 %v6959_v43, %s12575_s29  ;;  %v6927_v50 = vmul.f32 %v15551_v49, %v10238_v45  ;;  %vm4071_vm15 = vcmask 95280  }
0x18e7   : > { %v6768_v58 = vmax.f32 %v6759_v14, %v6765_v25  ;;  %v7008_v16 = vpop.permute.xlu1 %7007  ;;  %v6976_v43 = vmul.f32 %v15558_v36, %v10241_v13  ;;  %v10244_v25 = vld [vmem:[#allocation9 + $0x57] ss:$0 sm:$0xff] }
0x18e8   : > { %v7010_v31 = vmul.f32 %v15558_v36, %v7008_v16  ;;  %v7011_v51 = vmul.f32 %v15508_v4, %v7008_v16  ;;  %v6948_v14 = vadd.f32 %v6943_v62, %v6927_v50  ;;  %v6928_v16 = vmul.f32 %v15546_v15, %v10238_v45 }
0x18e9   : > { %v11924_v12 = vpack.c.bf16 %v6769_v18, %v6768_v58  ;;  %v7074_v45 = vstv %s10247_s17 }
0x18ea   : > { %6995 = vrot.lane.b32.xlu1 %v6990_v47, %s12574_s28  ;;  %6993 = vrot.lane.b32.xlu0 %v6989_v9, %s12574_s28  ;;  %v7027_v47 = vmul.f32 %v15573_v37, %v10244_v25 }
0x18eb   : > { %11926 = vmatpush3.bf16.msk.msra.mxu1 %vm14816_vm5, %v11924_v12  ;;  %v7059_v56 = vpop.permute.xlu1 %7058 }
0x18ec   : > { %11927 = vmatprep.subr.bf16.mxu1 %v12587_v40  ;;  %v7061_v35 = vmul.f32 %v15573_v37, %v7059_v56  ;;  %v7062_v41 = vmul.f32 %v15526_v57, %v7059_v56 }
0x18ee   : > { %7016 = vrot.lane.b32.xlu1 %v7011_v51, %s12575_s29  ;;  %7014 = vrot.lane.b32.xlu0 %v7010_v31, %s12575_s29 }
0x18ef   : > { %11259 = vmatmul.mubr.msk.f32.vlgmr.msra.gmra.mrb[36].mxu1 %vm3511_vm1, %v16462_v27  ;;  %v6945_v30 = vpop.permute.xlu1 %6944 }
0x18f0   : > { %11930 = vmatpush3.bf16.msk.msra.mxu1 %vm14833_vm6, %v16555_v53  ;;  %11265 = vmatprep.mubr.msk.f32.mxu1 %vm12588_vm2, %v16428_v1  ;;  %v6949_v48 = vadd.f32 %v6945_v30, %v6928_v16  ;;  %v7028_v30 = vmul.f32 %v15526_v57, %v10244_v25 }
0x18f1   : > { %11932 = vmatprep.subr.msk.bf16.mxu1 %vm14580_vm3, %v12578_v20 }
0x18f2   : > { %7046 = vrot.lane.b32.xlu1 %v7041_v3, %s12574_s28  ;;  %7044 = vrot.lane.b32.xlu0 %v7040_v28, %s12574_s28 }
0x18f6   : > { %7067 = vrot.lane.b32.xlu1 %v7062_v41, %s12575_s29  ;;  %7065 = vrot.lane.b32.xlu0 %v7061_v35, %s12575_s29  ;;  %v6977_v41 = vmul.f32 %v15508_v4, %v10241_v13 }
0x18fa   : > { %7342 = vrot.lane.b32.xlu1 %v10263_v22, %s12586_s26 }
0x18fe   : > { %7393 = vrot.lane.b32.xlu1 %v10266_v23, %s12586_s26 }
0x1902   : > { %7444 = vrot.lane.b32.xlu1 %v10269_v59, %s12586_s26 }
0x1958   : > { %v6966_v24 = vpop.permute.xlu1 %6965  ;;  %v6964_v52 = vpop.permute.xlu0 %6963 }
0x1959   : > { %v6969_v60 = vadd.f32 %v6964_v52, %v6948_v14  ;;  %v6970_v56 = vadd.f32 %v6966_v24, %v6949_v48 }
0x195b   : > { %v6978_v6 = vadd.f32 %v6976_v43, %v6969_v60  ;;  %v6979_v22 = vadd.f32 %v6977_v41, %v6970_v56  ;;  %v10264_v60 = vld [vmem:[#allocation9 + $0x5c] ss:$0 sm:$0xff]  ;;  %v10267_v43 = vld [vmem:[#allocation9 + $0x5f] ss:$0 sm:$0xff] }
0x195c   : > { %v6996_v11 = vpop.permute.xlu1 %6995  ;;  %v6994_v7 = vpop.permute.xlu0 %6993 }
0x195d   : > { %v6999_v18 = vadd.f32 %v6994_v7, %v6978_v6  ;;  %v7000_v23 = vadd.f32 %v6996_v11, %v6979_v22  ;;  %v10270_v6 = vld [vmem:[#allocation9 + $0x62] ss:$0 sm:$0xff] }
0x1960   : > { %v7017_v34 = vpop.permute.xlu1 %7016  ;;  %v7015_v46 = vpop.permute.xlu0 %7014 }
0x1961   : > { %v7020_v58 = vadd.f32 %v7015_v46, %v6999_v18  ;;  %v7021_v59 = vadd.f32 %v7017_v34, %v7000_v23 }
0x1963   : > { %v7029_v12 = vadd.f32 %v7027_v47, %v7020_v58  ;;  %v7030_v24 = vadd.f32 %v7028_v30, %v7021_v59 }
0x1964   : > { %v7047_v63 = vpop.permute.xlu1 %7046  ;;  %v7045_v9 = vpop.permute.xlu0 %7044 }
0x1965   : > { %v7050_v51 = vadd.f32 %v7045_v9, %v7029_v12  ;;  %v7051_v11 = vadd.f32 %v7047_v63, %v7030_v24 }
0x1968   : > { %v7068_v0 = vpop.permute.xlu1 %7067  ;;  %v7066_v31 = vpop.permute.xlu0 %7065 }
0x1969   : > { %v7071_v28 = vadd.f32 %v7066_v31, %v7050_v51 }
0x196c   : > { %v15594_v38 = vpop.permute.xlu1 %7342 }
0x196d   : > { %v7345_v39 = vmul.f32 %v15551_v49, %v15594_v38  ;;  %v7346_v46 = vmul.f32 %v15546_v15, %v15594_v38 }
0x196f   : > { %7349 = vrot.lane.b32.xlu1 %v7345_v39, %s12574_s28  ;;  %v7072_v39 = vadd.f32 %v7068_v0, %v7051_v11 }
0x19c2   : > { %v6839_v3 = vpop.f32.mrb[36].mxu1 }
0x19c3   : > { %v11260_v35 = vpop.f32.mrb[37].mxu1  ;;  %11266 = vmatmul.mubr.msk.f32.vlgmr.msra.gmra.mrb[38].mxu1 %vm3511_vm1, %v6839_v3 }
0x19c4   : > { %11934 = vmatpush3.bf16.msk.msra.mxu1 %vm14580_vm3, %v12578_v20  ;;  %11290 = vmatprep.mubr.msk.f32.mxu1 %vm3408_vm13, %v7071_v28  ;;  %v7394_v28 = vpop.permute.xlu1 %7393 }
0x19c5   : > { %11936 = vmatprep.subr.msk.bf16.mxu1 %vm16525_vm11, %v12578_v20  ;;  %v7396_v35 = vmul.f32 %v15558_v36, %v7394_v28  ;;  %v7397_v41 = vmul.f32 %v15508_v4, %v7394_v28 }
0x19c8   : > { %11938 = vmatpush3.bf16.msk.msra.mxu1 %vm16525_vm11, %v12578_v20  ;;  %v7445_v24 = vpop.permute.xlu1 %7444 }
0x19c9   : > { %11940 = vmatprep.subr.msk.bf16.mxu1 %vm14625_vm0, %v12578_v20  ;;  %v7447_v11 = vmul.f32 %v15573_v37, %v7445_v24 }
0x19cc   : > { %11942 = vmatpush3.bf16.msk.msra.mxu1 %vm14625_vm0, %v12578_v20 }
0x19cd   : > { %11945 = vmatprep.subr.msk.bf16.mxu1 %vm14644_vm10, %v14636_v2 }
0x19d0   : > { %11948 = vmatpush3.bf16.msk.msra.mxu1 %vm14644_vm10, %v14636_v2 }
0x19d1   : > { %11950 = vmatprep.subr.bf16.mxu1 %v14654_v21 }
0x19d4   : > { %11952 = vmatpush3.bf16.msra.mxu1 %v14654_v21 }
0x19d5   : > { %11288 = vmatprep.subr.mxu1 %v14664_v33 }
0x19d8   : > { %11289 = vmatpush3.msra.mxu1 %v14664_v33 }
0x19d9   : > { %11291 = vmatmul.mubr.msk.f32.vlgmr.msra.gmra.mrb[40].mxu1 %vm3408_vm13, %v7072_v39  ;;  %11983 = vmatprep.subr.bf16.mxu1 %v12587_v40  ;;  %v7448_v39 = vmul.f32 %v15526_v57, %v7445_v24 }
0x19da   : > { %11336 = vmatprep.mubr.msk.f32.mxu1 %vm12588_vm2, %v16428_v1 }
0x1a96   : > { %v15636_v34 = vpop.f32.mrb[38].mxu1 }
0x1a97   : > { %v11267_v62 = vpop.f32.mrb[39].mxu1 }
0x1aac   : > { %v11292_v52 = vpop.f32.mrb[40].mxu1 }
0x1aad   : > { %v7153_v50 = vadd.f32 %v11292_v52, %v7074_v45  ;;  %v7147_v63 = vpop.f32.mrb[41].mxu1 }
0x1aae   : > { %v7148_v14 = vadd.f32 %v7147_v63, %v7074_v45  ;;  %v10290_v63 = vld [vmem:[#allocation9 + $0x67] ss:$0 sm:$0xff] }
0x1aaf   : > { %v7157_v13 = vmax.f32 %v7153_v50, 0.0  ;;  %v10287_v50 = vld [vmem:[#allocation9 + $0x64] ss:$0 sm:$0xff] }
0x1ab0   : > { %v7156_v0 = vmax.f32 %v7148_v14, 0.0  ;;  %v10293_v14 = vld [vmem:[#allocation9 + $0x6a] ss:$0 sm:$0xff] }
0x1ab2   : > { %v12351_v7 = vpack.i.bf16 %v7157_v13, %v7156_v0 }
0x1ab4   : > { %12352 = vrot.lane.b32.xlu0 %v12351_v7, %s12574_s28 }
0x1ab8   : > { %7363 = vrot.lane.b32.xlu0 %v10264_v60, %s12585_s25 }
0x1abc   : > { %7414 = vrot.lane.b32.xlu0 %v10267_v43, %s12585_s25 }
0x1ac0   : > { %7465 = vrot.lane.b32.xlu0 %v10270_v6, %s12585_s25 }
0x1ac4   : > { %7351 = vrot.lane.b32.xlu0 %v7346_v46, %s12574_s28 }
0x1b26   : > { %v12353_v18 = vpop.permute.xlu0 %12352 }
0x1b27   : > { %v12355_v25 = vunpack.i.h.bf16 %v12353_v18  ;;  %v12354_v58 = vunpack.i.l.bf16 %v12353_v18 }
0x1b29   : > { %v7167_v9 = vmax.f32 %v7157_v13, %v12355_v25  ;;  %v7166_v47 = vmax.f32 %v7156_v0, %v12354_v58  ;;  %v7350_v25 = vpop.permute.xlu1 %7349  ;;  %v10262_v58 = vld [vmem:[#allocation9 + $0x5a] ss:$0 sm:$0xff] }
0x1b2a   : > { %v7364_v12 = vpop.permute.xlu0 %7363 }
0x1b2b   : > { %v7171_v16 = vrot.slane %v7167_v9, 1  ;;  %v7170_v31 = vrot.slane %v7166_v47, 1  ;;  %v7366_v51 = vmul.f32 %v15551_v49, %v7364_v12  ;;  %v7367_v48 = vmul.f32 %v15546_v15, %v7364_v12 }
0x1b2d   : > { %v7176_v3 = vmax.f32 %v7167_v9, %v7171_v16  ;;  %v7172_v56 = vsel %vm16564_vm14, %v7170_v31, %v7171_v16  ;;  %7372 = vrot.lane.b32.xlu0 %v7367_v48, %s12575_s29  ;;  %7370 = vrot.lane.b32.xlu1 %v7366_v51, %s12575_s29  ;;  %v10265_v16 = vld [vmem:[#allocation9 + $0x5d] ss:$0 sm:$0xff]  ;;  %vm6106_vm14 = vcmask 341280  }
0x1b2e   : > { %v7175_v38 = vmax.f32 %v7166_v47, %v7172_v56  ;;  %v7415_v23 = vpop.permute.xlu0 %7414  ;;  %v7334_v47 = vmul.f32 %v15551_v49, %v10262_v58  ;;  %v7383_v48 = vmul.f32 %v15558_v36, %v10265_v16 }
0x1b2f   : > { %v7417_v59 = vmul.f32 %v15558_v36, %v7415_v23  ;;  %v7418_v30 = vmul.f32 %v15508_v4, %v7415_v23 }
0x1b30   : > { %v11954_v22 = vpack.c.bf16 %v7176_v3, %v7175_v38  ;;  %v7355_v12 = vadd.f32 %v7350_v25, %v7334_v47  ;;  %v10268_v38 = vld [vmem:[#allocation9 + $0x60] ss:$0 sm:$0xff] }
0x1b31   : > { %7402 = vrot.lane.b32.xlu0 %v7397_v41, %s12574_s28  ;;  %7400 = vrot.lane.b32.xlu1 %v7396_v35, %s12574_s28 }
0x1b32   : > { %11956 = vmatpush3.bf16.msk.msra.mxu0 %vm14816_vm5, %v11954_v22  ;;  %v7466_v62 = vpop.permute.xlu0 %7465  ;;  %v7434_v22 = vmul.f32 %v15573_v37, %v10268_v38 }
0x1b33   : > { %11957 = vmatprep.subr.bf16.mxu0 %v12587_v40  ;;  %v7468_v45 = vmul.f32 %v15573_v37, %v7466_v62  ;;  %v7469_v52 = vmul.f32 %v15526_v57, %v7466_v62 }
0x1b35   : > { %7423 = vrot.lane.b32.xlu0 %v7418_v30, %s12575_s29  ;;  %7421 = vrot.lane.b32.xlu1 %v7417_v59, %s12575_s29  ;;  %v7335_v59 = vmul.f32 %v15546_v15, %v10262_v58 }
0x1b36   : > { %11298 = vmatmul.mubr.msk.f32.vlgmr.msra.gmra.mrb[38].mxu0 %vm3511_vm1, %v16462_v27  ;;  %v7352_v13 = vpop.permute.xlu0 %7351 }
0x1b37   : > { %11960 = vmatpush3.bf16.msk.msra.mxu0 %vm14833_vm6, %v16555_v53  ;;  %11304 = vmatprep.mubr.msk.f32.mxu0 %vm12588_vm2, %v16428_v1 }
0x1b38   : > { %11962 = vmatprep.subr.msk.bf16.mxu0 %vm14580_vm3, %v12578_v20 }
0x1b39   : > { %7453 = vrot.lane.b32.xlu0 %v7448_v39, %s12574_s28  ;;  %7451 = vrot.lane.b32.xlu1 %v7447_v11, %s12574_s28  ;;  %v7356_v11 = vadd.f32 %v7352_v13, %v7335_v59 }
0x1b3d   : > { %7474 = vrot.lane.b32.xlu0 %v7469_v52, %s12575_s29  ;;  %7472 = vrot.lane.b32.xlu1 %v7468_v45, %s12575_s29 }
0x1b41   : > { %7749 = vrot.lane.b32.xlu0 %v10287_v50, %s12586_s26  ;;  %v7384_v50 = vmul.f32 %v15508_v4, %v10265_v16 }
0x1b45   : > { %7800 = vrot.lane.b32.xlu0 %v10290_v63, %s12586_s26 }
0x1b49   : > { %7851 = vrot.lane.b32.xlu0 %v10293_v14, %s12586_s26 }
0x1b9f   : > { %v7373_v0 = vpop.permute.xlu0 %7372  ;;  %v7371_v9 = vpop.permute.xlu1 %7370 }
0x1ba0   : > { %v7376_v51 = vadd.f32 %v7371_v9, %v7355_v12  ;;  %v7377_v45 = vadd.f32 %v7373_v0, %v7356_v11  ;;  %v7435_v0 = vmul.f32 %v15526_v57, %v10268_v38  ;;  %v7481_v9 = vstv %s10271_s24 }
0x1ba2   : > { %v7385_v28 = vadd.f32 %v7383_v48, %v7376_v51  ;;  %v7386_v63 = vadd.f32 %v7384_v50, %v7377_v45  ;;  %v10288_v48 = vld [vmem:[#allocation9 + $0x65] ss:$0 sm:$0xff] }
0x1ba3   : > { %v7403_v7 = vpop.permute.xlu0 %7402  ;;  %v7401_v31 = vpop.permute.xlu1 %7400 }
0x1ba4   : > { %v7406_v56 = vadd.f32 %v7401_v31, %v7385_v28  ;;  %v7407_v14 = vadd.f32 %v7403_v7, %v7386_v63  ;;  %v10291_v28 = vld [vmem:[#allocation9 + $0x68] ss:$0 sm:$0xff] }
0x1ba7   : > { %v7424_v60 = vpop.permute.xlu0 %7423  ;;  %v7422_v3 = vpop.permute.xlu1 %7421 }
0x1ba8   : > { %v7427_v35 = vadd.f32 %v7422_v3, %v7406_v56  ;;  %v7428_v13 = vadd.f32 %v7424_v60, %v7407_v14  ;;  %v10294_v3 = vld [vmem:[#allocation9 + $0x6b] ss:$0 sm:$0xff] }
0x1baa   : > { %v7436_v23 = vadd.f32 %v7434_v22, %v7427_v35 }
0x1bab   : > { %v7454_v43 = vpop.permute.xlu0 %7453  ;;  %v7452_v41 = vpop.permute.xlu1 %7451 }
0x1bac   : > { %v7457_v24 = vadd.f32 %v7452_v41, %v7436_v23 }
0x1baf   : > { %v7475_v6 = vpop.permute.xlu0 %7474  ;;  %v7473_v30 = vpop.permute.xlu1 %7472 }
0x1bb0   : > { %v7478_v39 = vadd.f32 %v7473_v30, %v7457_v24 }
0x1bb3   : > { %v15682_v46 = vpop.permute.xlu0 %7749 }
0x1bb4   : > { %v7752_v18 = vmul.f32 %v15551_v49, %v15682_v46  ;;  %v7753_v56 = vmul.f32 %v15546_v15, %v15682_v46 }
0x1bb6   : > { %7756 = vrot.lane.b32.xlu0 %v7752_v18, %s12574_s28  ;;  %v7437_v18 = vadd.f32 %v7435_v0, %v7428_v13 }
0x1bb8   : > { %v7458_v7 = vadd.f32 %v7454_v43, %v7437_v18 }
0x1bba   : > { %v7479_v25 = vadd.f32 %v7475_v6, %v7458_v7 }
0x1c09   : > { %v7246_v62 = vpop.f32.mrb[38].mxu0 }
0x1c0a   : > { %v11299_v52 = vpop.f32.mrb[39].mxu0  ;;  %11305 = vmatmul.mubr.msk.f32.vlgmr.msra.gmra.mrb[40].mxu0 %vm3511_vm1, %v7246_v62  ;;  %v7801_v62 = vpop.permute.xlu0 %7800 }
0x1c0b   : > { %11964 = vmatpush3.bf16.msk.msra.mxu0 %vm14580_vm3, %v12578_v20  ;;  %11329 = vmatprep.mubr.msk.f32.mxu0 %vm3408_vm13, %v7478_v39  ;;  %v7803_v50 = vmul.f32 %v15558_v36, %v7801_v62  ;;  %v7804_v63 = vmul.f32 %v15508_v4, %v7801_v62 }
0x1c0c   : > { %11966 = vmatprep.subr.msk.bf16.mxu0 %vm16525_vm11, %v12578_v20 }
0x1c0e   : > { %v7852_v7 = vpop.permute.xlu0 %7851 }
0x1c0f   : > { %11968 = vmatpush3.bf16.msk.msra.mxu0 %vm16525_vm11, %v12578_v20 }
0x1c10   : > { %11970 = vmatprep.subr.msk.bf16.mxu0 %vm14625_vm0, %v12578_v20 }
0x1c13   : > { %11972 = vmatpush3.bf16.msk.msra.mxu0 %vm14625_vm0, %v12578_v20 }
0x1c14   : > { %11975 = vmatprep.subr.msk.bf16.mxu0 %vm14644_vm10, %v14636_v2 }
0x1c17   : > { %11978 = vmatpush3.bf16.msk.msra.mxu0 %vm14644_vm10, %v14636_v2 }
0x1c18   : > { %11980 = vmatprep.subr.bf16.mxu0 %v14654_v21 }
0x1c1b   : > { %11982 = vmatpush3.bf16.msra.mxu0 %v14654_v21 }
0x1c1c   : > { %11327 = vmatprep.subr.mxu0 %v14664_v33 }
0x1c1f   : > { %11328 = vmatpush3.msra.mxu0 %v14664_v33 }
0x1c20   : > { %11330 = vmatmul.mubr.msk.f32.vlgmr.msra.gmra.mrb[42].mxu0 %vm3408_vm13, %v7479_v25  ;;  %12013 = vmatprep.subr.bf16.mxu0 %v12587_v40  ;;  %v7854_v25 = vmul.f32 %v15573_v37, %v7852_v7 }
0x1c21   : > { %11375 = vmatprep.mubr.msk.f32.mxu0 %vm12588_vm2, %v16428_v1 }
0x1cdd   : > { %v15724_v60 = vpop.f32.mrb[40].mxu0 }
0x1cde   : > { %v11306_v58 = vpop.f32.mrb[41].mxu0 }
0x1cdf   : > { %v7855_v58 = vmul.f32 %v15526_v57, %v7852_v7 }
0x1cf3   : > { %v11331_v47 = vpop.f32.mrb[42].mxu0 }
0x1cf4   : > { %v7560_v12 = vadd.f32 %v11331_v47, %v7481_v9  ;;  %v7554_v43 = vpop.f32.mrb[43].mxu0 }
0x1cf5   : > { %v7555_v16 = vadd.f32 %v7554_v43, %v7481_v9  ;;  %v10311_v43 = vld [vmem:[#allocation9 + $0x6d] ss:$0 sm:$0xff] }
0x1cf6   : > { %v7564_v31 = vmax.f32 %v7560_v12, 0.0 }
0x1cf7   : > { %v7563_v6 = vmax.f32 %v7555_v16, 0.0  ;;  %v10314_v16 = vld [vmem:[#allocation9 + $0x70] ss:$0 sm:$0xff] }
0x1cf9   : > { %v12356_v51 = vpack.i.bf16 %v7564_v31, %v7563_v6 }
0x1cfb   : > { %12357 = vrot.lane.b32.xlu1 %v12356_v51, %s12574_s28 }
0x1cff   : > { %7770 = vrot.lane.b32.xlu1 %v10288_v48, %s12585_s25 }
0x1d03   : > { %7821 = vrot.lane.b32.xlu1 %v10291_v28, %s12585_s25  ;;  %v10289_v28 = vld [vmem:[#allocation9 + $0x66] ss:$0 sm:$0xff] }
0x1d07   : > { %7872 = vrot.lane.b32.xlu1 %v10294_v3, %s12585_s25 }
0x1d0b   : > { %7758 = vrot.lane.b32.xlu1 %v7753_v56, %s12574_s28 }
0x1d6d   : > { %v12358_v38 = vpop.permute.xlu1 %12357 }
0x1d6e   : > { %v12360_v35 = vunpack.i.h.bf16 %v12358_v38  ;;  %v12359_v41 = vunpack.i.l.bf16 %v12358_v38 }
0x1d70   : > { %v7574_v22 = vmax.f32 %v7564_v31, %v12360_v35  ;;  %v7573_v23 = vmax.f32 %v7563_v6, %v12359_v41  ;;  %v10317_v31 = vld [vmem:[#allocation9 + $0x73] ss:$0 sm:$0xff]  ;;  %v10286_v6 = vld [vmem:[#allocation9 + $0x63] ss:$0 sm:$0xff]  ;;  %v7791_v35 = vmul.f32 %v15508_v4, %v10289_v28 }
0x1d71   : > { %v7771_v59 = vpop.permute.xlu1 %7770  ;;  %v7742_v48 = vmul.f32 %v15546_v15, %v10286_v6 }
0x1d72   : > { %v7578_v30 = vrot.slane %v7574_v22, 1  ;;  %v7577_v24 = vrot.slane %v7573_v23, 1  ;;  %v7773_v11 = vmul.f32 %v15551_v49, %v7771_v59  ;;  %v7774_v39 = vmul.f32 %v15546_v15, %v7771_v59 }
0x1d74   : > { %v7583_v45 = vmax.f32 %v7574_v22, %v7578_v30  ;;  %v7579_v52 = vsel %vm16558_vm4, %v7577_v24, %v7578_v30  ;;  %7779 = vrot.lane.b32.xlu1 %v7774_v39, %s12575_s29  ;;  %7777 = vrot.lane.b32.xlu0 %v7773_v11, %s12575_s29 }
0x1d75   : > { %v7582_v46 = vmax.f32 %v7573_v23, %v7579_v52  ;;  %v7822_v13 = vpop.permute.xlu1 %7821  ;;  %v10292_v23 = vld [vmem:[#allocation9 + $0x69] ss:$0 sm:$0xff] }
0x1d76   : > { %v7824_v0 = vmul.f32 %v15558_v36, %v7822_v13  ;;  %v7825_v18 = vmul.f32 %v15508_v4, %v7822_v13  ;;  %v7842_v11 = vmul.f32 %v15526_v57, %v10292_v23 }
0x1d77   : > { %v11984_v14 = vpack.c.bf16 %v7583_v45, %v7582_v46 }
0x1d78   : > { %7809 = vrot.lane.b32.xlu1 %v7804_v63, %s12574_s28  ;;  %7807 = vrot.lane.b32.xlu0 %v7803_v50, %s12574_s28 }
0x1d79   : > { %11986 = vmatpush3.bf16.msk.msra.mxu1 %vm14816_vm5, %v11984_v14  ;;  %v7873_v9 = vpop.permute.xlu1 %7872  ;;  %v7757_v14 = vpop.permute.xlu0 %7756 }
0x1d7a   : > { %11987 = vmatprep.subr.bf16.mxu1 %v12587_v40  ;;  %v7875_v47 = vmul.f32 %v15573_v37, %v7873_v9  ;;  %v7876_v12 = vmul.f32 %v15526_v57, %v7873_v9 }
0x1d7c   : > { %7830 = vrot.lane.b32.xlu1 %v7825_v18, %s12575_s29  ;;  %7828 = vrot.lane.b32.xlu0 %v7824_v0, %s12575_s29  ;;  %v7741_v0 = vmul.f32 %v15551_v49, %v10286_v6 }
0x1d7d   : > { %11337 = vmatmul.mubr.msk.f32.vlgmr.msra.gmra.mrb[42].mxu1 %vm3511_vm1, %v16462_v27  ;;  %v7759_v51 = vpop.permute.xlu1 %7758 }
0x1d7e   : > { %11990 = vmatpush3.bf16.msk.msra.mxu1 %vm14833_vm6, %v16555_v53  ;;  %11343 = vmatprep.mubr.msk.f32.mxu1 %vm12588_vm2, %v16428_v1  ;;  %v7763_v3 = vadd.f32 %v7759_v51, %v7742_v48  ;;  %v7762_v18 = vadd.f32 %v7757_v14, %v7741_v0 }
0x1d7f   : > { %11992 = vmatprep.subr.msk.bf16.mxu1 %vm14580_vm3, %v12578_v20 }
0x1d80   : > { %7860 = vrot.lane.b32.xlu1 %v7855_v58, %s12574_s28  ;;  %7858 = vrot.lane.b32.xlu0 %v7854_v25, %s12574_s28  ;;  %v7790_v58 = vmul.f32 %v15558_v36, %v10289_v28 }
0x1d84   : > { %7881 = vrot.lane.b32.xlu1 %v7876_v12, %s12575_s29  ;;  %7879 = vrot.lane.b32.xlu0 %v7875_v47, %s12575_s29 }
0x1d88   : > { %8156 = vrot.lane.b32.xlu1 %v10311_v43, %s12586_s26 }
0x1d8c   : > { %8207 = vrot.lane.b32.xlu1 %v10314_v16, %s12586_s26 }
0x1d90   : > { %8258 = vrot.lane.b32.xlu1 %v10317_v31, %s12586_s26  ;;  %v7841_v31 = vmul.f32 %v15573_v37, %v10292_v23 }
0x1de6   : > { %v7780_v56 = vpop.permute.xlu1 %7779  ;;  %v7778_v13 = vpop.permute.xlu0 %7777 }
0x1de7   : > { %v7784_v38 = vadd.f32 %v7780_v56, %v7763_v3  ;;  %v7783_v25 = vadd.f32 %v7778_v13, %v7762_v18 }
0x1de9   : > { %v7793_v41 = vadd.f32 %v7791_v35, %v7784_v38  ;;  %v7792_v9 = vadd.f32 %v7790_v58, %v7783_v25 }
0x1dea   : > { %v7810_v22 = vpop.permute.xlu1 %7809  ;;  %v7808_v7 = vpop.permute.xlu0 %7807 }
0x1deb   : > { %v7814_v59 = vadd.f32 %v7810_v22, %v7793_v41  ;;  %v7813_v12 = vadd.f32 %v7808_v7, %v7792_v9  ;;  %v7888_v41 = vstv %s10295_s16 }
0x1dee   : > { %v7831_v30 = vpop.permute.xlu1 %7830  ;;  %v7829_v47 = vpop.permute.xlu0 %7828 }
0x1def   : > { %v7835_v24 = vadd.f32 %v7831_v30, %v7814_v59  ;;  %v7834_v43 = vadd.f32 %v7829_v47, %v7813_v12 }
0x1df1   : > { %v7844_v39 = vadd.f32 %v7842_v11, %v7835_v24  ;;  %v7843_v51 = vadd.f32 %v7841_v31, %v7834_v43 }
0x1df2   : > { %v7861_v62 = vpop.permute.xlu1 %7860  ;;  %v7859_v16 = vpop.permute.xlu0 %7858 }
0x1df3   : > { %v7865_v45 = vadd.f32 %v7861_v62, %v7844_v39  ;;  %v7864_v3 = vadd.f32 %v7859_v16, %v7843_v51  ;;  %v10312_v62 = vld [vmem:[#allocation9 + $0x6e] ss:$0 sm:$0xff] }
0x1df6   : > { %v7882_v52 = vpop.permute.xlu1 %7881  ;;  %v7880_v48 = vpop.permute.xlu0 %7879 }
0x1df7   : > { %v7886_v46 = vadd.f32 %v7882_v52, %v7865_v45  ;;  %v7885_v56 = vadd.f32 %v7880_v48, %v7864_v3  ;;  %v10315_v45 = vld [vmem:[#allocation9 + $0x71] ss:$0 sm:$0xff]  ;;  %v10318_v52 = vld [vmem:[#allocation9 + $0x74] ss:$0 sm:$0xff] }
0x1dfa   : > { %v8157_v50 = vpop.permute.xlu1 %8156 }
0x1dfb   : > { %v8159_v63 = vmul.f32 %v15551_v49, %v8157_v50 }
0x1dfd   : > { %8163 = vrot.lane.b32.xlu1 %v8159_v63, %s12574_s28 }
0x1dfe   : > { %v8208_v12 = vpop.permute.xlu1 %8207 }
0x1dff   : > { %v8210_v31 = vmul.f32 %v15558_v36, %v8208_v12  ;;  %v8211_v51 = vmul.f32 %v15508_v4, %v8208_v12 }
0x1e50   : > { %v7653_v38 = vpop.f32.mrb[42].mxu1 }
0x1e51   : > { %v11338_v35 = vpop.f32.mrb[43].mxu1  ;;  %11344 = vmatmul.mubr.msk.f32.vlgmr.msra.gmra.mrb[44].mxu1 %vm3511_vm1, %v7653_v38 }
0x1e52   : > { %11994 = vmatpush3.bf16.msk.msra.mxu1 %vm14580_vm3, %v12578_v20  ;;  %11368 = vmatprep.mubr.msk.f32.mxu1 %vm3408_vm13, %v7885_v56  ;;  %v8259_v35 = vpop.permute.xlu1 %8258 }
0x1e53   : > { %11996 = vmatprep.subr.msk.bf16.mxu1 %vm16525_vm11, %v12578_v20 }
0x1e56   : > { %11998 = vmatpush3.bf16.msk.msra.mxu1 %vm16525_vm11, %v12578_v20 }
0x1e57   : > { %12000 = vmatprep.subr.msk.bf16.mxu1 %vm14625_vm0, %v12578_v20 }
0x1e5a   : > { %12002 = vmatpush3.bf16.msk.msra.mxu1 %vm14625_vm0, %v12578_v20 }
0x1e5b   : > { %12005 = vmatprep.subr.msk.bf16.mxu1 %vm14644_vm10, %v14636_v2 }
0x1e5e   : > { %12008 = vmatpush3.bf16.msk.msra.mxu1 %vm14644_vm10, %v14636_v2 }
0x1e5f   : > { %12010 = vmatprep.subr.bf16.mxu1 %v14654_v21 }
0x1e62   : > { %12012 = vmatpush3.bf16.msra.mxu1 %v14654_v21 }
0x1e63   : > { %11366 = vmatprep.subr.mxu1 %v14664_v33 }
0x1e66   : > { %11367 = vmatpush3.msra.mxu1 %v14664_v33 }
0x1e67   : > { %11369 = vmatmul.mubr.msk.f32.vlgmr.msra.gmra.mrb[46].mxu1 %vm3408_vm13, %v7886_v46  ;;  %12043 = vmatprep.subr.bf16.mxu1 %v12587_v40  ;;  %v8160_v46 = vmul.f32 %v15546_v15, %v8157_v50 }
0x1e68   : > { %11414 = vmatprep.mubr.msk.f32.mxu1 %vm12588_vm2, %v16428_v1 }
0x1f24   : > { %v15809_v6 = vpop.f32.mrb[44].mxu1 }
0x1f25   : > { %v11345_v28 = vpop.f32.mrb[45].mxu1 }
0x1f26   : > { %v8261_v28 = vmul.f32 %v15573_v37, %v8259_v35 }
0x1f3a   : > { %v11370_v22 = vpop.f32.mrb[46].mxu1 }
0x1f3b   : > { %v7967_v23 = vadd.f32 %v11370_v22, %v7888_v41  ;;  %v7961_v59 = vpop.f32.mrb[47].mxu1 }
0x1f3c   : > { %v7962_v30 = vadd.f32 %v7961_v59, %v7888_v41  ;;  %v8262_v41 = vmul.f32 %v15526_v57, %v8259_v35 }
0x1f3d   : > { %v7971_v24 = vmax.f32 %v7967_v23, 0.0 }
0x1f3e   : > { %v7970_v11 = vmax.f32 %v7962_v30, 0.0  ;;  %v10335_v30 = vld [vmem:[#allocation9 + $0x76] ss:$0 sm:$0xff] }
0x1f40   : > { %v12361_v39 = vpack.i.bf16 %v7971_v24, %v7970_v11 }
0x1f42   : > { %12362 = vrot.lane.b32.xlu0 %v12361_v39, %s12574_s28  ;;  %v10310_v39 = vld [vmem:[#allocation9 + $0x6c] ss:$0 sm:$0xff] }
0x1f46   : > { %8177 = vrot.lane.b32.xlu0 %v10312_v62, %s12585_s25 }
0x1f4a   : > { %8228 = vrot.lane.b32.xlu0 %v10315_v45, %s12585_s25  ;;  %v8149_v45 = vmul.f32 %v15546_v15, %v10310_v39 }
0x1f4e   : > { %8279 = vrot.lane.b32.xlu0 %v10318_v52, %s12585_s25  ;;  %v10313_v52 = vld [vmem:[#allocation9 + $0x6f] ss:$0 sm:$0xff] }
0x1f52   : > { %8165 = vrot.lane.b32.xlu0 %v8160_v46, %s12574_s28 }
0x1fb4   : > { %v12363_v63 = vpop.permute.xlu0 %12362 }
0x1fb5   : > { %v12365_v14 = vunpack.i.h.bf16 %v12363_v63  ;;  %v12364_v13 = vunpack.i.l.bf16 %v12363_v63 }
0x1fb7   : > { %v7981_v0 = vmax.f32 %v7971_v24, %v12365_v14  ;;  %v7980_v18 = vmax.f32 %v7970_v11, %v12364_v13  ;;  %v10338_v24 = vld [vmem:[#allocation9 + $0x79] ss:$0 sm:$0xff]  ;;  %v10341_v11 = vld [vmem:[#allocation9 + $0x7c] ss:$0 sm:$0xff]  ;;  %v8198_v13 = vmul.f32 %v15508_v4, %v10313_v52 }
0x1fb8   : > { %v8178_v7 = vpop.permute.xlu0 %8177 }
0x1fb9   : > { %v7985_v25 = vrot.slane %v7981_v0, 1  ;;  %v7984_v58 = vrot.slane %v7980_v18, 1  ;;  %v8180_v9 = vmul.f32 %v15551_v49, %v8178_v7  ;;  %v8181_v47 = vmul.f32 %v15546_v15, %v8178_v7 }
0x1fbb   : > { %v7990_v43 = vmax.f32 %v7981_v0, %v7985_v25  ;;  %v7986_v16 = vsel %vm16565_vm8, %v7984_v58, %v7985_v25  ;;  %8186 = vrot.lane.b32.xlu0 %v8181_v47, %s12575_s29  ;;  %8184 = vrot.lane.b32.xlu1 %v8180_v9, %s12575_s29  ;;  %v10316_v25 = vld [vmem:[#allocation9 + $0x72] ss:$0 sm:$0xff]  ;;  %vm6920_vm8 = vcmask 439680  }
0x1fbc   : > { %v7989_v50 = vmax.f32 %v7980_v18, %v7986_v16  ;;  %v8229_v3 = vpop.permute.xlu0 %8228  ;;  %v8249_v47 = vmul.f32 %v15526_v57, %v10316_v25 }
0x1fbd   : > { %v8231_v56 = vmul.f32 %v15558_v36, %v8229_v3  ;;  %v8232_v38 = vmul.f32 %v15508_v4, %v8229_v3  ;;  %v8164_v3 = vpop.permute.xlu1 %8163 }
0x1fbe   : > { %v12014_v48 = vpack.c.bf16 %v7990_v43, %v7989_v50 }
0x1fbf   : > { %8216 = vrot.lane.b32.xlu0 %v8211_v51, %s12574_s28  ;;  %8214 = vrot.lane.b32.xlu1 %v8210_v31, %s12574_s28 }
0x1fc0   : > { %12016 = vmatpush3.bf16.msk.msra.mxu0 %vm14816_vm5, %v12014_v48  ;;  %v8280_v22 = vpop.permute.xlu0 %8279 }
0x1fc1   : > { %12017 = vmatprep.subr.bf16.mxu0 %v12587_v40  ;;  %v8282_v23 = vmul.f32 %v15573_v37, %v8280_v22  ;;  %v8283_v59 = vmul.f32 %v15526_v57, %v8280_v22 }
0x1fc3   : > { %8237 = vrot.lane.b32.xlu0 %v8232_v38, %s12575_s29  ;;  %8235 = vrot.lane.b32.xlu1 %v8231_v56, %s12575_s29  ;;  %v8148_v56 = vmul.f32 %v15551_v49, %v10310_v39 }
0x1fc4   : > { %11376 = vmatmul.mubr.msk.f32.vlgmr.msra.gmra.mrb[44].mxu0 %vm3511_vm1, %v16462_v27  ;;  %v8166_v62 = vpop.permute.xlu0 %8165 }
0x1fc5   : > { %12020 = vmatpush3.bf16.msk.msra.mxu0 %vm14833_vm6, %v16555_v53  ;;  %11382 = vmatprep.mubr.msk.f32.mxu0 %vm12588_vm2, %v16428_v1  ;;  %v8170_v46 = vadd.f32 %v8166_v62, %v8149_v45  ;;  %v8169_v38 = vadd.f32 %v8164_v3, %v8148_v56 }
0x1fc6   : > { %12022 = vmatprep.subr.msk.bf16.mxu0 %vm14580_vm3, %v12578_v20 }
0x1fc7   : > { %8267 = vrot.lane.b32.xlu0 %v8262_v41, %s12574_s28  ;;  %8265 = vrot.lane.b32.xlu1 %v8261_v28, %s12574_s28  ;;  %v8197_v41 = vmul.f32 %v15558_v36, %v10313_v52 }
0x1fcb   : > { %8288 = vrot.lane.b32.xlu0 %v8283_v59, %s12575_s29  ;;  %8286 = vrot.lane.b32.xlu1 %v8282_v23, %s12575_s29 }
0x1fcf   : > { %8563 = vrot.lane.b32.xlu0 %v10335_v30, %s12586_s26 }
0x1fd3   : > { %8614 = vrot.lane.b32.xlu0 %v10338_v24, %s12586_s26  ;;  %v8248_v24 = vmul.f32 %v15573_v37, %v10316_v25 }
0x1fd7   : > { %8665 = vrot.lane.b32.xlu0 %v10341_v11, %s12586_s26 }
0x202d   : > { %v8187_v63 = vpop.permute.xlu0 %8186  ;;  %v8185_v4 = vpop.permute.xlu1 %8184 }
0x202e   : > { %v8191_v14 = vadd.f32 %v8187_v63, %v8170_v46  ;;  %v8190_v28 = vadd.f32 %v8185_v4, %v8169_v38 }
0x2030   : > { %v8200_v0 = vadd.f32 %v8198_v13, %v8191_v14  ;;  %v8199_v57 = vadd.f32 %v8197_v41, %v8190_v28  ;;  %v8295_v13 = vstv %s10319_s11 }
0x2031   : > { %v8217_v18 = vpop.permute.xlu0 %8216  ;;  %v8215_v35 = vpop.permute.xlu1 %8214 }
0x2032   : > { %v8221_v7 = vadd.f32 %v8217_v18, %v8200_v0  ;;  %v8220_v23 = vadd.f32 %v8215_v35, %v8199_v57  ;;  %v15902_v57 = vld [vmem:[#allocation2 + $0x8] sm:$0x1f] }
0x2035   : > { %v8238_v58 = vpop.permute.xlu0 %8237  ;;  %v8236_v22 = vpop.permute.xlu1 %8235 }
0x2036   : > { %v8242_v9 = vadd.f32 %v8238_v58, %v8221_v7  ;;  %v8241_v59 = vadd.f32 %v8236_v22, %v8220_v23 }
0x2038   : > { %v8251_v12 = vadd.f32 %v8249_v47, %v8242_v9  ;;  %v8250_v11 = vadd.f32 %v8248_v24, %v8241_v59  ;;  %v15909_v24 = vld [vmem:[#allocation2 + $0x9] sm:$0x1f] }
0x2039   : > { %v8268_v43 = vpop.permute.xlu0 %8267  ;;  %v8266_v30 = vpop.permute.xlu1 %8265 }
0x203a   : > { %v8272_v16 = vadd.f32 %v8268_v43, %v8251_v12  ;;  %v8271_v45 = vadd.f32 %v8266_v30, %v8250_v11  ;;  %v10336_v12 = vld [vmem:[#allocation9 + $0x77] ss:$0 sm:$0xff]  ;;  %v10339_v43 = vld [vmem:[#allocation9 + $0x7a] ss:$0 sm:$0xff] }
0x203d   : > { %v8289_v50 = vpop.permute.xlu0 %8288  ;;  %v8287_v62 = vpop.permute.xlu1 %8286 }
0x203e   : > { %v8293_v31 = vadd.f32 %v8289_v50, %v8272_v16  ;;  %v8292_v46 = vadd.f32 %v8287_v62, %v8271_v45  ;;  %v10342_v16 = vld [vmem:[#allocation9 + $0x7d] ss:$0 sm:$0xff] }
0x2041   : > { %v8564_v51 = vpop.permute.xlu0 %8563 }
0x2042   : > { %v8566_v48 = vmul.f32 %v15551_v49, %v8564_v51  ;;  %v8567_v50 = vmul.f32 %v15546_v15, %v8564_v51 }
0x2044   : > { %8570 = vrot.lane.b32.xlu0 %v8566_v48, %s12574_s28 }
0x2045   : > { %v8615_v23 = vpop.permute.xlu0 %8614 }
0x2046   : > { %v8617_v30 = vmul.f32 %v15558_v36, %v8615_v23  ;;  %v8618_v11 = vmul.f32 %v15909_v24, %v8615_v23 }
0x2097   : > { %v8060_v63 = vpop.f32.mrb[44].mxu0 }
0x2098   : > { %v11377_v14 = vpop.f32.mrb[45].mxu0  ;;  %11383 = vmatmul.mubr.msk.f32.vlgmr.msra.gmra.mrb[46].mxu0 %vm3511_vm1, %v8060_v63  ;;  %v8666_v63 = vpop.permute.xlu0 %8665 }
0x2099   : > { %12024 = vmatpush3.bf16.msk.msra.mxu0 %vm14580_vm3, %v12578_v20  ;;  %11407 = vmatprep.mubr.msk.f32.mxu0 %vm3408_vm13, %v8292_v46  ;;  %v8668_v14 = vmul.f32 %v15573_v37, %v8666_v63  ;;  %v15937_v37 = vld [vmem:[#allocation2 + $0x2] sm:$0xff] }
0x209a   : > { %12026 = vmatprep.subr.msk.bf16.mxu0 %vm16525_vm11, %v12578_v20 }
0x209d   : > { %12028 = vmatpush3.bf16.msk.msra.mxu0 %vm16525_vm11, %v12578_v20 }
0x209e   : > { %12030 = vmatprep.subr.msk.bf16.mxu0 %vm14625_vm0, %v12578_v20 }
0x20a1   : > { %12032 = vmatpush3.bf16.msk.msra.mxu0 %vm14625_vm0, %v12578_v20 }
0x20a2   : > { %12035 = vmatprep.subr.msk.bf16.mxu0 %vm14644_vm10, %v14636_v2 }
0x20a5   : > { %12038 = vmatpush3.bf16.msk.msra.mxu0 %vm14644_vm10, %v14636_v2 }
0x20a6   : > { %12040 = vmatprep.subr.bf16.mxu0 %v14654_v21 }
0x20a9   : > { %12042 = vmatpush3.bf16.msra.mxu0 %v14654_v21 }
0x20aa   : > { %11405 = vmatprep.subr.mxu0 %v14664_v33 }
0x20ad   : > { %11406 = vmatpush3.msra.mxu0 %v14664_v33 }
0x20ae   : > { %11408 = vmatmul.mubr.msk.f32.vlgmr.msra.gmra.mrb[48].mxu0 %vm3408_vm13, %v8293_v31  ;;  %12073 = vmatprep.subr.bf16.mxu0 %v12587_v40 }
0x20af   : > { %11453 = vmatprep.mubr.msk.f32.mxu0 %vm12588_vm2, %v16428_v1 }
0x216b   : > { %v15893_v39 = vpop.f32.mrb[46].mxu0 }
0x216c   : > { %v11384_v52 = vpop.f32.mrb[47].mxu0 }
0x216d   : > { %v15924_v52 = vld [vmem:[#allocation2 + $0xa] sm:$0x1f] }
0x2181   : > { %v11409_v0 = vpop.f32.mrb[48].mxu0 }
0x2182   : > { %v8374_v18 = vadd.f32 %v11409_v0, %v8295_v13  ;;  %v8368_v7 = vpop.f32.mrb[49].mxu0 }
0x2183   : > { %v8369_v25 = vadd.f32 %v8368_v7, %v8295_v13  ;;  %v8669_v13 = vmul.f32 %v15924_v52, %v8666_v63  ;;  %v10359_v7 = vld [vmem:[#allocation9 + $0x7f] ss:$0 sm:$0xff] }
0x2184   : > { %v8378_v58 = vmax.f32 %v8374_v18, 0.0 }
0x2185   : > { %v8377_v9 = vmax.f32 %v8369_v25, 0.0  ;;  %v10362_v25 = vld [vmem:[#allocation9 + $0x82] ss:$0 sm:$0xff] }
0x2187   : > { %v12366_v47 = vpack.i.bf16 %v8378_v58, %v8377_v9 }
0x2189   : > { %12367 = vrot.lane.b32.xlu1 %v12366_v47, %s12574_s28 }
0x218d   : > { %8584 = vrot.lane.b32.xlu1 %v10336_v12, %s12585_s25 }
0x2191   : > { %8635 = vrot.lane.b32.xlu1 %v10339_v43, %s12585_s25  ;;  %v10337_v43 = vld [vmem:[#allocation9 + $0x78] ss:$0 sm:$0xff] }
0x2195   : > { %8686 = vrot.lane.b32.xlu1 %v10342_v16, %s12585_s25 }
0x2199   : > { %8572 = vrot.lane.b32.xlu1 %v8567_v50, %s12574_s28 }
0x21fb   : > { %v12368_v31 = vpop.permute.xlu1 %12367 }
0x21fc   : > { %v12370_v48 = vunpack.i.h.bf16 %v12368_v31  ;;  %v12369_v3 = vunpack.i.l.bf16 %v12368_v31 }
0x21fe   : > { %v8388_v4 = vmax.f32 %v8378_v58, %v12370_v48  ;;  %v8387_v56 = vmax.f32 %v8377_v9, %v12369_v3  ;;  %v10365_v58 = vld [vmem:[#allocation9 + $0x85] ss:$0 sm:$0xff]  ;;  %v10334_v9 = vld [vmem:[#allocation9 + $0x75] ss:$0 sm:$0xff]  ;;  %v8605_v48 = vmul.f32 %v15909_v24, %v10337_v43 }
0x21ff   : > { %v8585_v38 = vpop.permute.xlu1 %8584  ;;  %v8556_v12 = vmul.f32 %v15902_v57, %v10334_v9 }
0x2200   : > { %v8392_v35 = vrot.slane %v8388_v4, 1  ;;  %v8391_v28 = vrot.slane %v8387_v56, 1  ;;  %v8587_v41 = vmul.f32 %v15551_v49, %v8585_v38  ;;  %v8588_v22 = vmul.f32 %v15902_v57, %v8585_v38  ;;  %v10340_v38 = vld [vmem:[#allocation9 + $0x7b] ss:$0 sm:$0xff] }
0x2202   : > { %v8397_v59 = vmax.f32 %v8388_v4, %v8392_v35  ;;  %v8393_v15 = vsel %vm16566_vm7, %v8391_v28, %v8392_v35  ;;  %8593 = vrot.lane.b32.xlu1 %v8588_v22, %s12575_s29  ;;  %8591 = vrot.lane.b32.xlu0 %v8587_v41, %s12575_s29  ;;  %v8656_v41 = vmul.f32 %v15924_v52, %v10340_v38  ;;  %vm7327_vm7 = vcmask 488880  }
0x2203   : > { %v8396_v51 = vmax.f32 %v8387_v56, %v8393_v15  ;;  %v8636_v62 = vpop.permute.xlu1 %8635 }
0x2204   : > { %v8638_v45 = vmul.f32 %v15558_v36, %v8636_v62  ;;  %v8639_v46 = vmul.f32 %v15909_v24, %v8636_v62  ;;  %v8571_v62 = vpop.permute.xlu0 %8570 }
0x2205   : > { %v12044_v49 = vpack.c.bf16 %v8397_v59, %v8396_v51 }
0x2206   : > { %8623 = vrot.lane.b32.xlu1 %v8618_v11, %s12574_s28  ;;  %8621 = vrot.lane.b32.xlu0 %v8617_v30, %s12574_s28  ;;  %v15949_v11 = vld [vmem:[#allocation2] sm:$0xff] }
0x2207   : > { %12046 = vmatpush3.bf16.msk.msra.mxu1 %vm14816_vm5, %v12044_v49  ;;  %v8687_v36 = vpop.permute.xlu1 %8686 }
0x2208   : > { %12047 = vmatprep.subr.bf16.mxu1 %v12587_v40  ;;  %v8689_v0 = vmul.f32 %v15937_v37, %v8687_v36  ;;  %v8690_v18 = vmul.f32 %v15924_v52, %v8687_v36  ;;  %v15954_v36 = vld [vmem:[#allocation2 + $0x1] sm:$0xff] }
0x220a   : > { %8644 = vrot.lane.b32.xlu1 %v8639_v46, %s12575_s29  ;;  %8642 = vrot.lane.b32.xlu0 %v8638_v45, %s12575_s29  ;;  %v8555_v46 = vmul.f32 %v15949_v11, %v10334_v9 }
0x220b   : > { %11415 = vmatmul.mubr.msk.f32.vlgmr.msra.gmra.mrb[48].mxu1 %vm3511_vm1, %v16462_v27  ;;  %v8573_v47 = vpop.permute.xlu1 %8572 }
0x220c   : > { %12050 = vmatpush3.bf16.msk.msra.mxu1 %vm14833_vm6, %v16555_v53  ;;  %11421 = vmatprep.mubr.msk.f32.mxu1 %vm12588_vm2, %v16428_v1  ;;  %v8577_v16 = vadd.f32 %v8573_v47, %v8556_v12  ;;  %v8576_v63 = vadd.f32 %v8571_v62, %v8555_v46  ;;  %v8655_v12 = vmul.f32 %v15937_v37, %v10340_v38 }
0x220d   : > { %12052 = vmatprep.subr.msk.bf16.mxu1 %vm14580_vm3, %v12578_v20 }
0x220e   : > { %8674 = vrot.lane.b32.xlu1 %v8669_v13, %s12574_s28  ;;  %8672 = vrot.lane.b32.xlu0 %v8668_v14, %s12574_s28 }
0x2212   : > { %8695 = vrot.lane.b32.xlu1 %v8690_v18, %s12575_s29  ;;  %8693 = vrot.lane.b32.xlu0 %v8689_v0, %s12575_s29  ;;  %v8604_v0 = vmul.f32 %v15954_v36, %v10337_v43 }
0x2216   : > { %8970 = vrot.lane.b32.xlu1 %v10359_v7, %s12586_s26 }
0x221a   : > { %9021 = vrot.lane.b32.xlu1 %v10362_v25, %s12586_s26 }
0x221e   : > { %9072 = vrot.lane.b32.xlu1 %v10365_v58, %s12586_s26 }
0x2274   : > { %v8594_v50 = vpop.permute.xlu1 %8593  ;;  %v8592_v45 = vpop.permute.xlu0 %8591 }
0x2275   : > { %v8598_v31 = vadd.f32 %v8594_v50, %v8577_v16  ;;  %v8597_v13 = vadd.f32 %v8592_v45, %v8576_v63 }
0x2277   : > { %v8607_v3 = vadd.f32 %v8605_v48, %v8598_v31  ;;  %v8606_v18 = vadd.f32 %v8604_v0, %v8597_v13 }
0x2278   : > { %v8624_v4 = vpop.permute.xlu1 %8623  ;;  %v8622_v14 = vpop.permute.xlu0 %8621 }
0x2279   : > { %v8628_v56 = vadd.f32 %v8624_v4, %v8607_v3  ;;  %v8627_v25 = vadd.f32 %v8622_v14, %v8606_v18 }
0x227c   : > { %v8645_v35 = vpop.permute.xlu1 %8644  ;;  %v8643_v7 = vpop.permute.xlu0 %8642 }
0x227d   : > { %v8649_v28 = vadd.f32 %v8645_v35, %v8628_v56  ;;  %v8648_v58 = vadd.f32 %v8643_v7, %v8627_v25  ;;  %v8702_v56 = vstv %s10343_s23 }
0x227f   : > { %v8658_v22 = vadd.f32 %v8656_v41, %v8649_v28  ;;  %v8657_v16 = vadd.f32 %v8655_v12, %v8648_v58 }
0x2280   : > { %v8675_v23 = vpop.permute.xlu1 %8674  ;;  %v8673_v47 = vpop.permute.xlu0 %8672 }
0x2281   : > { %v8679_v59 = vadd.f32 %v8675_v23, %v8658_v22  ;;  %v8678_v31 = vadd.f32 %v8673_v47, %v8657_v16 }
0x2284   : > { %v8696_v15 = vpop.permute.xlu1 %8695  ;;  %v8694_v50 = vpop.permute.xlu0 %8693 }
0x2285   : > { %v8700_v51 = vadd.f32 %v8696_v15, %v8679_v59  ;;  %v8699_v48 = vadd.f32 %v8694_v50, %v8678_v31  ;;  %v10360_v15 = vld [vmem:[#allocation9 + $0x80] ss:$0 sm:$0xff] }
0x2288   : > { %v8971_v30 = vpop.permute.xlu1 %8970 }
0x2289   : > { %v8973_v49 = vmul.f32 %v15949_v11, %v8971_v30  ;;  %v8974_v62 = vmul.f32 %v15902_v57, %v8971_v30 }
0x228b   : > { %8977 = vrot.lane.b32.xlu1 %v8973_v49, %s12574_s28  ;;  %v10366_v49 = vld [vmem:[#allocation9 + $0x86] ss:$0 sm:$0xff] }
0x228c   : > { %v9022_v47 = vpop.permute.xlu1 %9021 }
0x228d   : > { %v9024_v50 = vmul.f32 %v15954_v36, %v9022_v47  ;;  %v9025_v31 = vmul.f32 %v15909_v24, %v9022_v47 }
0x22de   : > { %v8467_v3 = vpop.f32.mrb[48].mxu1 }
0x22df   : > { %v11416_v9 = vpop.f32.mrb[49].mxu1  ;;  %11422 = vmatmul.mubr.msk.f32.vlgmr.msra.gmra.mrb[50].mxu1 %vm3511_vm1, %v8467_v3 }
0x22e0   : > { %12054 = vmatpush3.bf16.msk.msra.mxu1 %vm14580_vm3, %v12578_v20  ;;  %11446 = vmatprep.mubr.msk.f32.mxu1 %vm3408_vm13, %v8699_v48 }
0x22e1   : > { %12056 = vmatprep.subr.msk.bf16.mxu1 %vm16525_vm11, %v12578_v20 }
0x22e4   : > { %12058 = vmatpush3.bf16.msk.msra.mxu1 %vm16525_vm11, %v12578_v20 }
0x22e5   : > { %12060 = vmatprep.subr.msk.bf16.mxu1 %vm14625_vm0, %v12578_v20 }
0x22e8   : > { %12062 = vmatpush3.bf16.msk.msra.mxu1 %vm14625_vm0, %v12578_v20 }
0x22e9   : > { %12065 = vmatprep.subr.msk.bf16.mxu1 %vm14644_vm10, %v14636_v2 }
0x22ec   : > { %12068 = vmatpush3.bf16.msk.msra.mxu1 %vm14644_vm10, %v14636_v2 }
0x22ed   : > { %12070 = vmatprep.subr.bf16.mxu1 %v14654_v21 }
0x22f0   : > { %12072 = vmatpush3.bf16.msra.mxu1 %v14654_v21 }
0x22f1   : > { %11444 = vmatprep.subr.mxu1 %v14664_v33 }
0x22f4   : > { %11445 = vmatpush3.msra.mxu1 %v14664_v33 }
0x22f5   : > { %11447 = vmatmul.mubr.msk.f32.vlgmr.msra.gmra.mrb[52].mxu1 %vm3408_vm13, %v8700_v51  ;;  %12103 = vmatprep.subr.bf16.mxu1 %v12587_v40  ;;  %v10363_v51 = vld [vmem:[#allocation9 + $0x83] ss:$0 sm:$0xff] }
0x22f6   : > { %11492 = vmatprep.mubr.msk.f32.mxu1 %vm12588_vm2, %v16428_v1 }
0x23b2   : > { %v15989_v43 = vpop.f32.mrb[50].mxu1 }
0x23b3   : > { %v11423_v4 = vpop.f32.mrb[51].mxu1 }
0x23c8   : > { %v11448_v38 = vpop.f32.mrb[52].mxu1 }
0x23c9   : > { %v8781_v35 = vadd.f32 %v11448_v38, %v8702_v56  ;;  %v8775_v28 = vpop.f32.mrb[53].mxu1 }
0x23ca   : > { %v8776_v41 = vadd.f32 %v8775_v28, %v8702_v56  ;;  %v9073_v56 = vpop.permute.xlu1 %9072 }
0x23cb   : > { %v8785_v22 = vmax.f32 %v8781_v35, 0.0  ;;  %v9075_v38 = vmul.f32 %v15937_v37, %v9073_v56  ;;  %v9076_v35 = vmul.f32 %v15924_v52, %v9073_v56 }
0x23cc   : > { %v8784_v23 = vmax.f32 %v8776_v41, 0.0 }
0x23ce   : > { %v12371_v59 = vpack.i.bf16 %v8785_v22, %v8784_v23 }
0x23d0   : > { %12372 = vrot.lane.b32.xlu0 %v12371_v59, %s12574_s28  ;;  %v10386_v59 = vld [vmem:[#allocation9 + $0x8b] ss:$0 sm:$0xff] }
0x23d4   : > { %8991 = vrot.lane.b32.xlu0 %v10360_v15, %s12585_s25  ;;  %v10389_v15 = vld [vmem:[#allocation9 + $0x8e] ss:$0 sm:$0xff] }
0x23d8   : > { %9042 = vrot.lane.b32.xlu0 %v10363_v51, %s12585_s25  ;;  %v10358_v51 = vld [vmem:[#allocation9 + $0x7e] ss:$0 sm:$0xff] }
0x23dc   : > { %9093 = vrot.lane.b32.xlu0 %v10366_v49, %s12585_s25 }
0x23e0   : > { %8979 = vrot.lane.b32.xlu0 %v8974_v62, %s12574_s28  ;;  %v8963_v62 = vmul.f32 %v15902_v57, %v10358_v51 }
0x2442   : > { %v12373_v45 = vpop.permute.xlu0 %12372 }
0x2443   : > { %v12375_v46 = vunpack.i.h.bf16 %v12373_v45  ;;  %v12374_v63 = vunpack.i.l.bf16 %v12373_v45  ;;  %v10361_v45 = vld [vmem:[#allocation9 + $0x81] ss:$0 sm:$0xff] }
0x2445   : > { %v8795_v14 = vmax.f32 %v8785_v22, %v12375_v46  ;;  %v8794_v13 = vmax.f32 %v8784_v23, %v12374_v63  ;;  %v10383_v23 = vld [vmem:[#allocation9 + $0x88] ss:$0 sm:$0xff] }
0x2446   : > { %v8992_v0 = vpop.permute.xlu0 %8991 }
0x2447   : > { %v8799_v18 = vrot.slane %v8795_v14, 1  ;;  %v8798_v7 = vrot.slane %v8794_v13, 1  ;;  %v8994_v25 = vmul.f32 %v15949_v11, %v8992_v0  ;;  %v8995_v58 = vmul.f32 %v15902_v57, %v8992_v0 }
0x2449   : > { %v8804_v12 = vmax.f32 %v8795_v14, %v8799_v18  ;;  %v8800_v16 = vsel %vm16567_vm9, %v8798_v7, %v8799_v18  ;;  %9000 = vrot.lane.b32.xlu0 %v8995_v58, %s12575_s29  ;;  %8998 = vrot.lane.b32.xlu1 %v8994_v25, %s12575_s29  ;;  %v10364_v25 = vld [vmem:[#allocation9 + $0x84] ss:$0 sm:$0xff]  ;;  %vm8141_vm9 = vcmask 587280  }
0x244a   : > { %v8803_v30 = vmax.f32 %v8794_v13, %v8800_v16  ;;  %v9043_v3 = vpop.permute.xlu0 %9042  ;;  %v9012_v13 = vmul.f32 %v15909_v24, %v10361_v45 }
0x244b   : > { %v9045_v9 = vmul.f32 %v15954_v36, %v9043_v3  ;;  %v9046_v4 = vmul.f32 %v15909_v24, %v9043_v3 }
0x244c   : > { %v12074_v48 = vpack.c.bf16 %v8804_v12, %v8803_v30  ;;  %v9063_v12 = vmul.f32 %v15924_v52, %v10364_v25 }
0x244d   : > { %9030 = vrot.lane.b32.xlu0 %v9025_v31, %s12574_s28  ;;  %9028 = vrot.lane.b32.xlu1 %v9024_v50, %s12574_s28 }
0x244e   : > { %12076 = vmatpush3.bf16.msk.msra.mxu0 %vm14816_vm5, %v12074_v48  ;;  %v9094_v28 = vpop.permute.xlu0 %9093 }
0x244f   : > { %12077 = vmatprep.subr.bf16.mxu0 %v12587_v40  ;;  %v9096_v41 = vmul.f32 %v15937_v37, %v9094_v28  ;;  %v9097_v22 = vmul.f32 %v15924_v52, %v9094_v28 }
0x2451   : > { %9051 = vrot.lane.b32.xlu0 %v9046_v4, %s12575_s29  ;;  %9049 = vrot.lane.b32.xlu1 %v9045_v9, %s12575_s29  ;;  %v8978_v4 = vpop.permute.xlu1 %8977 }
0x2452   : > { %11454 = vmatmul.mubr.msk.f32.vlgmr.msra.gmra.mrb[50].mxu0 %vm3511_vm1, %v16462_v27  ;;  %v8980_v49 = vpop.permute.xlu0 %8979 }
0x2453   : > { %12080 = vmatpush3.bf16.msk.msra.mxu0 %vm14833_vm6, %v16555_v53  ;;  %11460 = vmatprep.mubr.msk.f32.mxu0 %vm12588_vm2, %v16428_v1  ;;  %v8984_v46 = vadd.f32 %v8980_v49, %v8963_v62 }
0x2454   : > { %12082 = vmatprep.subr.msk.bf16.mxu0 %vm14580_vm3, %v12578_v20 }
0x2455   : > { %9081 = vrot.lane.b32.xlu0 %v9076_v35, %s12574_s28  ;;  %9079 = vrot.lane.b32.xlu1 %v9075_v38, %s12574_s28  ;;  %v8962_v38 = vmul.f32 %v15949_v11, %v10358_v51 }
0x2457   : > { %v8983_v35 = vadd.f32 %v8978_v4, %v8962_v38  ;;  %v10390_v4 = vld [vmem:[#allocation9 + $0x8f] ss:$0 sm:$0xff] }
0x2459   : > { %9102 = vrot.lane.b32.xlu0 %v9097_v22, %s12575_s29  ;;  %9100 = vrot.lane.b32.xlu1 %v9096_v41, %s12575_s29  ;;  %v9011_v22 = vmul.f32 %v15954_v36, %v10361_v45 }
0x245d   : > { %9377 = vrot.lane.b32.xlu0 %v10383_v23, %s12586_s26 }
0x2461   : > { %9428 = vrot.lane.b32.xlu0 %v10386_v59, %s12586_s26 }
0x2465   : > { %9479 = vrot.lane.b32.xlu0 %v10389_v15, %s12586_s26  ;;  %s10367_s26 = sld [smem:[#allocation11 + $0xe]] }
0x24bb   : > { %v9001_v63 = vpop.permute.xlu0 %9000  ;;  %v8999_v56 = vpop.permute.xlu1 %8998 }
0x24bc   : > { %v9005_v14 = vadd.f32 %v9001_v63, %v8984_v46  ;;  %v9004_v41 = vadd.f32 %v8999_v56, %v8983_v35  ;;  %v9062_v46 = vmul.f32 %v15937_v37, %v10364_v25  ;;  %v9109_v25 = vstv %s10367_s26 }
0x24be   : > { %v9014_v0 = vadd.f32 %v9012_v13, %v9005_v14  ;;  %v9013_v23 = vadd.f32 %v9011_v22, %v9004_v41 }
0x24bf   : > { %v9031_v18 = vpop.permute.xlu0 %9030  ;;  %v9029_v28 = vpop.permute.xlu1 %9028 }
0x24c0   : > { %v9035_v7 = vadd.f32 %v9031_v18, %v9014_v0  ;;  %v9034_v15 = vadd.f32 %v9029_v28, %v9013_v23 }
0x24c3   : > { %v9052_v58 = vpop.permute.xlu0 %9051  ;;  %v9050_v59 = vpop.permute.xlu1 %9049 }
0x24c4   : > { %v9056_v47 = vadd.f32 %v9052_v58, %v9035_v7  ;;  %v9055_v49 = vadd.f32 %v9050_v59, %v9034_v15 }
0x24c6   : > { %v9065_v16 = vadd.f32 %v9063_v12, %v9056_v47  ;;  %v9064_v63 = vadd.f32 %v9062_v46, %v9055_v49 }
0x24c7   : > { %v9082_v30 = vpop.permute.xlu0 %9081  ;;  %v9080_v62 = vpop.permute.xlu1 %9079 }
0x24c8   : > { %v9086_v50 = vadd.f32 %v9082_v30, %v9065_v16  ;;  %v9085_v13 = vadd.f32 %v9080_v62, %v9064_v63 }
0x24cb   : > { %v9103_v31 = vpop.permute.xlu0 %9102  ;;  %v9101_v14 = vpop.permute.xlu1 %9100 }
0x24cc   : > { %v9107_v48 = vadd.f32 %v9103_v31, %v9086_v50  ;;  %v9106_v0 = vadd.f32 %v9101_v14, %v9085_v13 }
0x24cf   : > { %v9378_v3 = vpop.permute.xlu0 %9377 }
0x24d0   : > { %v9380_v9 = vmul.f32 %v15949_v11, %v9378_v3  ;;  %v9381_v56 = vmul.f32 %v15902_v57, %v9378_v3 }
0x24d2   : > { %9384 = vrot.lane.b32.xlu0 %v9380_v9, %s12574_s28  ;;  %v10387_v9 = vld [vmem:[#allocation9 + $0x8c] ss:$0 sm:$0xff] }
0x24d3   : > { %v9429_v46 = vpop.permute.xlu0 %9428 }
0x24d4   : > { %v9431_v13 = vmul.f32 %v15954_v36, %v9429_v46 }
0x2525   : > { %v8874_v18 = vpop.f32.mrb[50].mxu0 }
0x2526   : > { %v11455_v7 = vpop.f32.mrb[51].mxu0  ;;  %11461 = vmatmul.mubr.msk.f32.vlgmr.msra.gmra.mrb[52].mxu0 %vm3511_vm1, %v8874_v18 }
0x2527   : > { %12084 = vmatpush3.bf16.msk.msra.mxu0 %vm14580_vm3, %v12578_v20  ;;  %11485 = vmatprep.mubr.msk.f32.mxu0 %vm3408_vm13, %v9106_v0  ;;  %v9432_v0 = vmul.f32 %v15909_v24, %v9429_v46 }
0x2528   : > { %12086 = vmatprep.subr.msk.bf16.mxu0 %vm16525_vm11, %v12578_v20 }
0x252b   : > { %12088 = vmatpush3.bf16.msk.msra.mxu0 %vm16525_vm11, %v12578_v20 }
0x252c   : > { %12090 = vmatprep.subr.msk.bf16.mxu0 %vm14625_vm0, %v12578_v20 }
0x252f   : > { %12092 = vmatpush3.bf16.msk.msra.mxu0 %vm14625_vm0, %v12578_v20 }
0x2530   : > { %12095 = vmatprep.subr.msk.bf16.mxu0 %vm14644_vm10, %v14636_v2 }
0x2533   : > { %12098 = vmatpush3.bf16.msk.msra.mxu0 %vm14644_vm10, %v14636_v2 }
0x2534   : > { %12100 = vmatprep.subr.bf16.mxu0 %v14654_v21 }
0x2537   : > { %12102 = vmatpush3.bf16.msra.mxu0 %v14654_v21 }
0x2538   : > { %11483 = vmatprep.subr.mxu0 %v14664_v33 }
0x253b   : > { %11484 = vmatpush3.msra.mxu0 %v14664_v33 }
0x253c   : > { %11486 = vmatmul.mubr.msk.f32.vlgmr.msra.gmra.mrb[54].mxu0 %vm3408_vm13, %v9107_v48  ;;  %12133 = vmatprep.subr.bf16.mxu0 %v12587_v40  ;;  %v10384_v48 = vld [vmem:[#allocation9 + $0x89] ss:$0 sm:$0xff] }
0x253d   : > { %11531 = vmatprep.mubr.msk.f32.mxu0 %vm12588_vm2, %v16428_v1 }
0x25f9   : > { %v16073_v51 = vpop.f32.mrb[52].mxu0 }
0x25fa   : > { %v11462_v45 = vpop.f32.mrb[53].mxu0 }
0x260f   : > { %v11487_v58 = vpop.f32.mrb[54].mxu0 }
0x2610   : > { %v9188_v47 = vadd.f32 %v11487_v58, %v9109_v25  ;;  %v9182_v12 = vpop.f32.mrb[55].mxu0  ;;  %v9480_v58 = vpop.permute.xlu0 %9479 }
0x2611   : > { %v9183_v16 = vadd.f32 %v9182_v12, %v9109_v25  ;;  %v9483_v12 = vmul.f32 %v15924_v52, %v9480_v58 }
0x2612   : > { %v9192_v30 = vmax.f32 %v9188_v47, 0.0  ;;  %v9482_v47 = vmul.f32 %v15937_v37, %v9480_v58 }
0x2613   : > { %v9191_v50 = vmax.f32 %v9183_v16, 0.0 }
0x2615   : > { %v12376_v31 = vpack.i.bf16 %v9192_v30, %v9191_v50 }
0x2617   : > { %12377 = vrot.lane.b32.xlu1 %v12376_v31, %s12574_s28  ;;  %v10382_v31 = vld [vmem:[#allocation9 + $0x87] ss:$0 sm:$0xff] }
0x261b   : > { %9398 = vrot.lane.b32.xlu1 %v10384_v48, %s12585_s25  ;;  %v9370_v48 = vmul.f32 %v15902_v57, %v10382_v31 }
0x261f   : > { %9449 = vrot.lane.b32.xlu1 %v10387_v9, %s12585_s25 }
0x2623   : > { %9500 = vrot.lane.b32.xlu1 %v10390_v4, %s12585_s25  ;;  %s12589_s25 = smov 6  }
0x2627   : > { %9386 = vrot.lane.b32.xlu1 %v9381_v56, %s12574_s28 }
0x2689   : > { %v12378_v38 = vpop.permute.xlu1 %12377 }
0x268a   : > { %v12380_v35 = vunpack.i.h.bf16 %v12378_v38  ;;  %v12379_v28 = vunpack.i.l.bf16 %v12378_v38 }
0x268c   : > { %v9202_v41 = vmax.f32 %v9192_v30, %v12380_v35  ;;  %v9201_v22 = vmax.f32 %v9191_v50, %v12379_v28  ;;  %v10388_v35 = vld [vmem:[#allocation9 + $0x8d] ss:$0 sm:$0xff] }
0x268d   : > { %v9399_v23 = vpop.permute.xlu1 %9398 }
0x268e   : > { %v9206_v59 = vrot.slane %v9202_v41, 1  ;;  %v9205_v15 = vrot.slane %v9201_v22, 1  ;;  %v9401_v49 = vmul.f32 %v15949_v11, %v9399_v23  ;;  %v9402_v62 = vmul.f32 %v15902_v57, %v9399_v23 }
0x2690   : > { %v9211_v63 = vmax.f32 %v9202_v41, %v9206_v59  ;;  %v9207_v14 = vsel %vm16568_vm12, %v9205_v15, %v9206_v59  ;;  %9407 = vrot.lane.b32.xlu1 %v9402_v62, %s12575_s29  ;;  %9405 = vrot.lane.b32.xlu0 %v9401_v49, %s12575_s29  ;;  %v9470_v41 = vmul.f32 %v15924_v52, %v10388_v35  ;;  %v9385_v49 = vpop.permute.xlu0 %9384  ;;  %vm8548_vm12 = vcmask 636480  }
0x2691   : > { %v9210_v3 = vmax.f32 %v9201_v22, %v9207_v14  ;;  %v9450_v7 = vpop.permute.xlu1 %9449 }
0x2692   : > { %v9452_v45 = vmul.f32 %v15954_v36, %v9450_v7  ;;  %v9453_v25 = vmul.f32 %v15909_v24, %v9450_v7 }
0x2693   : > { %v12104_v18 = vpack.c.bf16 %v9211_v63, %v9210_v3 }
0x2694   : > { %9437 = vrot.lane.b32.xlu1 %v9432_v0, %s12574_s28  ;;  %9435 = vrot.lane.b32.xlu0 %v9431_v13, %s12574_s28 }
0x2695   : > { %12106 = vmatpush3.bf16.msk.msra.mxu1 %vm14816_vm5, %v12104_v18  ;;  %v9501_v16 = vpop.permute.xlu1 %9500 }
0x2696   : > { %12107 = vmatprep.subr.bf16.mxu1 %v12587_v40  ;;  %v9503_v30 = vmul.f32 %v15937_v37, %v9501_v16  ;;  %v9504_v50 = vmul.f32 %v15924_v52, %v9501_v16 }
0x2698   : > { %9458 = vrot.lane.b32.xlu1 %v9453_v25, %s12575_s29  ;;  %9456 = vrot.lane.b32.xlu0 %v9452_v45, %s12575_s29  ;;  %v9469_v45 = vmul.f32 %v15937_v37, %v10388_v35 }
0x2699   : > { %11493 = vmatmul.mubr.msk.f32.vlgmr.msra.gmra.mrb[54].mxu1 %vm3511_vm1, %v16462_v27 }
0x269a   : > { %12110 = vmatpush3.bf16.msk.msra.mxu1 %vm14833_vm6, %v16555_v53  ;;  %11499 = vmatprep.mubr.msk.f32.mxu1 %vm12588_vm2, %v16428_v1 }
0x269b   : > { %12112 = vmatprep.subr.msk.bf16.mxu1 %vm14580_vm3, %v12578_v20 }
0x269c   : > { %9488 = vrot.lane.b32.xlu1 %v9483_v12, %s12574_s28  ;;  %9486 = vrot.lane.b32.xlu0 %v9482_v47, %s12574_s28 }
0x26a0   : > { %9509 = vrot.lane.b32.xlu1 %v9504_v50, %s12575_s29  ;;  %9507 = vrot.lane.b32.xlu0 %v9503_v30, %s12575_s29  ;;  %s10391_s29 = sld [smem:[#allocation11 + $0xf]] }
0x26a4   : > { %4068 = vrot.lane.b32.xlu1 %v14996_v32, %s12589_s25  ;;  %v9387_v32 = vpop.permute.xlu1 %9386 }
0x26a5   : > { %v9391_v9 = vadd.f32 %v9387_v32, %v9370_v48 }
0x26a6   : > { %v9516_v10 = vstv %s10391_s29 }
0x26a8   : > { %4882 = vrot.lane.b32.xlu1 %v15184_v17, %s12590_s27  ;;  %v10385_v17 = vld [vmem:[#allocation9 + $0x8a] ss:$0 sm:$0xff] }
0x26a9   : > { %v9418_v3 = vmul.f32 %v15954_v36, %v10385_v17 }
0x26ac   : > { %5696 = vrot.lane.b32.xlu1 %v15360_v44, %s12581_s15  ;;  %s12595_s15 = smov 12  }
0x26b0   : > { %6510 = vrot.lane.b32.xlu1 %v15540_v29, %s12591_s9  ;;  %v9419_v29 = vmul.f32 %v15909_v24, %v10385_v17  ;;  %v9369_v24 = vmul.f32 %v15949_v11, %v10382_v31 }
0x26b2   : > { %v9390_v46 = vadd.f32 %v9385_v49, %v9369_v24 }
0x26b4   : > { %7324 = vrot.lane.b32.xlu1 %v15724_v60, %s12592_s22 }
0x26b8   : > { %8138 = vrot.lane.b32.xlu1 %v15893_v39, %s12593_s30 }
0x26bc   : > { %8952 = vrot.lane.b32.xlu1 %v16073_v51, %s12594_s21 }
0x2702   : > { %v9408_v4 = vpop.permute.xlu1 %9407  ;;  %v9406_v62 = vpop.permute.xlu0 %9405 }
0x2703   : > { %v9412_v44 = vadd.f32 %v9408_v4, %v9391_v9  ;;  %v9411_v14 = vadd.f32 %v9406_v62, %v9390_v46 }
0x2705   : > { %v9421_v56 = vadd.f32 %v9419_v29, %v9412_v44  ;;  %v9420_v13 = vadd.f32 %v9418_v3, %v9411_v14 }
0x2706   : > { %v9438_v38 = vpop.permute.xlu1 %9437  ;;  %v9436_v63 = vpop.permute.xlu0 %9435 }
0x2707   : > { %v9442_v60 = vadd.f32 %v9438_v38, %v9421_v56  ;;  %v9441_v52 = vadd.f32 %v9436_v63, %v9420_v13 }
0x270a   : > { %v9459_v28 = vpop.permute.xlu1 %9458  ;;  %v9457_v0 = vpop.permute.xlu0 %9456 }
0x270b   : > { %v9463_v39 = vadd.f32 %v9459_v28, %v9442_v60  ;;  %v9462_v18 = vadd.f32 %v9457_v0, %v9441_v52 }
0x270d   : > { %v9472_v51 = vadd.f32 %v9470_v41, %v9463_v39  ;;  %v9471_v25 = vadd.f32 %v9469_v45, %v9462_v18 }
0x270e   : > { %v9489_v22 = vpop.permute.xlu1 %9488  ;;  %v9487_v7 = vpop.permute.xlu0 %9486 }
0x270f   : > { %v9493_v23 = vadd.f32 %v9489_v22, %v9472_v51  ;;  %v9492_v47 = vadd.f32 %v9487_v7, %v9471_v25 }
0x2712   : > { %v9510_v59 = vpop.permute.xlu1 %9509  ;;  %v9508_v58 = vpop.permute.xlu0 %9507 }
0x2713   : > { %v9514_v57 = vadd.f32 %v9510_v59, %v9493_v23  ;;  %v9513_v12 = vadd.f32 %v9508_v58, %v9492_v47 }
0x2716   : > { %v4069_v15 = vpop.permute.xlu1 %4068 }
0x2717   : > { %4072 = vst.msk [vmem:[%s14907_s7] sm:$0x3f] %vm4071_vm15, %v4069_v15  ;;  %vm8955_vm15 = vcmask 685680  }
0x276c   : > { %v9281_v16 = vpop.f32.mrb[54].mxu1 }
0x276d   : > { %v11494_v30 = vpop.f32.mrb[55].mxu1  ;;  %11500 = vmatmul.mubr.msk.f32.vlgmr.msra.gmra.mrb[56].mxu1 %vm3511_vm1, %v9281_v16 }
0x276e   : > { %12114 = vmatpush3.bf16.msk.msra.mxu1 %vm14580_vm3, %v12578_v20  ;;  %11524 = vmatprep.mubr.msk.f32.mxu1 %vm3408_vm13, %v9513_v12  ;;  %vm4478_vm3 = vcmask 144480  }
0x276f   : > { %12116 = vmatprep.subr.msk.bf16.mxu1 %vm16525_vm11, %v12578_v20 }
0x2772   : > { %12118 = vmatpush3.bf16.msk.msra.mxu1 %vm16525_vm11, %v12578_v20  ;;  %vm4885_vm11 = vcmask 193680  }
0x2773   : > { %12120 = vmatprep.subr.msk.bf16.mxu1 %vm14625_vm0, %v12578_v20 }
0x2776   : > { %12122 = vmatpush3.bf16.msk.msra.mxu1 %vm14625_vm0, %v12578_v20  ;;  %vm5292_vm0 = vcmask 242880  }
0x2777   : > { %12125 = vmatprep.subr.msk.bf16.mxu1 %vm14644_vm10, %v14636_v2 }
0x277a   : > { %12128 = vmatpush3.bf16.msk.msra.mxu1 %vm14644_vm10, %v14636_v2  ;;  %vm16569_vm10 = vmmov %vm16558_vm4  ;;  %vm6513_vm4 = vcmask 390480  }
0x277b   : > { %12130 = vmatprep.subr.bf16.mxu1 %v14654_v21 }
0x277e   : > { %12132 = vmatpush3.bf16.msra.mxu1 %v14654_v21  ;;  %v4883_v21 = vpop.permute.xlu1 %4882 }
0x277f   : > { %11522 = vmatprep.subr.mxu1 %v14664_v33 }
0x2782   : > { %11523 = vmatpush3.msra.mxu1 %v14664_v33 }
0x2783   : > { %11525 = vmatmul.mubr.msk.f32.vlgmr.msra.gmra.mrb[58].mxu1 %vm3408_vm13, %v9514_v57  ;;  %vm5699_vm13 = vcmask 292080  }
0x2840   : > { %v9354_v8 = vpop.f32.mrb[56].mxu1 }
0x2841   : > { %v11501_v20 = vpop.f32.mrb[57].mxu1 }
0x2856   : > { %v11526_v61 = vpop.f32.mrb[58].mxu1 }
0x2857   : > { %v9595_v37 = vadd.f32 %v11526_v61, %v9516_v10  ;;  %v9589_v11 = vpop.f32.mrb[59].mxu1 }
0x2858   : > { %v9590_v36 = vadd.f32 %v9589_v11, %v9516_v10 }
0x2859   : > { %v9599_v26 = vmax.f32 %v9595_v37, 0.0 }
0x285a   : > { %v9598_v2 = vmax.f32 %v9590_v36, 0.0 }
0x285c   : > { %v12381_v50 = vpack.i.bf16 %v9599_v26, %v9598_v2 }
0x285e   : > { %12382 = vrot.lane.b32.xlu0 %v12381_v50, %s12574_s28  ;;  %s12600_s28 = smov 84  }
0x2862   : > { %4475 = vrot.lane.b32.xlu0 %v15084_v54, %s12595_s15  ;;  %v5697_v54 = vpop.permute.xlu1 %5696 }
0x2866   : > { %5289 = vrot.lane.b32.xlu0 %v15272_v42, %s12596_s13 }
0x286a   : > { %6103 = vrot.lane.b32.xlu0 %v15448_v5, %s12597_s14 }
0x286e   : > { %6917 = vrot.lane.b32.xlu0 %v15636_v34, %s12598_s12 }
0x2872   : > { %7731 = vrot.lane.b32.xlu0 %v15809_v6, %s12583_s18  ;;  %s12601_s18 = smov 90  }
0x2876   : > { %8545 = vrot.lane.b32.xlu0 %v15989_v43, %s12599_s10  ;;  %v6511_v43 = vpop.permute.xlu1 %6510 }
0x287a   : > { %9359 = vrot.lane.b32.xlu0 %v9354_v8, %s12600_s28  ;;  %v7325_v38 = vpop.permute.xlu1 %7324 }
0x28d0   : > { %v12383_v33 = vpop.permute.xlu0 %12382 }
0x28d1   : > { %v12385_v42 = vunpack.i.h.bf16 %v12383_v33  ;;  %v12384_v31 = vunpack.i.l.bf16 %v12383_v33 }
0x28d3   : > { %v9609_v5 = vmax.f32 %v9599_v26, %v12385_v42  ;;  %v9608_v32 = vmax.f32 %v9598_v2, %v12384_v31 }
0x28d4   : > { %v4476_v34 = vpop.permute.xlu0 %4475 }
0x28d5   : > { %v9613_v6 = vrot.slane %v9609_v5, 1  ;;  %v9612_v48 = vrot.slane %v9608_v32, 1  ;;  %4479 = vst.msk [vmem:[%s14907_s7] sm:$0x3f] %vm4478_vm3, %v4476_v34 }
0x28d6   : > { %4886 = vst.msk [vmem:[%s14907_s7] sm:$0x3f] %vm4885_vm11, %v4883_v21 }
0x28d7   : > { %v9618_v17 = vmax.f32 %v9609_v5, %v9613_v6  ;;  %v9614_v9 = vsel %vm16569_vm10, %v9612_v48, %v9613_v6 }
0x28d8   : > { %v9617_v4 = vmax.f32 %v9608_v32, %v9614_v9  ;;  %v5290_v44 = vpop.permute.xlu0 %5289 }
0x28d9   : > { %5293 = vst.msk [vmem:[%s14907_s7] sm:$0x3f] %vm5292_vm0, %v5290_v44 }
0x28da   : > { %v12134_v29 = vpack.c.bf16 %v9618_v17, %v9617_v4  ;;  %5700 = vst.msk [vmem:[%s14907_s7] sm:$0x3f] %vm5699_vm13, %v5697_v54 }
0x28dc   : > { %v6104_v56 = vpop.permute.xlu0 %6103  ;;  %12136 = vmatpush3.bf16.msk.msra.mxu0 %vm14816_vm5, %v12134_v29  ;;  %vm7734_vm5 = vcmask 538080  }
0x28dd   : > { %6107 = vst.msk [vmem:[%s14907_s7] sm:$0x3f] %vm6106_vm14, %v6104_v56  ;;  %12137 = vmatprep.subr.bf16.mxu0 %v12587_v40  ;;  %v8139_v40 = vpop.permute.xlu1 %8138 }
0x28de   : > { %6514 = vst.msk [vmem:[%s14907_s7] sm:$0x3f] %vm6513_vm4, %v6511_v43 }
0x28df   : > { %11532 = vmatmul.mubr.msk.f32.vlgmr.msra.gmra.mrb[56].mxu0 %vm3511_vm1, %v16462_v27 }
0x28e0   : > { %v6918_v60 = vpop.permute.xlu0 %6917  ;;  %12140 = vmatpush3.bf16.msk.msra.mxu0 %vm14833_vm6, %v16555_v53  ;;  %11538 = vmatprep.mubr.msk.f32.mxu0 %vm12588_vm2, %v16428_v1  ;;  %vm9362_vm6 = vcmask 734880   ;;  %vm9769_vm2 = vcmask 784080  }
0x28e1   : > { %6921 = vst.msk [vmem:[%s14907_s7] sm:$0x3f] %vm6920_vm8, %v6918_v60  ;;  %v8953_v35 = vpop.permute.xlu1 %8952 }
0x28e2   : > { %7328 = vst.msk [vmem:[%s14907_s7] sm:$0x3f] %vm7327_vm7, %v7325_v38 }
0x28e4   : > { %v7732_v55 = vpop.permute.xlu0 %7731 }
0x28e5   : > { %7735 = vst.msk [vmem:[%s14907_s7] sm:$0x3f] %vm7734_vm5, %v7732_v55 }
0x28e6   : > { %8142 = vst.msk [vmem:[%s14907_s7] sm:$0x3f] %vm8141_vm9, %v8139_v40 }
0x28e8   : > { %v8546_v27 = vpop.permute.xlu0 %8545 }
0x28e9   : > { %8549 = vst.msk [vmem:[%s14907_s7] sm:$0x3f] %vm8548_vm12, %v8546_v27 }
0x28ea   : > { %8956 = vst.msk [vmem:[%s14907_s7] sm:$0x3f] %vm8955_vm15, %v8953_v35 }
0x28ec   : > { %v9360_v19 = vpop.permute.xlu0 %9359 }
0x28ed   : > { %9363 = vst.msk [vmem:[%s14907_s7] sm:$0x3f] %vm9362_vm6, %v9360_v19 }
0x29b2   : > { %v9688_v1 = vpop.f32.mrb[56].mxu0 }
0x29b3   : > { %v11533_v53 = vpop.f32.mrb[57].mxu0  ;;  %11539 = vmatmul.mubr.msk.f32.vlgmr.msra.gmra.mrb[58].mxu0 %vm3511_vm1, %v9688_v1 }
0x2a86   : > { %v9761_v28 = vpop.f32.mrb[58].mxu0 }
0x2a87   : > { %v11540_v39 = vpop.f32.mrb[59].mxu0  ;;  %9766 = vrot.lane.b32.xlu1 %v9761_v28, %s12601_s18 }
0x2af9   : > { %v9767_v41 = vpop.permute.xlu1 %9766 }
0x2afa   : > { %9770 = vst.msk [vmem:[%s14907_s7] sm:$0x3f] %vm9769_vm2, %v9767_v41 }
0x2afb PF: > { %p18_p1 = scmp.ge.s32.totalorder %s12731_s8, 4   ;;  %s16570_s18 = smov %s12557_s19 }
0x2afc   : > { %s16571_s19 = smov %s12561_s20  ;;  %s16572_s20 = smov %s12740_s6 }
0x2afd   : > { %s16573_s21 = smov %s12731_s8  ;;  %20 = sbr.rel (!%p18_p1) target bundleno = 6 (0x6), region = 97 }
0x2b04   :  { %9790 = vsyncpa [#allocation4], 1 }
0x2b05   :  { %9792 = vsyncpa [#allocation4 + $0x1], 1 }
0x2b06   :  { %9793 = vsyncpa [#allocation10], 1 }
0x2b07   :  { %9794 = vsyncpa [#allocation5], 1 }
0x2b08   :  { %9796 = vsyncpa [#allocation5 + $0x1], 1 }
0x2b09   :  { %9797 = vsyncpa [#allocation8], 1 }

</bundles_post_ra>
